<compile_context>
chip_gen: v5e
topology: v5e:2x2
jax: 0.10.0
libtpu: 0.0.40
codegen_flags: <defaults>
</compile_context>

<pallas_src>
import functools

import jax
import jax.numpy as jnp
import numpy as np
from jax import lax
from jax.experimental import pallas as pl
from jax.experimental.pallas import tpu as pltpu

EPS = 1e-5      # nn.BatchNorm2d default eps
LANE = 128      # lane width (v5e MXU-matched; see notes for v6e/v7x widening)
TM = 128        # conv M-chunk: (128,128) f32 accumulator = 16 vregs (no spill)


def _round_up(v, m):
    return (v + m - 1) // m * m


def _pad_to(a, shape):
    return jnp.pad(a, [(0, t - s) for s, t in zip(a.shape, shape)])


# ---------------- fused kernel, stride == 1 (fast flat-slab path) ----------------

def _block_kernel_s1(x_ref, my_ref, mh_ref, s1_ref, t1_ref, w1_ref, s2_ref,
                     t2_ref, w2_ref, b2_ref, *rest, H, W, use_conv1x1):
    if use_conv1x1:
        wsc_ref, bsc_ref, o_ref, y_scr, h_scr = rest
    else:
        o_ref, y_scr, h_scr = rest

    Wp = W + 2                       # flat row stride of the padded frame
    M = (H - 1) * Wp + W             # flat conv-output rows (junk cols included)
    off = Wp + 1                     # flat offset of interior pixel (1,1)
    Pp = h_scr.shape[-1]

    # ---- bn1 + relu (+ halo zeroing via mask) -> bf16 flat padded scratch ----
    y = jnp.maximum(x_ref[...].astype(jnp.float32) * s1_ref[...] + t1_ref[...], 0.0)
    y_scr[...] = (y * my_ref[...]).astype(y_scr.dtype)

    # Only the 2*(W+3) rows of h_scr never covered by the conv1 writeback must
    # be zero (conv2 reads them as halo).  ~10 KB/image, no persistent state.
    zrows = jnp.zeros((off, Pp), h_scr.dtype)
    h_scr[pl.ds(0, off), :] = zrows
    h_scr[pl.ds(off + M, off), :] = zrows

    def taps(src, w_ref, m0, tm):
        # 3x3 conv tap = ONE contiguous slab matmul; straight dot chain.
        acc = None
        for t in range(9):
            o = (t // 3) * Wp + (t % 3)
            d = jnp.dot(src[pl.ds(o + m0, tm), :], w_ref[t],
                        preferred_element_type=jnp.float32)
            acc = d if acc is None else acc + d
        return acc

    # ---- conv1 -> bn2 (scale on f32 acc) -> relu -> h_scr (bf16) ----
    # TODO(synk): Dropout is identity (eval mode); no random masking implemented.
    for m0 in range(0, M, TM):
        tm = min(TM, M - m0)
        a1 = taps(y_scr, w1_ref, m0, tm)
        h = jnp.maximum(a1 * s2_ref[...] + t2_ref[...], 0.0)
        h_scr[pl.ds(off + m0, tm), :] = (h * mh_ref[pl.ds(m0, tm), :]).astype(h_scr.dtype)

    # ---- conv2 + b2 + shortcut + residual add ----
    for m0 in range(0, M, TM):
        tm = min(TM, M - m0)
        a2 = taps(h_scr, w2_ref, m0, tm) + b2_ref[...]
        if use_conv1x1:
            a2 = a2 + jnp.dot(y_scr[pl.ds(off + m0, tm), :], wsc_ref[...],
                              preferred_element_type=jnp.float32) + bsc_ref[...]
        else:
            a2 = a2 + x_ref[pl.ds(off + m0, tm), :].astype(jnp.float32)
        o_ref[pl.ds(m0, tm), :] = a2.astype(o_ref.dtype)


# ---------------- fallback kernel, stride != 1 (downsampling blocks) ----------------
# NOTE: rarely-taken path; keeps the earlier 3-D-scratch / 9-strided-slab scheme.

def _block_kernel_strided(x_ref, my_ref, s1_ref, t1_ref, w1_ref, s2_ref, t2_ref,
                          w2_ref, b2_ref, wsc_ref, bsc_ref, o_ref, y_scr, h_scr,
                          *, H, W, Ho, Wo, stride):
    Hp, Wp = H + 2, W + 2
    Cp = y_scr.shape[-1]
    Pp = h_scr.shape[-1]

    x3 = x_ref[...].astype(jnp.float32).reshape(Hp, Wp, Cp)
    m3 = my_ref[...].reshape(Hp, Wp, 1)
    y_scr[...] = (jnp.maximum(x3 * s1_ref[...] + t1_ref[...], 0.0) * m3).astype(y_scr.dtype)
    h_scr[...] = jnp.zeros_like(h_scr)

    def conv(src, w_ref, st):
        acc = None
        for t in range(9):
            ky, kx = divmod(t, 3)
            if st == 1:
                sl = src[pl.ds(ky, Ho), pl.ds(kx, Wo), :]
            else:
                sl = src[pl.ds(ky, Ho, st), pl.ds(kx, Wo, st), :]
            d = jnp.dot(sl.reshape(Ho * Wo, src.shape[-1]), w_ref[t],
                        preferred_element_type=jnp.float32)
            acc = d if acc is None else acc + d
        return acc

    h = jnp.maximum(conv(y_scr, w1_ref, stride) * s2_ref[...] + t2_ref[...], 0.0)
    # TODO(synk): Dropout is identity (eval mode).
    h_scr[pl.ds(1, Ho), pl.ds(1, Wo), :] = h.reshape(Ho, Wo, Pp).astype(h_scr.dtype)

    out = conv(h_scr, w2_ref, 1) + b2_ref[...]
    ysub = y_scr[pl.ds(1, Ho, stride), pl.ds(1, Wo, stride), :]
    out = out + jnp.dot(ysub.reshape(Ho * Wo, Cp), wsc_ref[...],
                        preferred_element_type=jnp.float32) + bsc_ref[...]
    o_ref[...] = out.astype(o_ref.dtype)


# ---------------- wrapper: folding, padding, pallas_call ----------------

def basic_block_forward(x_nchw, p, stride=1):
    """Pallas TPU implementation of BasicBlock.forward (inference semantics)."""
    x = jnp.transpose(x_nchw, (0, 2, 3, 1)).astype(jnp.float32)   # NCHW -> NHWC
    N, H, W, Cin = x.shape
    P = p["w1"].shape[-1]
    use_conv1x1 = (stride != 1) or (Cin != P)
    Ho = (H - 1) // stride + 1
    Wo = (W - 1) // stride + 1
    Hp, Wp = H + 2, W + 2
    Lp = Hp * Wp

    Cp = _round_up(Cin, LANE)
    Pp = _round_up(P, LANE)

    # Fold BN running stats into per-channel affines (inference mode).
    scale1 = p["bn1_gamma"] * lax.rsqrt(p["bn1_var"] + EPS)
    shift1 = p["bn1_beta"] - p["bn1_mean"] * scale1
    scale2 = p["bn2_gamma"] * lax.rsqrt(p["bn2_var"] + EPS)
    shift2 = p["bn2_beta"] - p["bn2_mean"] * scale2
    t2 = p["b1"] * scale2 + shift2           # bn2(conv1(y)+b1) = conv1(y)*scale2 + t2

    # Spatially pre-padded (1-px zero halo), channel-padded, flattened bf16 x.
    xp = jnp.pad(x, ((0, 0), (1, 1), (1, 1), (0, 0)))
    xp = _pad_to(xp.reshape(N, Lp, Cin), (N, Lp, Cp)).astype(jnp.bfloat16)

    # Per-row halo mask for the padded frame (broadcast over channels in-kernel).
    my = np.zeros((Hp, Wp), np.float32)
    my[1:H + 1, 1:W + 1] = 1.0
    my = jnp.asarray(my.reshape(Lp, 1))

    s1 = _pad_to(scale1[None, :], (1, Cp))
    t1 = _pad_to(shift1[None, :], (1, Cp))
    w1_p = _pad_to(p["w1"].reshape(9, Cin, P), (9, Cp, Pp)).astype(jnp.bfloat16)
    s2_p = _pad_to(scale2[None, :], (1, Pp))
    t2_p = _pad_to(t2[None, :], (1, Pp))
    w2_p = _pad_to(p["w2"].reshape(9, P, P), (9, Pp, Pp)).astype(jnp.bfloat16)
    b2_p = _pad_to(p["b2"][None, :], (1, Pp))
    wsc_p = _pad_to(p["wsc"], (Cp, Pp)).astype(jnp.bfloat16)
    bsc_p = _pad_to(p["bsc"][None, :], (1, Pp))

    c2 = lambda n: (0, 0)
    c3 = lambda n: (0, 0, 0)
    # NOTE: for production WRN channel widths, these constant-index weight specs
    # should be single-buffered (pipeline_mode=pl.Buffered(1)) to halve their
    # VMEM footprint; omitted here for maximum portability at toy shapes.
    common_specs = [
        pl.BlockSpec((1, Cp), c2), pl.BlockSpec((1, Cp), c2),
        pl.BlockSpec((9, Cp, Pp), c3),
        pl.BlockSpec((1, Pp), c2), pl.BlockSpec((1, Pp), c2),
        pl.BlockSpec((9, Pp, Pp), c3), pl.BlockSpec((1, Pp), c2),
    ]
    common_args = [s1, t1, w1_p, s2_p, t2_p, w2_p, b2_p]
    sc_specs = [pl.BlockSpec((Cp, Pp), c2), pl.BlockSpec((1, Pp), c2)]
    sc_args = [wsc_p, bsc_p]

    if stride == 1:
        M = (H - 1) * Wp + W
        mh = jnp.asarray(((np.arange(M) % Wp) < W).astype(np.float32).reshape(M, 1))
        in_specs = ([pl.BlockSpec((None, Lp, Cp), lambda n: (n, 0, 0)),
                     pl.BlockSpec((Lp, 1), c2), pl.BlockSpec((M, 1), c2)]
                    + common_specs + (sc_specs if use_conv1x1 else []))
        args = [xp, my, mh] + common_args + (sc_args if use_conv1x1 else [])
        kernel = functools.partial(_block_kernel_s1, H=H, W=W,
                                   use_conv1x1=use_conv1x1)
        out = pl.pallas_call(
            kernel,
            out_shape=jax.ShapeDtypeStruct((N, M, Pp), jnp.float32),
            grid=(N,),
            in_specs=in_specs,
            out_specs=pl.BlockSpec((None, M, Pp), lambda n: (n, 0, 0)),
            scratch_shapes=[pltpu.VMEM((Lp, Cp), jnp.bfloat16),
                            pltpu.VMEM((Lp, Pp), jnp.bfloat16)],
            compiler_params=pltpu.CompilerParams(
                dimension_semantics=("parallel",)),
        )(*args)
        out = jnp.pad(out, ((0, 0), (0, H * Wp - M), (0, 0)))
        out = out.reshape(N, H, Wp, Pp)[:, :, :W, :P]
    else:
        # Downsampling fallback (stride != 1 always implies the 1x1 shortcut).
        in_specs = ([pl.BlockSpec((None, Lp, Cp), lambda n: (n, 0, 0)),
                     pl.BlockSpec((Lp, 1), c2)] + common_specs + sc_specs)
        args = [xp, my] + common_args + sc_args
        kernel = functools.partial(_block_kernel_strided, H=H, W=W, Ho=Ho, Wo=Wo,
                                   stride=stride)
        out = pl.pallas_call(
            kernel,
            out_shape=jax.ShapeDtypeStruct((N, Ho * Wo, Pp), jnp.float32),
            grid=(N,),
            in_specs=in_specs,
            out_specs=pl.BlockSpec((None, Ho * Wo, Pp), lambda n: (n, 0, 0)),
            scratch_shapes=[pltpu.VMEM((Hp, Wp, Cp), jnp.bfloat16),
                            pltpu.VMEM((Ho + 2, Wo + 2, Pp), jnp.bfloat16)],
            compiler_params=pltpu.CompilerParams(
                dimension_semantics=("parallel",)),
        )(*args)
        out = out.reshape(N, Ho, Wo, Pp)[..., :P]

    return jnp.transpose(out, (0, 3, 1, 2))                  # NHWC -> NCHW


# ---------------- pure-JAX reference (for validation) ----------------

def reference_forward(x_nchw, p, stride=1):
    x = jnp.transpose(x_nchw, (0, 2, 3, 1))
    Cin = x.shape[-1]
    P = p["w1"].shape[-1]
    use_conv1x1 = (stride != 1) or (Cin != P)
    dn = ("NHWC", "HWIO", "NHWC")

    def bn(h, g, b, m, v):
        return (h - m) / jnp.sqrt(v + EPS) * g + b

    y = jax.nn.relu(bn(x, p["bn1_gamma"], p["bn1_beta"], p["bn1_mean"], p["bn1_var"]))
    if use_conv1x1:
        sc = lax.conv_general_dilated(y, p["wsc"][None, None], (stride, stride),
                                      "VALID", dimension_numbers=dn) + p["bsc"]
    else:
        sc = x
    o = lax.conv_general_dilated(y, p["w1"], (stride, stride),
                                 ((1, 1), (1, 1)), dimension_numbers=dn) + p["b1"]
    o = jax.nn.relu(bn(o, p["bn2_gamma"], p["bn2_beta"], p["bn2_mean"], p["bn2_var"]))
    o = lax.conv_general_dilated(o, p["w2"], (1, 1),
                                 ((1, 1), (1, 1)), dimension_numbers=dn) + p["b2"]
    o = o + sc
    return jnp.transpose(o, (0, 3, 1, 2))


def _make_params(key, Cin, P):
    f32 = jnp.float32
    ks = jax.random.split(key, 14)
    return {
        "bn1_gamma": 1.0 + 0.1 * jax.random.normal(ks[0], (Cin,), f32),
        "bn1_beta": 0.1 * jax.random.normal(ks[1], (Cin,), f32),
        "bn1_mean": 0.1 * jax.random.normal(ks[2], (Cin,), f32),
        "bn1_var": jax.random.uniform(ks[3], (Cin,), f32, 0.5, 1.5),
        "w1": 0.1 * jax.random.normal(ks[4], (3, 3, Cin, P), f32),   # HWIO
        "b1": 0.1 * jax.random.normal(ks[5], (P,), f32),
        "bn2_gamma": 1.0 + 0.1 * jax.random.normal(ks[6], (P,), f32),
        "bn2_beta": 0.1 * jax.random.normal(ks[7], (P,), f32),
        "bn2_mean": 0.1 * jax.random.normal(ks[8], (P,), f32),
        "bn2_var": jax.random.uniform(ks[9], (P,), f32, 0.5, 1.5),
        "w2": 0.1 * jax.random.normal(ks[10], (3, 3, P, P), f32),    # HWIO
        "b2": 0.1 * jax.random.normal(ks[11], (P,), f32),
        "wsc": 0.1 * jax.random.normal(ks[12], (Cin, P), f32),       # 1x1 (IO)
        "bsc": 0.1 * jax.random.normal(ks[13], (P,), f32),
    }


if __name__ == "__main__":
    N, H, W = 2, 16, 16
    key = jax.random.PRNGKey(0)

    cases = [
        (4, 8, 1, "conv1x1-shortcut"),    # inplanes != planes -> 1x1 shortcut
        (8, 8, 1, "identity-shortcut"),   # inplanes == planes, stride 1
    ]
    for Cin, P, stride, name in cases:
        key, pk, xk = jax.random.split(key, 3)
        params = _make_params(pk, Cin, P)
        x = jax.random.normal(xk, (N, Cin, H, W), jnp.float32)      # NCHW

        out = jax.block_until_ready(basic_block_forward(x, params, stride=stride))
        ref = jax.block_until_ready(reference_forward(x, params, stride=stride))

        Ho = (H - 1) // stride + 1
        Wo = (W - 1) // stride + 1
        assert out.shape == (N, P, Ho, Wo), (name, out.shape)
        np.testing.assert_allclose(np.asarray(out), np.asarray(ref),
                                   rtol=5e-2, atol=5e-2, err_msg=name)

    print("KERNEL_OK")
</pallas_src>

<mosaic_0001>
module attributes {stable_mosaic.version = 11 : i64} {
  func.func @_block_kernel_s1(%arg0: i32, %arg1: memref<1x324x128xbf16, #tpu.memory_space<vmem>>, %arg2: memref<324x1xf32, #tpu.memory_space<vmem>>, %arg3: memref<286x1xf32, #tpu.memory_space<vmem>>, %arg4: memref<1x128xf32, #tpu.memory_space<vmem>>, %arg5: memref<1x128xf32, #tpu.memory_space<vmem>>, %arg6: memref<9x128x128xbf16, #tpu.memory_space<vmem>>, %arg7: memref<1x128xf32, #tpu.memory_space<vmem>>, %arg8: memref<1x128xf32, #tpu.memory_space<vmem>>, %arg9: memref<9x128x128xbf16, #tpu.memory_space<vmem>>, %arg10: memref<1x128xf32, #tpu.memory_space<vmem>>, %arg11: memref<128x128xbf16, #tpu.memory_space<vmem>>, %arg12: memref<1x128xf32, #tpu.memory_space<vmem>>, %arg13: memref<1x286x128xf32, #tpu.memory_space<vmem>>, %arg14: memref<324x128xbf16, #tpu.memory_space<vmem>>, %arg15: memref<324x128xbf16, #tpu.memory_space<vmem>>) attributes {dimension_semantics = [#tpu.dimension_semantics<parallel>], iteration_bounds = array<i64: 2>, scalar_prefetch = 0 : i64, scratch_operands = 2 : i64, tpu.core_type = #tpu.core_type<tc>, window_params = [{transform_indices = @transform_0, window_bounds = array<i64: 1, 324, 128>}, {pipeline_mode = #tpu.pipeline_mode<synchronous>, transform_indices = @transform_1, window_bounds = array<i64: 324, 1>}, {pipeline_mode = #tpu.pipeline_mode<synchronous>, transform_indices = @transform_2, window_bounds = array<i64: 286, 1>}, {pipeline_mode = #tpu.pipeline_mode<synchronous>, transform_indices = @transform_3, window_bounds = array<i64: 1, 128>}, {pipeline_mode = #tpu.pipeline_mode<synchronous>, transform_indices = @transform_4, window_bounds = array<i64: 1, 128>}, {pipeline_mode = #tpu.pipeline_mode<synchronous>, transform_indices = @transform_5, window_bounds = array<i64: 9, 128, 128>}, {pipeline_mode = #tpu.pipeline_mode<synchronous>, transform_indices = @transform_6, window_bounds = array<i64: 1, 128>}, {pipeline_mode = #tpu.pipeline_mode<synchronous>, transform_indices = @transform_7, window_bounds = array<i64: 1, 128>}, {pipeline_mode = #tpu.pipeline_mode<synchronous>, transform_indices = @transform_8, window_bounds = array<i64: 9, 128, 128>}, {pipeline_mode = #tpu.pipeline_mode<synchronous>, transform_indices = @transform_9, window_bounds = array<i64: 1, 128>}, {pipeline_mode = #tpu.pipeline_mode<synchronous>, transform_indices = @transform_10, window_bounds = array<i64: 128, 128>}, {pipeline_mode = #tpu.pipeline_mode<synchronous>, transform_indices = @transform_11, window_bounds = array<i64: 1, 128>}, {transform_indices = @transform_12, window_bounds = array<i64: 1, 286, 128>}]} {
    %c0 = arith.constant 0 : index
    %c0_0 = arith.constant 0 : index
    %c0_1 = arith.constant 0 : index
    %0 = vector.load %arg1[%c0, %c0_0, %c0_1] : memref<1x324x128xbf16, #tpu.memory_space<vmem>>, vector<1x324x128xbf16>
    %1 = vector.shape_cast %0 : vector<1x324x128xbf16> to vector<324x128xbf16>
    %2 = arith.extf %1 : vector<324x128xbf16> to vector<324x128xf32>
    %c0_2 = arith.constant 0 : index
    %c0_3 = arith.constant 0 : index
    %3 = vector.load %arg4[%c0_2, %c0_3] : memref<1x128xf32, #tpu.memory_space<vmem>>, vector<1x128xf32>
    %4 = vector.broadcast %3 : vector<1x128xf32> to vector<324x128xf32>
    %5 = arith.mulf %2, %4 : vector<324x128xf32>
    %c0_4 = arith.constant 0 : index
    %c0_5 = arith.constant 0 : index
    %6 = vector.load %arg5[%c0_4, %c0_5] : memref<1x128xf32, #tpu.memory_space<vmem>>, vector<1x128xf32>
    %7 = vector.broadcast %6 : vector<1x128xf32> to vector<324x128xf32>
    %8 = arith.addf %5, %7 : vector<324x128xf32>
    %cst = arith.constant 0.000000e+00 : f32
    %9 = vector.broadcast %cst : f32 to vector<324x128xf32>
    %10 = arith.maximumf %8, %9 : vector<324x128xf32>
    %c0_6 = arith.constant 0 : index
    %c0_7 = arith.constant 0 : index
    %11 = vector.load %arg2[%c0_6, %c0_7] : memref<324x1xf32, #tpu.memory_space<vmem>>, vector<324x1xf32>
    %12 = vector.broadcast %11 : vector<324x1xf32> to vector<324x128xf32>
    %13 = arith.mulf %10, %12 : vector<324x128xf32>
    %14 = arith.truncf %13 : vector<324x128xf32> to vector<324x128xbf16>
    %c0_8 = arith.constant 0 : index
    %c0_9 = arith.constant 0 : index
    %15 = vector.load %arg14[%c0_8, %c0_9] : memref<324x128xbf16, #tpu.memory_space<vmem>>, vector<324x128xbf16>
    tpu.vector_store %arg14[%c0_8, %c0_9], %14 {strides = array<i32>} : memref<324x128xbf16, #tpu.memory_space<vmem>>, vector<324x128xbf16>,
    %cst_10 = arith.constant 0.000000e+00 : bf16
    %16 = vector.broadcast %cst_10 : bf16 to vector<19x128xbf16>
    %c0_11 = arith.constant 0 : index
    %c0_12 = arith.constant 0 : index
    %17 = vector.load %arg15[%c0_11, %c0_12] : memref<324x128xbf16, #tpu.memory_space<vmem>>, vector<19x128xbf16>
    tpu.vector_store %arg15[%c0_11, %c0_12], %16 {strides = array<i32>} : memref<324x128xbf16, #tpu.memory_space<vmem>>, vector<19x128xbf16>,
    %c305 = arith.constant 305 : index
    %c0_13 = arith.constant 0 : index
    %18 = vector.load %arg15[%c305, %c0_13] : memref<324x128xbf16, #tpu.memory_space<vmem>>, vector<19x128xbf16>
    tpu.vector_store %arg15[%c305, %c0_13], %16 {strides = array<i32>} : memref<324x128xbf16, #tpu.memory_space<vmem>>, vector<19x128xbf16>,
    %c0_14 = arith.constant 0 : index
    %c0_15 = arith.constant 0 : index
    %19 = vector.load %arg14[%c0_14, %c0_15] : memref<324x128xbf16, #tpu.memory_space<vmem>>, vector<128x128xbf16>
    %c0_16 = arith.constant 0 : index
    %c0_17 = arith.constant 0 : index
    %c0_18 = arith.constant 0 : index
    %20 = vector.load %arg6[%c0_16, %c0_17, %c0_18] : memref<9x128x128xbf16, #tpu.memory_space<vmem>>, vector<1x128x128xbf16>
    %21 = vector.shape_cast %20 : vector<1x128x128xbf16> to vector<128x128xbf16>
    %cst_19 = arith.constant dense<0.000000e+00> : vector<128x128xf32>
    %22 = tpu.matmul %19, %21, %cst_19 {dimension_numbers = #tpu.dot_dimension_numbers<[1], [0], [0], [1], [0, 0, 1, 1], [], []>} : vector<128x128xbf16>, vector<128x128xbf16>, vector<128x128xf32> -> vector<128x128xf32>
    %c1 = arith.constant 1 : index
    %c0_20 = arith.constant 0 : index
    %23 = vector.load %arg14[%c1, %c0_20] : memref<324x128xbf16, #tpu.memory_space<vmem>>, vector<128x128xbf16>
    %c1_21 = arith.constant 1 : index
    %c0_22 = arith.constant 0 : index
    %c0_23 = arith.constant 0 : index
    %24 = vector.load %arg6[%c1_21, %c0_22, %c0_23] : memref<9x128x128xbf16, #tpu.memory_space<vmem>>, vector<1x128x128xbf16>
    %25 = vector.shape_cast %24 : vector<1x128x128xbf16> to vector<128x128xbf16>
    %cst_24 = arith.constant dense<0.000000e+00> : vector<128x128xf32>
    %26 = tpu.matmul %23, %25, %cst_24 {dimension_numbers = #tpu.dot_dimension_numbers<[1], [0], [0], [1], [0, 0, 1, 1], [], []>} : vector<128x128xbf16>, vector<128x128xbf16>, vector<128x128xf32> -> vector<128x128xf32>
    %27 = arith.addf %22, %26 : vector<128x128xf32>
    %c2 = arith.constant 2 : index
    %c0_25 = arith.constant 0 : index
    %28 = vector.load %arg14[%c2, %c0_25] : memref<324x128xbf16, #tpu.memory_space<vmem>>, vector<128x128xbf16>
    %c2_26 = arith.constant 2 : index
    %c0_27 = arith.constant 0 : index
    %c0_28 = arith.constant 0 : index
    %29 = vector.load %arg6[%c2_26, %c0_27, %c0_28] : memref<9x128x128xbf16, #tpu.memory_space<vmem>>, vector<1x128x128xbf16>
    %30 = vector.shape_cast %29 : vector<1x128x128xbf16> to vector<128x128xbf16>
    %cst_29 = arith.constant dense<0.000000e+00> : vector<128x128xf32>
    %31 = tpu.matmul %28, %30, %cst_29 {dimension_numbers = #tpu.dot_dimension_numbers<[1], [0], [0], [1], [0, 0, 1, 1], [], []>} : vector<128x128xbf16>, vector<128x128xbf16>, vector<128x128xf32> -> vector<128x128xf32>
    %32 = arith.addf %27, %31 : vector<128x128xf32>
    %c18 = arith.constant 18 : index
    %c0_30 = arith.constant 0 : index
    %33 = vector.load %arg14[%c18, %c0_30] : memref<324x128xbf16, #tpu.memory_space<vmem>>, vector<128x128xbf16>
    %c3 = arith.constant 3 : index
    %c0_31 = arith.constant 0 : index
    %c0_32 = arith.constant 0 : index
    %34 = vector.load %arg6[%c3, %c0_31, %c0_32] : memref<9x128x128xbf16, #tpu.memory_space<vmem>>, vector<1x128x128xbf16>
    %35 = vector.shape_cast %34 : vector<1x128x128xbf16> to vector<128x128xbf16>
    %cst_33 = arith.constant dense<0.000000e+00> : vector<128x128xf32>
    %36 = tpu.matmul %33, %35, %cst_33 {dimension_numbers = #tpu.dot_dimension_numbers<[1], [0], [0], [1], [0, 0, 1, 1], [], []>} : vector<128x128xbf16>, vector<128x128xbf16>, vector<128x128xf32> -> vector<128x128xf32>
    %37 = arith.addf %32, %36 : vector<128x128xf32>
    %c19 = arith.constant 19 : index
    %c0_34 = arith.constant 0 : index
    %38 = vector.load %arg14[%c19, %c0_34] : memref<324x128xbf16, #tpu.memory_space<vmem>>, vector<128x128xbf16>
    %c4 = arith.constant 4 : index
    %c0_35 = arith.constant 0 : index
    %c0_36 = arith.constant 0 : index
    %39 = vector.load %arg6[%c4, %c0_35, %c0_36] : memref<9x128x128xbf16, #tpu.memory_space<vmem>>, vector<1x128x128xbf16>
    %40 = vector.shape_cast %39 : vector<1x128x128xbf16> to vector<128x128xbf16>
    %cst_37 = arith.constant dense<0.000000e+00> : vector<128x128xf32>
    %41 = tpu.matmul %38, %40, %cst_37 {dimension_numbers = #tpu.dot_dimension_numbers<[1], [0], [0], [1], [0, 0, 1, 1], [], []>} : vector<128x128xbf16>, vector<128x128xbf16>, vector<128x128xf32> -> vector<128x128xf32>
    %42 = arith.addf %37, %41 : vector<128x128xf32>
    %c20 = arith.constant 20 : index
    %c0_38 = arith.constant 0 : index
    %43 = vector.load %arg14[%c20, %c0_38] : memref<324x128xbf16, #tpu.memory_space<vmem>>, vector<128x128xbf16>
    %c5 = arith.constant 5 : index
    %c0_39 = arith.constant 0 : index
    %c0_40 = arith.constant 0 : index
    %44 = vector.load %arg6[%c5, %c0_39, %c0_40] : memref<9x128x128xbf16, #tpu.memory_space<vmem>>, vector<1x128x128xbf16>
    %45 = vector.shape_cast %44 : vector<1x128x128xbf16> to vector<128x128xbf16>
    %cst_41 = arith.constant dense<0.000000e+00> : vector<128x128xf32>
    %46 = tpu.matmul %43, %45, %cst_41 {dimension_numbers = #tpu.dot_dimension_numbers<[1], [0], [0], [1], [0, 0, 1, 1], [], []>} : vector<128x128xbf16>, vector<128x128xbf16>, vector<128x128xf32> -> vector<128x128xf32>
    %47 = arith.addf %42, %46 : vector<128x128xf32>
    %c36 = arith.constant 36 : index
    %c0_42 = arith.constant 0 : index
    %48 = vector.load %arg14[%c36, %c0_42] : memref<324x128xbf16, #tpu.memory_space<vmem>>, vector<128x128xbf16>
    %c6 = arith.constant 6 : index
    %c0_43 = arith.constant 0 : index
    %c0_44 = arith.constant 0 : index
    %49 = vector.load %arg6[%c6, %c0_43, %c0_44] : memref<9x128x128xbf16, #tpu.memory_space<vmem>>, vector<1x128x128xbf16>
    %50 = vector.shape_cast %49 : vector<1x128x128xbf16> to vector<128x128xbf16>
    %cst_45 = arith.constant dense<0.000000e+00> : vector<128x128xf32>
    %51 = tpu.matmul %48, %50, %cst_45 {dimension_numbers = #tpu.dot_dimension_numbers<[1], [0], [0], [1], [0, 0, 1, 1], [], []>} : vector<128x128xbf16>, vector<128x128xbf16>, vector<128x128xf32> -> vector<128x128xf32>
    %52 = arith.addf %47, %51 : vector<128x128xf32>
    %c37 = arith.constant 37 : index
    %c0_46 = arith.constant 0 : index
    %53 = vector.load %arg14[%c37, %c0_46] : memref<324x128xbf16, #tpu.memory_space<vmem>>, vector<128x128xbf16>
    %c7 = arith.constant 7 : index
    %c0_47 = arith.constant 0 : index
    %c0_48 = arith.constant 0 : index
    %54 = vector.load %arg6[%c7, %c0_47, %c0_48] : memref<9x128x128xbf16, #tpu.memory_space<vmem>>, vector<1x128x128xbf16>
    %55 = vector.shape_cast %54 : vector<1x128x128xbf16> to vector<128x128xbf16>
    %cst_49 = arith.constant dense<0.000000e+00> : vector<128x128xf32>
    %56 = tpu.matmul %53, %55, %cst_49 {dimension_numbers = #tpu.dot_dimension_numbers<[1], [0], [0], [1], [0, 0, 1, 1], [], []>} : vector<128x128xbf16>, vector<128x128xbf16>, vector<128x128xf32> -> vector<128x128xf32>
    %57 = arith.addf %52, %56 : vector<128x128xf32>
    %c38 = arith.constant 38 : index
    %c0_50 = arith.constant 0 : index
    %58 = vector.load %arg14[%c38, %c0_50] : memref<324x128xbf16, #tpu.memory_space<vmem>>, vector<128x128xbf16>
    %c8 = arith.constant 8 : index
    %c0_51 = arith.constant 0 : index
    %c0_52 = arith.constant 0 : index
    %59 = vector.load %arg6[%c8, %c0_51, %c0_52] : memref<9x128x128xbf16, #tpu.memory_space<vmem>>, vector<1x128x128xbf16>
    %60 = vector.shape_cast %59 : vector<1x128x128xbf16> to vector<128x128xbf16>
    %cst_53 = arith.constant dense<0.000000e+00> : vector<128x128xf32>
    %61 = tpu.matmul %58, %60, %cst_53 {dimension_numbers = #tpu.dot_dimension_numbers<[1], [0], [0], [1], [0, 0, 1, 1], [], []>} : vector<128x128xbf16>, vector<128x128xbf16>, vector<128x128xf32> -> vector<128x128xf32>
    %62 = arith.addf %57, %61 : vector<128x128xf32>
    %c0_54 = arith.constant 0 : index
    %c0_55 = arith.constant 0 : index
    %63 = vector.load %arg7[%c0_54, %c0_55] : memref<1x128xf32, #tpu.memory_space<vmem>>, vector<1x128xf32>
    %64 = vector.broadcast %63 : vector<1x128xf32> to vector<128x128xf32>
    %65 = arith.mulf %62, %64 : vector<128x128xf32>
    %c0_56 = arith.constant 0 : index
    %c0_57 = arith.constant 0 : index
    %66 = vector.load %arg8[%c0_56, %c0_57] : memref<1x128xf32, #tpu.memory_space<vmem>>, vector<1x128xf32>
    %67 = vector.broadcast %66 : vector<1x128xf32> to vector<128x128xf32>
    %68 = arith.addf %65, %67 : vector<128x128xf32>
    %cst_58 = arith.constant 0.000000e+00 : f32
    %69 = vector.broadcast %cst_58 : f32 to vector<128x128xf32>
    %70 = arith.maximumf %68, %69 : vector<128x128xf32>
    %c0_59 = arith.constant 0 : index
    %c0_60 = arith.constant 0 : index
    %71 = vector.load %arg3[%c0_59, %c0_60] : memref<286x1xf32, #tpu.memory_space<vmem>>, vector<128x1xf32>
    %72 = vector.broadcast %71 : vector<128x1xf32> to vector<128x128xf32>
    %73 = arith.mulf %70, %72 : vector<128x128xf32>
    %74 = arith.truncf %73 : vector<128x128xf32> to vector<128x128xbf16>
    %c19_61 = arith.constant 19 : index
    %c0_62 = arith.constant 0 : index
    %75 = vector.load %arg15[%c19_61, %c0_62] : memref<324x128xbf16, #tpu.memory_space<vmem>>, vector<128x128xbf16>
    tpu.vector_store %arg15[%c19_61, %c0_62], %74 {strides = array<i32>} : memref<324x128xbf16, #tpu.memory_space<vmem>>, vector<128x128xbf16>,
    %c128 = arith.constant 128 : index
    %c0_63 = arith.constant 0 : index
    %76 = vector.load %arg14[%c128, %c0_63] : memref<324x128xbf16, #tpu.memory_space<vmem>>, vector<128x128xbf16>
    %c0_64 = arith.constant 0 : index
    %c0_65 = arith.constant 0 : index
    %c0_66 = arith.constant 0 : index
    %77 = vector.load %arg6[%c0_64, %c0_65, %c0_66] : memref<9x128x128xbf16, #tpu.memory_space<vmem>>, vector<1x128x128xbf16>
    %78 = vector.shape_cast %77 : vector<1x128x128xbf16> to vector<128x128xbf16>
    %cst_67 = arith.constant dense<0.000000e+00> : vector<128x128xf32>
    %79 = tpu.matmul %76, %78, %cst_67 {dimension_numbers = #tpu.dot_dimension_numbers<[1], [0], [0], [1], [0, 0, 1, 1], [], []>} : vector<128x128xbf16>, vector<128x128xbf16>, vector<128x128xf32> -> vector<128x128xf32>
    %c129 = arith.constant 129 : index
    %c0_68 = arith.constant 0 : index
    %80 = vector.load %arg14[%c129, %c0_68] : memref<324x128xbf16, #tpu.memory_space<vmem>>, vector<128x128xbf16>
    %c1_69 = arith.constant 1 : index
    %c0_70 = arith.constant 0 : index
    %c0_71 = arith.constant 0 : index
    %81 = vector.load %arg6[%c1_69, %c0_70, %c0_71] : memref<9x128x128xbf16, #tpu.memory_space<vmem>>, vector<1x128x128xbf16>
    %82 = vector.shape_cast %81 : vector<1x128x128xbf16> to vector<128x128xbf16>
    %cst_72 = arith.constant dense<0.000000e+00> : vector<128x128xf32>
    %83 = tpu.matmul %80, %82, %cst_72 {dimension_numbers = #tpu.dot_dimension_numbers<[1], [0], [0], [1], [0, 0, 1, 1], [], []>} : vector<128x128xbf16>, vector<128x128xbf16>, vector<128x128xf32> -> vector<128x128xf32>
    %84 = arith.addf %79, %83 : vector<128x128xf32>
    %c130 = arith.constant 130 : index
    %c0_73 = arith.constant 0 : index
    %85 = vector.load %arg14[%c130, %c0_73] : memref<324x128xbf16, #tpu.memory_space<vmem>>, vector<128x128xbf16>
    %c2_74 = arith.constant 2 : index
    %c0_75 = arith.constant 0 : index
    %c0_76 = arith.constant 0 : index
    %86 = vector.load %arg6[%c2_74, %c0_75, %c0_76] : memref<9x128x128xbf16, #tpu.memory_space<vmem>>, vector<1x128x128xbf16>
    %87 = vector.shape_cast %86 : vector<1x128x128xbf16> to vector<128x128xbf16>
    %cst_77 = arith.constant dense<0.000000e+00> : vector<128x128xf32>
    %88 = tpu.matmul %85, %87, %cst_77 {dimension_numbers = #tpu.dot_dimension_numbers<[1], [0], [0], [1], [0, 0, 1, 1], [], []>} : vector<128x128xbf16>, vector<128x128xbf16>, vector<128x128xf32> -> vector<128x128xf32>
    %89 = arith.addf %84, %88 : vector<128x128xf32>
    %c146 = arith.constant 146 : index
    %c0_78 = arith.constant 0 : index
    %90 = vector.load %arg14[%c146, %c0_78] : memref<324x128xbf16, #tpu.memory_space<vmem>>, vector<128x128xbf16>
    %c3_79 = arith.constant 3 : index
    %c0_80 = arith.constant 0 : index
    %c0_81 = arith.constant 0 : index
    %91 = vector.load %arg6[%c3_79, %c0_80, %c0_81] : memref<9x128x128xbf16, #tpu.memory_space<vmem>>, vector<1x128x128xbf16>
    %92 = vector.shape_cast %91 : vector<1x128x128xbf16> to vector<128x128xbf16>
    %cst_82 = arith.constant dense<0.000000e+00> : vector<128x128xf32>
    %93 = tpu.matmul %90, %92, %cst_82 {dimension_numbers = #tpu.dot_dimension_numbers<[1], [0], [0], [1], [0, 0, 1, 1], [], []>} : vector<128x128xbf16>, vector<128x128xbf16>, vector<128x128xf32> -> vector<128x128xf32>
    %94 = arith.addf %89, %93 : vector<128x128xf32>
    %c147 = arith.constant 147 : index
    %c0_83 = arith.constant 0 : index
    %95 = vector.load %arg14[%c147, %c0_83] : memref<324x128xbf16, #tpu.memory_space<vmem>>, vector<128x128xbf16>
    %c4_84 = arith.constant 4 : index
    %c0_85 = arith.constant 0 : index
    %c0_86 = arith.constant 0 : index
    %96 = vector.load %arg6[%c4_84, %c0_85, %c0_86] : memref<9x128x128xbf16, #tpu.memory_space<vmem>>, vector<1x128x128xbf16>
    %97 = vector.shape_cast %96 : vector<1x128x128xbf16> to vector<128x128xbf16>
    %cst_87 = arith.constant dense<0.000000e+00> : vector<128x128xf32>
    %98 = tpu.matmul %95, %97, %cst_87 {dimension_numbers = #tpu.dot_dimension_numbers<[1], [0], [0], [1], [0, 0, 1, 1], [], []>} : vector<128x128xbf16>, vector<128x128xbf16>, vector<128x128xf32> -> vector<128x128xf32>
    %99 = arith.addf %94, %98 : vector<128x128xf32>
    %c148 = arith.constant 148 : index
    %c0_88 = arith.constant 0 : index
    %100 = vector.load %arg14[%c148, %c0_88] : memref<324x128xbf16, #tpu.memory_space<vmem>>, vector<128x128xbf16>
    %c5_89 = arith.constant 5 : index
    %c0_90 = arith.constant 0 : index
    %c0_91 = arith.constant 0 : index
    %101 = vector.load %arg6[%c5_89, %c0_90, %c0_91] : memref<9x128x128xbf16, #tpu.memory_space<vmem>>, vector<1x128x128xbf16>
    %102 = vector.shape_cast %101 : vector<1x128x128xbf16> to vector<128x128xbf16>
    %cst_92 = arith.constant dense<0.000000e+00> : vector<128x128xf32>
    %103 = tpu.matmul %100, %102, %cst_92 {dimension_numbers = #tpu.dot_dimension_numbers<[1], [0], [0], [1], [0, 0, 1, 1], [], []>} : vector<128x128xbf16>, vector<128x128xbf16>, vector<128x128xf32> -> vector<128x128xf32>
    %104 = arith.addf %99, %103 : vector<128x128xf32>
    %c164 = arith.constant 164 : index
    %c0_93 = arith.constant 0 : index
    %105 = vector.load %arg14[%c164, %c0_93] : memref<324x128xbf16, #tpu.memory_space<vmem>>, vector<128x128xbf16>
    %c6_94 = arith.constant 6 : index
    %c0_95 = arith.constant 0 : index
    %c0_96 = arith.constant 0 : index
    %106 = vector.load %arg6[%c6_94, %c0_95, %c0_96] : memref<9x128x128xbf16, #tpu.memory_space<vmem>>, vector<1x128x128xbf16>
    %107 = vector.shape_cast %106 : vector<1x128x128xbf16> to vector<128x128xbf16>
    %cst_97 = arith.constant dense<0.000000e+00> : vector<128x128xf32>
    %108 = tpu.matmul %105, %107, %cst_97 {dimension_numbers = #tpu.dot_dimension_numbers<[1], [0], [0], [1], [0, 0, 1, 1], [], []>} : vector<128x128xbf16>, vector<128x128xbf16>, vector<128x128xf32> -> vector<128x128xf32>
    %109 = arith.addf %104, %108 : vector<128x128xf32>
    %c165 = arith.constant 165 : index
    %c0_98 = arith.constant 0 : index
    %110 = vector.load %arg14[%c165, %c0_98] : memref<324x128xbf16, #tpu.memory_space<vmem>>, vector<128x128xbf16>
    %c7_99 = arith.constant 7 : index
    %c0_100 = arith.constant 0 : index
    %c0_101 = arith.constant 0 : index
    %111 = vector.load %arg6[%c7_99, %c0_100, %c0_101] : memref<9x128x128xbf16, #tpu.memory_space<vmem>>, vector<1x128x128xbf16>
    %112 = vector.shape_cast %111 : vector<1x128x128xbf16> to vector<128x128xbf16>
    %cst_102 = arith.constant dense<0.000000e+00> : vector<128x128xf32>
    %113 = tpu.matmul %110, %112, %cst_102 {dimension_numbers = #tpu.dot_dimension_numbers<[1], [0], [0], [1], [0, 0, 1, 1], [], []>} : vector<128x128xbf16>, vector<128x128xbf16>, vector<128x128xf32> -> vector<128x128xf32>
    %114 = arith.addf %109, %113 : vector<128x128xf32>
    %c166 = arith.constant 166 : index
    %c0_103 = arith.constant 0 : index
    %115 = vector.load %arg14[%c166, %c0_103] : memref<324x128xbf16, #tpu.memory_space<vmem>>, vector<128x128xbf16>
    %c8_104 = arith.constant 8 : index
    %c0_105 = arith.constant 0 : index
    %c0_106 = arith.constant 0 : index
    %116 = vector.load %arg6[%c8_104, %c0_105, %c0_106] : memref<9x128x128xbf16, #tpu.memory_space<vmem>>, vector<1x128x128xbf16>
    %117 = vector.shape_cast %116 : vector<1x128x128xbf16> to vector<128x128xbf16>
    %cst_107 = arith.constant dense<0.000000e+00> : vector<128x128xf32>
    %118 = tpu.matmul %115, %117, %cst_107 {dimension_numbers = #tpu.dot_dimension_numbers<[1], [0], [0], [1], [0, 0, 1, 1], [], []>} : vector<128x128xbf16>, vector<128x128xbf16>, vector<128x128xf32> -> vector<128x128xf32>
    %119 = arith.addf %114, %118 : vector<128x128xf32>
    %c0_108 = arith.constant 0 : index
    %c0_109 = arith.constant 0 : index
    %120 = vector.load %arg7[%c0_108, %c0_109] : memref<1x128xf32, #tpu.memory_space<vmem>>, vector<1x128xf32>
    %121 = vector.broadcast %120 : vector<1x128xf32> to vector<128x128xf32>
    %122 = arith.mulf %119, %121 : vector<128x128xf32>
    %c0_110 = arith.constant 0 : index
    %c0_111 = arith.constant 0 : index
    %123 = vector.load %arg8[%c0_110, %c0_111] : memref<1x128xf32, #tpu.memory_space<vmem>>, vector<1x128xf32>
    %124 = vector.broadcast %123 : vector<1x128xf32> to vector<128x128xf32>
    %125 = arith.addf %122, %124 : vector<128x128xf32>
    %cst_112 = arith.constant 0.000000e+00 : f32
    %126 = vector.broadcast %cst_112 : f32 to vector<128x128xf32>
    %127 = arith.maximumf %125, %126 : vector<128x128xf32>
    %c128_113 = arith.constant 128 : index
    %c0_114 = arith.constant 0 : index
    %128 = vector.load %arg3[%c128_113, %c0_114] : memref<286x1xf32, #tpu.memory_space<vmem>>, vector<128x1xf32>
    %129 = vector.broadcast %128 : vector<128x1xf32> to vector<128x128xf32>
    %130 = arith.mulf %127, %129 : vector<128x128xf32>
    %131 = arith.truncf %130 : vector<128x128xf32> to vector<128x128xbf16>
    %c147_115 = arith.constant 147 : index
    %c0_116 = arith.constant 0 : index
    %132 = vector.load %arg15[%c147_115, %c0_116] : memref<324x128xbf16, #tpu.memory_space<vmem>>, vector<128x128xbf16>
    tpu.vector_store %arg15[%c147_115, %c0_116], %131 {strides = array<i32>} : memref<324x128xbf16, #tpu.memory_space<vmem>>, vector<128x128xbf16>,
    %c256 = arith.constant 256 : index
    %c0_117 = arith.constant 0 : index
    %133 = vector.load %arg14[%c256, %c0_117] : memref<324x128xbf16, #tpu.memory_space<vmem>>, vector<30x128xbf16>
    %c0_118 = arith.constant 0 : index
    %c0_119 = arith.constant 0 : index
    %c0_120 = arith.constant 0 : index
    %134 = vector.load %arg6[%c0_118, %c0_119, %c0_120] : memref<9x128x128xbf16, #tpu.memory_space<vmem>>, vector<1x128x128xbf16>
    %135 = vector.shape_cast %134 : vector<1x128x128xbf16> to vector<128x128xbf16>
    %cst_121 = arith.constant dense<0.000000e+00> : vector<30x128xf32>
    %136 = tpu.matmul %133, %135, %cst_121 {dimension_numbers = #tpu.dot_dimension_numbers<[1], [0], [0], [1], [0, 0, 1, 1], [], []>} : vector<30x128xbf16>, vector<128x128xbf16>, vector<30x128xf32> -> vector<30x128xf32>
    %c257 = arith.constant 257 : index
    %c0_122 = arith.constant 0 : index
    %137 = vector.load %arg14[%c257, %c0_122] : memref<324x128xbf16, #tpu.memory_space<vmem>>, vector<30x128xbf16>
    %c1_123 = arith.constant 1 : index
    %c0_124 = arith.constant 0 : index
    %c0_125 = arith.constant 0 : index
    %138 = vector.load %arg6[%c1_123, %c0_124, %c0_125] : memref<9x128x128xbf16, #tpu.memory_space<vmem>>, vector<1x128x128xbf16>
    %139 = vector.shape_cast %138 : vector<1x128x128xbf16> to vector<128x128xbf16>
    %cst_126 = arith.constant dense<0.000000e+00> : vector<30x128xf32>
    %140 = tpu.matmul %137, %139, %cst_126 {dimension_numbers = #tpu.dot_dimension_numbers<[1], [0], [0], [1], [0, 0, 1, 1], [], []>} : vector<30x128xbf16>, vector<128x128xbf16>, vector<30x128xf32> -> vector<30x128xf32>
    %141 = arith.addf %136, %140 : vector<30x128xf32>
    %c258 = arith.constant 258 : index
    %c0_127 = arith.constant 0 : index
    %142 = vector.load %arg14[%c258, %c0_127] : memref<324x128xbf16, #tpu.memory_space<vmem>>, vector<30x128xbf16>
    %c2_128 = arith.constant 2 : index
    %c0_129 = arith.constant 0 : index
    %c0_130 = arith.constant 0 : index
    %143 = vector.load %arg6[%c2_128, %c0_129, %c0_130] : memref<9x128x128xbf16, #tpu.memory_space<vmem>>, vector<1x128x128xbf16>
    %144 = vector.shape_cast %143 : vector<1x128x128xbf16> to vector<128x128xbf16>
    %cst_131 = arith.constant dense<0.000000e+00> : vector<30x128xf32>
    %145 = tpu.matmul %142, %144, %cst_131 {dimension_numbers = #tpu.dot_dimension_numbers<[1], [0], [0], [1], [0, 0, 1, 1], [], []>} : vector<30x128xbf16>, vector<128x128xbf16>, vector<30x128xf32> -> vector<30x128xf32>
    %146 = arith.addf %141, %145 : vector<30x128xf32>
    %c274 = arith.constant 274 : index
    %c0_132 = arith.constant 0 : index
    %147 = vector.load %arg14[%c274, %c0_132] : memref<324x128xbf16, #tpu.memory_space<vmem>>, vector<30x128xbf16>
    %c3_133 = arith.constant 3 : index
    %c0_134 = arith.constant 0 : index
    %c0_135 = arith.constant 0 : index
    %148 = vector.load %arg6[%c3_133, %c0_134, %c0_135] : memref<9x128x128xbf16, #tpu.memory_space<vmem>>, vector<1x128x128xbf16>
    %149 = vector.shape_cast %148 : vector<1x128x128xbf16> to vector<128x128xbf16>
    %cst_136 = arith.constant dense<0.000000e+00> : vector<30x128xf32>
    %150 = tpu.matmul %147, %149, %cst_136 {dimension_numbers = #tpu.dot_dimension_numbers<[1], [0], [0], [1], [0, 0, 1, 1], [], []>} : vector<30x128xbf16>, vector<128x128xbf16>, vector<30x128xf32> -> vector<30x128xf32>
    %151 = arith.addf %146, %150 : vector<30x128xf32>
    %c275 = arith.constant 275 : index
    %c0_137 = arith.constant 0 : index
    %152 = vector.load %arg14[%c275, %c0_137] : memref<324x128xbf16, #tpu.memory_space<vmem>>, vector<30x128xbf16>
    %c4_138 = arith.constant 4 : index
    %c0_139 = arith.constant 0 : index
    %c0_140 = arith.constant 0 : index
    %153 = vector.load %arg6[%c4_138, %c0_139, %c0_140] : memref<9x128x128xbf16, #tpu.memory_space<vmem>>, vector<1x128x128xbf16>
    %154 = vector.shape_cast %153 : vector<1x128x128xbf16> to vector<128x128xbf16>
    %cst_141 = arith.constant dense<0.000000e+00> : vector<30x128xf32>
    %155 = tpu.matmul %152, %154, %cst_141 {dimension_numbers = #tpu.dot_dimension_numbers<[1], [0], [0], [1], [0, 0, 1, 1], [], []>} : vector<30x128xbf16>, vector<128x128xbf16>, vector<30x128xf32> -> vector<30x128xf32>
    %156 = arith.addf %151, %155 : vector<30x128xf32>
    %c276 = arith.constant 276 : index
    %c0_142 = arith.constant 0 : index
    %157 = vector.load %arg14[%c276, %c0_142] : memref<324x128xbf16, #tpu.memory_space<vmem>>, vector<30x128xbf16>
    %c5_143 = arith.constant 5 : index
    %c0_144 = arith.constant 0 : index
    %c0_145 = arith.constant 0 : index
    %158 = vector.load %arg6[%c5_143, %c0_144, %c0_145] : memref<9x128x128xbf16, #tpu.memory_space<vmem>>, vector<1x128x128xbf16>
    %159 = vector.shape_cast %158 : vector<1x128x128xbf16> to vector<128x128xbf16>
    %cst_146 = arith.constant dense<0.000000e+00> : vector<30x128xf32>
    %160 = tpu.matmul %157, %159, %cst_146 {dimension_numbers = #tpu.dot_dimension_numbers<[1], [0], [0], [1], [0, 0, 1, 1], [], []>} : vector<30x128xbf16>, vector<128x128xbf16>, vector<30x128xf32> -> vector<30x128xf32>
    %161 = arith.addf %156, %160 : vector<30x128xf32>
    %c292 = arith.constant 292 : index
    %c0_147 = arith.constant 0 : index
    %162 = vector.load %arg14[%c292, %c0_147] : memref<324x128xbf16, #tpu.memory_space<vmem>>, vector<30x128xbf16>
    %c6_148 = arith.constant 6 : index
    %c0_149 = arith.constant 0 : index
    %c0_150 = arith.constant 0 : index
    %163 = vector.load %arg6[%c6_148, %c0_149, %c0_150] : memref<9x128x128xbf16, #tpu.memory_space<vmem>>, vector<1x128x128xbf16>
    %164 = vector.shape_cast %163 : vector<1x128x128xbf16> to vector<128x128xbf16>
    %cst_151 = arith.constant dense<0.000000e+00> : vector<30x128xf32>
    %165 = tpu.matmul %162, %164, %cst_151 {dimension_numbers = #tpu.dot_dimension_numbers<[1], [0], [0], [1], [0, 0, 1, 1], [], []>} : vector<30x128xbf16>, vector<128x128xbf16>, vector<30x128xf32> -> vector<30x128xf32>
    %166 = arith.addf %161, %165 : vector<30x128xf32>
    %c293 = arith.constant 293 : index
    %c0_152 = arith.constant 0 : index
    %167 = vector.load %arg14[%c293, %c0_152] : memref<324x128xbf16, #tpu.memory_space<vmem>>, vector<30x128xbf16>
    %c7_153 = arith.constant 7 : index
    %c0_154 = arith.constant 0 : index
    %c0_155 = arith.constant 0 : index
    %168 = vector.load %arg6[%c7_153, %c0_154, %c0_155] : memref<9x128x128xbf16, #tpu.memory_space<vmem>>, vector<1x128x128xbf16>
    %169 = vector.shape_cast %168 : vector<1x128x128xbf16> to vector<128x128xbf16>
    %cst_156 = arith.constant dense<0.000000e+00> : vector<30x128xf32>
    %170 = tpu.matmul %167, %169, %cst_156 {dimension_numbers = #tpu.dot_dimension_numbers<[1], [0], [0], [1], [0, 0, 1, 1], [], []>} : vector<30x128xbf16>, vector<128x128xbf16>, vector<30x128xf32> -> vector<30x128xf32>
    %171 = arith.addf %166, %170 : vector<30x128xf32>
    %c294 = arith.constant 294 : index
    %c0_157 = arith.constant 0 : index
    %172 = vector.load %arg14[%c294, %c0_157] : memref<324x128xbf16, #tpu.memory_space<vmem>>, vector<30x128xbf16>
    %c8_158 = arith.constant 8 : index
    %c0_159 = arith.constant 0 : index
    %c0_160 = arith.constant 0 : index
    %173 = vector.load %arg6[%c8_158, %c0_159, %c0_160] : memref<9x128x128xbf16, #tpu.memory_space<vmem>>, vector<1x128x128xbf16>
    %174 = vector.shape_cast %173 : vector<1x128x128xbf16> to vector<128x128xbf16>
    %cst_161 = arith.constant dense<0.000000e+00> : vector<30x128xf32>
    %175 = tpu.matmul %172, %174, %cst_161 {dimension_numbers = #tpu.dot_dimension_numbers<[1], [0], [0], [1], [0, 0, 1, 1], [], []>} : vector<30x128xbf16>, vector<128x128xbf16>, vector<30x128xf32> -> vector<30x128xf32>
    %176 = arith.addf %171, %175 : vector<30x128xf32>
    %c0_162 = arith.constant 0 : index
    %c0_163 = arith.constant 0 : index
    %177 = vector.load %arg7[%c0_162, %c0_163] : memref<1x128xf32, #tpu.memory_space<vmem>>, vector<1x128xf32>
    %178 = vector.broadcast %177 : vector<1x128xf32> to vector<30x128xf32>
    %179 = arith.mulf %176, %178 : vector<30x128xf32>
    %c0_164 = arith.constant 0 : index
    %c0_165 = arith.constant 0 : index
    %180 = vector.load %arg8[%c0_164, %c0_165] : memref<1x128xf32, #tpu.memory_space<vmem>>, vector<1x128xf32>
    %181 = vector.broadcast %180 : vector<1x128xf32> to vector<30x128xf32>
    %182 = arith.addf %179, %181 : vector<30x128xf32>
    %cst_166 = arith.constant 0.000000e+00 : f32
    %183 = vector.broadcast %cst_166 : f32 to vector<30x128xf32>
    %184 = arith.maximumf %182, %183 : vector<30x128xf32>
    %c256_167 = arith.constant 256 : index
    %c0_168 = arith.constant 0 : index
    %185 = vector.load %arg3[%c256_167, %c0_168] : memref<286x1xf32, #tpu.memory_space<vmem>>, vector<30x1xf32>
    %186 = vector.broadcast %185 : vector<30x1xf32> to vector<30x128xf32>
    %187 = arith.mulf %184, %186 : vector<30x128xf32>
    %188 = arith.truncf %187 : vector<30x128xf32> to vector<30x128xbf16>
    %c275_169 = arith.constant 275 : index
    %c0_170 = arith.constant 0 : index
    %189 = vector.load %arg15[%c275_169, %c0_170] : memref<324x128xbf16, #tpu.memory_space<vmem>>, vector<30x128xbf16>
    tpu.vector_store %arg15[%c275_169, %c0_170], %188 {strides = array<i32>} : memref<324x128xbf16, #tpu.memory_space<vmem>>, vector<30x128xbf16>,
    %c0_171 = arith.constant 0 : index
    %c0_172 = arith.constant 0 : index
    %190 = vector.load %arg15[%c0_171, %c0_172] : memref<324x128xbf16, #tpu.memory_space<vmem>>, vector<128x128xbf16>
    %c0_173 = arith.constant 0 : index
    %c0_174 = arith.constant 0 : index
    %c0_175 = arith.constant 0 : index
    %191 = vector.load %arg9[%c0_173, %c0_174, %c0_175] : memref<9x128x128xbf16, #tpu.memory_space<vmem>>, vector<1x128x128xbf16>
    %192 = vector.shape_cast %191 : vector<1x128x128xbf16> to vector<128x128xbf16>
    %cst_176 = arith.constant dense<0.000000e+00> : vector<128x128xf32>
    %193 = tpu.matmul %190, %192, %cst_176 {dimension_numbers = #tpu.dot_dimension_numbers<[1], [0], [0], [1], [0, 0, 1, 1], [], []>} : vector<128x128xbf16>, vector<128x128xbf16>, vector<128x128xf32> -> vector<128x128xf32>
    %c1_177 = arith.constant 1 : index
    %c0_178 = arith.constant 0 : index
    %194 = vector.load %arg15[%c1_177, %c0_178] : memref<324x128xbf16, #tpu.memory_space<vmem>>, vector<128x128xbf16>
    %c1_179 = arith.constant 1 : index
    %c0_180 = arith.constant 0 : index
    %c0_181 = arith.constant 0 : index
    %195 = vector.load %arg9[%c1_179, %c0_180, %c0_181] : memref<9x128x128xbf16, #tpu.memory_space<vmem>>, vector<1x128x128xbf16>
    %196 = vector.shape_cast %195 : vector<1x128x128xbf16> to vector<128x128xbf16>
    %cst_182 = arith.constant dense<0.000000e+00> : vector<128x128xf32>
    %197 = tpu.matmul %194, %196, %cst_182 {dimension_numbers = #tpu.dot_dimension_numbers<[1], [0], [0], [1], [0, 0, 1, 1], [], []>} : vector<128x128xbf16>, vector<128x128xbf16>, vector<128x128xf32> -> vector<128x128xf32>
    %198 = arith.addf %193, %197 : vector<128x128xf32>
    %c2_183 = arith.constant 2 : index
    %c0_184 = arith.constant 0 : index
    %199 = vector.load %arg15[%c2_183, %c0_184] : memref<324x128xbf16, #tpu.memory_space<vmem>>, vector<128x128xbf16>
    %c2_185 = arith.constant 2 : index
    %c0_186 = arith.constant 0 : index
    %c0_187 = arith.constant 0 : index
    %200 = vector.load %arg9[%c2_185, %c0_186, %c0_187] : memref<9x128x128xbf16, #tpu.memory_space<vmem>>, vector<1x128x128xbf16>
    %201 = vector.shape_cast %200 : vector<1x128x128xbf16> to vector<128x128xbf16>
    %cst_188 = arith.constant dense<0.000000e+00> : vector<128x128xf32>
    %202 = tpu.matmul %199, %201, %cst_188 {dimension_numbers = #tpu.dot_dimension_numbers<[1], [0], [0], [1], [0, 0, 1, 1], [], []>} : vector<128x128xbf16>, vector<128x128xbf16>, vector<128x128xf32> -> vector<128x128xf32>
    %203 = arith.addf %198, %202 : vector<128x128xf32>
    %c18_189 = arith.constant 18 : index
    %c0_190 = arith.constant 0 : index
    %204 = vector.load %arg15[%c18_189, %c0_190] : memref<324x128xbf16, #tpu.memory_space<vmem>>, vector<128x128xbf16>
    %c3_191 = arith.constant 3 : index
    %c0_192 = arith.constant 0 : index
    %c0_193 = arith.constant 0 : index
    %205 = vector.load %arg9[%c3_191, %c0_192, %c0_193] : memref<9x128x128xbf16, #tpu.memory_space<vmem>>, vector<1x128x128xbf16>
    %206 = vector.shape_cast %205 : vector<1x128x128xbf16> to vector<128x128xbf16>
    %cst_194 = arith.constant dense<0.000000e+00> : vector<128x128xf32>
    %207 = tpu.matmul %204, %206, %cst_194 {dimension_numbers = #tpu.dot_dimension_numbers<[1], [0], [0], [1], [0, 0, 1, 1], [], []>} : vector<128x128xbf16>, vector<128x128xbf16>, vector<128x128xf32> -> vector<128x128xf32>
    %208 = arith.addf %203, %207 : vector<128x128xf32>
    %c19_195 = arith.constant 19 : index
    %c0_196 = arith.constant 0 : index
    %209 = vector.load %arg15[%c19_195, %c0_196] : memref<324x128xbf16, #tpu.memory_space<vmem>>, vector<128x128xbf16>
    %c4_197 = arith.constant 4 : index
    %c0_198 = arith.constant 0 : index
    %c0_199 = arith.constant 0 : index
    %210 = vector.load %arg9[%c4_197, %c0_198, %c0_199] : memref<9x128x128xbf16, #tpu.memory_space<vmem>>, vector<1x128x128xbf16>
    %211 = vector.shape_cast %210 : vector<1x128x128xbf16> to vector<128x128xbf16>
    %cst_200 = arith.constant dense<0.000000e+00> : vector<128x128xf32>
    %212 = tpu.matmul %209, %211, %cst_200 {dimension_numbers = #tpu.dot_dimension_numbers<[1], [0], [0], [1], [0, 0, 1, 1], [], []>} : vector<128x128xbf16>, vector<128x128xbf16>, vector<128x128xf32> -> vector<128x128xf32>
    %213 = arith.addf %208, %212 : vector<128x128xf32>
    %c20_201 = arith.constant 20 : index
    %c0_202 = arith.constant 0 : index
    %214 = vector.load %arg15[%c20_201, %c0_202] : memref<324x128xbf16, #tpu.memory_space<vmem>>, vector<128x128xbf16>
    %c5_203 = arith.constant 5 : index
    %c0_204 = arith.constant 0 : index
    %c0_205 = arith.constant 0 : index
    %215 = vector.load %arg9[%c5_203, %c0_204, %c0_205] : memref<9x128x128xbf16, #tpu.memory_space<vmem>>, vector<1x128x128xbf16>
    %216 = vector.shape_cast %215 : vector<1x128x128xbf16> to vector<128x128xbf16>
    %cst_206 = arith.constant dense<0.000000e+00> : vector<128x128xf32>
    %217 = tpu.matmul %214, %216, %cst_206 {dimension_numbers = #tpu.dot_dimension_numbers<[1], [0], [0], [1], [0, 0, 1, 1], [], []>} : vector<128x128xbf16>, vector<128x128xbf16>, vector<128x128xf32> -> vector<128x128xf32>
    %218 = arith.addf %213, %217 : vector<128x128xf32>
    %c36_207 = arith.constant 36 : index
    %c0_208 = arith.constant 0 : index
    %219 = vector.load %arg15[%c36_207, %c0_208] : memref<324x128xbf16, #tpu.memory_space<vmem>>, vector<128x128xbf16>
    %c6_209 = arith.constant 6 : index
    %c0_210 = arith.constant 0 : index
    %c0_211 = arith.constant 0 : index
    %220 = vector.load %arg9[%c6_209, %c0_210, %c0_211] : memref<9x128x128xbf16, #tpu.memory_space<vmem>>, vector<1x128x128xbf16>
    %221 = vector.shape_cast %220 : vector<1x128x128xbf16> to vector<128x128xbf16>
    %cst_212 = arith.constant dense<0.000000e+00> : vector<128x128xf32>
    %222 = tpu.matmul %219, %221, %cst_212 {dimension_numbers = #tpu.dot_dimension_numbers<[1], [0], [0], [1], [0, 0, 1, 1], [], []>} : vector<128x128xbf16>, vector<128x128xbf16>, vector<128x128xf32> -> vector<128x128xf32>
    %223 = arith.addf %218, %222 : vector<128x128xf32>
    %c37_213 = arith.constant 37 : index
    %c0_214 = arith.constant 0 : index
    %224 = vector.load %arg15[%c37_213, %c0_214] : memref<324x128xbf16, #tpu.memory_space<vmem>>, vector<128x128xbf16>
    %c7_215 = arith.constant 7 : index
    %c0_216 = arith.constant 0 : index
    %c0_217 = arith.constant 0 : index
    %225 = vector.load %arg9[%c7_215, %c0_216, %c0_217] : memref<9x128x128xbf16, #tpu.memory_space<vmem>>, vector<1x128x128xbf16>
    %226 = vector.shape_cast %225 : vector<1x128x128xbf16> to vector<128x128xbf16>
    %cst_218 = arith.constant dense<0.000000e+00> : vector<128x128xf32>
    %227 = tpu.matmul %224, %226, %cst_218 {dimension_numbers = #tpu.dot_dimension_numbers<[1], [0], [0], [1], [0, 0, 1, 1], [], []>} : vector<128x128xbf16>, vector<128x128xbf16>, vector<128x128xf32> -> vector<128x128xf32>
    %228 = arith.addf %223, %227 : vector<128x128xf32>
    %c38_219 = arith.constant 38 : index
    %c0_220 = arith.constant 0 : index
    %229 = vector.load %arg15[%c38_219, %c0_220] : memref<324x128xbf16, #tpu.memory_space<vmem>>, vector<128x128xbf16>
    %c8_221 = arith.constant 8 : index
    %c0_222 = arith.constant 0 : index
    %c0_223 = arith.constant 0 : index
    %230 = vector.load %arg9[%c8_221, %c0_222, %c0_223] : memref<9x128x128xbf16, #tpu.memory_space<vmem>>, vector<1x128x128xbf16>
    %231 = vector.shape_cast %230 : vector<1x128x128xbf16> to vector<128x128xbf16>
    %cst_224 = arith.constant dense<0.000000e+00> : vector<128x128xf32>
    %232 = tpu.matmul %229, %231, %cst_224 {dimension_numbers = #tpu.dot_dimension_numbers<[1], [0], [0], [1], [0, 0, 1, 1], [], []>} : vector<128x128xbf16>, vector<128x128xbf16>, vector<128x128xf32> -> vector<128x128xf32>
    %233 = arith.addf %228, %232 : vector<128x128xf32>
    %c0_225 = arith.constant 0 : index
    %c0_226 = arith.constant 0 : index
    %234 = vector.load %arg10[%c0_225, %c0_226] : memref<1x128xf32, #tpu.memory_space<vmem>>, vector<1x128xf32>
    %235 = vector.broadcast %234 : vector<1x128xf32> to vector<128x128xf32>
    %236 = arith.addf %233, %235 : vector<128x128xf32>
    %c19_227 = arith.constant 19 : index
    %c0_228 = arith.constant 0 : index
    %237 = vector.load %arg14[%c19_227, %c0_228] : memref<324x128xbf16, #tpu.memory_space<vmem>>, vector<128x128xbf16>
    %c0_229 = arith.constant 0 : index
    %c0_230 = arith.constant 0 : index
    %238 = vector.load %arg11[%c0_229, %c0_230] : memref<128x128xbf16, #tpu.memory_space<vmem>>, vector<128x128xbf16>
    %cst_231 = arith.constant dense<0.000000e+00> : vector<128x128xf32>
    %239 = tpu.matmul %237, %238, %cst_231 {dimension_numbers = #tpu.dot_dimension_numbers<[1], [0], [0], [1], [0, 0, 1, 1], [], []>} : vector<128x128xbf16>, vector<128x128xbf16>, vector<128x128xf32> -> vector<128x128xf32>
    %240 = arith.addf %236, %239 : vector<128x128xf32>
    %c0_232 = arith.constant 0 : index
    %c0_233 = arith.constant 0 : index
    %241 = vector.load %arg12[%c0_232, %c0_233] : memref<1x128xf32, #tpu.memory_space<vmem>>, vector<1x128xf32>
    %242 = vector.broadcast %241 : vector<1x128xf32> to vector<128x128xf32>
    %243 = arith.addf %240, %242 : vector<128x128xf32>
    %c0_234 = arith.constant 0 : index
    %c0_235 = arith.constant 0 : index
    %c0_236 = arith.constant 0 : index
    %244 = vector.load %arg13[%c0_234, %c0_235, %c0_236] : memref<1x286x128xf32, #tpu.memory_space<vmem>>, vector<1x128x128xf32>
    %245 = vector.shape_cast %244 : vector<1x128x128xf32> to vector<128x128xf32>
    %246 = vector.shape_cast %243 : vector<128x128xf32> to vector<1x128x128xf32>
    tpu.vector_store %arg13[%c0_234, %c0_235, %c0_236], %246 {strides = array<i32>} : memref<1x286x128xf32, #tpu.memory_space<vmem>>, vector<1x128x128xf32>,
    %c128_237 = arith.constant 128 : index
    %c0_238 = arith.constant 0 : index
    %247 = vector.load %arg15[%c128_237, %c0_238] : memref<324x128xbf16, #tpu.memory_space<vmem>>, vector<128x128xbf16>
    %c0_239 = arith.constant 0 : index
    %c0_240 = arith.constant 0 : index
    %c0_241 = arith.constant 0 : index
    %248 = vector.load %arg9[%c0_239, %c0_240, %c0_241] : memref<9x128x128xbf16, #tpu.memory_space<vmem>>, vector<1x128x128xbf16>
    %249 = vector.shape_cast %248 : vector<1x128x128xbf16> to vector<128x128xbf16>
    %cst_242 = arith.constant dense<0.000000e+00> : vector<128x128xf32>
    %250 = tpu.matmul %247, %249, %cst_242 {dimension_numbers = #tpu.dot_dimension_numbers<[1], [0], [0], [1], [0, 0, 1, 1], [], []>} : vector<128x128xbf16>, vector<128x128xbf16>, vector<128x128xf32> -> vector<128x128xf32>
    %c129_243 = arith.constant 129 : index
    %c0_244 = arith.constant 0 : index
    %251 = vector.load %arg15[%c129_243, %c0_244] : memref<324x128xbf16, #tpu.memory_space<vmem>>, vector<128x128xbf16>
    %c1_245 = arith.constant 1 : index
    %c0_246 = arith.constant 0 : index
    %c0_247 = arith.constant 0 : index
    %252 = vector.load %arg9[%c1_245, %c0_246, %c0_247] : memref<9x128x128xbf16, #tpu.memory_space<vmem>>, vector<1x128x128xbf16>
    %253 = vector.shape_cast %252 : vector<1x128x128xbf16> to vector<128x128xbf16>
    %cst_248 = arith.constant dense<0.000000e+00> : vector<128x128xf32>
    %254 = tpu.matmul %251, %253, %cst_248 {dimension_numbers = #tpu.dot_dimension_numbers<[1], [0], [0], [1], [0, 0, 1, 1], [], []>} : vector<128x128xbf16>, vector<128x128xbf16>, vector<128x128xf32> -> vector<128x128xf32>
    %255 = arith.addf %250, %254 : vector<128x128xf32>
    %c130_249 = arith.constant 130 : index
    %c0_250 = arith.constant 0 : index
    %256 = vector.load %arg15[%c130_249, %c0_250] : memref<324x128xbf16, #tpu.memory_space<vmem>>, vector<128x128xbf16>
    %c2_251 = arith.constant 2 : index
    %c0_252 = arith.constant 0 : index
    %c0_253 = arith.constant 0 : index
    %257 = vector.load %arg9[%c2_251, %c0_252, %c0_253] : memref<9x128x128xbf16, #tpu.memory_space<vmem>>, vector<1x128x128xbf16>
    %258 = vector.shape_cast %257 : vector<1x128x128xbf16> to vector<128x128xbf16>
    %cst_254 = arith.constant dense<0.000000e+00> : vector<128x128xf32>
    %259 = tpu.matmul %256, %258, %cst_254 {dimension_numbers = #tpu.dot_dimension_numbers<[1], [0], [0], [1], [0, 0, 1, 1], [], []>} : vector<128x128xbf16>, vector<128x128xbf16>, vector<128x128xf32> -> vector<128x128xf32>
    %260 = arith.addf %255, %259 : vector<128x128xf32>
    %c146_255 = arith.constant 146 : index
    %c0_256 = arith.constant 0 : index
    %261 = vector.load %arg15[%c146_255, %c0_256] : memref<324x128xbf16, #tpu.memory_space<vmem>>, vector<128x128xbf16>
    %c3_257 = arith.constant 3 : index
    %c0_258 = arith.constant 0 : index
    %c0_259 = arith.constant 0 : index
    %262 = vector.load %arg9[%c3_257, %c0_258, %c0_259] : memref<9x128x128xbf16, #tpu.memory_space<vmem>>, vector<1x128x128xbf16>
    %263 = vector.shape_cast %262 : vector<1x128x128xbf16> to vector<128x128xbf16>
    %cst_260 = arith.constant dense<0.000000e+00> : vector<128x128xf32>
    %264 = tpu.matmul %261, %263, %cst_260 {dimension_numbers = #tpu.dot_dimension_numbers<[1], [0], [0], [1], [0, 0, 1, 1], [], []>} : vector<128x128xbf16>, vector<128x128xbf16>, vector<128x128xf32> -> vector<128x128xf32>
    %265 = arith.addf %260, %264 : vector<128x128xf32>
    %c147_261 = arith.constant 147 : index
    %c0_262 = arith.constant 0 : index
    %266 = vector.load %arg15[%c147_261, %c0_262] : memref<324x128xbf16, #tpu.memory_space<vmem>>, vector<128x128xbf16>
    %c4_263 = arith.constant 4 : index
    %c0_264 = arith.constant 0 : index
    %c0_265 = arith.constant 0 : index
    %267 = vector.load %arg9[%c4_263, %c0_264, %c0_265] : memref<9x128x128xbf16, #tpu.memory_space<vmem>>, vector<1x128x128xbf16>
    %268 = vector.shape_cast %267 : vector<1x128x128xbf16> to vector<128x128xbf16>
    %cst_266 = arith.constant dense<0.000000e+00> : vector<128x128xf32>
    %269 = tpu.matmul %266, %268, %cst_266 {dimension_numbers = #tpu.dot_dimension_numbers<[1], [0], [0], [1], [0, 0, 1, 1], [], []>} : vector<128x128xbf16>, vector<128x128xbf16>, vector<128x128xf32> -> vector<128x128xf32>
    %270 = arith.addf %265, %269 : vector<128x128xf32>
    %c148_267 = arith.constant 148 : index
    %c0_268 = arith.constant 0 : index
    %271 = vector.load %arg15[%c148_267, %c0_268] : memref<324x128xbf16, #tpu.memory_space<vmem>>, vector<128x128xbf16>
    %c5_269 = arith.constant 5 : index
    %c0_270 = arith.constant 0 : index
    %c0_271 = arith.constant 0 : index
    %272 = vector.load %arg9[%c5_269, %c0_270, %c0_271] : memref<9x128x128xbf16, #tpu.memory_space<vmem>>, vector<1x128x128xbf16>
    %273 = vector.shape_cast %272 : vector<1x128x128xbf16> to vector<128x128xbf16>
    %cst_272 = arith.constant dense<0.000000e+00> : vector<128x128xf32>
    %274 = tpu.matmul %271, %273, %cst_272 {dimension_numbers = #tpu.dot_dimension_numbers<[1], [0], [0], [1], [0, 0, 1, 1], [], []>} : vector<128x128xbf16>, vector<128x128xbf16>, vector<128x128xf32> -> vector<128x128xf32>
    %275 = arith.addf %270, %274 : vector<128x128xf32>
    %c164_273 = arith.constant 164 : index
    %c0_274 = arith.constant 0 : index
    %276 = vector.load %arg15[%c164_273, %c0_274] : memref<324x128xbf16, #tpu.memory_space<vmem>>, vector<128x128xbf16>
    %c6_275 = arith.constant 6 : index
    %c0_276 = arith.constant 0 : index
    %c0_277 = arith.constant 0 : index
    %277 = vector.load %arg9[%c6_275, %c0_276, %c0_277] : memref<9x128x128xbf16, #tpu.memory_space<vmem>>, vector<1x128x128xbf16>
    %278 = vector.shape_cast %277 : vector<1x128x128xbf16> to vector<128x128xbf16>
    %cst_278 = arith.constant dense<0.000000e+00> : vector<128x128xf32>
    %279 = tpu.matmul %276, %278, %cst_278 {dimension_numbers = #tpu.dot_dimension_numbers<[1], [0], [0], [1], [0, 0, 1, 1], [], []>} : vector<128x128xbf16>, vector<128x128xbf16>, vector<128x128xf32> -> vector<128x128xf32>
    %280 = arith.addf %275, %279 : vector<128x128xf32>
    %c165_279 = arith.constant 165 : index
    %c0_280 = arith.constant 0 : index
    %281 = vector.load %arg15[%c165_279, %c0_280] : memref<324x128xbf16, #tpu.memory_space<vmem>>, vector<128x128xbf16>
    %c7_281 = arith.constant 7 : index
    %c0_282 = arith.constant 0 : index
    %c0_283 = arith.constant 0 : index
    %282 = vector.load %arg9[%c7_281, %c0_282, %c0_283] : memref<9x128x128xbf16, #tpu.memory_space<vmem>>, vector<1x128x128xbf16>
    %283 = vector.shape_cast %282 : vector<1x128x128xbf16> to vector<128x128xbf16>
    %cst_284 = arith.constant dense<0.000000e+00> : vector<128x128xf32>
    %284 = tpu.matmul %281, %283, %cst_284 {dimension_numbers = #tpu.dot_dimension_numbers<[1], [0], [0], [1], [0, 0, 1, 1], [], []>} : vector<128x128xbf16>, vector<128x128xbf16>, vector<128x128xf32> -> vector<128x128xf32>
    %285 = arith.addf %280, %284 : vector<128x128xf32>
    %c166_285 = arith.constant 166 : index
    %c0_286 = arith.constant 0 : index
    %286 = vector.load %arg15[%c166_285, %c0_286] : memref<324x128xbf16, #tpu.memory_space<vmem>>, vector<128x128xbf16>
    %c8_287 = arith.constant 8 : index
    %c0_288 = arith.constant 0 : index
    %c0_289 = arith.constant 0 : index
    %287 = vector.load %arg9[%c8_287, %c0_288, %c0_289] : memref<9x128x128xbf16, #tpu.memory_space<vmem>>, vector<1x128x128xbf16>
    %288 = vector.shape_cast %287 : vector<1x128x128xbf16> to vector<128x128xbf16>
    %cst_290 = arith.constant dense<0.000000e+00> : vector<128x128xf32>
    %289 = tpu.matmul %286, %288, %cst_290 {dimension_numbers = #tpu.dot_dimension_numbers<[1], [0], [0], [1], [0, 0, 1, 1], [], []>} : vector<128x128xbf16>, vector<128x128xbf16>, vector<128x128xf32> -> vector<128x128xf32>
    %290 = arith.addf %285, %289 : vector<128x128xf32>
    %c0_291 = arith.constant 0 : index
    %c0_292 = arith.constant 0 : index
    %291 = vector.load %arg10[%c0_291, %c0_292] : memref<1x128xf32, #tpu.memory_space<vmem>>, vector<1x128xf32>
    %292 = vector.broadcast %291 : vector<1x128xf32> to vector<128x128xf32>
    %293 = arith.addf %290, %292 : vector<128x128xf32>
    %c147_293 = arith.constant 147 : index
    %c0_294 = arith.constant 0 : index
    %294 = vector.load %arg14[%c147_293, %c0_294] : memref<324x128xbf16, #tpu.memory_space<vmem>>, vector<128x128xbf16>
    %c0_295 = arith.constant 0 : index
    %c0_296 = arith.constant 0 : index
    %295 = vector.load %arg11[%c0_295, %c0_296] : memref<128x128xbf16, #tpu.memory_space<vmem>>, vector<128x128xbf16>
    %cst_297 = arith.constant dense<0.000000e+00> : vector<128x128xf32>
    %296 = tpu.matmul %294, %295, %cst_297 {dimension_numbers = #tpu.dot_dimension_numbers<[1], [0], [0], [1], [0, 0, 1, 1], [], []>} : vector<128x128xbf16>, vector<128x128xbf16>, vector<128x128xf32> -> vector<128x128xf32>
    %297 = arith.addf %293, %296 : vector<128x128xf32>
    %c0_298 = arith.constant 0 : index
    %c0_299 = arith.constant 0 : index
    %298 = vector.load %arg12[%c0_298, %c0_299] : memref<1x128xf32, #tpu.memory_space<vmem>>, vector<1x128xf32>
    %299 = vector.broadcast %298 : vector<1x128xf32> to vector<128x128xf32>
    %300 = arith.addf %297, %299 : vector<128x128xf32>
    %c0_300 = arith.constant 0 : index
    %c128_301 = arith.constant 128 : index
    %c0_302 = arith.constant 0 : index
    %301 = vector.load %arg13[%c0_300, %c128_301, %c0_302] : memref<1x286x128xf32, #tpu.memory_space<vmem>>, vector<1x128x128xf32>
    %302 = vector.shape_cast %301 : vector<1x128x128xf32> to vector<128x128xf32>
    %303 = vector.shape_cast %300 : vector<128x128xf32> to vector<1x128x128xf32>
    tpu.vector_store %arg13[%c0_300, %c128_301, %c0_302], %303 {strides = array<i32>} : memref<1x286x128xf32, #tpu.memory_space<vmem>>, vector<1x128x128xf32>,
    %c256_303 = arith.constant 256 : index
    %c0_304 = arith.constant 0 : index
    %304 = vector.load %arg15[%c256_303, %c0_304] : memref<324x128xbf16, #tpu.memory_space<vmem>>, vector<30x128xbf16>
    %c0_305 = arith.constant 0 : index
    %c0_306 = arith.constant 0 : index
    %c0_307 = arith.constant 0 : index
    %305 = vector.load %arg9[%c0_305, %c0_306, %c0_307] : memref<9x128x128xbf16, #tpu.memory_space<vmem>>, vector<1x128x128xbf16>
    %306 = vector.shape_cast %305 : vector<1x128x128xbf16> to vector<128x128xbf16>
    %cst_308 = arith.constant dense<0.000000e+00> : vector<30x128xf32>
    %307 = tpu.matmul %304, %306, %cst_308 {dimension_numbers = #tpu.dot_dimension_numbers<[1], [0], [0], [1], [0, 0, 1, 1], [], []>} : vector<30x128xbf16>, vector<128x128xbf16>, vector<30x128xf32> -> vector<30x128xf32>
    %c257_309 = arith.constant 257 : index
    %c0_310 = arith.constant 0 : index
    %308 = vector.load %arg15[%c257_309, %c0_310] : memref<324x128xbf16, #tpu.memory_space<vmem>>, vector<30x128xbf16>
    %c1_311 = arith.constant 1 : index
    %c0_312 = arith.constant 0 : index
    %c0_313 = arith.constant 0 : index
    %309 = vector.load %arg9[%c1_311, %c0_312, %c0_313] : memref<9x128x128xbf16, #tpu.memory_space<vmem>>, vector<1x128x128xbf16>
    %310 = vector.shape_cast %309 : vector<1x128x128xbf16> to vector<128x128xbf16>
    %cst_314 = arith.constant dense<0.000000e+00> : vector<30x128xf32>
    %311 = tpu.matmul %308, %310, %cst_314 {dimension_numbers = #tpu.dot_dimension_numbers<[1], [0], [0], [1], [0, 0, 1, 1], [], []>} : vector<30x128xbf16>, vector<128x128xbf16>, vector<30x128xf32> -> vector<30x128xf32>
    %312 = arith.addf %307, %311 : vector<30x128xf32>
    %c258_315 = arith.constant 258 : index
    %c0_316 = arith.constant 0 : index
    %313 = vector.load %arg15[%c258_315, %c0_316] : memref<324x128xbf16, #tpu.memory_space<vmem>>, vector<30x128xbf16>
    %c2_317 = arith.constant 2 : index
    %c0_318 = arith.constant 0 : index
    %c0_319 = arith.constant 0 : index
    %314 = vector.load %arg9[%c2_317, %c0_318, %c0_319] : memref<9x128x128xbf16, #tpu.memory_space<vmem>>, vector<1x128x128xbf16>
    %315 = vector.shape_cast %314 : vector<1x128x128xbf16> to vector<128x128xbf16>
    %cst_320 = arith.constant dense<0.000000e+00> : vector<30x128xf32>
    %316 = tpu.matmul %313, %315, %cst_320 {dimension_numbers = #tpu.dot_dimension_numbers<[1], [0], [0], [1], [0, 0, 1, 1], [], []>} : vector<30x128xbf16>, vector<128x128xbf16>, vector<30x128xf32> -> vector<30x128xf32>
    %317 = arith.addf %312, %316 : vector<30x128xf32>
    %c274_321 = arith.constant 274 : index
    %c0_322 = arith.constant 0 : index
    %318 = vector.load %arg15[%c274_321, %c0_322] : memref<324x128xbf16, #tpu.memory_space<vmem>>, vector<30x128xbf16>
    %c3_323 = arith.constant 3 : index
    %c0_324 = arith.constant 0 : index
    %c0_325 = arith.constant 0 : index
    %319 = vector.load %arg9[%c3_323, %c0_324, %c0_325] : memref<9x128x128xbf16, #tpu.memory_space<vmem>>, vector<1x128x128xbf16>
    %320 = vector.shape_cast %319 : vector<1x128x128xbf16> to vector<128x128xbf16>
    %cst_326 = arith.constant dense<0.000000e+00> : vector<30x128xf32>
    %321 = tpu.matmul %318, %320, %cst_326 {dimension_numbers = #tpu.dot_dimension_numbers<[1], [0], [0], [1], [0, 0, 1, 1], [], []>} : vector<30x128xbf16>, vector<128x128xbf16>, vector<30x128xf32> -> vector<30x128xf32>
    %322 = arith.addf %317, %321 : vector<30x128xf32>
    %c275_327 = arith.constant 275 : index
    %c0_328 = arith.constant 0 : index
    %323 = vector.load %arg15[%c275_327, %c0_328] : memref<324x128xbf16, #tpu.memory_space<vmem>>, vector<30x128xbf16>
    %c4_329 = arith.constant 4 : index
    %c0_330 = arith.constant 0 : index
    %c0_331 = arith.constant 0 : index
    %324 = vector.load %arg9[%c4_329, %c0_330, %c0_331] : memref<9x128x128xbf16, #tpu.memory_space<vmem>>, vector<1x128x128xbf16>
    %325 = vector.shape_cast %324 : vector<1x128x128xbf16> to vector<128x128xbf16>
    %cst_332 = arith.constant dense<0.000000e+00> : vector<30x128xf32>
    %326 = tpu.matmul %323, %325, %cst_332 {dimension_numbers = #tpu.dot_dimension_numbers<[1], [0], [0], [1], [0, 0, 1, 1], [], []>} : vector<30x128xbf16>, vector<128x128xbf16>, vector<30x128xf32> -> vector<30x128xf32>
    %327 = arith.addf %322, %326 : vector<30x128xf32>
    %c276_333 = arith.constant 276 : index
    %c0_334 = arith.constant 0 : index
    %328 = vector.load %arg15[%c276_333, %c0_334] : memref<324x128xbf16, #tpu.memory_space<vmem>>, vector<30x128xbf16>
    %c5_335 = arith.constant 5 : index
    %c0_336 = arith.constant 0 : index
    %c0_337 = arith.constant 0 : index
    %329 = vector.load %arg9[%c5_335, %c0_336, %c0_337] : memref<9x128x128xbf16, #tpu.memory_space<vmem>>, vector<1x128x128xbf16>
    %330 = vector.shape_cast %329 : vector<1x128x128xbf16> to vector<128x128xbf16>
    %cst_338 = arith.constant dense<0.000000e+00> : vector<30x128xf32>
    %331 = tpu.matmul %328, %330, %cst_338 {dimension_numbers = #tpu.dot_dimension_numbers<[1], [0], [0], [1], [0, 0, 1, 1], [], []>} : vector<30x128xbf16>, vector<128x128xbf16>, vector<30x128xf32> -> vector<30x128xf32>
    %332 = arith.addf %327, %331 : vector<30x128xf32>
    %c292_339 = arith.constant 292 : index
    %c0_340 = arith.constant 0 : index
    %333 = vector.load %arg15[%c292_339, %c0_340] : memref<324x128xbf16, #tpu.memory_space<vmem>>, vector<30x128xbf16>
    %c6_341 = arith.constant 6 : index
    %c0_342 = arith.constant 0 : index
    %c0_343 = arith.constant 0 : index
    %334 = vector.load %arg9[%c6_341, %c0_342, %c0_343] : memref<9x128x128xbf16, #tpu.memory_space<vmem>>, vector<1x128x128xbf16>
    %335 = vector.shape_cast %334 : vector<1x128x128xbf16> to vector<128x128xbf16>
    %cst_344 = arith.constant dense<0.000000e+00> : vector<30x128xf32>
    %336 = tpu.matmul %333, %335, %cst_344 {dimension_numbers = #tpu.dot_dimension_numbers<[1], [0], [0], [1], [0, 0, 1, 1], [], []>} : vector<30x128xbf16>, vector<128x128xbf16>, vector<30x128xf32> -> vector<30x128xf32>
    %337 = arith.addf %332, %336 : vector<30x128xf32>
    %c293_345 = arith.constant 293 : index
    %c0_346 = arith.constant 0 : index
    %338 = vector.load %arg15[%c293_345, %c0_346] : memref<324x128xbf16, #tpu.memory_space<vmem>>, vector<30x128xbf16>
    %c7_347 = arith.constant 7 : index
    %c0_348 = arith.constant 0 : index
    %c0_349 = arith.constant 0 : index
    %339 = vector.load %arg9[%c7_347, %c0_348, %c0_349] : memref<9x128x128xbf16, #tpu.memory_space<vmem>>, vector<1x128x128xbf16>
    %340 = vector.shape_cast %339 : vector<1x128x128xbf16> to vector<128x128xbf16>
    %cst_350 = arith.constant dense<0.000000e+00> : vector<30x128xf32>
    %341 = tpu.matmul %338, %340, %cst_350 {dimension_numbers = #tpu.dot_dimension_numbers<[1], [0], [0], [1], [0, 0, 1, 1], [], []>} : vector<30x128xbf16>, vector<128x128xbf16>, vector<30x128xf32> -> vector<30x128xf32>
    %342 = arith.addf %337, %341 : vector<30x128xf32>
    %c294_351 = arith.constant 294 : index
    %c0_352 = arith.constant 0 : index
    %343 = vector.load %arg15[%c294_351, %c0_352] : memref<324x128xbf16, #tpu.memory_space<vmem>>, vector<30x128xbf16>
    %c8_353 = arith.constant 8 : index
    %c0_354 = arith.constant 0 : index
    %c0_355 = arith.constant 0 : index
    %344 = vector.load %arg9[%c8_353, %c0_354, %c0_355] : memref<9x128x128xbf16, #tpu.memory_space<vmem>>, vector<1x128x128xbf16>
    %345 = vector.shape_cast %344 : vector<1x128x128xbf16> to vector<128x128xbf16>
    %cst_356 = arith.constant dense<0.000000e+00> : vector<30x128xf32>
    %346 = tpu.matmul %343, %345, %cst_356 {dimension_numbers = #tpu.dot_dimension_numbers<[1], [0], [0], [1], [0, 0, 1, 1], [], []>} : vector<30x128xbf16>, vector<128x128xbf16>, vector<30x128xf32> -> vector<30x128xf32>
    %347 = arith.addf %342, %346 : vector<30x128xf32>
    %c0_357 = arith.constant 0 : index
    %c0_358 = arith.constant 0 : index
    %348 = vector.load %arg10[%c0_357, %c0_358] : memref<1x128xf32, #tpu.memory_space<vmem>>, vector<1x128xf32>
    %349 = vector.broadcast %348 : vector<1x128xf32> to vector<30x128xf32>
    %350 = arith.addf %347, %349 : vector<30x128xf32>
    %c275_359 = arith.constant 275 : index
    %c0_360 = arith.constant 0 : index
    %351 = vector.load %arg14[%c275_359, %c0_360] : memref<324x128xbf16, #tpu.memory_space<vmem>>, vector<30x128xbf16>
    %c0_361 = arith.constant 0 : index
    %c0_362 = arith.constant 0 : index
    %352 = vector.load %arg11[%c0_361, %c0_362] : memref<128x128xbf16, #tpu.memory_space<vmem>>, vector<128x128xbf16>
    %cst_363 = arith.constant dense<0.000000e+00> : vector<30x128xf32>
    %353 = tpu.matmul %351, %352, %cst_363 {dimension_numbers = #tpu.dot_dimension_numbers<[1], [0], [0], [1], [0, 0, 1, 1], [], []>} : vector<30x128xbf16>, vector<128x128xbf16>, vector<30x128xf32> -> vector<30x128xf32>
    %354 = arith.addf %350, %353 : vector<30x128xf32>
    %c0_364 = arith.constant 0 : index
    %c0_365 = arith.constant 0 : index
    %355 = vector.load %arg12[%c0_364, %c0_365] : memref<1x128xf32, #tpu.memory_space<vmem>>, vector<1x128xf32>
    %356 = vector.broadcast %355 : vector<1x128xf32> to vector<30x128xf32>
    %357 = arith.addf %354, %356 : vector<30x128xf32>
    %c0_366 = arith.constant 0 : index
    %c256_367 = arith.constant 256 : index
    %c0_368 = arith.constant 0 : index
    %358 = vector.load %arg13[%c0_366, %c256_367, %c0_368] : memref<1x286x128xf32, #tpu.memory_space<vmem>>, vector<1x30x128xf32>
    %359 = vector.shape_cast %358 : vector<1x30x128xf32> to vector<30x128xf32>
    %360 = vector.shape_cast %357 : vector<30x128xf32> to vector<1x30x128xf32>
    tpu.vector_store %arg13[%c0_366, %c256_367, %c0_368], %360 {strides = array<i32>} : memref<1x286x128xf32, #tpu.memory_space<vmem>>, vector<1x30x128xf32>,
    return
  }
  func.func @transform_0(%arg0: i32) -> (i32, i32, i32) {
    %c0_i32 = arith.constant 0 : i32
    %c0_i32_0 = arith.constant 0 : i32
    %c0_i32_1 = arith.constant 0 : i32
    return %arg0, %c0_i32, %c0_i32_0 : i32, i32, i32
  }
  func.func @transform_1(%arg0: i32) -> (i32, i32) {
    %c0_i32 = arith.constant 0 : i32
    %c0_i32_0 = arith.constant 0 : i32
    %c0_i32_1 = arith.constant 0 : i32
    return %c0_i32, %c0_i32_0 : i32, i32
  }
  func.func @transform_2(%arg0: i32) -> (i32, i32) {
    %c0_i32 = arith.constant 0 : i32
    %c0_i32_0 = arith.constant 0 : i32
    %c0_i32_1 = arith.constant 0 : i32
    return %c0_i32, %c0_i32_0 : i32, i32
  }
  func.func @transform_3(%arg0: i32) -> (i32, i32) {
    %c0_i32 = arith.constant 0 : i32
    %c0_i32_0 = arith.constant 0 : i32
    %c0_i32_1 = arith.constant 0 : i32
    return %c0_i32, %c0_i32_0 : i32, i32
  }
  func.func @transform_4(%arg0: i32) -> (i32, i32) {
    %c0_i32 = arith.constant 0 : i32
    %c0_i32_0 = arith.constant 0 : i32
    %c0_i32_1 = arith.constant 0 : i32
    return %c0_i32, %c0_i32_0 : i32, i32
  }
  func.func @transform_5(%arg0: i32) -> (i32, i32, i32) {
    %c0_i32 = arith.constant 0 : i32
    %c0_i32_0 = arith.constant 0 : i32
    %c0_i32_1 = arith.constant 0 : i32
    %c0_i32_2 = arith.constant 0 : i32
    return %c0_i32, %c0_i32_0, %c0_i32_1 : i32, i32, i32
  }
  func.func @transform_6(%arg0: i32) -> (i32, i32) {
    %c0_i32 = arith.constant 0 : i32
    %c0_i32_0 = arith.constant 0 : i32
    %c0_i32_1 = arith.constant 0 : i32
    return %c0_i32, %c0_i32_0 : i32, i32
  }
  func.func @transform_7(%arg0: i32) -> (i32, i32) {
    %c0_i32 = arith.constant 0 : i32
    %c0_i32_0 = arith.constant 0 : i32
    %c0_i32_1 = arith.constant 0 : i32
    return %c0_i32, %c0_i32_0 : i32, i32
  }
  func.func @transform_8(%arg0: i32) -> (i32, i32, i32) {
    %c0_i32 = arith.constant 0 : i32
    %c0_i32_0 = arith.constant 0 : i32
    %c0_i32_1 = arith.constant 0 : i32
    %c0_i32_2 = arith.constant 0 : i32
    return %c0_i32, %c0_i32_0, %c0_i32_1 : i32, i32, i32
  }
  func.func @transform_9(%arg0: i32) -> (i32, i32) {
    %c0_i32 = arith.constant 0 : i32
    %c0_i32_0 = arith.constant 0 : i32
    %c0_i32_1 = arith.constant 0 : i32
    return %c0_i32, %c0_i32_0 : i32, i32
  }
  func.func @transform_10(%arg0: i32) -> (i32, i32) {
    %c0_i32 = arith.constant 0 : i32
    %c0_i32_0 = arith.constant 0 : i32
    %c0_i32_1 = arith.constant 0 : i32
    return %c0_i32, %c0_i32_0 : i32, i32
  }
  func.func @transform_11(%arg0: i32) -> (i32, i32) {
    %c0_i32 = arith.constant 0 : i32
    %c0_i32_0 = arith.constant 0 : i32
    %c0_i32_1 = arith.constant 0 : i32
    return %c0_i32, %c0_i32_0 : i32, i32
  }
  func.func @transform_12(%arg0: i32) -> (i32, i32, i32) {
    %c0_i32 = arith.constant 0 : i32
    %c0_i32_0 = arith.constant 0 : i32
    %c0_i32_1 = arith.constant 0 : i32
    return %arg0, %c0_i32, %c0_i32_0 : i32, i32, i32
  }
}

</mosaic_0001>

<bundles_post_ra>
// kernel: tpu_custom_call.1
= control target key start
LH: loop header
LB: loop body
LE: loop exit
PB: predicated region body
PF: predicated region fallthrough
CT: control target
= control target key end

     0   :  { %s15568_s21 = smov 0   ;;  %s20332_s0 = inlined_call_operand.vmem [shape: bf16[2,324,128], index: 0, kind: input, shape index: {}]   ;;  %s20333_s1 = inlined_call_operand.vmem [shape: f32[324,1], index: 1, kind: input, shape index: {}]   ;;  %s20334_s2 = inlined_call_operand.vmem [shape: f32[286,1], index: 2, kind: input, shape index: {}]   ;;  %s20335_s3 = inlined_call_operand.vmem [shape: f32[1,128], index: 3, kind: input, shape index: {}]   ;;  %s20336_s4 = inlined_call_operand.vmem [shape: f32[1,128], index: 4, kind: input, shape index: {}]   ;;  %s20337_s5 = inlined_call_operand.vmem [shape: bf16[9,128,128], index: 5, kind: input, shape index: {}]   ;;  %s20338_s6 = inlined_call_operand.vmem [shape: f32[1,128], index: 6, kind: input, shape index: {}]   ;;  %s20339_s7 = inlined_call_operand.vmem [shape: f32[1,128], index: 7, kind: input, shape index: {}]   ;;  %s20340_s8 = inlined_call_operand.vmem [shape: bf16[9,128,128], index: 8, kind: input, shape index: {}]   ;;  %s20341_s9 = inlined_call_operand.vmem [shape: f32[1,128], index: 9, kind: input, shape index: {}]   ;;  %s20342_s10 = inlined_call_operand.vmem [shape: bf16[128,128], index: 10, kind: input, shape index: {}]   ;;  %s20343_s11 = inlined_call_operand.vmem [shape: f32[1,128], index: 11, kind: input, shape index: {}]   ;;  %s20344_s12 = inlined_call_operand.vmem [shape: f32[2,286,128], index: 12, kind: output, shape index: {}]  }
   0x1 LB: > { %s11558_s22 = sadd.s32 4294967295, %s15500_s21   ;;  %p11562_p0 = scmp.ge.s32.totalorder %s15500_s21, 1  ;;  %s15500_s21 = sphi %s15568_s21, %s22_s21  }
   0x2   : > { %p362_p1 = scmp.lt.s32.totalorder %s15500_s21, 3 }
   0x4   : > { %p363_p2 = pnand %p11562_p0, %p362_p1 }
   0x6   : > { %366 = sbr.rel (%p363_p2) target bundleno = 1661 (0x67d), region = 68 }
   0xb   : > { %v632_v0 = vld [vmem:[%s20333_s1 + $0x20] sm:$0xff]  ;;  %v630_v1 = vld [vmem:[%s20333_s1 + $0x10] sm:$0xff]  ;;  %v15502_v3 = vmov 0   ;;  %v633_v4 = vld [vmem:[%s20333_s1 + $0x28] sm:$0xff]  ;;  %p404_p3 = scmp.lt.s32.totalorder %s11558_s22, 1  ;;  %vm1406_vm0 = vcmask 1046528  }
   0xc   : > { %v628_v2 = vld [vmem:[%s20333_s1] sm:$0xff]  ;;  %15450 = vset.pattern.permute.xlu2 %v15502_v3  ;;  %997 = vst [vmem:[#allocation3] sm:$0xf] %v15502_v3  ;;  %15449 = vset.pattern.permute.xlu1 %v15502_v3  ;;  %v631_v5 = vld [vmem:[%s20333_s1 + $0x18] sm:$0xff]  ;;  %v629_v6 = vld [vmem:[%s20333_s1 + $0x8] sm:$0xff]  ;;  %vm2004_vm2 = vcmask 1045504  }
   0xd   : > { %998 = vst [vmem:[#allocation3 + $0x4] sm:$0xf] %v15502_v3  ;;  %15448 = vset.pattern.permute.xlu0 %v15502_v3  ;;  %691 = vperm.xlu2 %15450, %v632_v0   ;;  %v636_v7 = vld [vmem:[%s20333_s1 + $0x40] sm:$0xff]  ;;  %v635_v8 = vld [vmem:[%s20333_s1 + $0x38] sm:$0xff]  ;;  %v634_v9 = vld [vmem:[%s20333_s1 + $0x30] sm:$0xff]  ;;  %s20413_s22 = smov (!%p404_p3, %s11558_s22), 1 }
   0xe   : > { %1011 = vst [vmem:[#allocation3 + $0x9c] sm:$0xf] %v15502_v3  ;;  %681 = vperm.xlu1 %15449, %v630_v1   ;;  %671 = vperm.xlu0 %15448, %v628_v2   ;;  %v639_v10 = vld [vmem:[%s20333_s1 + $0x58] sm:$0xff]  ;;  %v638_v11 = vld [vmem:[%s20333_s1 + $0x50] sm:$0xff]  ;;  %v637_v12 = vld [vmem:[%s20333_s1 + $0x48] sm:$0xff]  ;;  %s15437_s25 = smul.u32 164, %s20413_s22 }
   0xf   : > { %1012 = vst [vmem:[#allocation3 + $0xa0] sm:$0x3] %v15502_v3  ;;  %v642_v13 = vld [vmem:[%s20333_s1 + $0x70] sm:$0xff]  ;;  %v641_v14 = vld [vmem:[%s20333_s1 + $0x68] sm:$0xff]  ;;  %v640_v15 = vld [vmem:[%s20333_s1 + $0x60] sm:$0xff]  ;;  %vm2602_vm4 = vcmask 1044480  }
  0x10   : > { %v645_v16 = vld [vmem:[%s20333_s1 + $0x88] sm:$0xff]  ;;  %v644_v17 = vld [vmem:[%s20333_s1 + $0x80] sm:$0xff]  ;;  %v643_v18 = vld [vmem:[%s20333_s1 + $0x78] sm:$0xff]  ;;  %s15697_s18 = scalar_lea.vmem %s20332_s0, %s15437_s25  ;;  %vm1106_vm1 = vsmask.f32 7424  ;;  %vm999_vm6 = vcmask 1041408  }
  0x11   : > { %v648_v19 = vld [vmem:[%s20333_s1 + $0xa0] sm:$0xff]  ;;  %v647_v20 = vld [vmem:[%s20333_s1 + $0x98] sm:$0xff]  ;;  %v646_v21 = vld [vmem:[%s20333_s1 + $0x90] sm:$0xff]  ;;  %vm1781_vm3 = vsmask.f32 6400  ;;  %vm3103_vm9 = vcmask 1043457  }
  0x12   : > { %v651_v22 = vld [vmem:[%s20333_s1 + $0xb8] sm:$0xff]  ;;  %v650_v23 = vld [vmem:[%s20333_s1 + $0xb0] sm:$0xff]  ;;  %v649_v24 = vld [vmem:[%s20333_s1 + $0xa8] sm:$0xff]  ;;  %vm2379_vm5 = vsmask.f32 5376  ;;  %vm1005_vm14 = vcmask 1043456  }
  0x13   : > { %v654_v25 = vld [vmem:[%s20333_s1 + $0xd0] sm:$0xff]  ;;  %v653_v26 = vld [vmem:[%s20333_s1 + $0xc8] sm:$0xff]  ;;  %v652_v27 = vld [vmem:[%s20333_s1 + $0xc0] sm:$0xff]  ;;  %vm1000_vm7 = vsmask.f32 1280  ;;  %s15438_s26 = smul.u32 288, %s20413_s22 }
  0x14   : > { %v14613_v28 = vld [vmem:[%s20337_s5 + $0x38] sm:$0xff]  ;;  %v14612_v29 = vld [vmem:[%s20337_s5 + $0x30] sm:$0xff]  ;;  %v657_v30 = vld [vmem:[%s20333_s1 + $0xe8] sm:$0xff]  ;;  %vm3104_vm10 = vsmask.f32 7942 }
  0x15   : > { %696 = vperm.xlu2 %15450, %v633_v4   ;;  %1336 = vmatpush.bf16.msra.mxu1 %v14613_v28  ;;  %v656_v31 = vld [vmem:[%s20333_s1 + $0xe0] sm:$0xff]  ;;  %v655_v32 = vld [vmem:[%s20333_s1 + $0xd8] sm:$0xff]  ;;  %v14611_v33 = vld [vmem:[%s20337_s5 + $0x28] sm:$0xff]  ;;  %vm2925_vm12 = vsmask.f32 5392  ;;  %s19269_s13 = scalar_lea.vmem %s20344_s12, %s15438_s26 }
  0x16   : > { %686 = vperm.xlu1 %15449, %v631_v5   ;;  %676 = vperm.xlu0 %15448, %v629_v6   ;;  %v14629_v34 = vld [vmem:[%s20337_s5 + $0xb8] sm:$0xff]  ;;  %v660_v37 = vld [vmem:[%s20333_s1 + $0x100] sm:$0xff]  ;;  %v658_v40 = vld [vmem:[%s20333_s1 + $0xf0] sm:$0xff]  ;;  %vm1006_vm15 = vsmask.f32 7938 }
  0x17   : > { %v14621_v35 = vld [vmem:[%s20337_s5 + $0x78] sm:$0xff]  ;;  %1480 = vmatpush.bf16.msra.mxu2 %v14629_v34  ;;  %v14610_v38 = vld [vmem:[%s20337_s5 + $0x20] sm:$0xff]  ;;  %v15370_v41 = vld [vmem:[%s15697_s18 + $0x10] sm:$0xff]  }
  0x18   : > { %v14644_v36 = vld [vmem:[%s20337_s5 + $0xf8] sm:$0xff]  ;;  %1231 = vmatpush.bf16.msra.mxu0 %v14621_v35  ;;  %v14628_v43 = vld [vmem:[%s20337_s5 + $0xb0] sm:$0xff]  ;;  %v15175_v44 = vunpack.c.l.bf16 %v15370_v41  ;;  %v15724_v47 = vld [vmem:[%s20335_s3] ss:$0 sm:$0xff]  ;;  %v15176_v48 = vunpack.c.h.bf16 %v15370_v41 }
  0x19   : > { %1337 = vmatpush.bf16.msra.mxu1 %v14612_v29  ;;  %v659_v39 = vld [vmem:[%s20333_s1 + $0xf8] sm:$0xff]  ;;  %1695 = vmatpush.bf16.msra.mxu3 %v14644_v36  ;;  %v14620_v45 = vld [vmem:[%s20337_s5 + $0x70] sm:$0xff]  ;;  %v14627_v49 = vld [vmem:[%s20337_s5 + $0xa8] sm:$0xff] }
  0x1a   : > { %v14609_v42 = vld [vmem:[%s20337_s5 + $0x18] sm:$0xff]  ;;  %v14643_v46 = vld [vmem:[%s20337_s5 + $0xf0] sm:$0xff]  ;;  %v14619_v50 = vld [vmem:[%s20337_s5 + $0x68] sm:$0xff]  ;;  %v505_v53 = vmul.f32 %v15724_v47, %v15175_v44  ;;  %v506_v58 = vmul.f32 %v15724_v47, %v15176_v48 }
  0x1b   : > { %1481 = vmatpush.bf16.msra.mxu2 %v14628_v43  ;;  %v14642_v51 = vld [vmem:[%s20337_s5 + $0xe8] sm:$0xff]  ;;  %v663_v52 = vld [vmem:[%s20333_s1 + $0x118] sm:$0xff]  ;;  %v14608_v54 = vld [vmem:[%s20337_s5 + $0x10] sm:$0xff] }
  0x1c   : > { %1232 = vmatpush.bf16.msra.mxu0 %v14620_v45  ;;  %v662_v55 = vld [vmem:[%s20333_s1 + $0x110] sm:$0xff]  ;;  %v661_v56 = vld [vmem:[%s20333_s1 + $0x108] sm:$0xff]  ;;  %v15751_v57 = vld [vmem:[%s20336_s4] ss:$0 sm:$0xff] }
  0x1d   : > { %711 = vperm.xlu2 %15450, %v636_v7   ;;  %1338 = vmatpush.bf16.msra.mxu1 %v14611_v33  ;;  %v14626_v59 = vld [vmem:[%s20337_s5 + $0xa0] sm:$0xff]  ;;  %v550_v60 = vadd.f32 %v15751_v57, %v505_v53  ;;  %v14607_v61 = vld [vmem:[%s20337_s5 + $0x8] sm:$0xff]  ;;  %v551_v0 = vadd.f32 %v15751_v57, %v506_v58  ;;  %v666_v4 = vld [vmem:[%s20333_s1 + $0x130] sm:$0xff] }
  0x1e   : > { %706 = vperm.xlu1 %15449, %v635_v8   ;;  %701 = vperm.xlu0 %15448, %v634_v9   ;;  %v14618_v63 = vld [vmem:[%s20337_s5 + $0x60] sm:$0xff]  ;;  %v14625_v5 = vld [vmem:[%s20337_s5 + $0x98] sm:$0xff]  ;;  %v665_v6 = vld [vmem:[%s20333_s1 + $0x128] sm:$0xff] }
  0x1f   : > { %1696 = vmatpush.bf16.msra.mxu3 %v14643_v46  ;;  %1482 = vmatpush.bf16.msra.mxu2 %v14627_v49  ;;  %v14641_v1 = vld [vmem:[%s20337_s5 + $0xe0] sm:$0xff]  ;;  %v591_v3 = vmax.f32 %v550_v60, 0.0  ;;  %v14617_v8 = vld [vmem:[%s20337_s5 + $0x58] sm:$0xff]  ;;  %v592_v9 = vmax.f32 %v551_v0, 0.0  ;;  %v2799_v35 = vld [vmem:[%s20334_s2 + $0x10] sm:$0xff] }
  0x20   : > { %1233 = vmatpush.bf16.msra.mxu0 %v14619_v50  ;;  %v14606_v2 = vld [vmem:[%s20337_s5] sm:$0xff]  ;;  %v2800_v34 = vld [vmem:[%s20334_s2 + $0x18] sm:$0xff]  ;;  %v2798_v36 = vld [vmem:[%s20334_s2 + $0x8] sm:$0xff] }
  0x21   : > { %1339 = vmatpush.bf16.msra.mxu1 %v14610_v38  ;;  %v664_v7 = vld [vmem:[%s20333_s1 + $0x120] sm:$0xff]  ;;  %v15371_v41 = vld [vmem:[%s15697_s18 + $0x18] sm:$0xff]   ;;  %v15373_v50 = vld [vmem:[%s15697_s18 + $0x28] sm:$0xff]  }
  0x22   : > { %v14637_v28 = vld [vmem:[%s20337_s5 + $0xc0] sm:$0xff]  ;;  %v14660_v43 = vld [vmem:[%s20337_s5 + $0x178] sm:$0xff]  ;;  %v15180_v46 = vunpack.c.h.bf16 %v15371_v41  ;;  %v15179_v48 = vunpack.c.l.bf16 %v15371_v41  ;;  %v2802_v58 = vld [vmem:[%s20334_s2 + $0x28] sm:$0xff] }
  0x23   : > { %1697 = vmatpush.bf16.msra.mxu3 %v14642_v51  ;;  %1483 = vmatpush.bf16.msra.mxu2 %v14626_v59  ;;  %v15372_v49 = vld [vmem:[%s15697_s18 + $0x20] sm:$0xff]   ;;  %vm16985_vm8 = vmand %vm999_vm6, %vm1000_vm7 }
  0x24   : > { %1234 = vmatpush.bf16.msra.mxu0 %v14618_v63  ;;  %v2801_v59 = vld [vmem:[%s20334_s2 + $0x20] sm:$0xff]  ;;  %v15183_v60 = vunpack.c.l.bf16 %v15372_v49  ;;  %v507_v63 = vmul.f32 %v15724_v47, %v15179_v48  ;;  %vm17111_vm11 = vmand %vm3103_vm9, %vm3104_vm10 }
  0x25   : > { %726 = vperm.xlu2 %15450, %v639_v10   ;;  %1340 = vmatpush.bf16.msra.mxu1 %v14609_v42  ;;  %v14640_v10 = vld [vmem:[%s20337_s5 + $0xd8] sm:$0xff]  ;;  %vm17158_vm13 = vmor %vm1000_vm7, %vm2925_vm12  ;;  %vm6285_vm7 = vcmask 1040384  }
  0x26   : > { %721 = vperm.xlu1 %15449, %v638_v11   ;;  %716 = vperm.xlu0 %15448, %v637_v12   ;;  %v14675_v42 = vld [vmem:[%s20337_s5 + $0x1b8] sm:$0xff]  ;;  %vm1007_vm6 = vmand %vm1005_vm14, %vm1006_vm15 }
  0x27   : > { %1698 = vmatpush.bf16.msra.mxu3 %v14641_v1  ;;  %1484 = vmatpush.bf16.msra.mxu2 %v14625_v5  ;;  %v15187_v5 = vunpack.c.l.bf16 %v15373_v50 }
  0x28   : > { %1235 = vmatpush.bf16.msra.mxu0 %v14617_v8 }
  0x29   : > { %1341 = vmatpush.bf16.msra.mxu1 %v14608_v54 }
  0x2b   : > { %1699 = vmatpush.bf16.msra.mxu3 %v14640_v10 }
  0x2d   : > { %741 = vperm.xlu2 %15450, %v642_v13   ;;  %1342 = vmatpush.bf16.msra.mxu1 %v14607_v61  ;;  %v14624_v13 = vld [vmem:[%s20337_s5 + $0x90] sm:$0xff]  ;;  %v15188_v61 = vunpack.c.h.bf16 %v15373_v50 }
  0x2e   : > { %736 = vperm.xlu1 %15449, %v641_v14   ;;  %731 = vperm.xlu0 %15448, %v640_v15   ;;  %v14616_v14 = vld [vmem:[%s20337_s5 + $0x50] sm:$0xff] }
  0x2f   : > { %1485 = vmatpush.bf16.msra.mxu2 %v14624_v13  ;;  %1236 = vmatpush.bf16.msra.mxu0 %v14616_v14  ;;  %v512_v8 = vmul.f32 %v15724_v47, %v15188_v61 }
  0x31   : > { %1343 = vmatpush.bf16.msra.mxu1 %v14606_v2 }
  0x35   : > { %756 = vperm.xlu2 %15450, %v645_v16   ;;  %v14639_v16 = vld [vmem:[%s20337_s5 + $0xd0] sm:$0xff]  ;;  %2078 = vmatpush.bf16.msrb.mxu1 %v14660_v43 }
  0x36   : > { %751 = vperm.xlu1 %15449, %v644_v17   ;;  %746 = vperm.xlu0 %15448, %v643_v18   ;;  %v2797_v18 = vld [vmem:[%s20334_s2] sm:$0xff] }
  0x37   : > { %1700 = vmatpush.bf16.msra.mxu3 %v14639_v16 }
  0x3d   : > { %771 = vperm.xlu2 %15450, %v648_v19   ;;  %v14623_v19 = vld [vmem:[%s20337_s5 + $0x88] sm:$0xff] }
  0x3e   : > { %766 = vperm.xlu1 %15449, %v647_v20   ;;  %761 = vperm.xlu0 %15448, %v646_v21   ;;  %v668_v20 = vld [vmem:[%s20333_s1 + $0x140] sm:$0xf]  ;;  %v667_v21 = vld [vmem:[%s20333_s1 + $0x138] sm:$0xff] }
  0x3f   : > { %1486 = vmatpush.bf16.msra.mxu2 %v14623_v19 }
  0x45   : > { %786 = vperm.xlu2 %15450, %v651_v22   ;;  %v14615_v22 = vld [vmem:[%s20337_s5 + $0x48] sm:$0xff] }
  0x46   : > { %781 = vperm.xlu1 %15449, %v650_v23   ;;  %776 = vperm.xlu0 %15448, %v649_v24   ;;  %v14638_v23 = vld [vmem:[%s20337_s5 + $0xc8] sm:$0xff] }
  0x47   : > { %v15369_v24 = vld [vmem:[%s15697_s18 + $0x8] sm:$0xff]   ;;  %1237 = vmatpush.bf16.msra.mxu0 %v14615_v22  ;;  %1701 = vmatpush.bf16.msra.mxu3 %v14638_v23  ;;  %v2805_v22 = vld [vmem:[%s20334_s2 + $0x40] sm:$0xff]  ;;  %v2804_v23 = vld [vmem:[%s20334_s2 + $0x38] sm:$0xff] }
  0x4b   : > { %1702 = vmatpush.bf16.msra.mxu3 %v14637_v28 }
  0x4d   : > { %801 = vperm.xlu2 %15450, %v654_v25   ;;  %v15166_v25 = vld [vmem:[%s15697_s18] sm:$0xff]  }
  0x4e   : > { %796 = vperm.xlu1 %15449, %v653_v26   ;;  %791 = vperm.xlu0 %15448, %v652_v27   ;;  %v14622_v26 = vld [vmem:[%s20337_s5 + $0x80] sm:$0xff]  ;;  %v15168_v33 = vunpack.c.h.bf16 %v15166_v25 }
  0x4f   : > { %v14614_v27 = vld [vmem:[%s20337_s5 + $0x40] sm:$0xff]  ;;  %1487 = vmatpush.bf16.msra.mxu2 %v14622_v26  ;;  %v557_v26 = vadd.f32 %v15751_v57, %v512_v8 }
  0x50   : > { %1238 = vmatpush.bf16.msra.mxu0 %v14614_v27 }
  0x51   : > { %v598_v43 = vmax.f32 %v557_v26, 0.0 }
  0x53   : > { %2293 = vmatpush.bf16.msrb.mxu2 %v14675_v42 }
  0x55   : > { %816 = vperm.xlu2 %15450, %v657_v30   ;;  %v15171_v30 = vunpack.c.l.bf16 %v15369_v24 }
  0x56   : > { %811 = vperm.xlu1 %15449, %v656_v31   ;;  %806 = vperm.xlu0 %15448, %v655_v32   ;;  %v15167_v31 = vunpack.c.l.bf16 %v15166_v25  ;;  %v15172_v32 = vunpack.c.h.bf16 %v15369_v24  ;;  %v15374_v24 = vld [vmem:[%s15697_s18 + $0x30] sm:$0xff]  }
  0x58   : > { %v501_v38 = vmul.f32 %v15724_v47, %v15167_v31 }
  0x5d   : > { %831 = vperm.xlu2 %15450, %v660_v37   ;;  %v503_v37 = vmul.f32 %v15724_v47, %v15171_v30 }
  0x5e   : > { %826 = vperm.xlu1 %15449, %v659_v39   ;;  %821 = vperm.xlu0 %15448, %v658_v40   ;;  %v504_v39 = vmul.f32 %v15724_v47, %v15172_v32  ;;  %v502_v40 = vmul.f32 %v15724_v47, %v15168_v33  ;;  %v14652_v33 = vld [vmem:[%s20337_s5 + $0x138] sm:$0xff] }
  0x5f   : > { %v548_v51 = vadd.f32 %v15751_v57, %v503_v37  ;;  %v15192_v37 = vunpack.c.h.bf16 %v15374_v24  ;;  %1918 = vmatpush.bf16.msrb.mxu0 %v14652_v33 }
  0x60   : > { %v549_v53 = vadd.f32 %v15751_v57, %v504_v39  ;;  %v547_v54 = vadd.f32 %v15751_v57, %v502_v40 }
  0x61   : > { %v589_v0 = vmax.f32 %v548_v51, 0.0 }
  0x62   : > { %v590_v2 = vmax.f32 %v549_v53, 0.0  ;;  %v2808_v53 = vld [vmem:[%s20334_s2 + $0x58] sm:$0xff] }
  0x65   : > { %846 = vperm.xlu2 %15450, %v663_v52   ;;  %v546_v52 = vadd.f32 %v15751_v57, %v501_v38  ;;  %v15191_v38 = vunpack.c.l.bf16 %v15374_v24 }
  0x66   : > { %841 = vperm.xlu1 %15449, %v662_v55   ;;  %836 = vperm.xlu0 %15448, %v661_v56   ;;  %v2803_v55 = vld [vmem:[%s20334_s2 + $0x30] sm:$0xff] }
  0x67   : > { %v692_v62 = vpop.permute.xlu2 %691  ;;  %v587_v1 = vmax.f32 %v546_v52, 0.0 }
  0x68   : > { %v878_v11 = vmul.f32 %v692_v62, %v591_v3  ;;  %v508_v62 = vmul.f32 %v15724_v47, %v15180_v46  ;;  %v588_v3 = vmax.f32 %v547_v54, 0.0  ;;  %v2807_v54 = vld [vmem:[%s20334_s2 + $0x50] sm:$0xff] }
  0x6d   : > { %861 = vperm.xlu2 %15450, %v666_v4   ;;  %v14683_v4 = vld [vmem:[%s20337_s5 + $0x1f8] sm:$0xff] }
  0x6e   : > { %856 = vperm.xlu1 %15449, %v665_v6   ;;  %851 = vperm.xlu0 %15448, %v664_v7   ;;  %v15184_v6 = vunpack.c.h.bf16 %v15372_v49  ;;  %v509_v7 = vmul.f32 %v15724_v47, %v15183_v60  ;;  %v2809_v49 = vld [vmem:[%s20334_s2 + $0x60] sm:$0xff] }
  0x6f   : > { %v697_v12 = vpop.permute.xlu2 %696  ;;  %2516 = vmatpush.bf16.msrb.mxu3 %v14683_v4 }
  0x70   : > { %v879_v15 = vmul.f32 %v697_v12, %v592_v9  ;;  %v552_v12 = vadd.f32 %v15751_v57, %v507_v63  ;;  %v510_v19 = vmul.f32 %v15724_v47, %v15184_v6  ;;  %v554_v25 = vadd.f32 %v15751_v57, %v509_v7  ;;  %v14682_v7 = vld [vmem:[%s20337_s5 + $0x1f0] sm:$0xff] }
  0x72   : > { %v15258_v17 = vpack.c.bf16 %v879_v15, %v878_v11  ;;  %v553_v11 = vadd.f32 %v15751_v57, %v508_v62  ;;  %v593_v30 = vmax.f32 %v552_v12, 0.0  ;;  %v15899_v32 = vadd.f32 %v15751_v57, %v510_v19 }
  0x73   : > { %v595_v42 = vmax.f32 %v554_v25, 0.0  ;;  %2517 = vmatpush.bf16.msrb.mxu3 %v14682_v7 }
  0x74   : > { %15389 = vst [vmem:[#allocation2 + $0x10] sm:$0xff] %v15258_v17   ;;  %v2806_v17 = vld [vmem:[%s20334_s2 + $0x48] sm:$0xff]  ;;  %v594_v28 = vmax.f32 %v553_v11, 0.0  ;;  %v596_v51 = vmax.f32 %v15899_v32, 0.0 }
  0x75   : > { %2815 = vperm.xlu2 %15450, %v2797_v18   ;;  %v511_v18 = vmul.f32 %v15724_v47, %v15187_v5 }
  0x76   : > { %871 = vperm.xlu1 %15449, %v668_v20   ;;  %866 = vperm.xlu0 %15448, %v667_v21  }
  0x77   : > { %v15827_v29 = vpop.permute.xlu2 %711  ;;  %v15896_v31 = vadd.f32 %v15751_v57, %v511_v18 }
  0x79   : > { %v597_v50 = vmax.f32 %v15896_v31, 0.0 }
  0x7d   : > { %2830 = vperm.xlu2 %15450, %v2800_v34   ;;  %v14674_v34 = vld [vmem:[%s20337_s5 + $0x1b0] sm:$0xff] }
  0x7e   : > { %2825 = vperm.xlu1 %15449, %v2799_v35   ;;  %2820 = vperm.xlu0 %15448, %v2798_v36   ;;  %v14659_v35 = vld [vmem:[%s20337_s5 + $0x170] sm:$0xff] }
  0x7f   : > { %v15858_v56 = vpop.permute.xlu2 %726  ;;  %v15910_v36 = vld [vmem:[#allocation2 + $0x10] sm:$0xff]  ;;  %2294 = vmatpush.bf16.msrb.mxu2 %v14674_v34  ;;  %2079 = vmatpush.bf16.msrb.mxu1 %v14659_v35  ;;  %v2810_v35 = vld [vmem:[%s20334_s2 + $0x68] sm:$0xff] }
  0x80   : > { %v682_v44 = vpop.permute.xlu1 %681  ;;  %v672_v45 = vpop.permute.xlu0 %671  ;;  %v885_v11 = vmul.f32 %v15858_v56, %v598_v43  ;;  %v2811_v34 = vld [vmem:[%s20334_s2 + $0x70] sm:$0xff] }
  0x81   : > { %v876_v13 = vmul.f32 %v682_v44, %v589_v0  ;;  %v874_v14 = vmul.f32 %v672_v45, %v587_v1  ;;  %v15914_v44 = vld [vmem:[%s15697_s18 + $0x38] sm:$0xff]   ;;  %v15917_v45 = vld [vmem:[%s15697_s18 + $0x40] sm:$0xff]   ;;  %v882_v1 = vmul.f32 %v15827_v29, %v595_v42 }
  0x82   : > { %v15195_v60 = vunpack.c.l.bf16 %v15914_v44  ;;  %v15196_v24 = vunpack.c.h.bf16 %v15914_v44 }
  0x84   : > { %v515_v25 = vmul.f32 %v15724_v47, %v15195_v60  ;;  %v516_v43 = vmul.f32 %v15724_v47, %v15196_v24 }
  0x85   : > { %2845 = vperm.xlu2 %15450, %v2803_v55   ;;  %v1623_v55 = vrot.slane %v15910_v36, 1 }
  0x86   : > { %2840 = vperm.xlu1 %15449, %v2802_v58   ;;  %2835 = vperm.xlu0 %15448, %v2801_v59   ;;  %v514_v58 = vmul.f32 %v15724_v47, %v15192_v37  ;;  %v513_v59 = vmul.f32 %v15724_v47, %v15191_v38  ;;  %v15377_v38 = vld [vmem:[%s15697_s18 + $0x48] sm:$0xff]  }
  0x87   : > { %v15891_v27 = vpop.permute.xlu2 %741 }
  0x88   : > { %v687_v9 = vpop.permute.xlu1 %686  ;;  %v677_v10 = vpop.permute.xlu0 %676 }
  0x89   : > { %v877_v15 = vmul.f32 %v687_v9, %v590_v2  ;;  %v875_v16 = vmul.f32 %v677_v10, %v588_v3  ;;  %v15200_v2 = vunpack.c.h.bf16 %v15917_v45 }
  0x8b   : > { %v15253_v20 = vpack.c.bf16 %v877_v15, %v876_v13  ;;  %v15880_v21 = vpack.c.bf16 %v875_v16, %v874_v14  ;;  %v559_v14 = vadd.f32 %v15751_v57, %v514_v58  ;;  %v558_v15 = vadd.f32 %v15751_v57, %v513_v59 }
  0x8c   : > { %v518_v37 = vmul.f32 %v15724_v47, %v15200_v2 }
  0x8d   : > { %15388 = vst [vmem:[#allocation2 + $0x8] sm:$0xff] %v15253_v20   ;;  %2860 = vperm.xlu2 %15450, %v2806_v17   ;;  %1344 = vmatmul.bf16.vlgmr.msra.gmra.mxu1 %v15880_v21  ;;  %v1110_v41 = vshll.u32 %v15880_v21, 16  ;;  %v1108_v8 = vshrl.u32 %v15880_v21, 16 }
  0x8e   : > { %15249 = vst [vmem:[#allocation2] sm:$0xff] %v15880_v21   ;;  %2855 = vperm.xlu1 %15449, %v2805_v22   ;;  %2850 = vperm.xlu0 %15448, %v2804_v23   ;;  %v15199_v21 = vunpack.c.l.bf16 %v15917_v45  ;;  %v15987_v45 = vld [vmem:[#allocation2 + $0x10] sm:$0xff] }
  0x8f   : > { %v1112_v61 = vrot.slane %v1110_v41, 1  ;;  %v15948_v12 = vpop.permute.xlu2 %756  ;;  %v599_v41 = vmax.f32 %v558_v15, 0.0  ;;  %v1123_v7 = vshll.u32 %v15987_v45, 16  ;;  %v1410_v24 = vrot.slane %v15987_v45, 1 }
  0x90   : > { %v707_v39 = vpop.permute.xlu1 %706  ;;  %v702_v40 = vpop.permute.xlu0 %701  ;;  %v517_v42 = vmul.f32 %v15724_v47, %v15199_v21 }
  0x91   : > { %v881_v46 = vmul.f32 %v707_v39, %v594_v28  ;;  %v880_v48 = vmul.f32 %v702_v40, %v593_v30  ;;  %v1113_v19 = vor.u32 %v1112_v61, %v1108_v8  ;;  %v2812_v30 = vld [vmem:[%s20334_s2 + $0x78] sm:$0xff]  ;;  %v15982_v39 = vld [vmem:[%s15697_s18 + $0x50] sm:$0xff]   ;;  %v600_v40 = vmax.f32 %v559_v14, 0.0 }
  0x92   : > { %v562_v2 = vadd.f32 %v15751_v57, %v517_v42  ;;  %v15208_v42 = vunpack.c.h.bf16 %v15982_v39 }
  0x93   : > { %v15263_v52 = vpack.c.bf16 %v881_v46, %v880_v48  ;;  %v14651_v46 = vld [vmem:[%s20337_s5 + $0x130] sm:$0xff]  ;;  %v14673_v48 = vld [vmem:[%s20337_s5 + $0x1a8] sm:$0xff] }
  0x94   : > { %v15934_v62 = vld [vmem:[#allocation2 + $0x8] sm:$0xff]  ;;  %1919 = vmatpush.bf16.msrb.mxu0 %v14651_v46  ;;  %2295 = vmatpush.bf16.msrb.mxu2 %v14673_v48 }
  0x95   : > { %v1545_v63 = vld [vmem:[#allocation2 + $0x8] sm:$0xe]  ;;  %v15936_v0 = vld [vmem:[#allocation2 + $0xc] sm:$0xf]  ;;  %15390 = vst [vmem:[#allocation2 + $0x18] sm:$0xff] %v15263_v52   ;;  %2875 = vperm.xlu2 %15450, %v2809_v49   ;;  %v1408_v29 = vrot.slane %v15934_v62, 1  ;;  %v560_v49 = vadd.f32 %v15751_v57, %v515_v25 }
  0x96   : > { %v15407_v3 = vld [vmem:[#allocation2] sm:$0xf0]  ;;  %v15408_v4 = vld [vmem:[#allocation2] sm:$0xe]  ;;  %v1596_v5 = vunpack.c.l.b16 %v1545_v63  ;;  %v1597_v6 = vunpack.c.l.b16 %v15936_v0  ;;  %2870 = vperm.xlu1 %15449, %v2808_v53   ;;  %2865 = vperm.xlu0 %15448, %v2807_v54   ;;  %v1115_v10 = vshll.u32 %v15934_v62, 16  ;;  %v14658_v52 = vld [vmem:[%s20337_s5 + $0x168] sm:$0xff]  ;;  %v563_v53 = vadd.f32 %v15751_v57, %v518_v37 }
  0x97   : > { %v15409_v9 = vor.u32 %v15408_v4, %v15407_v3  ;;  %v1983_v44 = vld [vmem:[#allocation2 + $0x8] sm:$0xc]  ;;  %v15207_v54 = vunpack.c.l.bf16 %v15982_v39  ;;  %v16001_v61 = vpop.permute.xlu2 %771  ;;  %v561_v3 = vadd.f32 %v15751_v57, %v516_v43  ;;  %2080 = vmatpush.bf16.msrb.mxu1 %v14658_v52  ;;  %v16006_v4 = vld [vmem:[%s15697_s18 + $0x58] sm:$0xff]   ;;  %v601_v8 = vmax.f32 %v560_v49, 0.0 }
  0x98   : > { %v15952_v13 = vpack.c.b16 %v1597_v6, %v1596_v5  ;;  %v722_v16 = vpop.permute.xlu1 %721  ;;  %v717_v17 = vpop.permute.xlu0 %716  ;;  %v15956_v20 = vrot.slane %v1115_v10, 1  ;;  %v2002_v60 = vunpack.c.l.b16 %v1983_v44  ;;  %v4899_v5 = vld [vmem:[%s20334_s2 + $0x90] sm:$0xff]  ;;  %v4898_v10 = vld [vmem:[%s20334_s2 + $0x88] sm:$0xff]  ;;  %v2006_v0 = vrot.slane %v15910_v36, 2 }
  0x99   : > { %v1407_v18 = vrot.slane %v15409_v9, 1  ;;  %v884_v56 = vmul.f32 %v722_v16, %v597_v50  ;;  %v883_v22 = vmul.f32 %v717_v17, %v596_v51  ;;  %v15204_v50 = vunpack.c.h.bf16 %v15377_v38  ;;  %v14681_v25 = vld [vmem:[%s20337_s5 + $0x1e8] sm:$0xff] }
  0x9a   : > { %v1622_v23 = vrot.slane %v15952_v13, 1  ;;  %v1118_v28 = vsel %vm1106_vm1, %v1113_v19, %v15956_v20  ;;  %v15203_v51 = vunpack.c.l.bf16 %v15377_v38  ;;  %v604_v17 = vmax.f32 %v563_v53, 0.0  ;;  %2518 = vmatpush.bf16.msrb.mxu3 %v14681_v25  ;;  %v4902_v44 = vld [vmem:[%s20334_s2 + $0xa8] sm:$0xff]  ;;  %v16100_v25 = vld [vmem:[%s15697_s18 + $0x70] sm:$0xff]  }
  0x9b   : > { %v1409_v26 = vsel %vm1406_vm0, %v1407_v18, %v1408_v29  ;;  %v15273_v31 = vpack.c.bf16 %v885_v11, %v884_v56  ;;  %v15268_v32 = vpack.c.bf16 %v883_v22, %v882_v1  ;;  %1239 = vmatmul.bf16.vlgmr.msra.gmra.mxu0 %v1118_v28  ;;  %v4897_v11 = vld [vmem:[%s20334_s2 + $0x80] sm:$0xff]  ;;  %v520_v15 = vmul.f32 %v15724_v47, %v15204_v50 }
  0x9c   : > { %1488 = vmatmul.bf16.vlgmr.msra.gmra.mxu2 %v1409_v26  ;;  %v1624_v33 = vsel %vm1406_vm0, %v1622_v23, %v1623_v55  ;;  %v16018_v14 = vld [vmem:[#allocation2 + $0x18] sm:$0xff]  ;;  %v519_v16 = vmul.f32 %v15724_v47, %v15203_v51  ;;  %v521_v18 = vmul.f32 %v15724_v47, %v15207_v54  ;;  %v1119_v19 = vshrl.u32 %v15934_v62, 16 }
  0x9d   : > { %1703 = vmatmul.bf16.vlgmr.msra.gmra.mxu3 %v1624_v33  ;;  %15392 = vst [vmem:[#allocation2 + $0x28] sm:$0xff] %v15273_v31   ;;  %2890 = vperm.xlu2 %15450, %v2812_v30   ;;  %v2003_v21 = vpack.c.b16 %v1597_v6, %v2002_v60  ;;  %v15212_v56 = vunpack.c.h.bf16 %v16006_v4  ;;  %v603_v22 = vmax.f32 %v562_v2, 0.0  ;;  %v602_v23 = vmax.f32 %v561_v3, 0.0  ;;  %v14650_v3 = vld [vmem:[%s20337_s5 + $0x128] sm:$0xff] }
  0x9e   : > { %1349 = vmatmul.bf16.gmra.mxu1 %v15934_v62  ;;  %15391 = vst [vmem:[#allocation2 + $0x20] sm:$0xff] %v15268_v32   ;;  %2885 = vperm.xlu1 %15449, %v2811_v34   ;;  %v1121_v26 = vor.u32 %v1119_v19, %v15956_v20  ;;  %v16032_v28 = vrot.slane %v1123_v7, 1  ;;  %v888_v6 = vmul.f32 %v15891_v27, %v601_v8  ;;  %v1625_v30 = vrot.slane %v16018_v14, 1 }
  0x9f   : > { %2880 = vperm.xlu0 %15448, %v2810_v35   ;;  %v565_v31 = vadd.f32 %v15751_v57, %v520_v15  ;;  %v564_v32 = vadd.f32 %v15751_v57, %v519_v16  ;;  %v891_v33 = vmul.f32 %v15948_v12, %v604_v17  ;;  %v2005_v37 = vrot.slane %v2003_v21, 2  ;;  %v16056_v49 = vpop.permute.xlu2 %786  ;;  %1920 = vmatpush.bf16.msrb.mxu0 %v14650_v3 }
  0xa0   : > { %v737_v58 = vpop.permute.xlu1 %736  ;;  %v732_v59 = vpop.permute.xlu0 %731  ;;  %v1791_v20 = vshrl.u32 %v15910_v36, 16  ;;  %v1794_v38 = vshll.u32 %v15910_v36, 16  ;;  %v15211_v27 = vunpack.c.l.bf16 %v16006_v4  ;;  %v1411_v43 = vsel %vm1406_vm0, %v1408_v29, %v1410_v24  ;;  %v4901_v29 = vld [vmem:[%s20334_s2 + $0xa0] sm:$0xff]  ;;  %v14656_v36 = vld [vmem:[%s20337_s5 + $0x158] sm:$0xff] }
  0xa1   : > { %v887_v63 = vmul.f32 %v737_v58, %v600_v40  ;;  %v886_v1 = vmul.f32 %v732_v59, %v599_v41  ;;  %v1126_v12 = vsel %vm1106_vm1, %v1121_v26, %v16032_v28  ;;  %v1783_v46 = vshrl.u32 %v15952_v13, 16  ;;  %v14672_v4 = vld [vmem:[%s20337_s5 + $0x1a0] sm:$0xff] }
  0xa2   : > { %v1786_v48 = vshll.u32 %v15952_v13, 16  ;;  %v1626_v62 = vsel %vm1406_vm0, %v1623_v55, %v1625_v30  ;;  %v4900_v13 = vld [vmem:[%s20334_s2 + $0x98] sm:$0xff]  ;;  %v524_v51 = vmul.f32 %v15724_v47, %v15212_v56  ;;  %v16073_v52 = vsel %vm2004_vm2, %v2005_v37, %v2006_v0  ;;  %2296 = vmatpush.bf16.msrb.mxu2 %v14672_v4  ;;  %v4905_v26 = vld [vmem:[%s20334_s2 + $0xc0] sm:$0xff] }
  0xa3   : > { %v15278_v9 = vpack.c.bf16 %v887_v63, %v886_v1  ;;  %v1793_v53 = vrot.slane %v1791_v20, 1  ;;  %v1796_v54 = vrot.slane %v1794_v38, 2  ;;  %v606_v55 = vmax.f32 %v565_v31, 0.0  ;;  %v16078_v63 = vld [vmem:[#allocation2 + $0x18] sm:$0xff]  ;;  %v15380_v1 = vld [vmem:[%s15697_s18 + $0x60] sm:$0xff]  }
  0xa4   : > { %v605_v58 = vmax.f32 %v564_v32, 0.0  ;;  %v523_v59 = vmul.f32 %v15724_v47, %v15211_v27  ;;  %v522_v60 = vmul.f32 %v15724_v47, %v15208_v42  ;;  %v566_v2 = vadd.f32 %v15751_v57, %v521_v18 }
  0xa5   : > { %15393 = vst [vmem:[#allocation2 + $0x30] sm:$0xff] %v15278_v9   ;;  %4925 = vperm.xlu2 %15450, %v4899_v5   ;;  %v14657_v5 = vld [vmem:[%s20337_s5 + $0x160] sm:$0xff]  ;;  %v1785_v7 = vrot.slane %v1783_v46, 1  ;;  %v1788_v8 = vrot.slane %v1786_v48, 2  ;;  %v569_v9 = vadd.f32 %v15751_v57, %v524_v51  ;;  %v15216_v16 = vunpack.c.h.bf16 %v15380_v1 }
  0xa6   : > { %4920 = vperm.xlu1 %15449, %v4898_v10   ;;  %v16093_v10 = vld [vmem:[%s15697_s18 + $0x68] sm:$0xff]   ;;  %v15215_v17 = vunpack.c.l.bf16 %v15380_v1  ;;  %v16095_v18 = vor.u32 %v1796_v54, %v1793_v53  ;;  %v568_v56 = vadd.f32 %v15751_v57, %v523_v59  ;;  %2081 = vmatpush.bf16.msrb.mxu1 %v14657_v5  ;;  %v1127_v37 = vshrl.u32 %v15987_v45, 16  ;;  %v16114_v20 = vld [vmem:[#allocation2 + $0x20] sm:$0xff]  ;;  %v4908_v5 = vld [vmem:[%s20334_s2 + $0xd8] sm:$0xff] }
  0xa7   : > { %4915 = vperm.xlu0 %15448, %v4897_v11   ;;  %v1789_v31 = vor.u32 %v1788_v8, %v1785_v7  ;;  %v15219_v32 = vunpack.c.l.bf16 %v16093_v10  ;;  %v610_v38 = vmax.f32 %v569_v9, 0.0  ;;  %v16122_v42 = vpop.permute.xlu2 %801  ;;  %v15224_v46 = vunpack.c.h.bf16 %v16100_v25  ;;  %v16137_v53 = vld [vmem:[%s15697_s18 + $0x80] sm:$0xff]  }
  0xa8   : > { %v752_v34 = vpop.permute.xlu1 %751  ;;  %v747_v35 = vpop.permute.xlu0 %746  ;;  %v1412_v48 = vrot.slane %v16078_v63, 1  ;;  %v15231_v7 = vunpack.c.l.bf16 %v16137_v53 }
  0xa9   : > { %v890_v40 = vmul.f32 %v752_v34, %v603_v22  ;;  %v889_v41 = vmul.f32 %v747_v35, %v602_v23  ;;  %v567_v22 = vadd.f32 %v15751_v57, %v522_v60  ;;  %v607_v23 = vmax.f32 %v566_v2, 0.0  ;;  %v4904_v34 = vld [vmem:[%s20334_s2 + $0xb8] sm:$0xff]  ;;  %v4903_v35 = vld [vmem:[%s20334_s2 + $0xb0] sm:$0xff] }
  0xaa   : > { %v16120_v27 = vsel %vm1781_vm3, %v1789_v31, %v16095_v18  ;;  %v897_v51 = vmul.f32 %v16056_v49, %v610_v38  ;;  %v15223_v60 = vunpack.c.l.bf16 %v16100_v25  ;;  %v15220_v2 = vunpack.c.h.bf16 %v16093_v10  ;;  %v4906_v10 = vld [vmem:[%s20334_s2 + $0xc8] sm:$0xff]  ;;  %v14649_v25 = vld [vmem:[%s20337_s5 + $0x120] sm:$0xff]  ;;  %2082 = vmatpush.bf16.msrb.mxu1 %v14656_v36 }
  0xab   : > { %v15288_v39 = vpack.c.bf16 %v891_v33, %v890_v40  ;;  %v15283_v50 = vpack.c.bf16 %v889_v41, %v888_v6  ;;  %1244 = vmatmul.bf16.gmra.mxu0 %v1126_v12  ;;  %v1131_v6 = vshll.u32 %v16078_v63, 16  ;;  %v526_v40 = vmul.f32 %v15724_v47, %v15216_v16 }
  0xac   : > { %1493 = vmatmul.bf16.gmra.mxu2 %v1411_v43  ;;  %v525_v41 = vmul.f32 %v15724_v47, %v15215_v17  ;;  %v609_v43 = vmax.f32 %v568_v56, 0.0  ;;  %v608_v12 = vmax.f32 %v567_v22, 0.0  ;;  %v530_v3 = vmul.f32 %v15724_v47, %v15224_v46  ;;  %v15383_v56 = vld [vmem:[%s15697_s18 + $0x78] sm:$0xff]   ;;  %1921 = vmatpush.bf16.msrb.mxu0 %v14649_v25  ;;  %v16200_v46 = vld [vmem:[#allocation2 + $0x28] sm:$0xff] }
  0xad   : > { %1708 = vmatmul.bf16.gmra.mxu3 %v1626_v62  ;;  %15395 = vst [vmem:[#allocation2 + $0x40] sm:$0xff] %v15288_v39   ;;  %4940 = vperm.xlu2 %15450, %v4902_v44   ;;  %v14680_v44 = vld [vmem:[%s20337_s5 + $0x1e0] sm:$0xff]  ;;  %v16129_v39 = vrot.slane %v1131_v6, 1  ;;  %v527_v62 = vmul.f32 %v15724_v47, %v15219_v32  ;;  %v1413_v49 = vsel %vm1406_vm0, %v1410_v24, %v1412_v48  ;;  %v4907_v24 = vld [vmem:[%s20334_s2 + $0xd0] sm:$0xff]  ;;  %v1800_v32 = vshrl.u32 %v16018_v14, 16 }
  0xae   : > { %1354 = vmatmul.bf16.gmra.mxu1 %v15987_v45  ;;  %15394 = vst [vmem:[#allocation2 + $0x38] sm:$0xff] %v15283_v50   ;;  %4935 = vperm.xlu1 %15449, %v4901_v29   ;;  %v894_v50 = vmul.f32 %v16001_v61, %v607_v23  ;;  %v1129_v29 = vor.u32 %v1127_v37, %v16032_v28  ;;  %v2008_v28 = vrot.slane %v16018_v14, 2  ;;  %v15228_v37 = vunpack.c.h.bf16 %v15383_v56 }
  0xaf   : > { %4930 = vperm.xlu0 %15448, %v4900_v13   ;;  %v1627_v13 = vrot.slane %v16114_v20, 1  ;;  %2519 = vmatpush.bf16.msrb.mxu3 %v14680_v44  ;;  %v570_v59 = vadd.f32 %v15751_v57, %v525_v41  ;;  %v575_v23 = vadd.f32 %v15751_v57, %v530_v3  ;;  %v817_v6 = vpop.permute.xlu2 %816  ;;  %v15227_v38 = vunpack.c.l.bf16 %v15383_v56 }
  0xb0   : > { %v767_v11 = vpop.permute.xlu1 %766  ;;  %v762_v15 = vpop.permute.xlu0 %761  ;;  %v1134_v4 = vsel %vm1106_vm1, %v1129_v29, %v16129_v39  ;;  %v16182_v22 = vsel %vm2004_vm2, %v2006_v0, %v2008_v28  ;;  %v533_v0 = vmul.f32 %v15724_v47, %v15231_v7  ;;  %v1135_v29 = vshrl.u32 %v16078_v63, 16 }
  0xb1   : > { %v893_v19 = vmul.f32 %v767_v11, %v606_v55  ;;  %v892_v21 = vmul.f32 %v762_v15, %v605_v58  ;;  %v571_v58 = vadd.f32 %v15751_v57, %v526_v40  ;;  %v1628_v45 = vsel %vm1406_vm0, %v1625_v30, %v1627_v13  ;;  %v16169_v15 = vld [vmem:[%s15697_s18 + $0x88] sm:$0xff]  }
  0xb2   : > { %v572_v11 = vadd.f32 %v15751_v57, %v527_v62  ;;  %v611_v17 = vmax.f32 %v570_v59, 0.0  ;;  %v529_v30 = vmul.f32 %v15724_v47, %v15223_v60  ;;  %v15236_v31 = vunpack.c.h.bf16 %v16169_v15  ;;  %v4911_v62 = vld [vmem:[%s20334_s2 + $0xf0] sm:$0xff]  ;;  %v4910_v60 = vld [vmem:[%s20334_s2 + $0xe8] sm:$0xff] }
  0xb3   : > { %v15293_v33 = vpack.c.bf16 %v893_v19, %v892_v21  ;;  %v612_v16 = vmax.f32 %v571_v58, 0.0  ;;  %v528_v19 = vmul.f32 %v15724_v47, %v15220_v2  ;;  %v16174_v21 = vld [vmem:[#allocation2 + $0x20] sm:$0xff]  ;;  %v1803_v40 = vshll.u32 %v16018_v14, 16 }
  0xb4   : > { %v536_v58 = vmul.f32 %v15724_v47, %v15236_v31  ;;  %v1137_v2 = vor.u32 %v1135_v29, %v16129_v39  ;;  %v532_v3 = vmul.f32 %v15724_v47, %v15228_v37  ;;  %v1414_v39 = vrot.slane %v16174_v21, 1 }
  0xb5   : > { %15396 = vst [vmem:[#allocation2 + $0x48] sm:$0xff] %v15293_v33   ;;  %4955 = vperm.xlu2 %15450, %v4905_v26   ;;  %v14671_v26 = vld [vmem:[%s20337_s5 + $0x198] sm:$0xff]  ;;  %v613_v33 = vmax.f32 %v572_v11, 0.0  ;;  %v573_v44 = vadd.f32 %v15751_v57, %v528_v19 }
  0xb6   : > { %4950 = vperm.xlu1 %15449, %v4904_v34   ;;  %2297 = vmatpush.bf16.msrb.mxu2 %v14671_v26  ;;  %v16243_v56 = vadd.f32 %v15751_v57, %v532_v3  ;;  %v1415_v31 = vsel %vm1406_vm0, %v1412_v48, %v1414_v39 }
  0xb7   : > { %4945 = vperm.xlu0 %15448, %v4903_v35   ;;  %v614_v7 = vmax.f32 %v573_v44, 0.0  ;;  %v2012_v44 = vrot.slane %v16200_v46, 2 }
  0xb8   : > { %v782_v54 = vpop.permute.xlu1 %781  ;;  %v777_v55 = vpop.permute.xlu0 %776 }
  0xb9   : > { %v896_v61 = vmul.f32 %v782_v54, %v609_v43  ;;  %v895_v1 = vmul.f32 %v777_v55, %v608_v12  ;;  %v574_v12 = vadd.f32 %v15751_v57, %v529_v30  ;;  %v1802_v54 = vrot.slane %v1800_v32, 1  ;;  %v16270_v32 = vld [vmem:[#allocation2 + $0x28] sm:$0xff] }
  0xba   : > { %v16208_v55 = vadd.f32 %v15751_v57, %v533_v0  ;;  %v16253_v0 = vadd.f32 %v15751_v57, %v536_v58  ;;  %v1147_v58 = vshll.u32 %v16270_v32, 16 }
  0xbb   : > { %v15303_v8 = vpack.c.bf16 %v897_v51, %v896_v61  ;;  %v15298_v9 = vpack.c.bf16 %v895_v1, %v894_v50  ;;  %1249 = vmatmul.bf16.gmra.mxu0 %v1134_v4  ;;  %v616_v50 = vmax.f32 %v575_v23, 0.0  ;;  %v1139_v51 = vshll.u32 %v16174_v21, 16  ;;  %v4909_v61 = vld [vmem:[%s20334_s2 + $0xe0] sm:$0xff] }
  0xbc   : > { %1498 = vmatmul.bf16.gmra.mxu2 %v1413_v49  ;;  %v1805_v1 = vrot.slane %v1803_v40, 2  ;;  %v531_v49 = vmul.f32 %v15724_v47, %v15227_v38  ;;  %v2010_v4 = vrot.slane %v16114_v20, 2  ;;  %v15232_v23 = vunpack.c.h.bf16 %v16137_v53  ;;  %v16286_v40 = vld [vmem:[%s20335_s3] ss:$0 sm:$0xff] }
  0xbd   : > { %1713 = vmatmul.bf16.gmra.mxu3 %v1628_v45  ;;  %15398 = vst [vmem:[#allocation2 + $0x58] sm:$0xff] %v15303_v8   ;;  %4970 = vperm.xlu2 %15450, %v4908_v5   ;;  %v615_v5 = vmax.f32 %v574_v12, 0.0  ;;  %v1629_v8 = vrot.slane %v16200_v46, 1  ;;  %v16227_v47 = vrot.slane %v1139_v51, 1  ;;  %v903_v11 = vmul.f32 %v817_v6, %v616_v50  ;;  %v16250_v6 = vpop.permute.xlu2 %831  ;;  %v15386_v12 = vld [vmem:[%s15697_s18 + $0x90] sm:$0xff]  }
  0xbe   : > { %1359 = vmatmul.bf16.gmra.mxu1 %v16078_v63  ;;  %15397 = vst [vmem:[#allocation2 + $0x50] sm:$0xff] %v15298_v9   ;;  %4965 = vperm.xlu1 %15449, %v4907_v24   ;;  %v14679_v9 = vld [vmem:[%s20337_s5 + $0x1d8] sm:$0xff]  ;;  %v1806_v45 = vor.u32 %v1805_v1, %v1802_v54  ;;  %v900_v24 = vmul.f32 %v16122_v42, %v613_v33  ;;  %v1809_v42 = vshrl.u32 %v16114_v20, 16  ;;  %v619_v37 = vmax.f32 %v16208_v55, 0.0 }
  0xbf   : > { %4960 = vperm.xlu0 %15448, %v4906_v10   ;;  %v16234_v10 = vsel %vm2004_vm2, %v2008_v28, %v2010_v4  ;;  %2520 = vmatpush.bf16.msrb.mxu3 %v14679_v9  ;;  %v16246_v14 = vadd.f32 %v15751_v57, %v531_v49  ;;  %v15235_v28 = vunpack.c.l.bf16 %v16169_v15  ;;  %v1142_v15 = vsel %vm1106_vm1, %v1137_v2, %v16227_v47  ;;  %v6204_v57 = vld [vmem:[%s20334_s2 + $0x108] sm:$0xff]  ;;  %v16273_v33 = vld [vmem:[%s15697_s18 + $0x98] sm:$0xff]  }
  0xc0   : > { %v797_v34 = vpop.permute.xlu1 %796  ;;  %v792_v35 = vpop.permute.xlu0 %791  ;;  %v1811_v26 = vrot.slane %v1809_v42, 1  ;;  %v1630_v53 = vsel %vm1406_vm0, %v1627_v13, %v1629_v8  ;;  %v4912_v13 = vld [vmem:[%s20334_s2 + $0xf8] sm:$0xff]  ;;  %v618_v38 = vmax.f32 %v16243_v56, 0.0  ;;  %v1818_v51 = vshrl.u32 %v16200_v46, 16  ;;  %v16329_v56 = vld [vmem:[%s20336_s4] ss:$0 sm:$0xff] }
  0xc1   : > { %v899_v41 = vmul.f32 %v797_v34, %v612_v16  ;;  %v898_v43 = vmul.f32 %v792_v35, %v611_v17  ;;  %v16238_v16 = vsel %vm1781_vm3, %v16095_v18, %v1806_v45  ;;  %v1812_v17 = vshll.u32 %v16114_v20, 16  ;;  %v6203_v34 = vld [vmem:[%s20334_s2 + $0x100] sm:$0xff]  ;;  %v16320_v42 = vld [vmem:[#allocation2 + $0x38] sm:$0xff]  ;;  %v14678_v20 = vld [vmem:[%s20337_s5 + $0x1d0] sm:$0xff] }
  0xc2   : > { %v617_v50 = vmax.f32 %v16246_v14, 0.0  ;;  %v15243_v54 = vunpack.c.l.bf16 %v16273_v33  ;;  %v16314_v1 = vsel %vm2004_vm2, %v2010_v4, %v2012_v44  ;;  %v1821_v2 = vshll.u32 %v16200_v46, 16  ;;  %v14654_v46 = vld [vmem:[%s20337_s5 + $0x148] sm:$0xff] }
  0xc3   : > { %v15308_v59 = vpack.c.bf16 %v899_v41, %v898_v43  ;;  %v1814_v36 = vrot.slane %v1812_v17, 2  ;;  %v535_v41 = vmul.f32 %v16286_v40, %v15235_v28  ;;  %v16289_v43 = vld [vmem:[#allocation2 + $0x30] sm:$0xff]  ;;  %v622_v3 = vmax.f32 %v16253_v0, 0.0  ;;  %2521 = vmatpush.bf16.msrb.mxu3 %v14678_v20  ;;  %v6206_v0 = vld [vmem:[%s20334_s2 + $0x118] sm:$0x3f] }
  0xc4   : > { %v15240_v49 = vunpack.c.h.bf16 %v15386_v12  ;;  %v1823_v4 = vrot.slane %v1821_v2, 2  ;;  %v2014_v17 = vrot.slane %v16289_v43, 2  ;;  %v15244_v20 = vunpack.c.h.bf16 %v16273_v33 }
  0xc5   : > { %15399 = vst [vmem:[#allocation2 + $0x60] sm:$0xff] %v15308_v59   ;;  %4985 = vperm.xlu2 %15450, %v4911_v62   ;;  %v1815_v35 = vor.u32 %v1814_v36, %v1811_v26  ;;  %v534_v62 = vmul.f32 %v16286_v40, %v15232_v23  ;;  %v14648_v59 = vld [vmem:[%s20337_s5 + $0x118] sm:$0xff]  ;;  %v580_v14 = vadd.f32 %v16329_v56, %v535_v41  ;;  %v16333_v23 = vrot.slane %v1147_v58, 1 }
  0xc6   : > { %4980 = vperm.xlu1 %15449, %v4910_v60   ;;  %v14670_v60 = vld [vmem:[%s20337_s5 + $0x190] sm:$0xff]  ;;  %1922 = vmatpush.bf16.msrb.mxu0 %v14648_v59  ;;  %v1827_v26 = vshrl.u32 %v16289_v43, 16  ;;  %v2016_v41 = vrot.slane %v16320_v42, 2  ;;  %v906_v58 = vmul.f32 %v16250_v6, %v619_v37 }
  0xc7   : > { %4975 = vperm.xlu0 %15448, %v4909_v61   ;;  %v16297_v29 = vsel %vm1781_vm3, %v1806_v45, %v1815_v35  ;;  %v14655_v61 = vld [vmem:[%s20337_s5 + $0x150] sm:$0xff]  ;;  %2298 = vmatpush.bf16.msrb.mxu2 %v14670_v60  ;;  %v579_v28 = vadd.f32 %v16329_v56, %v534_v62  ;;  %v455_v62 = vld [vmem:[%s15697_s18 + $0xa0] sm:$0x3]  ;;  %v1839_v60 = vshll.u32 %v16320_v42, 16 }
  0xc8   : > { %v812_v30 = vpop.permute.xlu1 %811  ;;  %v807_v19 = vpop.permute.xlu0 %806  ;;  %2083 = vmatpush.bf16.msrb.mxu1 %v14655_v61  ;;  %v16361_v59 = vsel %vm2004_vm2, %v2014_v17, %v2016_v41  ;;  %v496_v55 = vunpack.c.l.bf16 %v455_v62 }
  0xc9   : > { %v902_v25 = vmul.f32 %v812_v30, %v615_v5  ;;  %v901_v18 = vmul.f32 %v807_v19, %v614_v7  ;;  %v15239_v5 = vunpack.c.l.bf16 %v15386_v12  ;;  %v1820_v7 = vrot.slane %v1818_v51, 1 }
  0xca   : > { %v621_v12 = vmax.f32 %v580_v14, 0.0  ;;  %v1841_v6 = vrot.slane %v1839_v60, 2  ;;  %v541_v33 = vmul.f32 %v16286_v40, %v496_v55 }
  0xcb   : > { %v15318_v63 = vpack.c.bf16 %v903_v11, %v902_v25  ;;  %v15313_v48 = vpack.c.bf16 %v901_v18, %v900_v24  ;;  %1254 = vmatmul.bf16.gmra.mxu0 %v1142_v15  ;;  %v1416_v24 = vrot.slane %v16270_v32, 1  ;;  %v1143_v11 = vshrl.u32 %v16174_v21, 16 }
  0xcc   : > { %1503 = vmatmul.bf16.gmra.mxu2 %v1415_v31  ;;  %v1824_v25 = vor.u32 %v1823_v4, %v1820_v7  ;;  %v16336_v18 = vsel %vm2004_vm2, %v2012_v44, %v2014_v17  ;;  %v6205_v31 = vld [vmem:[%s20334_s2 + $0x110] sm:$0xff]  ;;  %v538_v15 = vmul.f32 %v16286_v40, %v15240_v49  ;;  %v620_v44 = vmax.f32 %v579_v28, 0.0  ;;  %2084 = vmatpush.bf16.msrb.mxu1 %v14654_v46 }
  0xcd   : > { %1718 = vmatmul.bf16.gmra.mxu3 %v1630_v53  ;;  %15401 = vst [vmem:[#allocation2 + $0x70] sm:$0xff] %v15318_v63   ;;  %6214 = vperm.xlu2 %15450, %v6204_v57   ;;  %v537_v53 = vmul.f32 %v16286_v40, %v15239_v5  ;;  %v1830_v57 = vshll.u32 %v16289_v43, 16  ;;  %v847_v63 = vpop.permute.xlu2 %846 }
  0xce   : > { %1364 = vmatmul.bf16.gmra.mxu1 %v16174_v21  ;;  %15400 = vst [vmem:[#allocation2 + $0x68] sm:$0xff] %v15313_v48   ;;  %6209 = vperm.xlu1 %15449, %v6203_v34   ;;  %v1631_v48 = vrot.slane %v16289_v43, 1  ;;  %v16349_v34 = vld [vmem:[#allocation2 + $0x40] sm:$0xff]  ;;  %v909_v61 = vmul.f32 %v847_v63, %v622_v3  ;;  %v583_v2 = vadd.f32 %v16329_v56, %v538_v15 }
  0xcf   : > { %4990 = vperm.xlu0 %15448, %v4912_v13   ;;  %v16352_v13 = vsel %vm1781_vm3, %v1815_v35, %v1824_v25  ;;  %v1832_v51 = vrot.slane %v1830_v57, 2  ;;  %v1836_v35 = vshrl.u32 %v16320_v42, 16  ;;  %v20347_v37 = vrot.slane %v16349_v34, 2 }
  0xd0   : > { %v827_v9 = vpop.permute.xlu1 %826  ;;  %v822_v45 = vpop.permute.xlu0 %821  ;;  %v1417_v3 = vsel %vm1406_vm0, %v1414_v39, %v1416_v24  ;;  %v1632_v21 = vsel %vm1406_vm0, %v1629_v8, %v1631_v48  ;;  %v14647_v39 = vld [vmem:[%s20337_s5 + $0x110] sm:$0xff]  ;;  %v1848_v15 = vshll.u32 %v16349_v34, 16 }
  0xd1   : > { %v905_v30 = vmul.f32 %v827_v9, %v618_v38  ;;  %v904_v19 = vmul.f32 %v822_v45, %v617_v50  ;;  %v1829_v38 = vrot.slane %v1827_v26, 1  ;;  %v1145_v50 = vor.u32 %v1143_v11, %v16227_v47  ;;  %1923 = vmatpush.bf16.msrb.mxu0 %v14647_v39 }
  0xd2   : > { %v582_v47 = vadd.f32 %v16329_v56, %v537_v53  ;;  %v1838_v9 = vrot.slane %v1836_v35, 1  ;;  %v1845_v26 = vshrl.u32 %v16349_v34, 16  ;;  %v1850_v63 = vrot.slane %v1848_v15, 2 }
  0xd3   : > { %v15323_v36 = vpack.c.bf16 %v905_v30, %v904_v19  ;;  %v1833_v49 = vor.u32 %v1832_v51, %v1829_v38  ;;  %v1150_v17 = vsel %vm1106_vm1, %v1145_v50, %v16333_v23  ;;  %v16382_v19 = vsel %vm2004_vm2, %v2016_v41, %v20347_v37  ;;  %v14677_v50 = vld [vmem:[%s20337_s5 + $0x1c8] sm:$0xff] }
  0xd4   : > { %v1842_v30 = vor.u32 %v1841_v6, %v1838_v9  ;;  %v623_v53 = vmax.f32 %v582_v47, 0.0  ;;  %v1847_v57 = vrot.slane %v1845_v26, 1  ;;  %2522 = vmatpush.bf16.msrb.mxu3 %v14677_v50  ;;  %v1151_v47 = vshrl.u32 %v16270_v32, 16  ;;  %v14605_v50 = vld [vmem:[#allocation2 + $0x38] sm:$0xff] }
  0xd5   : > { %15402 = vst [vmem:[#allocation2 + $0x78] sm:$0xff] %v15323_v36   ;;  %v16370_v4 = vsel %vm1781_vm3, %v1824_v25, %v1833_v49  ;;  %v14669_v25 = vld [vmem:[%s20337_s5 + $0x188] sm:$0xff]  ;;  %v539_v36 = vmul.f32 %v16286_v40, %v15243_v54  ;;  %v540_v54 = vmul.f32 %v16286_v40, %v15244_v20  ;;  %v862_v6 = vpop.permute.xlu2 %861 }
  0xd6   : > { %6224 = vperm.xlu1 %15449, %v6206_v0   ;;  %v624_v0 = vmax.f32 %v583_v2, 0.0  ;;  %v16405_v8 = vsel %vm1781_vm3, %v1833_v49, %v1842_v30  ;;  %2299 = vmatpush.bf16.msrb.mxu2 %v14669_v25  ;;  %v16416_v62 = vor.u32 %v1850_v63, %v1847_v57  ;;  %v16426_v49 = vld [vmem:[#allocation2 + $0x20] sm:$0xff]  ;;  %v1153_v20 = vor.u32 %v1151_v47, %v16333_v23  ;;  %v16445_v23 = vld [vmem:[#allocation2 + $0x48] sm:$0xff] }
  0xd7   : > { %6219 = vperm.xlu0 %15448, %v6205_v31   ;;  %v16399_v31 = vld [vmem:[#allocation2 + $0x30] sm:$0xff]  ;;  %v584_v38 = vadd.f32 %v16329_v56, %v539_v36  ;;  %v585_v35 = vadd.f32 %v16329_v56, %v540_v54  ;;  %v14646_v54 = vld [vmem:[%s20337_s5 + $0x108] sm:$0xff]  ;;  %v14668_v57 = vld [vmem:[%s20337_s5 + $0x180] sm:$0xff] }
  0xd8   : > { %v842_v5 = vpop.permute.xlu1 %841  ;;  %v837_v7 = vpop.permute.xlu0 %836  ;;  %v16422_v60 = vsel %vm1781_vm3, %v1842_v30, %v16416_v62  ;;  %v1418_v2 = vrot.slane %v16399_v31, 1  ;;  %1924 = vmatpush.bf16.msrb.mxu0 %v14646_v54  ;;  %v2143_v54 = vld [vmem:[#allocation2 + $0x10] sm:$0xc] }
  0xd9   : > { %v908_v45 = vmul.f32 %v842_v5, %v621_v12  ;;  %v907_v11 = vmul.f32 %v837_v7, %v620_v44  ;;  %v1155_v44 = vshll.u32 %v16399_v31, 16  ;;  %v625_v5 = vmax.f32 %v584_v38, 0.0 }
  0xda   : > { %v626_v55 = vmax.f32 %v585_v35, 0.0  ;;  %2300 = vmatpush.bf16.msrb.mxu2 %v14668_v57  ;;  %v14676_v35 = vld [vmem:[%s20337_s5 + $0x1c0] sm:$0xff]  ;;  %v16514_v57 = vld [vmem:[#allocation2 + $0x14] sm:$0xf] }
  0xdb   : > { %v15333_v14 = vpack.c.bf16 %v909_v61, %v908_v45  ;;  %v15328_v28 = vpack.c.bf16 %v907_v11, %v906_v58  ;;  %1259 = vmatmul.bf16.gmra.mxu0 %v1150_v17  ;;  %v586_v58 = vadd.f32 %v16329_v56, %v541_v33  ;;  %v1157_v9 = vrot.slane %v1155_v44, 1  ;;  %v16429_v45 = vld [vmem:[#allocation2 + $0x28] sm:$0xff]  ;;  %v16431_v11 = vld [vmem:[#allocation2 + $0x30] sm:$0xff]  ;;  %2523 = vmatpush.bf16.msrb.mxu3 %v14676_v35 }
  0xdc   : > { %1508 = vmatmul.bf16.gmra.mxu2 %v1417_v3  ;;  %v1633_v56 = vrot.slane %v16320_v42, 1  ;;  %v16434_v3 = vld [vmem:[#allocation2 + $0x38] sm:$0xff]  ;;  %v2358_v17 = vld [vmem:[#allocation2 + $0x50] sm:$0x7]  ;;  %v912_v39 = vmul.f32 %v862_v6, %v625_v5  ;;  %v2610_v15 = vrot.slane %v16431_v11, 3  ;;  %v2616_v44 = vrot.slane %v16445_v23, 3 }
  0xdd   : > { %1723 = vmatmul.bf16.gmra.mxu3 %v1632_v21  ;;  %15404 = vst [vmem:[#allocation2 + $0x88] sm:$0xff] %v15333_v14   ;;  %v627_v7 = vmax.f32 %v586_v58, 0.0  ;;  %v20345_v21 = vrot.slane %v16426_v49, 3  ;;  %v1158_v36 = vsel %vm1106_vm1, %v1153_v20, %v1157_v9  ;;  %v2612_v43 = vrot.slane %v16434_v3, 3  ;;  %v14722_v42 = vld [vmem:[%s20337_s5 + $0xb8] sm:$0xff] }
  0xde   : > { %1369 = vmatmul.bf16.gmra.mxu1 %v16270_v32  ;;  %15403 = vst [vmem:[#allocation2 + $0x80] sm:$0xff] %v15328_v28   ;;  %v1419_v28 = vsel %vm1406_vm0, %v1416_v24, %v1418_v2  ;;  %v1634_v46 = vsel %vm1406_vm0, %v1631_v48, %v1633_v56  ;;  %v2377_v32 = vunpack.c.l.b16 %v2358_v17  ;;  %v2608_v24 = vrot.slane %v16429_v45, 3  ;;  %v14653_v48 = vld [vmem:[%s20337_s5 + $0x140] sm:$0xff] }
  0xdf   : > { %2085 = vmatpush.bf16.msrb.mxu1 %v14653_v48  ;;  %v1635_v20 = vrot.slane %v16349_v34, 1  ;;  %v1045_v17 = vld [vmem:[#allocation2 + $0x40] sm:$0x1]  ;;  %3590 = vmatpush.bf16.msra.mxu3 %v14722_v42  ;;  %v2194_v48 = vunpack.c.l.b16 %v2143_v54 }
  0xe0   : > { %v857_v41 = vpop.permute.xlu1 %856  ;;  %v852_v12 = vpop.permute.xlu0 %851  ;;  %v16467_v63 = vsel %vm2602_vm4, %v20345_v21, %v2608_v24  ;;  %v16470_v38 = vsel %vm2602_vm4, %v2608_v24, %v2610_v15  ;;  %v1167_v24 = vshrl.u32 %v14605_v50, 16 }
  0xe1   : > { %v911_v51 = vmul.f32 %v857_v41, %v624_v0  ;;  %v910_v40 = vmul.f32 %v852_v12, %v623_v53  ;;  %v16443_v0 = vld [vmem:[#allocation2 + $0x40] sm:$0xff]  ;;  %v16474_v41 = vsel %vm2602_vm4, %v2610_v15, %v2612_v43 }
  0xe2   : > { %v2614_v12 = vrot.slane %v16443_v0, 3 }
  0xe3   : > { %v15338_v61 = vpack.c.bf16 %v911_v51, %v910_v40  ;;  %v16478_v51 = vpack.c.b16 %v2377_v32, %v2377_v32 }
  0xe4   : > { %v16481_v40 = vsel %vm2602_vm4, %v2612_v43, %v2614_v12  ;;  %v16484_v58 = vsel %vm2602_vm4, %v2614_v12, %v2616_v44  ;;  %v20346_v12 = vunpack.c.l.b16 %v16514_v57 }
  0xe5   : > { %15405 = vst [vmem:[#allocation2 + $0x90] sm:$0xff] %v15338_v61   ;;  %v1163_v61 = vshll.u32 %v14605_v50, 16  ;;  %v2618_v47 = vrot.slane %v16478_v51, 3 }
  0xe7   : > { %v16491_v5 = vsel %vm2602_vm4, %v2616_v44, %v2618_v47  ;;  %v1165_v6 = vrot.slane %v1163_v61, 1  ;;  %v16519_v47 = vld [vmem:[#allocation2 + $0x18] sm:$0xff] }
  0xe8   : > { %v872_v30 = vpop.permute.xlu1 %871  ;;  %v867_v14 = vpop.permute.xlu0 %866 }
  0xe9   : > { %v914_v25 = vmul.f32 %v872_v30, %v627_v7  ;;  %v913_v26 = vmul.f32 %v867_v14, %v626_v55  ;;  %v1420_v7 = vrot.slane %v14605_v50, 1  ;;  %v1159_v55 = vshrl.u32 %v16399_v31, 16 }
  0xeb   : > { %v955_v53 = vpack.c.bf16 %v914_v25, %v914_v25  ;;  %v15343_v33 = vpack.c.bf16 %v913_v26, %v912_v39  ;;  %1264 = vmatmul.bf16.gmra.mxu0 %v1158_v36  ;;  %v1161_v30 = vor.u32 %v1159_v55, %v1157_v9  ;;  %v1421_v14 = vsel %vm1406_vm0, %v1418_v2, %v1420_v7  ;;  %v14645_v25 = vld [vmem:[%s20337_s5 + $0x100] sm:$0xff]  ;;  %v14706_v9 = vld [vmem:[%s20337_s5 + $0x38] sm:$0xff]  ;;  %v4249_v55 = vld [vmem:[#allocation2 + $0x54] sm:$0xf] }
  0xec   : > { %1513 = vmatmul.bf16.gmra.mxu2 %v1419_v28  ;;  %v1096_v39 = vunpack.c.l.b16 %v1045_v17  ;;  %v1636_v26 = vsel %vm1406_vm0, %v1633_v56, %v1635_v20  ;;  %1925 = vmatpush.bf16.msrb.mxu0 %v14645_v25  ;;  %v14714_v2 = vld [vmem:[%s20337_s5 + $0x78] sm:$0xff]  ;;  %v14705_v17 = vld [vmem:[%s20337_s5 + $0x30] sm:$0xff]  ;;  %v2392_v25 = vshll.u32 %v16519_v47, 16 }
  0xed   : > { %1728 = vmatmul.bf16.gmra.mxu3 %v1634_v46  ;;  %996 = vst [vmem:[#allocation2 + $0xa0] sm:$0x3] %v955_v53  ;;  %v1166_v28 = vsel %vm1106_vm1, %v1161_v30, %v1165_v6  ;;  %3448 = vmatpush.bf16.msra.mxu2 %v14706_v9  ;;  %v1169_v53 = vor.u32 %v1167_v24, %v1165_v6  ;;  %v14691_v6 = vld [vmem:[%s20337_s5 + $0x238] sm:$0xff]  ;;  %v4683_v30 = vld [vmem:[#allocation2 + $0x50] sm:$0x8] }
  0xee   : > { %1374 = vmatmul.bf16.gmra.mxu1 %v16399_v31  ;;  %15406 = vst [vmem:[#allocation2 + $0x98] sm:$0xff] %v15343_v33   ;;  %v1561_v31 = vld [vmem:[#allocation2 + $0x48] sm:$0x1]  ;;  %v1105_v36 = vpack.c.b16 %v1096_v39, %v1096_v39  ;;  %v2389_v39 = vshrl.u32 %v16519_v47, 16  ;;  %v2394_v42 = vrot.slane %v2392_v25, 3 }
  0xef   : > { %3343 = vmatpush.bf16.msra.mxu1 %v14714_v2  ;;  %v1612_v46 = vunpack.c.l.b16 %v1561_v31  ;;  %v4248_v31 = vld [vmem:[#allocation2 + $0x50] sm:$0xc] }
  0xf0   : > { %v1171_v32 = vshll.u32 %v1105_v36, 16  ;;  %v1422_v15 = vrot.slane %v1105_v36, 1  ;;  %2676 = vmatpush.bf16.msra.mxu0 %v14691_v6  ;;  %v14754_v36 = vld [vmem:[#allocation2 + $0x58] sm:$0xff] }
  0xf1   : > { %v1621_v56 = vpack.c.b16 %v1612_v46, %v1612_v46  ;;  %3449 = vmatpush.bf16.msra.mxu2 %v14705_v17  ;;  %v4704_v54 = vrot.slane %v14754_v36, 3  ;;  %v4491_v25 = vshrl.u32 %v14754_v36, 16 }
  0xf2   : > { %v1173_v33 = vrot.slane %v1171_v32, 1  ;;  %v1423_v44 = vsel %vm1406_vm0, %v1420_v7, %v1422_v15  ;;  %v14713_v7 = vld [vmem:[%s20337_s5 + $0x70] sm:$0xff]  ;;  %v2391_v32 = vrot.slane %v2389_v39, 2 }
  0xf3   : > { %v1637_v43 = vrot.slane %v1621_v56, 1  ;;  %3344 = vmatpush.bf16.msra.mxu1 %v14713_v7  ;;  %v4298_v56 = vunpack.c.l.b16 %v4248_v31  ;;  %v2398_v31 = vshrl.u32 %v16426_v49, 16 }
  0xf4   : > { %v1174_v35 = vsel %vm1106_vm1, %v1169_v53, %v1173_v33  ;;  %v2221_v53 = vrot.slane %v16519_v47, 2 }
  0xfb   : > { %1269 = vmatmul.bf16.gmra.mxu0 %v1166_v28  ;;  %v4701_v28 = vunpack.c.l.b16 %v4683_v30 }
  0xfc   : > { %1518 = vmatmul.bf16.gmra.mxu2 %v1421_v14  ;;  %v2211_v14 = vpack.c.b16 %v20346_v12, %v2194_v48 }
  0xfd   : > { %1733 = vmatmul.bf16.gmra.mxu3 %v1636_v26 }
  0xfe   : > { %1379 = vmatmul.bf16.gmra.mxu1 %v14605_v50  ;;  %v1638_v50 = vsel %vm1406_vm0, %v1635_v20, %v1637_v43  ;;  %v4299_v20 = vunpack.c.l.b16 %v4249_v55  ;;  %v2381_v26 = vshrl.u32 %v2211_v14, 16  ;;  %v2384_v9 = vshll.u32 %v2211_v14, 16 }
  0xff   : > { %v16540_v43 = vor.u32 %v2394_v42, %v2391_v32  ;;  %v2220_v48 = vrot.slane %v2211_v14, 2  ;;  %v14690_v14 = vld [vmem:[%s20337_s5 + $0x230] sm:$0xff]  ;;  %v4493_v32 = vrot.slane %v4491_v25, 2 }
 0x100   : > { %v4702_v46 = vpack.c.b16 %v4299_v20, %v4701_v28  ;;  %v2383_v24 = vrot.slane %v2381_v26, 2  ;;  %v2386_v15 = vrot.slane %v2384_v9, 3  ;;  %v14755_v28 = vld [vmem:[#allocation2 + $0x60] sm:$0xff]  ;;  %2677 = vmatpush.bf16.msra.mxu0 %v14690_v14  ;;  %v4494_v26 = vshll.u32 %v14754_v36, 16 }
 0x101   : > { %v2222_v17 = vsel %vm2004_vm2, %v2220_v48, %v2221_v53 }
 0x102   : > { %v4703_v33 = vrot.slane %v4702_v46, 3 }
 0x10a   : > { %v1345_v61 = vpop.f32.mrf.mxu1 }
 0x10b   : > { %1274 = vmatmul.bf16.gmra.mxu0 %v1174_v35  ;;  %v16545_v35 = vsel %vm2602_vm4, %v4703_v33, %v4704_v54  ;;  %v4496_v33 = vrot.slane %v4494_v26, 3 }
 0x10c   : > { %1523 = vmatmul.bf16.gmra.mxu2 %v1423_v44  ;;  %v16542_v44 = vpack.c.b16 %v4299_v20, %v4298_v56  ;;  %v14712_v20 = vld [vmem:[%s20337_s5 + $0x68] sm:$0xff] }
 0x10d   : > { %1738 = vmatmul.bf16.gmra.mxu3 %v1638_v50  ;;  %v2387_v50 = vor.u32 %v2386_v15, %v2383_v24  ;;  %3345 = vmatpush.bf16.msra.mxu1 %v14712_v20  ;;  %v2401_v24 = vshll.u32 %v16426_v49, 16  ;;  %v14756_v15 = vld [vmem:[#allocation2 + $0x68] sm:$0xff]  ;;  %v2400_v20 = vrot.slane %v2398_v31, 2 }
 0x10e   : > { %2086 = vmatmul.bf16.vlgmr.msrb.gmra.mxu1 %v16073_v52  ;;  %v14721_v52 = vld [vmem:[%s20337_s5 + $0xb0] sm:$0xff]  ;;  %v4483_v39 = vshrl.u32 %v16542_v44, 16 }
 0x10f   : > { %3591 = vmatpush.bf16.msra.mxu3 %v14721_v52  ;;  %v2396_v7 = vsel %vm2379_vm5, %v2387_v50, %v16540_v43  ;;  %v4500_v50 = vshrl.u32 %v14755_v28, 16  ;;  %v2403_v26 = vrot.slane %v2401_v24, 3 }
 0x110   : > { %v4485_v52 = vrot.slane %v4483_v39, 2  ;;  %v14757_v39 = vld [vmem:[#allocation2 + $0x70] sm:$0xff] }
 0x111   : > { %v4502_v25 = vrot.slane %v4500_v50, 2  ;;  %v16586_v21 = vor.u32 %v2403_v26, %v2400_v20 }
 0x112   : > { %v1347_v2 = vpop.f32.mrf.mxu1 }
 0x118   : > { %v1240_v55 = vpop.f32.mrf.mxu0 }
 0x119   : > { %v1346_v6 = vadd.f32 %v1345_v61, %v1240_v55  ;;  %v14704_v61 = vld [vmem:[%s20337_s5 + $0x28] sm:$0xff]  ;;  %v4706_v55 = vrot.slane %v14755_v28, 3 }
 0x11a   : > { %3450 = vmatpush.bf16.msra.mxu2 %v14704_v61 }
 0x11b   : > { %v16550_v30 = vpop.f32.mrf.mxu1  ;;  %1926 = vmatmul.bf16.vlgmr.msrb.gmra.mxu0 %v16120_v27  ;;  %v4486_v27 = vshll.u32 %v16542_v44, 16 }
 0x11c   : > { %2301 = vmatmul.bf16.vlgmr.msrb.gmra.mxu2 %v2222_v17  ;;  %v4497_v17 = vor.u32 %v4496_v33, %v4493_v32  ;;  %v20348_v33 = vrot.slane %v16426_v49, 2 }
 0x11d   : > { %2524 = vmatmul.bf16.vlgmr.msrb.gmra.mxu3 %v2396_v7  ;;  %v4488_v46 = vrot.slane %v4486_v27, 3  ;;  %v4503_v7 = vshll.u32 %v14755_v28, 16  ;;  %v16577_v27 = vsel %vm2602_vm4, %v4704_v54, %v4706_v55  ;;  %v14758_v28 = vld [vmem:[#allocation2 + $0x78] sm:$0xff] }
 0x11e   : > { %2091 = vmatmul.bf16.gmra.mxu1 %v16182_v22  ;;  %v4712_v37 = vrot.slane %v14758_v28, 3 }
 0x11f   : > { %v1489_v9 = vpop.f32.mrf.mxu2  ;;  %v4489_v48 = vor.u32 %v4488_v46, %v4485_v52  ;;  %v4505_v52 = vrot.slane %v4503_v7, 3  ;;  %v4708_v46 = vrot.slane %v14756_v15, 3 }
 0x120   : > { %v1529_v42 = vadd.f32 %v1489_v9, %v1346_v6  ;;  %v1704_v56 = vpop.f32.mrf.mxu3  ;;  %v1242_v36 = vpop.f32.mrf.mxu0  ;;  %v14720_v6 = vld [vmem:[%s20337_s5 + $0xa8] sm:$0xff] }
 0x121   : > { %v1348_v14 = vadd.f32 %v1347_v2, %v1242_v36  ;;  %v16580_v9 = vsel %vm2379_vm5, %v4489_v48, %v4497_v17  ;;  %3592 = vmatpush.bf16.msra.mxu3 %v14720_v6  ;;  %v4509_v2 = vshrl.u32 %v14756_v15, 16  ;;  %v4506_v32 = vor.u32 %v4505_v52, %v4502_v25 }
 0x122   : > { %v16569_v22 = vadd.f32 %v1704_v56, %v1529_v42  ;;  %v16583_v31 = vsel %vm2602_vm4, %v4706_v55, %v4708_v46  ;;  %v4512_v42 = vshll.u32 %v14756_v15, 16  ;;  %v4710_v36 = vrot.slane %v14757_v39, 3 }
 0x123   : > { %v16571_v61 = vpop.f32.mrf.mxu1  ;;  %v4511_v54 = vrot.slane %v4509_v2, 2  ;;  %v16589_v48 = vsel %vm2379_vm5, %v4497_v17, %v4506_v32  ;;  %v4518_v25 = vshrl.u32 %v14757_v39, 16  ;;  %v4521_v55 = vshll.u32 %v14757_v39, 16 }
 0x124   : > { %v4514_v7 = vrot.slane %v4512_v42, 3  ;;  %v16592_v6 = vsel %vm2602_vm4, %v4708_v46, %v4710_v36  ;;  %v2224_v17 = vsel %vm2004_vm2, %v2221_v53, %v20348_v33  ;;  %v2405_v39 = vsel %vm2379_vm5, %v16540_v43, %v16586_v21  ;;  %v14703_v46 = vld [vmem:[%s20337_s5 + $0x20] sm:$0xff] }
 0x125   : > { %v4520_v20 = vrot.slane %v4518_v25, 2  ;;  %v4523_v26 = vrot.slane %v4521_v55, 3  ;;  %v16616_v42 = vsel %vm2602_vm4, %v4710_v36, %v4712_v37  ;;  %v14759_v43 = vld [vmem:[#allocation2 + $0x80] sm:$0xff]  ;;  %3451 = vmatpush.bf16.msra.mxu2 %v14703_v46 }
 0x126   : > { %v4515_v12 = vor.u32 %v4514_v7, %v4511_v54  ;;  %20363 = vst [vmem:[#allocation4_spill] sm:$0xff] %v16616_v42  ;;  %v4527_v54 = vshrl.u32 %v14758_v28, 16  ;;  %v20367_v42 = vrot.slane %v16426_v49, 2 }
 0x127   : > { %v1491_v56 = vpop.f32.mrf.mxu2 }
 0x128   : > { %v1530_v50 = vadd.f32 %v1491_v56, %v1348_v14  ;;  %v1706_v24 = vpop.f32.mrf.mxu3  ;;  %v1245_v15 = vpop.f32.mrf.mxu0  ;;  %v16613_v53 = vsel %vm2379_vm5, %v4506_v32, %v4515_v12  ;;  %v4524_v56 = vor.u32 %v4523_v26, %v4520_v20  ;;  %v4529_v36 = vrot.slane %v4527_v54, 2  ;;  %v16627_v20 = vld [vmem:[#allocation2 + $0x88] sm:$0xff] }
 0x129   : > { %v1351_v2 = vadd.f32 %v16550_v30, %v1245_v15  ;;  %v14689_v30 = vld [vmem:[%s20337_s5 + $0x228] sm:$0xff]  ;;  %v2407_v15 = vshrl.u32 %v16429_v45, 16  ;;  %20364 = vst [vmem:[#allocation5_spill] sm:$0xff] %v16627_v20  ;;  %v4714_v26 = vrot.slane %v14759_v43, 3 }
 0x12a   : > { %v16594_v52 = vadd.f32 %v1706_v24, %v1530_v50  ;;  %v4530_v50 = vshll.u32 %v14758_v28, 16  ;;  %2678 = vmatpush.bf16.msra.mxu0 %v14689_v30  ;;  %v16623_v32 = vsel %vm2379_vm5, %v4515_v12, %v4524_v56  ;;  %v14719_v12 = vld [vmem:[%s20337_s5 + $0xa0] sm:$0xff] }
 0x12b   : > { %v1355_v14 = vpop.f32.mrf.mxu1  ;;  %1931 = vmatmul.bf16.gmra.mxu0 %v16238_v16  ;;  %v14711_v16 = vld [vmem:[%s20337_s5 + $0x60] sm:$0xff]  ;;  %v2409_v54 = vrot.slane %v2407_v15, 2  ;;  %3593 = vmatpush.bf16.msra.mxu3 %v14719_v12 }
 0x12c   : > { %2306 = vmatmul.bf16.gmra.mxu2 %v2224_v17  ;;  %3346 = vmatpush.bf16.msra.mxu1 %v14711_v16  ;;  %v4532_v7 = vrot.slane %v4530_v50, 3  ;;  %v2410_v17 = vshll.u32 %v16429_v45, 16  ;;  %v16639_v16 = vsel %vm2602_vm4, %v4712_v37, %v4714_v26 }
 0x12d   : > { %2529 = vmatmul.bf16.gmra.mxu3 %v2405_v39  ;;  %20366 = vst [vmem:[#allocation7_spill] sm:$0xff] %v16639_v16 }
 0x12e   : > { %2096 = vmatmul.bf16.gmra.mxu1 %v16234_v10  ;;  %v4533_v28 = vor.u32 %v4532_v7, %v4529_v36  ;;  %v2412_v50 = vrot.slane %v2410_v17, 3  ;;  %v4539_v36 = vshll.u32 %v14759_v43, 16  ;;  %v20349_v7 = vrot.slane %v16627_v20, 3 }
 0x12f   : > { %v1494_v24 = vpop.f32.mrf.mxu2  ;;  %v4545_v17 = vshrl.u32 %v16627_v20, 16 }
 0x130   : > { %v1531_v25 = vadd.f32 %v1494_v24, %v1351_v2  ;;  %v1709_v55 = vpop.f32.mrf.mxu3  ;;  %v1247_v39 = vpop.f32.mrf.mxu0  ;;  %v16636_v2 = vsel %vm2379_vm5, %v4524_v56, %v4533_v28  ;;  %v4536_v24 = vshrl.u32 %v14759_v43, 16  ;;  %v16646_v56 = vsel %vm2602_vm4, %v4714_v26, %v20349_v7 }
 0x131   : > { %v1353_v30 = vadd.f32 %v16571_v61, %v1247_v39  ;;  %20365 = vst [vmem:[#allocation6_spill] sm:$0xff] %v16636_v2  ;;  %v4541_v61 = vrot.slane %v4539_v36, 3  ;;  %v2225_v39 = vrot.slane %v16429_v45, 2  ;;  %v2413_v16 = vor.u32 %v2412_v50, %v2409_v54 }
 0x132   : > { %v16629_v10 = vadd.f32 %v1709_v55, %v1531_v25  ;;  %v4538_v25 = vrot.slane %v4536_v24, 2  ;;  %v4548_v43 = vshll.u32 %v16627_v20, 16  ;;  %v4547_v45 = vrot.slane %v4545_v17, 2 }
 0x133   : > { %v1357_v46 = vpop.f32.mrf.mxu1  ;;  %v2226_v26 = vsel %vm2004_vm2, %v20367_v42, %v2225_v39  ;;  %v2414_v54 = vsel %vm2379_vm5, %v16586_v21, %v2413_v16  ;;  %v14710_v42 = vld [vmem:[%s20337_s5 + $0x58] sm:$0xff] }
 0x134   : > { %v4542_v15 = vor.u32 %v4541_v61, %v4538_v25  ;;  %3347 = vmatpush.bf16.msra.mxu1 %v14710_v42  ;;  %v2416_v61 = vshrl.u32 %v16431_v11, 16 }
 0x136   : > { %v16653_v36 = vsel %vm2379_vm5, %v4533_v28, %v4542_v15 }
 0x137   : > { %v1496_v55 = vpop.f32.mrf.mxu2 }
 0x138   : > { %v1532_v33 = vadd.f32 %v1496_v55, %v1353_v30  ;;  %v1711_v37 = vpop.f32.mrf.mxu3  ;;  %v1250_v24 = vpop.f32.mrf.mxu0  ;;  %v4550_v55 = vrot.slane %v4548_v43, 3 }
 0x139   : > { %v1356_v2 = vadd.f32 %v1355_v14, %v1250_v24  ;;  %v14702_v14 = vld [vmem:[%s20337_s5 + $0x18] sm:$0xff] }
 0x13a   : > { %v16650_v12 = vadd.f32 %v1711_v37, %v1532_v33  ;;  %v14688_v33 = vld [vmem:[%s20337_s5 + $0x220] sm:$0xff]  ;;  %v16670_v28 = vor.u32 %v4550_v55, %v4547_v45  ;;  %3452 = vmatpush.bf16.msra.mxu2 %v14702_v14  ;;  %v2419_v37 = vshll.u32 %v16431_v11, 16 }
 0x13b   : > { %v1360_v30 = vpop.f32.mrf.mxu1  ;;  %1936 = vmatmul.bf16.gmra.mxu0 %v16297_v29 }
 0x13c   : > { %2311 = vmatmul.bf16.gmra.mxu2 %v2226_v26  ;;  %20368 = vst [vmem:[#allocation8_spill] sm:$0xff] %v16670_v28  ;;  %2679 = vmatpush.bf16.msra.mxu0 %v14688_v33  ;;  %v16675_v21 = vsel %vm2379_vm5, %v4542_v15, %v16670_v28  ;;  %v2418_v26 = vrot.slane %v2416_v61, 2  ;;  %v2421_v55 = vrot.slane %v2419_v37, 3  ;;  %v14687_v37 = vld [vmem:[%s20337_s5 + $0x218] sm:$0xff] }
 0x13d   : > { %2534 = vmatmul.bf16.gmra.mxu3 %v2414_v54  ;;  %20369 = vst [vmem:[#allocation9_spill] sm:$0xff] %v16675_v21 }
 0x13e   : > { %2101 = vmatmul.bf16.gmra.mxu1 %v16314_v1  ;;  %v14718_v1 = vld [vmem:[%s20337_s5 + $0x98] sm:$0xff]  ;;  %v2422_v14 = vor.u32 %v2421_v55, %v2418_v26 }
 0x13f   : > { %v1499_v29 = vpop.f32.mrf.mxu2  ;;  %3594 = vmatpush.bf16.msra.mxu3 %v14718_v1 }
 0x140   : > { %v1533_v50 = vadd.f32 %v1499_v29, %v1356_v2  ;;  %v1714_v25 = vpop.f32.mrf.mxu3  ;;  %v1252_v43 = vpop.f32.mrf.mxu0  ;;  %v2227_v2 = vrot.slane %v16431_v11, 2  ;;  %v2423_v61 = vsel %vm2379_vm5, %v2413_v16, %v2422_v14  ;;  %v14701_v11 = vld [vmem:[%s20337_s5 + $0x10] sm:$0xff]  ;;  %2680 = vmatpush.bf16.msra.mxu0 %v14687_v37 }
 0x141   : > { %v1358_v24 = vadd.f32 %v1357_v46, %v1252_v43  ;;  %3453 = vmatpush.bf16.msra.mxu2 %v14701_v11  ;;  %v2425_v43 = vshrl.u32 %v16434_v3, 16 }
 0x142   : > { %v16679_v17 = vadd.f32 %v1714_v25, %v1533_v50  ;;  %v2228_v46 = vsel %vm2004_vm2, %v2225_v39, %v2227_v2 }
 0x143   : > { %v1362_v45 = vpop.f32.mrf.mxu1 }
 0x147   : > { %v1501_v15 = vpop.f32.mrf.mxu2 }
 0x148   : > { %v1534_v54 = vadd.f32 %v1501_v15, %v1358_v24  ;;  %v1716_v33 = vpop.f32.mrf.mxu3  ;;  %v1255_v29 = vpop.f32.mrf.mxu0  ;;  %v2428_v24 = vshll.u32 %v16434_v3, 16 }
 0x149   : > { %v1361_v50 = vadd.f32 %v1360_v30, %v1255_v29  ;;  %v14709_v30 = vld [vmem:[%s20337_s5 + $0x50] sm:$0xff] }
 0x14a   : > { %v16685_v42 = vadd.f32 %v1716_v33, %v1534_v54  ;;  %3348 = vmatpush.bf16.msra.mxu1 %v14709_v30  ;;  %v14717_v54 = vld [vmem:[%s20337_s5 + $0x90] sm:$0xff]  ;;  %v2430_v33 = vrot.slane %v2428_v24, 3  ;;  %v2434_v24 = vshrl.u32 %v16443_v0, 16 }
 0x14b   : > { %v1365_v25 = vpop.f32.mrf.mxu1  ;;  %1941 = vmatmul.bf16.gmra.mxu0 %v16352_v13  ;;  %3595 = vmatpush.bf16.msra.mxu3 %v14717_v54 }
 0x14c   : > { %2316 = vmatmul.bf16.gmra.mxu2 %v2228_v46 }
 0x14d   : > { %2539 = vmatmul.bf16.gmra.mxu3 %v2423_v61 }
 0x14e   : > { %2106 = vmatmul.bf16.gmra.mxu1 %v16336_v18  ;;  %v2427_v18 = vrot.slane %v2425_v43, 2  ;;  %v14686_v43 = vld [vmem:[%s20337_s5 + $0x210] sm:$0xff] }
 0x14f   : > { %v1504_v39 = vpop.f32.mrf.mxu2  ;;  %2681 = vmatpush.bf16.msra.mxu0 %v14686_v43 }
 0x150   : > { %v1535_v13 = vadd.f32 %v1504_v39, %v1361_v50  ;;  %v1719_v16 = vpop.f32.mrf.mxu3  ;;  %v1257_v26 = vpop.f32.mrf.mxu0  ;;  %v2229_v50 = vrot.slane %v16434_v3, 2  ;;  %v2431_v37 = vor.u32 %v2430_v33, %v2427_v18  ;;  %v14700_v3 = vld [vmem:[%s20337_s5 + $0x8] sm:$0xff] }
 0x151   : > { %v1363_v55 = vadd.f32 %v1362_v45, %v1257_v26  ;;  %3454 = vmatpush.bf16.msra.mxu2 %v14700_v3  ;;  %v2437_v26 = vshll.u32 %v16443_v0, 16 }
 0x152   : > { %v16702_v1 = vadd.f32 %v1719_v16, %v1535_v13  ;;  %v2230_v45 = vsel %vm2004_vm2, %v2227_v2, %v2229_v50  ;;  %v2432_v16 = vsel %vm2379_vm5, %v2422_v14, %v2431_v37 }
 0x153   : > { %v1367_v15 = vpop.f32.mrf.mxu1 }
 0x157   : > { %v1506_v29 = vpop.f32.mrf.mxu2 }
 0x158   : > { %v1536_v46 = vadd.f32 %v1506_v29, %v1363_v55  ;;  %v1721_v61 = vpop.f32.mrf.mxu3  ;;  %v1260_v30 = vpop.f32.mrf.mxu0  ;;  %v14716_v29 = vld [vmem:[%s20337_s5 + $0x88] sm:$0xff] }
 0x159   : > { %v1366_v39 = vadd.f32 %v1365_v25, %v1260_v30  ;;  %v14708_v25 = vld [vmem:[%s20337_s5 + $0x48] sm:$0xff]  ;;  %3596 = vmatpush.bf16.msra.mxu3 %v14716_v29  ;;  %v2231_v30 = vrot.slane %v16443_v0, 2  ;;  %v14699_v0 = vld [vmem:[%s20337_s5] sm:$0xff] }
 0x15a   : > { %v16708_v11 = vadd.f32 %v1721_v61, %v1536_v46  ;;  %3349 = vmatpush.bf16.msra.mxu1 %v14708_v25  ;;  %v2439_v46 = vrot.slane %v2437_v26, 3  ;;  %3455 = vmatpush.bf16.msra.mxu2 %v14699_v0  ;;  %v2443_v26 = vshrl.u32 %v16445_v23, 16 }
 0x15b   : > { %v1370_v13 = vpop.f32.mrf.mxu1  ;;  %1946 = vmatmul.bf16.gmra.mxu0 %v16370_v4 }
 0x15c   : > { %2321 = vmatmul.bf16.gmra.mxu2 %v2230_v45 }
 0x15d   : > { %2544 = vmatmul.bf16.gmra.mxu3 %v2432_v16 }
 0x15e   : > { %2111 = vmatmul.bf16.gmra.mxu1 %v16361_v59  ;;  %v2436_v59 = vrot.slane %v2434_v24, 2 }
 0x15f   : > { %v1509_v2 = vpop.f32.mrf.mxu2 }
 0x160   : > { %v1537_v4 = vadd.f32 %v1509_v2, %v1366_v39  ;;  %v1724_v14 = vpop.f32.mrf.mxu3  ;;  %v1262_v54 = vpop.f32.mrf.mxu0  ;;  %v2440_v16 = vor.u32 %v2439_v46, %v2436_v59 }
 0x161   : > { %v1368_v18 = vadd.f32 %v1367_v15, %v1262_v54  ;;  %v2232_v15 = vsel %vm2004_vm2, %v2229_v50, %v2231_v30  ;;  %v1760_v50 = vld [vmem:[#allocation2 + $0x48] sm:$0x3]  ;;  %v2446_v54 = vshll.u32 %v16445_v23, 16 }
 0x162   : > { %v16725_v55 = vadd.f32 %v1724_v14, %v1537_v4  ;;  %v2441_v4 = vsel %vm2379_vm5, %v2431_v37, %v2440_v16  ;;  %v14685_v14 = vld [vmem:[%s20337_s5 + $0x208] sm:$0xff] }
 0x163   : > { %v1372_v33 = vpop.f32.mrf.mxu1  ;;  %2682 = vmatpush.bf16.msra.mxu0 %v14685_v14 }
 0x167   : > { %v1511_v61 = vpop.f32.mrf.mxu2 }
 0x168   : > { %v1538_v39 = vadd.f32 %v1511_v61, %v1368_v18  ;;  %v1726_v45 = vpop.f32.mrf.mxu3  ;;  %v1265_v3 = vpop.f32.mrf.mxu0  ;;  %v1779_v18 = vunpack.c.l.b16 %v1760_v50 }
 0x169   : > { %v1371_v25 = vadd.f32 %v1370_v13, %v1265_v3  ;;  %v14707_v13 = vld [vmem:[%s20337_s5 + $0x40] sm:$0xff] }
 0x16a   : > { %v16731_v43 = vadd.f32 %v1726_v45, %v1538_v39  ;;  %3350 = vmatpush.bf16.msra.mxu1 %v14707_v13  ;;  %v2445_v39 = vrot.slane %v2443_v26, 2  ;;  %v2448_v45 = vrot.slane %v2446_v54, 3  ;;  %v1780_v3 = vpack.c.b16 %v1779_v18, %v1779_v18  ;;  %v14684_v26 = vld [vmem:[%s20337_s5 + $0x200] sm:$0xff]  ;;  %v14753_v54 = vld [vmem:[%s20337_s5 + $0x178] sm:$0xff] }
 0x16b   : > { %v1375_v2 = vpop.f32.mrf.mxu1  ;;  %1951 = vmatmul.bf16.gmra.mxu0 %v16405_v8  ;;  %v14745_v18 = vld [vmem:[%s20337_s5 + $0x138] sm:$0xff]  ;;  %4183 = vmatpush.bf16.msrb.mxu2 %v14753_v54 }
 0x16c   : > { %2326 = vmatmul.bf16.gmra.mxu2 %v2232_v15  ;;  %v2233_v15 = vrot.slane %v16445_v23, 2  ;;  %v2449_v0 = vor.u32 %v2448_v45, %v2445_v39  ;;  %v2020_v13 = vrot.slane %v1780_v3, 2  ;;  %2683 = vmatpush.bf16.msra.mxu0 %v14684_v26 }
 0x16d   : > { %2549 = vmatmul.bf16.gmra.mxu3 %v2441_v4 }
 0x16e   : > { %2116 = vmatmul.bf16.gmra.mxu1 %v16382_v19  ;;  %v14715_v19 = vld [vmem:[%s20337_s5 + $0x80] sm:$0xff]  ;;  %v2450_v23 = vsel %vm2379_vm5, %v2440_v16, %v2449_v0  ;;  %v1857_v16 = vshll.u32 %v1780_v3, 16 }
 0x16f   : > { %v1514_v8 = vpop.f32.mrf.mxu2  ;;  %3597 = vmatpush.bf16.msra.mxu3 %v14715_v19  ;;  %v1854_v19 = vshrl.u32 %v1780_v3, 16  ;;  %4025 = vmatpush.bf16.msrb.mxu1 %v14745_v18 }
 0x170   : > { %v1539_v37 = vadd.f32 %v1514_v8, %v1371_v25  ;;  %v1729_v24 = vpop.f32.mrf.mxu3  ;;  %v1267_v59 = vpop.f32.mrf.mxu0  ;;  %v1859_v54 = vrot.slane %v1857_v16, 2 }
 0x171   : > { %v1373_v46 = vadd.f32 %v1372_v33, %v1267_v59  ;;  %v2159_v59 = vld [vmem:[#allocation2 + $0x50] sm:$0x3] }
 0x172   : > { %v16748_v29 = vadd.f32 %v1729_v24, %v1539_v37  ;;  %v2234_v37 = vsel %vm2004_vm2, %v2231_v30, %v2233_v15 }
 0x173   : > { %v1377_v61 = vpop.f32.mrf.mxu1 }
 0x177   : > { %v1516_v25 = vpop.f32.mrf.mxu2 }
 0x178   : > { %v1540_v4 = vadd.f32 %v1516_v25, %v1373_v46  ;;  %v1731_v14 = vpop.f32.mrf.mxu3  ;;  %v1270_v8 = vpop.f32.mrf.mxu0  ;;  %v2210_v46 = vunpack.c.l.b16 %v2159_v59  ;;  %v2452_v25 = vshrl.u32 %v16478_v51, 16 }
 0x179   : > { %v1376_v33 = vadd.f32 %v1375_v2, %v1270_v8  ;;  %v20370_v2 = vrot.slane %v16349_v34, 2  ;;  %v2455_v34 = vshll.u32 %v16478_v51, 16 }
 0x17a   : > { %v16754_v50 = vadd.f32 %v1731_v14, %v1540_v4  ;;  %v16773_v4 = vld [vmem:[#allocation2 + $0x40] sm:$0xff]   ;;  %v16775_v14 = vld [vmem:[#allocation2 + $0x48] sm:$0xff] }
 0x17b   : > { %v1380_v24 = vpop.f32.mrf.mxu1  ;;  %1956 = vmatmul.bf16.gmra.mxu0 %v16422_v60  ;;  %v2021_v30 = vsel %vm2004_vm2, %v20370_v2, %v2020_v13  ;;  %v3222_v3 = vshll.u32 %v16773_v4, 16  ;;  %v2454_v2 = vrot.slane %v2452_v25, 2  ;;  %v2457_v51 = vrot.slane %v2455_v34, 3 }
 0x17c   : > { %2331 = vmatmul.bf16.gmra.mxu2 %v2234_v37  ;;  %v2219_v37 = vpack.c.b16 %v2210_v46, %v2210_v46 }
 0x17d   : > { %2554 = vmatmul.bf16.gmra.mxu3 %v2450_v23  ;;  %v1856_v23 = vrot.slane %v1854_v19, 1  ;;  %v3220_v19 = vshrl.u32 %v16773_v4, 16 }
 0x17e   : > { %2121 = vmatmul.bf16.gmra.mxu1 %v2021_v30  ;;  %v3227_v30 = vshll.u32 %v16775_v14, 16 }
 0x17f   : > { %v1519_v60 = vpop.f32.mrf.mxu2 }
 0x180   : > { %v1541_v39 = vadd.f32 %v1519_v60, %v1376_v33  ;;  %v1734_v45 = vpop.f32.mrf.mxu3  ;;  %v1272_v8 = vpop.f32.mrf.mxu0  ;;  %v14768_v33 = vld [vmem:[%s20337_s5 + $0x1b8] sm:$0xff]  ;;  %v2235_v60 = vrot.slane %v2219_v37, 2  ;;  %v3229_v16 = vrot.slane %v3227_v30, 1 }
 0x181   : > { %v1378_v59 = vadd.f32 %v1377_v61, %v1272_v8  ;;  %4397 = vmatpush.bf16.msrb.mxu3 %v14768_v33  ;;  %v2458_v8 = vor.u32 %v2457_v51, %v2454_v2  ;;  %v16801_v2 = vld [vmem:[#allocation2 + $0x50] sm:$0xff] }
 0x182   : > { %v16777_v13 = vadd.f32 %v1734_v45, %v1541_v39  ;;  %v1860_v39 = vor.u32 %v1859_v54, %v1856_v23  ;;  %v3224_v45 = vrot.slane %v3222_v3, 1  ;;  %v2236_v25 = vsel %vm2004_vm2, %v2233_v15, %v2235_v60  ;;  %v14752_v23 = vld [vmem:[%s20337_s5 + $0x170] sm:$0xff]  ;;  %v15411_v60 = vld [vmem:[#allocation2 + $0x40] sm:$0xf0] }
 0x183   : > { %v1382_v26 = vpop.f32.mrf.mxu1  ;;  %v2459_v37 = vsel %vm2379_vm5, %v2449_v0, %v2458_v8  ;;  %v2581_v15 = vld [vmem:[#allocation2 + $0x10] sm:$0x8]  ;;  %4184 = vmatpush.bf16.msrb.mxu2 %v14752_v23  ;;  %v3231_v23 = vshrl.u32 %v16775_v14, 16 }
 0x184   : > { %v1861_v34 = vsel %vm1781_vm3, %v16416_v62, %v1860_v39  ;;  %v3225_v21 = vor.u32 %v3224_v45, %v3220_v19  ;;  %v14744_v62 = vld [vmem:[%s20337_s5 + $0x130] sm:$0xff]  ;;  %v2600_v3 = vunpack.c.l.b16 %v2581_v15  ;;  %v15412_v39 = vld [vmem:[#allocation2 + $0x40] sm:$0xe] }
 0x185   : > { %4026 = vmatpush.bf16.msrb.mxu1 %v14744_v62  ;;  %v14767_v45 = vld [vmem:[%s20337_s5 + $0x1b0] sm:$0xff]  ;;  %v15413_v8 = vor.u32 %v15412_v39, %v15411_v60 }
 0x186   : > { %4398 = vmatpush.bf16.msrb.mxu3 %v14767_v45 }
 0x187   : > { %v1521_v18 = vpop.f32.mrf.mxu2 }
 0x188   : > { %v1542_v46 = vadd.f32 %v1521_v18, %v1378_v59  ;;  %v1736_v61 = vpop.f32.mrf.mxu3  ;;  %v1275_v28 = vpop.f32.mrf.mxu0  ;;  %v14737_v59 = vld [vmem:[%s20337_s5 + $0xf8] sm:$0xff] }
 0x189   : > { %v1381_v20 = vadd.f32 %v1380_v24, %v1275_v28  ;;  %v3230_v28 = vsel %vm1106_vm1, %v3225_v21, %v3229_v16  ;;  %3804 = vmatpush.bf16.msrb.mxu0 %v14737_v59 }
 0x18a   : > { %v16785_v7 = vadd.f32 %v1736_v61, %v1542_v46  ;;  %v20371_v46 = vunpack.c.l.b16 %v16514_v57  ;;  %v3517_v57 = vrot.slane %v15413_v8, 1 }
 0x18b   : > { %v2087_v33 = vpop.f32.mrf.mxu1  ;;  %1961 = vmatmul.bf16.gmra.mxu0 %v1861_v34 }
 0x18c   : > { %2336 = vmatmul.bf16.gmra.mxu2 %v2236_v25  ;;  %v2601_v61 = vpack.c.b16 %v20371_v46, %v2600_v3  ;;  %v2604_v25 = vrot.slane %v16519_v47, 3  ;;  %v3233_v3 = vor.u32 %v3231_v23, %v3229_v16  ;;  %v14743_v16 = vld [vmem:[%s20337_s5 + $0x128] sm:$0xff] }
 0x18d   : > { %2559 = vmatmul.bf16.gmra.mxu3 %v2459_v37  ;;  %4027 = vmatpush.bf16.msrb.mxu1 %v14743_v16  ;;  %v14750_v16 = vld [vmem:[%s20337_s5 + $0x160] sm:$0xff] }
 0x18e   : > { %3351 = vmatmul.bf16.vlgmr.msra.gmra.mxu1 %v3230_v28  ;;  %v2603_v59 = vrot.slane %v2601_v61, 3 }
 0x18f   : > { %v1524_v24 = vpop.f32.mrf.mxu2 }
 0x190   : > { %v1543_v0 = vadd.f32 %v1524_v24, %v1381_v20  ;;  %v1739_v54 = vpop.f32.mrf.mxu3  ;;  %v1277_v30 = vpop.f32.mrf.mxu0  ;;  %v3235_v20 = vshll.u32 %v16801_v2, 16 }
 0x191   : > { %v1383_v18 = vadd.f32 %v1382_v26, %v1277_v30  ;;  %v3518_v26 = vrot.slane %v16775_v14, 1  ;;  %v14736_v30 = vld [vmem:[%s20337_s5 + $0xf0] sm:$0xff] }
 0x192   : > { %v16803_v51 = vadd.f32 %v1739_v54, %v1543_v0  ;;  %v3237_v28 = vrot.slane %v3235_v20, 1  ;;  %v2605_v0 = vsel %vm2602_vm4, %v2603_v59, %v2604_v25  ;;  %3805 = vmatpush.bf16.msrb.mxu0 %v14736_v30  ;;  %v3239_v59 = vshrl.u32 %v16801_v2, 16 }
 0x193   : > { %v2089_v21 = vpop.f32.mrf.mxu1  ;;  %v3519_v47 = vsel %vm1406_vm0, %v3517_v57, %v3518_v26  ;;  %v20372_v30 = vrot.slane %v16426_v49, 3 }
 0x197   : > { %v1526_v19 = vpop.f32.mrf.mxu2 }
 0x198   : > { %v1544_v34 = vadd.f32 %v1526_v19, %v1383_v18  ;;  %v1741_v37 = vpop.f32.mrf.mxu3  ;;  %v1927_v15 = vpop.f32.mrf.mxu0  ;;  %v14751_v18 = vld [vmem:[%s20337_s5 + $0x168] sm:$0xff] }
 0x199   : > { %v1967_v24 = vadd.f32 %v1927_v15, %v16569_v22  ;;  %v3238_v22 = vsel %vm1106_vm1, %v3233_v3, %v3237_v28  ;;  %4185 = vmatpush.bf16.msrb.mxu2 %v14751_v18  ;;  %v14766_v19 = vld [vmem:[%s20337_s5 + $0x1a8] sm:$0xff] }
 0x19a   : > { %v16814_v62 = vadd.f32 %v1741_v37, %v1544_v34  ;;  %4399 = vmatpush.bf16.msrb.mxu3 %v14766_v19  ;;  %v14765_v19 = vld [vmem:[%s20337_s5 + $0x1a0] sm:$0xff] }
 0x19b   : > { %v2092_v54 = vpop.f32.mrf.mxu1  ;;  %2684 = vmatmul.bf16.vlgmr.msra.gmra.mxu0 %v2605_v0  ;;  %v2127_v60 = vadd.f32 %v2087_v33, %v1967_v24  ;;  %v16833_v33 = vld [vmem:[#allocation2 + $0x58] sm:$0xff]  ;;  %v3520_v24 = vrot.slane %v16801_v2, 1  ;;  %v3241_v0 = vor.u32 %v3239_v59, %v3237_v28  ;;  %v14735_v28 = vld [vmem:[%s20337_s5 + $0xe8] sm:$0xff] }
 0x19c   : > { %3456 = vmatmul.bf16.vlgmr.msra.gmra.mxu2 %v16773_v4  ;;  %v3243_v23 = vshll.u32 %v16833_v33, 16  ;;  %3806 = vmatpush.bf16.msrb.mxu0 %v14735_v28  ;;  %v14734_v28 = vld [vmem:[%s20337_s5 + $0xe0] sm:$0xff] }
 0x19d   : > { %3598 = vmatmul.bf16.vlgmr.msra.gmra.mxu3 %v3519_v47  ;;  %4186 = vmatpush.bf16.msrb.mxu2 %v14750_v16  ;;  %v14749_v16 = vld [vmem:[%s20337_s5 + $0x158] sm:$0xff] }
 0x19e   : > { %3356 = vmatmul.bf16.gmra.mxu1 %v3238_v22  ;;  %v3521_v22 = vsel %vm1406_vm0, %v3518_v26, %v3520_v24  ;;  %4400 = vmatpush.bf16.msrb.mxu3 %v14765_v19 }
 0x19f   : > { %v2302_v4 = vpop.f32.mrf.mxu2 }
 0x1a0   : > { %v2342_v39 = vadd.f32 %v2302_v4, %v2127_v60  ;;  %v2525_v45 = vpop.f32.mrf.mxu3  ;;  %v1929_v61 = vpop.f32.mrf.mxu0  ;;  %v3245_v60 = vrot.slane %v3243_v23, 1  ;;  %3807 = vmatpush.bf16.msrb.mxu0 %v14734_v28  ;;  %v14748_v28 = vld [vmem:[%s20337_s5 + $0x150] sm:$0xff] }
 0x1a1   : > { %v1968_v20 = vadd.f32 %v1929_v61, %v16594_v52  ;;  %4187 = vmatpush.bf16.msrb.mxu2 %v14749_v16 }
 0x1a2   : > { %v16830_v46 = vadd.f32 %v2525_v45, %v2342_v39  ;;  %v3246_v49 = vsel %vm1106_vm1, %v3241_v0, %v3245_v60  ;;  %v16859_v39 = vld [vmem:[#allocation2 + $0x60] sm:$0xff]  ;;  %v3247_v0 = vshrl.u32 %v16833_v33, 16 }
 0x1a3   : > { %v2094_v8 = vpop.f32.mrf.mxu1  ;;  %v2128_v34 = vadd.f32 %v2089_v21, %v1968_v20  ;;  %v2607_v21 = vsel %vm2602_vm4, %v2604_v25, %v20372_v30  ;;  %v14742_v25 = vld [vmem:[%s20337_s5 + $0x120] sm:$0xff] }
 0x1a4   : > { %4028 = vmatpush.bf16.msrb.mxu1 %v14742_v25 }
 0x1a5   : > { %4188 = vmatpush.bf16.msrb.mxu2 %v14748_v28  ;;  %v16940_v28 = vld [vmem:[#allocation2 + $0x78] sm:$0xff] }
 0x1a7   : > { %v2304_v37 = vpop.f32.mrf.mxu2 }
 0x1a8   : > { %v2343_v15 = vadd.f32 %v2304_v37, %v2128_v34  ;;  %v2527_v57 = vpop.f32.mrf.mxu3  ;;  %v1932_v3 = vpop.f32.mrf.mxu0  ;;  %v3251_v37 = vshll.u32 %v16859_v39, 16 }
 0x1a9   : > { %v1969_v47 = vadd.f32 %v1932_v3, %v16629_v10 }
 0x1aa   : > { %v16841_v52 = vadd.f32 %v2527_v57, %v2343_v15  ;;  %v3522_v57 = vrot.slane %v16833_v33, 1  ;;  %v3253_v3 = vrot.slane %v3251_v37, 1 }
 0x1ab   : > { %v2097_v18 = vpop.f32.mrf.mxu1  ;;  %2689 = vmatmul.bf16.gmra.mxu0 %v2607_v21  ;;  %v2129_v10 = vadd.f32 %v2092_v54, %v1969_v47 }
 0x1ac   : > { %3461 = vmatmul.bf16.gmra.mxu2 %v16775_v14 }
 0x1ad   : > { %3603 = vmatmul.bf16.gmra.mxu3 %v3521_v22  ;;  %v3249_v22 = vor.u32 %v3247_v0, %v3245_v60 }
 0x1ae   : > { %3361 = vmatmul.bf16.gmra.mxu1 %v3246_v49  ;;  %v16886_v49 = vld [vmem:[#allocation2 + $0x68] sm:$0xff] }
 0x1af   : > { %v2307_v14 = vpop.f32.mrf.mxu2 }
 0x1b0   : > { %v2344_v26 = vadd.f32 %v2307_v14, %v2129_v10  ;;  %v2530_v4 = vpop.f32.mrf.mxu3  ;;  %v1934_v61 = vpop.f32.mrf.mxu0 }
 0x1b1   : > { %v1970_v54 = vadd.f32 %v1934_v61, %v16650_v12 }
 0x1b2   : > { %v16861_v45 = vadd.f32 %v2530_v4, %v2344_v26  ;;  %v14764_v4 = vld [vmem:[%s20337_s5 + $0x198] sm:$0xff] }
 0x1b3   : > { %v2099_v20 = vpop.f32.mrf.mxu1  ;;  %v2130_v34 = vadd.f32 %v2094_v8, %v1970_v54  ;;  %v3523_v8 = vsel %vm1406_vm0, %v3520_v24, %v3522_v57  ;;  %v3259_v54 = vshll.u32 %v16886_v49, 16  ;;  %4401 = vmatpush.bf16.msrb.mxu3 %v14764_v4 }
 0x1b7   : > { %v2309_v59 = vpop.f32.mrf.mxu2 }
 0x1b8   : > { %v2345_v23 = vadd.f32 %v2309_v59, %v2130_v34  ;;  %v2532_v15 = vpop.f32.mrf.mxu3  ;;  %v1937_v12 = vpop.f32.mrf.mxu0  ;;  %v3524_v59 = vrot.slane %v16859_v39, 1 }
 0x1b9   : > { %v1971_v30 = vadd.f32 %v1937_v12, %v16679_v17  ;;  %v3254_v17 = vsel %vm1106_vm1, %v3249_v22, %v3253_v3 }
 0x1ba   : > { %v16870_v47 = vadd.f32 %v2532_v15, %v2345_v23  ;;  %v3255_v23 = vshrl.u32 %v16859_v39, 16  ;;  %v3261_v15 = vrot.slane %v3259_v54, 1 }
 0x1bb   : > { %v2102_v21 = vpop.f32.mrf.mxu1  ;;  %2694 = vmatmul.bf16.gmra.mxu0 %v16467_v63  ;;  %v2131_v10 = vadd.f32 %v2097_v18, %v1971_v30 }
 0x1bc   : > { %3466 = vmatmul.bf16.gmra.mxu2 %v16801_v2  ;;  %v14741_v2 = vld [vmem:[%s20337_s5 + $0x118] sm:$0xff]  ;;  %v3257_v22 = vor.u32 %v3255_v23, %v3253_v3 }
 0x1bd   : > { %3608 = vmatmul.bf16.gmra.mxu3 %v3523_v8  ;;  %4029 = vmatpush.bf16.msrb.mxu1 %v14741_v2  ;;  %v14733_v8 = vld [vmem:[%s20337_s5 + $0xd8] sm:$0xff] }
 0x1be   : > { %3366 = vmatmul.bf16.gmra.mxu1 %v3254_v17  ;;  %3808 = vmatpush.bf16.msrb.mxu0 %v14733_v8 }
 0x1bf   : > { %v2312_v63 = vpop.f32.mrf.mxu2 }
 0x1c0   : > { %v2346_v24 = vadd.f32 %v2312_v63, %v2131_v10  ;;  %v2535_v60 = vpop.f32.mrf.mxu3  ;;  %v1939_v14 = vpop.f32.mrf.mxu0 }
 0x1c1   : > { %v1972_v18 = vadd.f32 %v1939_v14, %v16685_v42 }
 0x1c2   : > { %v16888_v25 = vadd.f32 %v2535_v60, %v2346_v24  ;;  %v14763_v24 = vld [vmem:[%s20337_s5 + $0x190] sm:$0xff] }
 0x1c3   : > { %v2104_v26 = vpop.f32.mrf.mxu1  ;;  %v2132_v61 = vadd.f32 %v2099_v20, %v1972_v18  ;;  %v3525_v20 = vsel %vm1406_vm0, %v3522_v57, %v3524_v59  ;;  %4402 = vmatpush.bf16.msrb.mxu3 %v14763_v24  ;;  %v3263_v18 = vshrl.u32 %v16886_v49, 16 }
 0x1c7   : > { %v2314_v19 = vpop.f32.mrf.mxu2 }
 0x1c8   : > { %v2347_v34 = vadd.f32 %v2314_v19, %v2132_v61  ;;  %v2537_v37 = vpop.f32.mrf.mxu3  ;;  %v1942_v42 = vpop.f32.mrf.mxu0  ;;  %v3526_v19 = vrot.slane %v16886_v49, 1 }
 0x1c9   : > { %v1973_v12 = vadd.f32 %v1942_v42, %v16702_v1  ;;  %v3262_v1 = vsel %vm1106_vm1, %v3257_v22, %v3261_v15  ;;  %v14732_v22 = vld [vmem:[%s20337_s5 + $0xd0] sm:$0xff] }
 0x1ca   : > { %v16897_v0 = vadd.f32 %v2537_v37, %v2347_v34  ;;  %v3265_v34 = vor.u32 %v3263_v18, %v3261_v15  ;;  %v14747_v15 = vld [vmem:[%s20337_s5 + $0x148] sm:$0xff]  ;;  %3809 = vmatpush.bf16.msrb.mxu0 %v14732_v22 }
 0x1cb   : > { %v2107_v30 = vpop.f32.mrf.mxu1  ;;  %2699 = vmatmul.bf16.gmra.mxu0 %v16470_v38  ;;  %v2133_v16 = vadd.f32 %v2102_v21, %v1973_v12  ;;  %v16916_v21 = vld [vmem:[#allocation2 + $0x70] sm:$0xff]  ;;  %4189 = vmatpush.bf16.msrb.mxu2 %v14747_v15 }
 0x1cc   : > { %3471 = vmatmul.bf16.gmra.mxu2 %v16833_v33  ;;  %v14740_v33 = vld [vmem:[%s20337_s5 + $0x110] sm:$0xff]  ;;  %v3267_v4 = vshll.u32 %v16916_v21, 16 }
 0x1cd   : > { %3613 = vmatmul.bf16.gmra.mxu3 %v3525_v20  ;;  %4030 = vmatpush.bf16.msrb.mxu1 %v14740_v33 }
 0x1ce   : > { %3371 = vmatmul.bf16.gmra.mxu1 %v3262_v1  ;;  %v3269_v12 = vrot.slane %v3267_v4, 1 }
 0x1cf   : > { %v2317_v38 = vpop.f32.mrf.mxu2 }
 0x1d0   : > { %v2348_v57 = vadd.f32 %v2317_v38, %v2133_v16  ;;  %v2540_v3 = vpop.f32.mrf.mxu3  ;;  %v1944_v17 = vpop.f32.mrf.mxu0  ;;  %v14762_v38 = vld [vmem:[%s20337_s5 + $0x188] sm:$0xff] }
 0x1d1   : > { %v1974_v2 = vadd.f32 %v1944_v17, %v16708_v11  ;;  %4403 = vmatpush.bf16.msrb.mxu3 %v14762_v38 }
 0x1d2   : > { %v16913_v10 = vadd.f32 %v2540_v3, %v2348_v57  ;;  %v3275_v3 = vshll.u32 %v16940_v28, 16 }
 0x1d3   : > { %v2109_v63 = vpop.f32.mrf.mxu1  ;;  %v2134_v60 = vadd.f32 %v2104_v26, %v1974_v2  ;;  %v3527_v26 = vsel %vm1406_vm0, %v3524_v59, %v3526_v19 }
 0x1d4   : > { %v3277_v18 = vrot.slane %v3275_v3, 1  ;;  %v3530_v3 = vrot.slane %v16940_v28, 1 }
 0x1d7   : > { %v2319_v14 = vpop.f32.mrf.mxu2 }
 0x1d8   : > { %v2349_v61 = vadd.f32 %v2319_v14, %v2134_v60  ;;  %v2542_v54 = vpop.f32.mrf.mxu3  ;;  %v1947_v37 = vpop.f32.mrf.mxu0  ;;  %v3528_v60 = vrot.slane %v16916_v21, 1  ;;  %v3271_v14 = vshrl.u32 %v16916_v21, 16 }
 0x1d9   : > { %v1975_v23 = vadd.f32 %v1947_v37, %v16725_v55  ;;  %v3270_v55 = vsel %vm1106_vm1, %v3265_v34, %v3269_v12 }
 0x1da   : > { %v16924_v11 = vadd.f32 %v2542_v54, %v2349_v61  ;;  %v3159_v61 = vld [vmem:[#allocation2 + $0x80] sm:$0x1]  ;;  %v3273_v37 = vor.u32 %v3271_v14, %v3269_v12 }
 0x1db   : > { %v2112_v42 = vpop.f32.mrf.mxu1  ;;  %2704 = vmatmul.bf16.gmra.mxu0 %v16474_v41  ;;  %v2135_v20 = vadd.f32 %v2107_v30, %v1975_v23  ;;  %v14731_v23 = vld [vmem:[%s20337_s5 + $0xc8] sm:$0xff]  ;;  %v3209_v15 = vunpack.c.l.b16 %v3159_v61 }
 0x1dc   : > { %3476 = vmatmul.bf16.gmra.mxu2 %v16859_v39  ;;  %v14739_v39 = vld [vmem:[%s20337_s5 + $0x108] sm:$0xff]  ;;  %3810 = vmatpush.bf16.msrb.mxu0 %v14731_v23 }
 0x1dd   : > { %3618 = vmatmul.bf16.gmra.mxu3 %v3527_v26  ;;  %4031 = vmatpush.bf16.msrb.mxu1 %v14739_v39  ;;  %v14746_v26 = vld [vmem:[%s20337_s5 + $0x140] sm:$0xff] }
 0x1de   : > { %3376 = vmatmul.bf16.gmra.mxu1 %v3270_v55  ;;  %4190 = vmatpush.bf16.msrb.mxu2 %v14746_v26 }
 0x1df   : > { %v2322_v41 = vpop.f32.mrf.mxu2 }
 0x1e0   : > { %v2350_v59 = vadd.f32 %v2322_v41, %v2135_v20  ;;  %v2545_v8 = vpop.f32.mrf.mxu3  ;;  %v1949_v1 = vpop.f32.mrf.mxu0  ;;  %v16967_v20 = vpack.c.b16 %v3209_v15, %v3209_v15  ;;  %v16995_v15 = vld [vmem:[#allocation2 + $0x50] sm:$0xff] }
 0x1e1   : > { %v1976_v30 = vadd.f32 %v1949_v1, %v16731_v43 }
 0x1e2   : > { %v16942_v16 = vadd.f32 %v2545_v8, %v2350_v59  ;;  %v14761_v59 = vld [vmem:[%s20337_s5 + $0x180] sm:$0xff]  ;;  %v3283_v1 = vshll.u32 %v16967_v20, 16 }
 0x1e3   : > { %v2114_v33 = vpop.f32.mrf.mxu1  ;;  %v2136_v57 = vadd.f32 %v2109_v63, %v1976_v30  ;;  %v3529_v63 = vsel %vm1406_vm0, %v3526_v19, %v3528_v60  ;;  %4404 = vmatpush.bf16.msrb.mxu3 %v14761_v59 }
 0x1e7   : > { %v2324_v17 = vpop.f32.mrf.mxu2 }
 0x1e8   : > { %v2351_v2 = vadd.f32 %v2324_v17, %v2136_v57  ;;  %v2547_v24 = vpop.f32.mrf.mxu3  ;;  %v1952_v43 = vpop.f32.mrf.mxu0  ;;  %v3655_v17 = vld [vmem:[#allocation2 + $0x48] sm:$0xe] }
 0x1e9   : > { %v1977_v54 = vadd.f32 %v1952_v43, %v16748_v29  ;;  %v3278_v29 = vsel %vm1106_vm1, %v3273_v37, %v3277_v18 }
 0x1ea   : > { %v16951_v4 = vadd.f32 %v2547_v24, %v2351_v2  ;;  %v16977_v2 = vld [vmem:[#allocation2 + $0x4c] sm:$0xf]  ;;  %v3279_v24 = vshrl.u32 %v16940_v28, 16 }
 0x1eb   : > { %v2117_v34 = vpop.f32.mrf.mxu1  ;;  %2709 = vmatmul.bf16.gmra.mxu0 %v16481_v40  ;;  %v2137_v22 = vadd.f32 %v2112_v42, %v1977_v54  ;;  %v3706_v23 = vunpack.c.l.b16 %v16977_v2  ;;  %v17047_v2 = vld [vmem:[%s20338_s6] ss:$0 sm:$0xff] }
 0x1ec   : > { %3481 = vmatmul.bf16.gmra.mxu2 %v16886_v49  ;;  %v14738_v49 = vld [vmem:[%s20337_s5 + $0x100] sm:$0xff]  ;;  %v3281_v37 = vor.u32 %v3279_v24, %v3277_v18 }
 0x1ed   : > { %3623 = vmatmul.bf16.gmra.mxu3 %v3529_v63  ;;  %4032 = vmatpush.bf16.msrb.mxu1 %v14738_v49  ;;  %v3705_v63 = vunpack.c.l.b16 %v3655_v17 }
 0x1ee   : > { %3381 = vmatmul.bf16.gmra.mxu1 %v3278_v29 }
 0x1ef   : > { %v2327_v40 = vpop.f32.mrf.mxu2 }
 0x1f0   : > { %v2352_v19 = vadd.f32 %v2327_v40, %v2137_v22  ;;  %v2550_v12 = vpop.f32.mrf.mxu3  ;;  %v1954_v39 = vpop.f32.mrf.mxu0  ;;  %v3531_v22 = vsel %vm1406_vm0, %v3528_v60, %v3530_v3  ;;  %v16999_v40 = vpack.c.b16 %v3706_v23, %v3705_v63  ;;  %v3898_v60 = vshrl.u32 %v16995_v15, 16 }
 0x1f1   : > { %v1978_v42 = vadd.f32 %v1954_v39, %v16754_v50  ;;  %v3285_v50 = vrot.slane %v3283_v1, 1 }
 0x1f2   : > { %v16969_v55 = vadd.f32 %v2550_v12, %v2352_v19  ;;  %v3901_v19 = vshll.u32 %v16995_v15, 16  ;;  %v3890_v59 = vshrl.u32 %v16999_v40, 16 }
 0x1f3   : > { %v2119_v41 = vpop.f32.mrf.mxu1  ;;  %v2138_v8 = vadd.f32 %v2114_v33, %v1978_v42  ;;  %v1002_v33 = vld [vmem:[#allocation3 + $0x8] sm:$0x3]  ;;  %v3286_v18 = vsel %vm1106_vm1, %v3281_v37, %v3285_v50 }
 0x1f4   : > { %v1003_v29 = vsel %vm16985_vm8, 0, %v1002_v33  ;;  %v3892_v17 = vrot.slane %v3890_v59, 1  ;;  %v3532_v33 = vrot.slane %v16967_v20, 1  ;;  %v17018_v20 = vld [vmem:[#allocation2 + $0x58] sm:$0xff] }
 0x1f5   : > { %1004 = vst [vmem:[#allocation3 + $0x8] sm:$0x3] %v1003_v29 }
 0x1f7   : > { %v2329_v30 = vpop.f32.mrf.mxu2 }
 0x1f8   : > { %v2353_v38 = vadd.f32 %v2329_v30, %v2138_v8  ;;  %v2552_v57 = vpop.f32.mrf.mxu3  ;;  %v1957_v43 = vpop.f32.mrf.mxu0  ;;  %v3893_v8 = vshll.u32 %v16999_v40, 16  ;;  %v3900_v30 = vrot.slane %v3898_v60, 1  ;;  %v3907_v60 = vshrl.u32 %v17018_v20, 16 }
 0x1f9   : > { %v1979_v61 = vadd.f32 %v1957_v43, %v16777_v13 }
 0x1fa   : > { %v16980_v14 = vadd.f32 %v2552_v57, %v2353_v38  ;;  %v3903_v38 = vrot.slane %v3901_v19, 2  ;;  %v3895_v24 = vrot.slane %v3893_v8, 2  ;;  %v3910_v19 = vshll.u32 %v17018_v20, 16 }
 0x1fb   : > { %v2122_v54 = vpop.f32.mrf.mxu1  ;;  %2714 = vmatmul.bf16.gmra.mxu0 %v16484_v58  ;;  %v2139_v13 = vadd.f32 %v2117_v34, %v1979_v61 }
 0x1fc   : > { %3486 = vmatmul.bf16.gmra.mxu2 %v16916_v21  ;;  %v3904_v61 = vor.u32 %v3903_v38, %v3900_v30  ;;  %v3896_v29 = vor.u32 %v3895_v24, %v3892_v17  ;;  %v3909_v38 = vrot.slane %v3907_v60, 1  ;;  %v14792_v17 = vld [vmem:[%s20337_s5 + $0x38] sm:$0xff]  ;;  %v14783_v60 = vld [vmem:[%s20337_s5 + $0x230] sm:$0xff] }
 0x1fd   : > { %3628 = vmatmul.bf16.gmra.mxu3 %v3531_v22 }
 0x1fe   : > { %3386 = vmatmul.bf16.gmra.mxu1 %v3286_v18  ;;  %v3905_v18 = vsel %vm1781_vm3, %v3896_v29, %v3904_v61  ;;  %5406 = vmatpush.bf16.msra.mxu3 %v14792_v17 }
 0x1ff   : > { %v2332_v49 = vpop.f32.mrf.mxu2 }
 0x200   : > { %v2354_v21 = vadd.f32 %v2332_v49, %v2139_v13  ;;  %v2555_v58 = vpop.f32.mrf.mxu3  ;;  %v1959_v34 = vpop.f32.mrf.mxu0  ;;  %v4090_v49 = vld [vmem:[#allocation2 + $0x48] sm:$0xc] }
 0x201   : > { %v1980_v39 = vadd.f32 %v1959_v34, %v16785_v7 }
 0x202   : > { %v17003_v12 = vadd.f32 %v2555_v58, %v2354_v21  ;;  %v4108_v58 = vunpack.c.l.b16 %v4090_v49 }
 0x203   : > { %v2124_v42 = vpop.f32.mrf.mxu1  ;;  %v2140_v1 = vadd.f32 %v2119_v41, %v1980_v39  ;;  %v3533_v41 = vsel %vm1406_vm0, %v3530_v3, %v3532_v33 }
 0x204   : > { %v4109_v30 = vpack.c.b16 %v3706_v23, %v4108_v58  ;;  %v14799_v58 = vld [vmem:[%s20337_s5 + $0x70] sm:$0xff] }
 0x206   : > { %v4110_v23 = vrot.slane %v4109_v30, 2 }
 0x207   : > { %v2334_v57 = vpop.f32.mrf.mxu2 }
 0x208   : > { %v2355_v50 = vadd.f32 %v2334_v57, %v2140_v1  ;;  %v2557_v43 = vpop.f32.mrf.mxu3  ;;  %v1962_v63 = vpop.f32.mrf.mxu0  ;;  %v3912_v57 = vrot.slane %v3910_v19, 2 }
 0x209   : > { %v1981_v7 = vadd.f32 %v1962_v63, %v16803_v51  ;;  %v14730_v51 = vld [vmem:[%s20337_s5 + $0xc0] sm:$0xff] }
 0x20a   : > { %v17009_v37 = vadd.f32 %v2557_v43, %v2355_v50  ;;  %3811 = vmatpush.bf16.msrb.mxu0 %v14730_v51  ;;  %v4111_v50 = vrot.slane %v16995_v15, 2  ;;  %v3732_v43 = vrot.slane %v16995_v15, 1  ;;  %v17061_v51 = vld [vmem:[%s20339_s7] ss:$0 sm:$0xff] }
 0x20b   : > { %v17012_v22 = vpop.f32.mrf.mxu1  ;;  %2719 = vmatmul.bf16.gmra.mxu0 %v16491_v5  ;;  %v2141_v13 = vadd.f32 %v2122_v54, %v1981_v7  ;;  %v14784_v5 = vld [vmem:[%s20337_s5 + $0x238] sm:$0xff]  ;;  %v17050_v7 = vor.u32 %v3912_v57, %v3909_v38  ;;  %v2816_v57 = vpop.permute.xlu2 %2815 }
 0x20c   : > { %3491 = vmatmul.bf16.gmra.mxu2 %v16940_v28  ;;  %v14800_v28 = vld [vmem:[%s20337_s5 + $0x78] sm:$0xff]  ;;  %4776 = vmatpush.bf16.msra.mxu1 %v14784_v5 }
 0x20d   : > { %3633 = vmatmul.bf16.gmra.mxu3 %v3533_v41  ;;  %5334 = vmatpush.bf16.msra.mxu2 %v14800_v28  ;;  %v3914_v5 = vsel %vm1781_vm3, %v3904_v61, %v17050_v7 }
 0x20e   : > { %4033 = vmatmul.bf16.vlgmr.msrb.gmra.mxu1 %v3905_v18 }
 0x20f   : > { %v2337_v21 = vpop.f32.mrf.mxu2 }
 0x210   : > { %v2356_v3 = vadd.f32 %v2337_v21, %v2141_v13  ;;  %v2560_v54 = vpop.f32.mrf.mxu3  ;;  %v1964_v39 = vpop.f32.mrf.mxu0  ;;  %v17054_v13 = vld [vmem:[#allocation2 + $0x58] sm:$0xff]  ;;  %4777 = vmatpush.bf16.msra.mxu1 %v14783_v60  ;;  %v17105_v60 = vld [vmem:[#allocation2 + $0x60] sm:$0xff] }
 0x211   : > { %v1982_v59 = vadd.f32 %v1964_v39, %v16814_v62  ;;  %v4324_v62 = vrot.slane %v16542_v44, 2  ;;  %v4325_v18 = vrot.slane %v17054_v13, 2  ;;  %5335 = vmatpush.bf16.msra.mxu2 %v14799_v58  ;;  %v14775_v13 = vld [vmem:[%s20337_s5 + $0x1f0] sm:$0xff] }
 0x212   : > { %v17031_v34 = vadd.f32 %v2560_v54, %v2356_v3  ;;  %v17077_v3 = vld [vmem:[#allocation2 + $0x60] sm:$0xff]  ;;  %v14776_v54 = vld [vmem:[%s20337_s5 + $0x1f8] sm:$0xff] }
 0x213   : > { %v17034_v8 = vpop.f32.mrf.mxu1  ;;  %v2142_v1 = vadd.f32 %v2124_v42, %v1982_v59  ;;  %v3731_v42 = vrot.slane %v16999_v40, 1  ;;  %v4112_v40 = vsel %vm2004_vm2, %v4110_v23, %v4111_v50  ;;  %4618 = vmatpush.bf16.msra.mxu0 %v14776_v54  ;;  %v3916_v30 = vshrl.u32 %v17077_v3, 16 }
 0x214   : > { %v3919_v38 = vshll.u32 %v17077_v3, 16 }
 0x215   : > { %v3733_v49 = vsel %vm1406_vm0, %v3731_v42, %v3732_v43  ;;  %v3918_v42 = vrot.slane %v3916_v30, 1  ;;  %v2821_v30 = vpop.permute.xlu0 %2820 }
 0x217   : > { %v2339_v24 = vpop.f32.mrf.mxu2  ;;  %4619 = vmatpush.bf16.msra.mxu0 %v14775_v13 }
 0x218   : > { %v2357_v33 = vadd.f32 %v2339_v24, %v2142_v1  ;;  %v2562_v63 = vpop.f32.mrf.mxu3  ;;  %v2685_v41 = vpop.f32.mrf.mxu0 }
 0x219   : > { %v2725_v44 = vadd.f32 %v2685_v41, %v16830_v46  ;;  %v4326_v46 = vsel %vm2004_vm2, %v4324_v62, %v4325_v18  ;;  %v3921_v41 = vrot.slane %v3919_v38, 2 }
 0x21a   : > { %v17052_v29 = vadd.f32 %v2562_v63, %v2357_v33 }
 0x21b   : > { %v17069_v28 = vpop.f32.mrf.mxu1  ;;  %3812 = vmatmul.bf16.vlgmr.msrb.gmra.mxu0 %v3733_v49  ;;  %v2745_v21 = vmul.f32 %v17047_v2, %v2725_v44  ;;  %v4113_v44 = vrot.slane %v17018_v20, 2  ;;  %v14791_v49 = vld [vmem:[%s20337_s5 + $0x30] sm:$0xff] }
 0x21c   : > { %4191 = vmatmul.bf16.vlgmr.msrb.gmra.mxu2 %v4112_v40  ;;  %v3734_v40 = vrot.slane %v17018_v20, 1  ;;  %5407 = vmatpush.bf16.msra.mxu3 %v14791_v49  ;;  %v17135_v49 = vld [vmem:[#allocation2 + $0x68] sm:$0xff] }
 0x21d   : > { %4405 = vmatmul.bf16.vlgmr.msrb.gmra.mxu3 %v4326_v46  ;;  %v2765_v19 = vadd.f32 %v17061_v51, %v2745_v21 }
 0x21e   : > { %4038 = vmatmul.bf16.gmra.mxu1 %v3914_v5 }
 0x21f   : > { %v3457_v39 = vpop.f32.mrf.mxu2  ;;  %v2781_v1 = vmax.f32 %v2765_v19, 0.0  ;;  %v4327_v19 = vrot.slane %v17105_v60, 2  ;;  %v14774_v60 = vld [vmem:[%s20337_s5 + $0x1e8] sm:$0xff] }
 0x220   : > { %v3458_v61 = vadd.f32 %v3457_v39, %v17012_v22  ;;  %v3599_v59 = vpop.f32.mrf.mxu3  ;;  %v2687_v24 = vpop.f32.mrf.mxu0  ;;  %4620 = vmatpush.bf16.msra.mxu0 %v14774_v60 }
 0x221   : > { %v2893_v33 = vmul.f32 %v2816_v57, %v2781_v1  ;;  %v2726_v63 = vadd.f32 %v2687_v24, %v16841_v52  ;;  %v17108_v1 = vor.u32 %v3921_v41, %v3918_v42  ;;  %v3106_v57 = vld [vmem:[#allocation3 + $0x8] sm:$0xe]  ;;  %v3735_v42 = vsel %vm1406_vm0, %v3732_v43, %v3734_v40 }
 0x222   : > { %v17092_v17 = vadd.f32 %v3599_v59, %v3458_v61 }
 0x223   : > { %v17095_v62 = vpop.f32.mrf.mxu1  ;;  %v2909_v23 = vpack.c.bf16 %v2893_v33, %v2893_v33  ;;  %v2746_v22 = vmul.f32 %v17047_v2, %v2726_v63  ;;  %v4114_v33 = vsel %vm2004_vm2, %v4111_v50, %v4113_v44  ;;  %v4328_v50 = vsel %vm2004_vm2, %v4325_v18, %v4327_v19  ;;  %v14798_v18 = vld [vmem:[%s20337_s5 + $0x68] sm:$0xff] }
 0x224   : > { %v3923_v43 = vsel %vm1781_vm3, %v17050_v7, %v17108_v1  ;;  %5336 = vmatpush.bf16.msra.mxu2 %v14798_v18 }
 0x225   : > { %v2928_v46 = vshrl.u32 %v2909_v23, 16  ;;  %v2931_v21 = vshll.u32 %v2909_v23, 16  ;;  %v2766_v52 = vadd.f32 %v17061_v51, %v2746_v22 }
 0x227   : > { %v3459_v5 = vpop.f32.mrf.mxu2  ;;  %v2930_v39 = vrot.slane %v2928_v46, 6  ;;  %v2933_v61 = vrot.slane %v2931_v21, 7  ;;  %v2782_v59 = vmax.f32 %v2766_v52, 0.0  ;;  %v14782_v21 = vld [vmem:[%s20337_s5 + $0x228] sm:$0xff] }
 0x228   : > { %v3460_v54 = vadd.f32 %v3459_v5, %v17034_v8  ;;  %v3601_v58 = vpop.f32.mrf.mxu3  ;;  %v2690_v8 = vpop.f32.mrf.mxu0  ;;  %4778 = vmatpush.bf16.msra.mxu1 %v14782_v21 }
 0x229   : > { %v2934_v63 = vor.u32 %v2933_v61, %v2930_v39  ;;  %v2894_v23 = vmul.f32 %v2821_v30, %v2782_v59  ;;  %v2727_v22 = vadd.f32 %v2690_v8, %v16861_v45  ;;  %v3925_v61 = vshrl.u32 %v17135_v49, 16 }
 0x22a   : > { %v17115_v24 = vadd.f32 %v3601_v58, %v3460_v54  ;;  %v3928_v8 = vshll.u32 %v17135_v49, 16 }
 0x22b   : > { %v17128_v41 = vpop.f32.mrf.mxu1  ;;  %3817 = vmatmul.bf16.gmra.mxu0 %v3735_v42  ;;  %v3107_v45 = vsel %vm17111_vm11, %v2934_v63, %v3106_v57  ;;  %v2910_v46 = vpack.c.bf16 %v2894_v23, %v2894_v23  ;;  %v2747_v15 = vmul.f32 %v17047_v2, %v2727_v22  ;;  %v2935_v42 = vrot.slane %v2934_v63, 4  ;;  %v14790_v63 = vld [vmem:[%s20337_s5 + $0x28] sm:$0xff] }
 0x22c   : > { %4196 = vmatmul.bf16.gmra.mxu2 %v4114_v33  ;;  %3108 = vst [vmem:[#allocation3 + $0x8] sm:$0xe] %v3107_v45  ;;  %v2826_v33 = vpop.permute.xlu1 %2825  ;;  %5408 = vmatpush.bf16.msra.mxu3 %v14790_v63 }
 0x22d   : > { %4410 = vmatmul.bf16.gmra.mxu3 %v4328_v50  ;;  %v2937_v52 = vshrl.u32 %v2910_v46, 16  ;;  %v2940_v5 = vshll.u32 %v2910_v46, 16  ;;  %v2767_v54 = vadd.f32 %v17061_v51, %v2747_v15 }
 0x22e   : > { %4043 = vmatmul.bf16.gmra.mxu1 %v3923_v43  ;;  %v3927_v43 = vrot.slane %v3925_v61, 1 }
 0x22f   : > { %v3462_v7 = vpop.f32.mrf.mxu2  ;;  %v2939_v59 = vrot.slane %v2937_v52, 6  ;;  %v2942_v30 = vrot.slane %v2940_v5, 7  ;;  %v2783_v57 = vmax.f32 %v2767_v54, 0.0  ;;  %v3930_v52 = vrot.slane %v3928_v8, 2 }
 0x230   : > { %v3463_v58 = vadd.f32 %v3462_v7, %v17069_v28  ;;  %v3604_v39 = vpop.f32.mrf.mxu3  ;;  %v2692_v28 = vpop.f32.mrf.mxu0  ;;  %v4115_v5 = vrot.slane %v17077_v3, 2  ;;  %v3736_v54 = vrot.slane %v17077_v3, 1 }
 0x231   : > { %v2943_v50 = vor.u32 %v2942_v30, %v2939_v59  ;;  %v2895_v45 = vmul.f32 %v2826_v33, %v2783_v57  ;;  %v2728_v46 = vadd.f32 %v2692_v28, %v16870_v47  ;;  %v17177_v30 = vld [vmem:[#allocation2 + $0x68] sm:$0xff] }
 0x232   : > { %v17162_v22 = vadd.f32 %v3604_v39, %v3463_v58  ;;  %v4329_v57 = vrot.slane %v17177_v30, 2  ;;  %v14773_v30 = vld [vmem:[%s20337_s5 + $0x1e0] sm:$0xff] }
 0x233   : > { %v17165_v15 = vpop.f32.mrf.mxu1  ;;  %v2944_v13 = vsel %vm17158_vm13, %v2935_v42, %v2943_v50  ;;  %v2911_v18 = vpack.c.bf16 %v2895_v45, %v2895_v45  ;;  %v2748_v21 = vmul.f32 %v17047_v2, %v2728_v46  ;;  %v17180_v42 = vor.u32 %v3930_v52, %v3927_v43  ;;  %v2831_v45 = vpop.permute.xlu2 %2830  ;;  %4621 = vmatpush.bf16.msra.mxu0 %v14773_v30 }
 0x234   : > { %3109 = vst [vmem:[#allocation3 + $0xc] sm:$0xf] %v2944_v13 }
 0x235   : > { %v2947_v47 = vshrl.u32 %v2911_v18, 16  ;;  %v2950_v7 = vshll.u32 %v2911_v18, 16  ;;  %v2768_v58 = vadd.f32 %v17061_v51, %v2748_v21  ;;  %v3737_v18 = vsel %vm1406_vm0, %v3734_v40, %v3736_v54 }
 0x236   : > { %v2945_v21 = vrot.slane %v2943_v50, 4 }
 0x237   : > { %v3464_v39 = vpop.f32.mrf.mxu2  ;;  %v2949_v8 = vrot.slane %v2947_v47, 6  ;;  %v2952_v33 = vrot.slane %v2950_v7, 7  ;;  %v2784_v28 = vmax.f32 %v2768_v58, 0.0  ;;  %v17202_v7 = vld [vmem:[#allocation2 + $0x70] sm:$0xff]  ;;  %v14781_v58 = vld [vmem:[%s20337_s5 + $0x220] sm:$0xff] }
 0x238   : > { %v3465_v61 = vadd.f32 %v3464_v39, %v17095_v62  ;;  %v3606_v59 = vpop.f32.mrf.mxu3  ;;  %v2695_v13 = vpop.f32.mrf.mxu0  ;;  %v4116_v62 = vsel %vm2004_vm2, %v4113_v44, %v4115_v5  ;;  %v4330_v44 = vsel %vm2004_vm2, %v4327_v19, %v4329_v57  ;;  %v14797_v19 = vld [vmem:[%s20337_s5 + $0x60] sm:$0xff]  ;;  %4779 = vmatpush.bf16.msra.mxu1 %v14781_v58 }
 0x239   : > { %v2953_v63 = vor.u32 %v2952_v33, %v2949_v8  ;;  %v2896_v43 = vmul.f32 %v2831_v45, %v2784_v28  ;;  %v2729_v52 = vadd.f32 %v2695_v13, %v16888_v25  ;;  %v3932_v25 = vsel %vm1781_vm3, %v17108_v1, %v17180_v42  ;;  %5337 = vmatpush.bf16.msra.mxu2 %v14797_v19 }
 0x23a   : > { %v17182_v46 = vadd.f32 %v3606_v59, %v3465_v61  ;;  %v3934_v28 = vshrl.u32 %v17202_v7, 16 }
 0x23b   : > { %v17195_v47 = vpop.f32.mrf.mxu1  ;;  %3822 = vmatmul.bf16.gmra.mxu0 %v3737_v18  ;;  %v2954_v20 = vsel %vm17158_vm13, %v2945_v21, %v2953_v63  ;;  %v2912_v40 = vpack.c.bf16 %v2896_v43, %v2896_v43  ;;  %v2749_v50 = vmul.f32 %v17047_v2, %v2729_v52  ;;  %v3937_v18 = vshll.u32 %v17202_v7, 16  ;;  %v2836_v21 = vpop.permute.xlu0 %2835 }
 0x23c   : > { %4201 = vmatmul.bf16.gmra.mxu2 %v4116_v62  ;;  %3110 = vst [vmem:[#allocation3 + $0x10] sm:$0xf] %v2954_v20 }
 0x23d   : > { %4415 = vmatmul.bf16.gmra.mxu3 %v4330_v44  ;;  %v2957_v39 = vshrl.u32 %v2912_v40, 16  ;;  %v2960_v61 = vshll.u32 %v2912_v40, 16  ;;  %v2769_v59 = vadd.f32 %v17061_v51, %v2749_v50  ;;  %v2955_v44 = vrot.slane %v2953_v63, 4  ;;  %v14789_v63 = vld [vmem:[%s20337_s5 + $0x20] sm:$0xff] }
 0x23e   : > { %4048 = vmatmul.bf16.gmra.mxu1 %v3932_v25  ;;  %v3936_v25 = vrot.slane %v3934_v28, 1  ;;  %5409 = vmatpush.bf16.msra.mxu3 %v14789_v63 }
 0x23f   : > { %v3467_v8 = vpop.f32.mrf.mxu2  ;;  %v2959_v45 = vrot.slane %v2957_v39, 6  ;;  %v2962_v13 = vrot.slane %v2960_v61, 7  ;;  %v2785_v62 = vmax.f32 %v2769_v59, 0.0  ;;  %v3939_v39 = vrot.slane %v3937_v18, 2 }
 0x240   : > { %v3468_v1 = vadd.f32 %v3467_v8, %v17128_v41  ;;  %v3609_v33 = vpop.f32.mrf.mxu3  ;;  %v2697_v52 = vpop.f32.mrf.mxu0  ;;  %v4117_v61 = vrot.slane %v17135_v49, 2  ;;  %v3738_v59 = vrot.slane %v17135_v49, 1 }
 0x241   : > { %v2963_v20 = vor.u32 %v2962_v13, %v2959_v45  ;;  %v2897_v40 = vmul.f32 %v2836_v21, %v2785_v62  ;;  %v2730_v41 = vadd.f32 %v2697_v52, %v16897_v0  ;;  %v17238_v13 = vld [vmem:[#allocation2 + $0x70] sm:$0xff] }
 0x242   : > { %v17223_v43 = vadd.f32 %v3609_v33, %v3468_v1  ;;  %v4331_v62 = vrot.slane %v17238_v13, 2  ;;  %v14772_v13 = vld [vmem:[%s20337_s5 + $0x1d8] sm:$0xff] }
 0x243   : > { %v17226_v50 = vpop.f32.mrf.mxu1  ;;  %v2964_v60 = vsel %vm17158_vm13, %v2955_v44, %v2963_v20  ;;  %v2913_v19 = vpack.c.bf16 %v2897_v40, %v2897_v40  ;;  %v2750_v58 = vmul.f32 %v17047_v2, %v2730_v41  ;;  %v17241_v44 = vor.u32 %v3939_v39, %v3936_v25  ;;  %v2841_v40 = vpop.permute.xlu1 %2840  ;;  %4622 = vmatpush.bf16.msra.mxu0 %v14772_v13 }
 0x244   : > { %3111 = vst [vmem:[#allocation3 + $0x14] sm:$0xf] %v2964_v60 }
 0x245   : > { %v2967_v0 = vshrl.u32 %v2913_v19, 16  ;;  %v2970_v8 = vshll.u32 %v2913_v19, 16  ;;  %v2770_v1 = vadd.f32 %v17061_v51, %v2750_v58  ;;  %v3739_v19 = vsel %vm1406_vm0, %v3736_v54, %v3738_v59 }
 0x246   : > { %v2965_v58 = vrot.slane %v2963_v20, 4 }
 0x247   : > { %v3469_v33 = vpop.f32.mrf.mxu2  ;;  %v2969_v18 = vrot.slane %v2967_v0, 6  ;;  %v2972_v21 = vrot.slane %v2970_v8, 7  ;;  %v2786_v52 = vmax.f32 %v2770_v1, 0.0  ;;  %v17263_v8 = vld [vmem:[#allocation2 + $0x78] sm:$0xff] }
 0x248   : > { %v3470_v28 = vadd.f32 %v3469_v33, %v17165_v15  ;;  %v3611_v45 = vpop.f32.mrf.mxu3  ;;  %v2700_v60 = vpop.f32.mrf.mxu0  ;;  %v4118_v15 = vsel %vm2004_vm2, %v4115_v5, %v4117_v61  ;;  %v4332_v5 = vsel %vm2004_vm2, %v4329_v57, %v4331_v62  ;;  %v14796_v57 = vld [vmem:[%s20337_s5 + $0x58] sm:$0xff] }
 0x249   : > { %v2973_v63 = vor.u32 %v2972_v21, %v2969_v18  ;;  %v2898_v25 = vmul.f32 %v2841_v40, %v2786_v52  ;;  %v2731_v39 = vadd.f32 %v2700_v60, %v16913_v10  ;;  %v3941_v10 = vsel %vm1781_vm3, %v17180_v42, %v17241_v44  ;;  %v14780_v1 = vld [vmem:[%s20337_s5 + $0x218] sm:$0xff]  ;;  %5338 = vmatpush.bf16.msra.mxu2 %v14796_v57 }
 0x24a   : > { %v17243_v41 = vadd.f32 %v3611_v45, %v3470_v28  ;;  %v3943_v52 = vshrl.u32 %v17263_v8, 16  ;;  %4780 = vmatpush.bf16.msra.mxu1 %v14780_v1 }
 0x24b   : > { %v17256_v0 = vpop.f32.mrf.mxu1  ;;  %3827 = vmatmul.bf16.gmra.mxu0 %v3739_v19  ;;  %v2974_v3 = vsel %vm17158_vm13, %v2965_v58, %v2973_v63  ;;  %v2914_v54 = vpack.c.bf16 %v2898_v25, %v2898_v25  ;;  %v2751_v20 = vmul.f32 %v17047_v2, %v2731_v39  ;;  %v3946_v19 = vshll.u32 %v17263_v8, 16  ;;  %v2846_v58 = vpop.permute.xlu2 %2845 }
 0x24c   : > { %4206 = vmatmul.bf16.gmra.mxu2 %v4118_v15  ;;  %3112 = vst [vmem:[#allocation3 + $0x18] sm:$0xf] %v2974_v3 }
 0x24d   : > { %4420 = vmatmul.bf16.gmra.mxu3 %v4332_v5  ;;  %v2977_v33 = vshrl.u32 %v2914_v54, 16  ;;  %v2980_v28 = vshll.u32 %v2914_v54, 16  ;;  %v2771_v45 = vadd.f32 %v17061_v51, %v2751_v20  ;;  %v2975_v5 = vrot.slane %v2973_v63, 4  ;;  %v14788_v63 = vld [vmem:[%s20337_s5 + $0x18] sm:$0xff] }
 0x24e   : > { %4053 = vmatmul.bf16.gmra.mxu1 %v3941_v10  ;;  %v3945_v10 = vrot.slane %v3943_v52, 1  ;;  %5410 = vmatpush.bf16.msra.mxu3 %v14788_v63 }
 0x24f   : > { %v3472_v18 = vpop.f32.mrf.mxu2  ;;  %v2979_v40 = vrot.slane %v2977_v33, 6  ;;  %v2982_v60 = vrot.slane %v2980_v28, 7  ;;  %v2787_v15 = vmax.f32 %v2771_v45, 0.0  ;;  %v3948_v33 = vrot.slane %v3946_v19, 2 }
 0x250   : > { %v3473_v42 = vadd.f32 %v3472_v18, %v17195_v47  ;;  %v3614_v21 = vpop.f32.mrf.mxu3  ;;  %v2702_v39 = vpop.f32.mrf.mxu0  ;;  %v4119_v28 = vrot.slane %v17202_v7, 2  ;;  %v3740_v45 = vrot.slane %v17202_v7, 1 }
 0x251   : > { %v2983_v3 = vor.u32 %v2982_v60, %v2979_v40  ;;  %v2899_v54 = vmul.f32 %v2846_v58, %v2787_v15  ;;  %v2732_v47 = vadd.f32 %v2702_v39, %v16924_v11  ;;  %v17299_v60 = vld [vmem:[#allocation2 + $0x78] sm:$0xff] }
 0x252   : > { %v17284_v25 = vadd.f32 %v3614_v21, %v3473_v42  ;;  %v20352_v15 = vrot.slane %v17299_v60, 2 }
 0x253   : > { %v17287_v20 = vpop.f32.mrf.mxu1  ;;  %v2984_v30 = vsel %vm17158_vm13, %v2975_v5, %v2983_v3  ;;  %v2915_v57 = vpack.c.bf16 %v2899_v54, %v2899_v54  ;;  %v2752_v1 = vmul.f32 %v17047_v2, %v2732_v47  ;;  %v17302_v5 = vor.u32 %v3948_v33, %v3945_v10  ;;  %v2851_v54 = vpop.permute.xlu0 %2850 }
 0x254   : > { %3113 = vst [vmem:[#allocation3 + $0x1c] sm:$0xf] %v2984_v30 }
 0x255   : > { %v2987_v11 = vshrl.u32 %v2915_v57, 16  ;;  %v2990_v18 = vshll.u32 %v2915_v57, 16  ;;  %v2772_v42 = vadd.f32 %v17061_v51, %v2752_v1  ;;  %v3741_v57 = vsel %vm1406_vm0, %v3738_v59, %v3740_v45 }
 0x256   : > { %v2985_v1 = vrot.slane %v2983_v3, 4 }
 0x257   : > { %v3474_v21 = vpop.f32.mrf.mxu2  ;;  %v2989_v19 = vrot.slane %v2987_v11, 6  ;;  %v2992_v58 = vrot.slane %v2990_v18, 7  ;;  %v2788_v39 = vmax.f32 %v2772_v42, 0.0  ;;  %v17324_v18 = vld [vmem:[#allocation2 + $0x80] sm:$0xff]  ;;  %v14779_v42 = vld [vmem:[%s20337_s5 + $0x210] sm:$0xff] }
 0x258   : > { %v3475_v52 = vadd.f32 %v3474_v21, %v17226_v50  ;;  %v3616_v40 = vpop.f32.mrf.mxu3  ;;  %v2705_v30 = vpop.f32.mrf.mxu0  ;;  %v4120_v50 = vsel %vm2004_vm2, %v4117_v61, %v4119_v28  ;;  %v4334_v61 = vsel %vm2004_vm2, %v4331_v62, %v20352_v15  ;;  %v14795_v62 = vld [vmem:[%s20337_s5 + $0x50] sm:$0xff]  ;;  %4781 = vmatpush.bf16.msra.mxu1 %v14779_v42 }
 0x259   : > { %v2993_v63 = vor.u32 %v2992_v58, %v2989_v19  ;;  %v2900_v10 = vmul.f32 %v2851_v54, %v2788_v39  ;;  %v2733_v33 = vadd.f32 %v2705_v30, %v16942_v16  ;;  %v3950_v16 = vsel %vm1781_vm3, %v17241_v44, %v17302_v5  ;;  %5339 = vmatpush.bf16.msra.mxu2 %v14795_v62 }
 0x25a   : > { %v17304_v47 = vadd.f32 %v3616_v40, %v3475_v52  ;;  %v3952_v39 = vshrl.u32 %v17324_v18, 16 }
 0x25b   : > { %v17317_v11 = vpop.f32.mrf.mxu1  ;;  %3832 = vmatmul.bf16.gmra.mxu0 %v3741_v57  ;;  %v2994_v49 = vsel %vm17158_vm13, %v2985_v1, %v2993_v63  ;;  %v2916_v59 = vpack.c.bf16 %v2900_v10, %v2900_v10  ;;  %v2753_v3 = vmul.f32 %v17047_v2, %v2733_v33  ;;  %v3955_v57 = vshll.u32 %v17324_v18, 16  ;;  %v2856_v1 = vpop.permute.xlu1 %2855 }
 0x25c   : > { %4211 = vmatmul.bf16.gmra.mxu2 %v4120_v50  ;;  %3114 = vst [vmem:[#allocation3 + $0x20] sm:$0xf] %v2994_v49 }
 0x25d   : > { %4425 = vmatmul.bf16.gmra.mxu3 %v4334_v61  ;;  %v2997_v21 = vshrl.u32 %v2916_v59, 16  ;;  %v3000_v52 = vshll.u32 %v2916_v59, 16  ;;  %v2773_v40 = vadd.f32 %v17061_v51, %v2753_v3  ;;  %v2995_v61 = vrot.slane %v2993_v63, 4 }
 0x25e   : > { %4058 = vmatmul.bf16.gmra.mxu1 %v3950_v16  ;;  %v3954_v16 = vrot.slane %v3952_v39, 1  ;;  %v3742_v63 = vrot.slane %v17263_v8, 1 }
 0x25f   : > { %v3477_v19 = vpop.f32.mrf.mxu2  ;;  %v2999_v54 = vrot.slane %v2997_v21, 6  ;;  %v3002_v30 = vrot.slane %v3000_v52, 7  ;;  %v2789_v50 = vmax.f32 %v2773_v40, 0.0  ;;  %v3957_v21 = vrot.slane %v3955_v57, 2  ;;  %v3869_v52 = vld [vmem:[#allocation2 + $0x88] sm:$0x3] }
 0x260   : > { %v3478_v44 = vadd.f32 %v3477_v19, %v17256_v0  ;;  %v3619_v58 = vpop.f32.mrf.mxu3  ;;  %v2707_v33 = vpop.f32.mrf.mxu0  ;;  %v4121_v40 = vrot.slane %v17263_v8, 2 }
 0x261   : > { %v3003_v49 = vor.u32 %v3002_v30, %v2999_v54  ;;  %v2901_v59 = vmul.f32 %v2856_v1, %v2789_v50  ;;  %v2734_v0 = vadd.f32 %v2707_v33, %v16951_v4  ;;  %v14787_v4 = vld [vmem:[%s20337_s5 + $0x10] sm:$0xff]  ;;  %v17360_v50 = vld [vmem:[#allocation2 + $0x80] sm:$0xff]  ;;  %v3887_v1 = vunpack.c.l.b16 %v3869_v52 }
 0x262   : > { %v17345_v10 = vadd.f32 %v3619_v58, %v3478_v44  ;;  %v20353_v57 = vrot.slane %v17360_v50, 2  ;;  %5411 = vmatpush.bf16.msra.mxu3 %v14787_v4 }
 0x263   : > { %v17348_v3 = vpop.f32.mrf.mxu1  ;;  %v3004_v13 = vsel %vm17158_vm13, %v2995_v61, %v3003_v49  ;;  %v2917_v62 = vpack.c.bf16 %v2901_v59, %v2901_v59  ;;  %v2754_v42 = vmul.f32 %v17047_v2, %v2734_v0  ;;  %v17363_v0 = vor.u32 %v3957_v21, %v3954_v16 }
 0x264   : > { %3115 = vst [vmem:[#allocation3 + $0x24] sm:$0xf] %v3004_v13  ;;  %v2861_v13 = vpop.permute.xlu2 %2860  ;;  %v3005_v52 = vrot.slane %v3003_v49, 4 }
 0x265   : > { %v3007_v19 = vshrl.u32 %v2917_v62, 16  ;;  %v3010_v44 = vshll.u32 %v2917_v62, 16  ;;  %v2774_v58 = vadd.f32 %v17061_v51, %v2754_v42  ;;  %v3743_v42 = vsel %vm1406_vm0, %v3740_v45, %v3742_v63 }
 0x267   : > { %v3479_v39 = vpop.f32.mrf.mxu2  ;;  %v3009_v33 = vrot.slane %v3007_v19, 6  ;;  %v3012_v61 = vrot.slane %v3010_v44, 7  ;;  %v2790_v59 = vmax.f32 %v2774_v58, 0.0  ;;  %v20379_v44 = vrot.slane %v17299_v60, 2  ;;  %v14771_v60 = vld [vmem:[%s20337_s5 + $0x1d0] sm:$0xff] }
 0x268   : > { %v3480_v54 = vadd.f32 %v3479_v39, %v17287_v20  ;;  %v3621_v30 = vpop.f32.mrf.mxu3  ;;  %v2710_v62 = vpop.f32.mrf.mxu0  ;;  %v4122_v20 = vsel %vm2004_vm2, %v4119_v28, %v4121_v40  ;;  %v17385_v58 = vpack.c.b16 %v3887_v1, %v3887_v1  ;;  %v14794_v39 = vld [vmem:[%s20337_s5 + $0x48] sm:$0xff]  ;;  %4623 = vmatpush.bf16.msra.mxu0 %v14771_v60 }
 0x269   : > { %v3013_v4 = vor.u32 %v3012_v61, %v3009_v33  ;;  %v2902_v16 = vmul.f32 %v2861_v13, %v2790_v59  ;;  %v2735_v21 = vadd.f32 %v2710_v62, %v16969_v55  ;;  %v4336_v28 = vsel %vm2004_vm2, %v20379_v44, %v20353_v57  ;;  %5340 = vmatpush.bf16.msra.mxu2 %v14794_v39 }
 0x26a   : > { %v17365_v15 = vadd.f32 %v3621_v30, %v3480_v54  ;;  %v3959_v55 = vsel %vm1781_vm3, %v17302_v5, %v17363_v0  ;;  %v14778_v54 = vld [vmem:[%s20337_s5 + $0x208] sm:$0xff]  ;;  %v3961_v13 = vshrl.u32 %v17385_v58, 16 }
 0x26b   : > { %v17378_v19 = vpop.f32.mrf.mxu1  ;;  %3837 = vmatmul.bf16.gmra.mxu0 %v3743_v42  ;;  %v3014_v7 = vsel %vm17158_vm13, %v3005_v52, %v3013_v4  ;;  %v2918_v45 = vpack.c.bf16 %v2902_v16, %v2902_v16  ;;  %v2755_v49 = vmul.f32 %v17047_v2, %v2735_v21  ;;  %4782 = vmatpush.bf16.msra.mxu1 %v14778_v54  ;;  %v3964_v52 = vshll.u32 %v17385_v58, 16  ;;  %v2866_v16 = vpop.permute.xlu0 %2865 }
 0x26c   : > { %4216 = vmatmul.bf16.gmra.mxu2 %v4122_v20  ;;  %3116 = vst [vmem:[#allocation3 + $0x28] sm:$0xf] %v3014_v7 }
 0x26d   : > { %4430 = vmatmul.bf16.gmra.mxu3 %v4336_v28  ;;  %v3017_v30 = vshrl.u32 %v2918_v45, 16  ;;  %v3020_v1 = vshll.u32 %v2918_v45, 16  ;;  %v2775_v33 = vadd.f32 %v17061_v51, %v2755_v49  ;;  %v3015_v28 = vrot.slane %v3013_v4, 4  ;;  %v14786_v4 = vld [vmem:[%s20337_s5 + $0x8] sm:$0xff] }
 0x26e   : > { %4063 = vmatmul.bf16.gmra.mxu1 %v3959_v55  ;;  %v3963_v55 = vrot.slane %v3961_v13, 1  ;;  %5412 = vmatpush.bf16.msra.mxu3 %v14786_v4 }
 0x26f   : > { %v3482_v61 = vpop.f32.mrf.mxu2  ;;  %v3019_v62 = vrot.slane %v3017_v30, 6  ;;  %v3022_v20 = vrot.slane %v3020_v1, 7  ;;  %v2791_v42 = vmax.f32 %v2775_v33, 0.0  ;;  %v3966_v30 = vrot.slane %v3964_v52, 2  ;;  %v3671_v52 = vld [vmem:[#allocation2 + $0x88] sm:$0x1] }
 0x270   : > { %v3483_v5 = vadd.f32 %v3482_v61, %v17317_v11  ;;  %v3624_v59 = vpop.f32.mrf.mxu3  ;;  %v2712_v44 = vpop.f32.mrf.mxu0  ;;  %v4123_v1 = vrot.slane %v17324_v18, 2  ;;  %v3744_v33 = vrot.slane %v17324_v18, 1  ;;  %v3721_v8 = vunpack.c.l.b16 %v3671_v52  ;;  %v14793_v52 = vld [vmem:[%s20337_s5 + $0x40] sm:$0xff] }
 0x271   : > { %v3023_v7 = vor.u32 %v3022_v20, %v3019_v62  ;;  %v2903_v45 = vmul.f32 %v2866_v16, %v2791_v42  ;;  %v2736_v11 = vadd.f32 %v2712_v44, %v16980_v14  ;;  %v17421_v20 = vld [vmem:[#allocation2 + $0x88] sm:$0xff]  ;;  %5341 = vmatpush.bf16.msra.mxu2 %v14793_v52 }
 0x272   : > { %v17406_v21 = vadd.f32 %v3624_v59, %v3483_v5  ;;  %v20354_v42 = vrot.slane %v17421_v20, 2  ;;  %v17473_v52 = vld [vmem:[#allocation2 + $0x88] sm:$0xf]  }
 0x273   : > { %v17409_v49 = vpop.f32.mrf.mxu1  ;;  %v3024_v60 = vsel %vm17158_vm13, %v3015_v28, %v3023_v7  ;;  %v2919_v39 = vpack.c.bf16 %v2903_v45, %v2903_v45  ;;  %v2756_v54 = vmul.f32 %v17047_v2, %v2736_v11  ;;  %v3967_v45 = vor.u32 %v3966_v30, %v3963_v55  ;;  %v4264_v11 = vld [vmem:[#allocation2 + $0x90] sm:$0x3] }
 0x274   : > { %3117 = vst [vmem:[#allocation3 + $0x2c] sm:$0xf] %v3024_v60  ;;  %v2871_v60 = vpop.permute.xlu1 %2870  ;;  %v3025_v4 = vrot.slane %v3023_v7, 4 }
 0x275   : > { %v3027_v14 = vshrl.u32 %v2919_v39, 16  ;;  %v3030_v61 = vshll.u32 %v2919_v39, 16  ;;  %v2776_v5 = vadd.f32 %v17061_v51, %v2756_v54  ;;  %v3745_v54 = vsel %vm1406_vm0, %v3742_v63, %v3744_v33 }
 0x277   : > { %v3484_v59 = vpop.f32.mrf.mxu2  ;;  %v3029_v16 = vrot.slane %v3027_v14, 6  ;;  %v3032_v44 = vrot.slane %v3030_v61, 7  ;;  %v2792_v28 = vmax.f32 %v2776_v5, 0.0  ;;  %v17439_v5 = vld [vmem:[#allocation3 + $0xc] sm:$0xf] }
 0x278   : > { %v3485_v13 = vadd.f32 %v3484_v59, %v17348_v3  ;;  %v3626_v62 = vpop.f32.mrf.mxu3  ;;  %v2715_v39 = vpop.f32.mrf.mxu0  ;;  %v4124_v3 = vsel %vm2004_vm2, %v4121_v40, %v4123_v1  ;;  %v20380_v40 = vrot.slane %v17360_v50, 2  ;;  %v14770_v50 = vld [vmem:[%s20337_s5 + $0x1c8] sm:$0xff] }
 0x279   : > { %v3033_v14 = vor.u32 %v3032_v44, %v3029_v16  ;;  %v2904_v55 = vmul.f32 %v2871_v60, %v2792_v28  ;;  %v2737_v30 = vadd.f32 %v2715_v39, %v17003_v12  ;;  %v6821_v16 = vld [vmem:[#allocation3 + $0x8] sm:$0xe]  ;;  %v14777_v44 = vld [vmem:[%s20337_s5 + $0x200] sm:$0xff]  ;;  %v6873_v28 = vunpack.c.l.b16 %v17439_v5  ;;  %4624 = vmatpush.bf16.msra.mxu0 %v14770_v50 }
 0x27a   : > { %v17424_v57 = vadd.f32 %v3626_v62, %v3485_v13  ;;  %v4338_v59 = vsel %vm2004_vm2, %v20380_v40, %v20354_v42  ;;  %v4314_v13 = vunpack.c.l.b16 %v4264_v11  ;;  %v3968_v62 = vsel %vm1781_vm3, %v17363_v0, %v3967_v45  ;;  %4783 = vmatpush.bf16.msra.mxu1 %v14777_v44 }
 0x27b   : > { %v17437_v61 = vpop.f32.mrf.mxu1  ;;  %3842 = vmatmul.bf16.gmra.mxu0 %v3745_v54  ;;  %v3034_v63 = vsel %vm17158_vm13, %v3025_v4, %v3033_v14  ;;  %v2920_v7 = vpack.c.bf16 %v2904_v55, %v2904_v55  ;;  %v2757_v12 = vmul.f32 %v17047_v2, %v2737_v30  ;;  %v3730_v54 = vpack.c.b16 %v3721_v8, %v3721_v8 }
 0x27c   : > { %4221 = vmatmul.bf16.gmra.mxu2 %v4124_v3  ;;  %3118 = vst [vmem:[#allocation3 + $0x30] sm:$0xf] %v3034_v63  ;;  %v6872_v4 = vunpack.c.l.b16 %v6821_v16  ;;  %v2876_v63 = vpop.permute.xlu2 %2875  ;;  %v3035_v42 = vrot.slane %v3033_v14, 4  ;;  %v17471_v16 = vld [vmem:[#allocation2 + $0x88] sm:$0xff]   ;;  %v17478_v14 = vld [vmem:[#allocation3 + $0x10] sm:$0xff] }
 0x27d   : > { %4435 = vmatmul.bf16.gmra.mxu3 %v4338_v59  ;;  %v3037_v11 = vshrl.u32 %v2920_v7, 16  ;;  %v3040_v60 = vshll.u32 %v2920_v7, 16  ;;  %v2777_v0 = vadd.f32 %v17061_v51, %v2757_v12  ;;  %v4323_v59 = vpack.c.b16 %v4314_v13, %v4314_v13  ;;  %v7258_v13 = vld [vmem:[#allocation3 + $0x8] sm:$0xc] }
 0x27e   : > { %4068 = vmatmul.bf16.gmra.mxu1 %v3968_v62  ;;  %v4125_v7 = vrot.slane %v17385_v58, 2  ;;  %v17466_v12 = vpack.c.b16 %v6873_v28, %v6872_v4  ;;  %v3746_v44 = vrot.slane %v3730_v54, 1 }
 0x27f   : > { %v3487_v45 = vpop.f32.mrf.mxu2  ;;  %v3039_v55 = vrot.slane %v3037_v11, 6  ;;  %v3042_v30 = vrot.slane %v3040_v60, 7  ;;  %v2793_v40 = vmax.f32 %v2777_v0, 0.0  ;;  %v4339_v0 = vrot.slane %v4323_v59, 2  ;;  %v14785_v59 = vld [vmem:[%s20337_s5] sm:$0xff] }
 0x280   : > { %v3488_v39 = vadd.f32 %v3487_v45, %v17378_v19  ;;  %v3629_v3 = vpop.f32.mrf.mxu3  ;;  %v2717_v5 = vpop.f32.mrf.mxu0  ;;  %v4126_v54 = vsel %vm2004_vm2, %v4123_v1, %v4125_v7  ;;  %v7061_v1 = vshll.u32 %v17466_v12, 16  ;;  %5413 = vmatpush.bf16.msra.mxu3 %v14785_v59  ;;  %v20355_v59 = vrot.slane %v17478_v14, 2 }
 0x281   : > { %v3043_v19 = vor.u32 %v3042_v30, %v3039_v55  ;;  %v2905_v45 = vmul.f32 %v2876_v63, %v2793_v40  ;;  %v2738_v50 = vadd.f32 %v2717_v5, %v17009_v37  ;;  %v7058_v37 = vshrl.u32 %v17466_v12, 16  ;;  %v14808_v63 = vld [vmem:[%s20337_s5 + $0xb8] sm:$0xff] }
 0x282   : > { %v17463_v62 = vadd.f32 %v3629_v3, %v3488_v39  ;;  %v7277_v39 = vunpack.c.l.b16 %v7258_v13  ;;  %v2881_v13 = vpop.permute.xlu0 %2880  ;;  %5498 = vmatpush.bf16.msrb.mxu2 %v14808_v63 }
 0x283   : > { %v17469_v8 = vpop.f32.mrf.mxu1  ;;  %v3044_v11 = vsel %vm17158_vm13, %v3035_v42, %v3043_v19  ;;  %v2921_v60 = vpack.c.bf16 %v2905_v45, %v2905_v45  ;;  %v2758_v58 = vmul.f32 %v17047_v2, %v2738_v50  ;;  %v3747_v2 = vsel %vm1406_vm0, %v3744_v33, %v3746_v44  ;;  %v14883_v50 = vld [vmem:[%s20340_s8 + $0x78] sm:$0xff] }
 0x284   : > { %3119 = vst [vmem:[#allocation3 + $0x34] sm:$0xf] %v3044_v11  ;;  %v20381_v33 = vrot.slane %v17421_v20, 2  ;;  %v3045_v44 = vrot.slane %v3043_v19, 4  ;;  %v7066_v20 = vshrl.u32 %v17478_v14, 16  ;;  %v17516_v19 = vld [vmem:[#allocation2 + $0x80] sm:$0xff]   ;;  %6508 = vmatpush.bf16.msrb.mxu1 %v14883_v50 }
 0x285   : > { %v3047_v3 = vshrl.u32 %v2921_v60, 16  ;;  %v3050_v4 = vshll.u32 %v2921_v60, 16  ;;  %v2778_v55 = vadd.f32 %v17061_v51, %v2758_v58  ;;  %v14769_v51 = vld [vmem:[%s20337_s5 + $0x1c0] sm:$0xff]  ;;  %v7060_v58 = vrot.slane %v7058_v37, 1  ;;  %v14860_v37 = vld [vmem:[%s20337_s5 + $0x238] sm:$0xff] }
 0x286   : > { %v4340_v45 = vsel %vm2004_vm2, %v20381_v33, %v4339_v0  ;;  %4625 = vmatpush.bf16.msra.mxu0 %v14769_v51  ;;  %v15475_v50 = vld [vmem:[%s20339_s7] ss:$0 sm:$0xff] }
 0x287   : > { %v3489_v30 = vpop.f32.mrf.mxu2  ;;  %v3049_v5 = vrot.slane %v3047_v3, 6  ;;  %v3052_v7 = vrot.slane %v3050_v4, 7  ;;  %v2794_v18 = vmax.f32 %v2778_v55, 0.0  ;;  %v14807_v55 = vld [vmem:[%s20337_s5 + $0xb0] sm:$0xff] }
 0x288   : > { %v3490_v42 = vadd.f32 %v3489_v30, %v17409_v49  ;;  %v3631_v40 = vpop.f32.mrf.mxu3  ;;  %v7278_v49 = vpack.c.b16 %v6873_v28, %v7277_v39  ;;  %v2720_v60 = vpop.f32.mrf.mxu0  ;;  %v14818_v28 = vld [vmem:[%s20337_s5 + $0xf8] sm:$0xff]  ;;  %v7069_v30 = vshll.u32 %v17478_v14, 16  ;;  %5499 = vmatpush.bf16.msrb.mxu2 %v14807_v55 }
 0x289   : > { %v17511_v39 = vor.u32 %v3052_v7, %v3049_v5  ;;  %v2906_v0 = vmul.f32 %v2881_v13, %v2794_v18  ;;  %v2739_v3 = vadd.f32 %v2720_v60, %v17031_v34  ;;  %v7068_v34 = vrot.slane %v7066_v20, 1  ;;  %v15474_v5 = vld [vmem:[%s20338_s6] ss:$0 sm:$0xff]  ;;  %5604 = vmatpush.bf16.msrb.mxu3 %v14818_v28 }
 0x28a   : > { %v17505_v11 = vadd.f32 %v3631_v40, %v3490_v42  ;;  %v7063_v42 = vrot.slane %v7061_v1, 2  ;;  %v7279_v40 = vrot.slane %v7278_v49, 2  ;;  %v5272_v1 = vshll.u32 %v17516_v19, 16  ;;  %v14817_v49 = vld [vmem:[%s20337_s5 + $0xf0] sm:$0xff]  ;;  %6160 = vmatpush.bf16.msrb.mxu0 %v14860_v37 }
 0x28b   : > { %v17514_v4 = vpop.f32.mrf.mxu1  ;;  %3847 = vmatmul.bf16.gmra.mxu0 %v3747_v2  ;;  %v3054_v51 = vsel %vm17158_vm13, %v3045_v44, %v17511_v39  ;;  %v2922_v63 = vpack.c.bf16 %v2906_v0, %v2906_v0  ;;  %v14882_v2 = vld [vmem:[%s20340_s8 + $0x70] sm:$0xff]  ;;  %v7071_v7 = vrot.slane %v7069_v30, 2  ;;  %v14806_v44 = vld [vmem:[%s20337_s5 + $0xa8] sm:$0xff]  ;;  %v3055_v37 = vrot.slane %v17511_v39, 4 }
 0x28c   : > { %4226 = vmatmul.bf16.gmra.mxu2 %v4126_v54  ;;  %v2759_v54 = vmul.f32 %v15474_v5, %v2739_v3  ;;  %3120 = vst [vmem:[#allocation3 + $0x38] sm:$0xf] %v3054_v51  ;;  %v17543_v18 = vsel %vm2004_vm2, %v7279_v40, %v20355_v59  ;;  %6509 = vmatpush.bf16.msrb.mxu1 %v14882_v2  ;;  %v5277_v51 = vshll.u32 %v17471_v16, 16  ;;  %v5274_v59 = vrot.slane %v5272_v1, 1  ;;  %v14805_v1 = vld [vmem:[%s20337_s5 + $0xa0] sm:$0xff] }
 0x28d   : > { %4440 = vmatmul.bf16.gmra.mxu3 %v4340_v45  ;;  %v3057_v33 = vshrl.u32 %v2922_v63, 16  ;;  %v3060_v45 = vshll.u32 %v2922_v63, 16  ;;  %v7064_v20 = vor.u32 %v7063_v42, %v7060_v58  ;;  %v17552_v0 = vor.u32 %v7071_v7, %v7068_v34  ;;  %v2886_v63 = vpop.permute.xlu1 %2885  ;;  %5500 = vmatpush.bf16.msrb.mxu2 %v14806_v44  ;;  %v17581_v44 = vld [vmem:[#allocation3 + $0x18] sm:$0xff] }
 0x28e   : > { %4784 = vmatmul.bf16.vlgmr.msra.gmra.mxu1 %v16545_v35  ;;  %v2779_v35 = vadd.f32 %v15475_v50, %v2759_v54  ;;  %5605 = vmatpush.bf16.msrb.mxu3 %v14817_v49  ;;  %v17571_v49 = vld [vmem:[#allocation3 + $0x14] sm:$0xf] }
 0x28f   : > { %v3492_v13 = vpop.f32.mrf.mxu2  ;;  %v3059_v3 = vrot.slane %v3057_v33, 6  ;;  %v3062_v30 = vrot.slane %v3060_v45, 7  ;;  %v17562_v58 = vsel %vm1781_vm3, %v7064_v20, %v17552_v0  ;;  %v5270_v33 = vshrl.u32 %v17516_v19, 16 }
 0x290   : > { %v3493_v60 = vadd.f32 %v3492_v13, %v17437_v61  ;;  %v3634_v28 = vpop.f32.mrf.mxu3  ;;  %v2795_v40 = vmax.f32 %v2779_v35, 0.0  ;;  %v2722_v55 = vpop.f32.mrf.mxu0  ;;  %v14816_v61 = vld [vmem:[%s20337_s5 + $0xe8] sm:$0xff]  ;;  %v17576_v13 = vrot.slane %v5277_v51, 1 }
 0x291   : > { %v3063_v42 = vor.u32 %v3062_v30, %v3059_v3  ;;  %v2740_v2 = vadd.f32 %v2722_v55, %v17052_v29  ;;  %v14815_v29 = vld [vmem:[%s20337_s5 + $0xe0] sm:$0xff]  ;;  %5501 = vmatpush.bf16.msrb.mxu2 %v14805_v1  ;;  %v14814_v1 = vld [vmem:[%s20337_s5 + $0xd8] sm:$0xff] }
 0x292   : > { %v17555_v54 = vadd.f32 %v3634_v28, %v3493_v60  ;;  %v2907_v34 = vmul.f32 %v2886_v63, %v2795_v40  ;;  %v7854_v60 = vld [vmem:[#allocation3 + $0x10] sm:$0x8]  ;;  %5606 = vmatpush.bf16.msrb.mxu3 %v14816_v61  ;;  %v5275_v63 = vor.u32 %v5274_v59, %v5270_v33  ;;  %v2891_v28 = vpop.permute.xlu2 %2890  ;;  %v20382_v33 = vunpack.c.l.b16 %v17571_v49 }
 0x293   : > { %v17566_v7 = vpop.f32.mrf.mxu1  ;;  %v3064_v45 = vsel %vm17158_vm13, %v3055_v37, %v3063_v42  ;;  %v2760_v39 = vmul.f32 %v15474_v5, %v2740_v2  ;;  %v14804_v5 = vld [vmem:[%s20337_s5 + $0x98] sm:$0xff]  ;;  %v7873_v61 = vunpack.c.l.b16 %v7854_v60 }
 0x294   : > { %v2923_v35 = vpack.c.bf16 %v2907_v34, %v2907_v34  ;;  %3121 = vst [vmem:[#allocation3 + $0x3c] sm:$0xf] %v3064_v45  ;;  %v5280_v45 = vsel %vm1106_vm1, %v5275_v63, %v17576_v13 }
 0x295   : > { %v2780_v30 = vadd.f32 %v15475_v50, %v2760_v39  ;;  %v7874_v39 = vpack.c.b16 %v20382_v33, %v7873_v61  ;;  %5502 = vmatpush.bf16.msrb.mxu2 %v14804_v5  ;;  %v14881_v61 = vld [vmem:[%s20340_s8 + $0x68] sm:$0xff] }
 0x296   : > { %v3067_v20 = vshrl.u32 %v2923_v35, 16  ;;  %v3070_v3 = vshll.u32 %v2923_v35, 16  ;;  %v3065_v35 = vrot.slane %v3063_v42, 4  ;;  %5607 = vmatpush.bf16.msrb.mxu3 %v14815_v29  ;;  %v14803_v42 = vld [vmem:[%s20337_s5 + $0x90] sm:$0xff]  ;;  %v17604_v29 = vld [vmem:[#allocation3 + $0x18] sm:$0xff]  ;;  %6510 = vmatpush.bf16.msrb.mxu1 %v14881_v61 }
 0x297   : > { %v3494_v40 = vpop.f32.mrf.mxu2  ;;  %v2796_v2 = vmax.f32 %v2780_v30, 0.0  ;;  %20383 = vst [vmem:[#allocation10_spill] sm:$0xff] %v17604_v29  ;;  %v15496_v61 = vld [vmem:[#allocation2 + $0x88] sm:$0x70] }
 0x298   : > { %v3495_v51 = vadd.f32 %v3494_v40, %v17469_v8  ;;  %v3636_v55 = vpop.f32.mrf.mxu3  ;;  %v3069_v37 = vrot.slane %v3067_v20, 6  ;;  %v3072_v34 = vrot.slane %v3070_v3, 7  ;;  %v3813_v59 = vpop.f32.mrf.mxu0  ;;  %v7075_v8 = vshrl.u32 %v17581_v44, 16 }
 0x299   : > { %v2908_v20 = vmul.f32 %v2891_v28, %v2796_v2  ;;  %v3853_v3 = vadd.f32 %v3813_v59, %v17092_v17  ;;  %v7078_v40 = vshll.u32 %v17581_v44, 16  ;;  %v14859_v28 = vld [vmem:[%s20337_s5 + $0x230] sm:$0xff]  ;;  %v7282_v17 = vrot.slane %v17581_v44, 2  ;;  %5503 = vmatpush.bf16.msrb.mxu2 %v14803_v42  ;;  %v14858_v44 = vld [vmem:[%s20337_s5 + $0x228] sm:$0xff] }
 0x29a   : > { %v17590_v50 = vadd.f32 %v3636_v55, %v3495_v51  ;;  %v3073_v60 = vor.u32 %v3072_v34, %v3069_v37  ;;  %v7077_v63 = vrot.slane %v7075_v8, 1  ;;  %5608 = vmatpush.bf16.msrb.mxu3 %v14814_v1  ;;  %v20384_v34 = vrot.slane %v17478_v14, 2  ;;  %6161 = vmatpush.bf16.msrb.mxu0 %v14859_v28 }
 0x29b   : > { %v17599_v30 = vpop.f32.mrf.mxu1  ;;  %4626 = vmatmul.bf16.vlgmr.msra.gmra.mxu0 %v16580_v9  ;;  %v2924_v51 = vpack.c.bf16 %v2908_v20, %v2908_v20  ;;  %v4074_v55 = vadd.f32 %v17514_v4, %v3853_v3  ;;  %v14813_v9 = vld [vmem:[%s20337_s5 + $0xd0] sm:$0xff]  ;;  %v7080_v37 = vrot.slane %v7078_v40, 2  ;;  %v20356_v59 = vrot.slane %v17604_v29, 3 }
 0x29c   : > { %5342 = vmatmul.bf16.vlgmr.msra.gmra.mxu2 %v5280_v45  ;;  %v3074_v5 = vsel %vm17158_vm13, %v3065_v35, %v3073_v60  ;;  %v7875_v35 = vrot.slane %v7874_v39, 3  ;;  %v14812_v39 = vld [vmem:[%s20337_s5 + $0xc8] sm:$0xff] }
 0x29d   : > { %5414 = vmatmul.bf16.vlgmr.msra.gmra.mxu3 %v17516_v19  ;;  %3122 = vst [vmem:[#allocation3 + $0x40] sm:$0xf] %v3074_v5  ;;  %v17628_v19 = vsel %vm2004_vm2, %v20384_v34, %v7282_v17  ;;  %v3077_v4 = vshrl.u32 %v2924_v51, 16  ;;  %v3080_v2 = vshll.u32 %v2924_v51, 16  ;;  %v7081_v33 = vor.u32 %v7080_v37, %v7077_v63  ;;  %v3124_v37 = vld [vmem:[#allocation3 + $0x48] sm:$0x3] }
 0x29e   : > { %4789 = vmatmul.bf16.gmra.mxu1 %v16577_v27  ;;  %v14802_v27 = vld [vmem:[%s20337_s5 + $0x88] sm:$0xff]  ;;  %v17637_v3 = vsel %vm2602_vm4, %v7875_v35, %v20356_v59  ;;  %5609 = vmatpush.bf16.msrb.mxu3 %v14813_v9  ;;  %v3075_v63 = vrot.slane %v3073_v60, 4  ;;  %v14801_v9 = vld [vmem:[%s20337_s5 + $0x80] sm:$0xff]  ;;  %v14827_v34 = vld [vmem:[%s20337_s5 + $0x138] sm:$0xff] }
 0x29f   : > { %v4192_v45 = vpop.f32.mrf.mxu2  ;;  %v3079_v14 = vrot.slane %v3077_v4, 6  ;;  %v3082_v20 = vrot.slane %v3080_v2, 7  ;;  %20385 = vst [vmem:[#allocation11_spill] sm:$0xff] %v17637_v3  ;;  %v17646_v28 = vsel %vm1781_vm3, %v17552_v0, %v7081_v33  ;;  %5504 = vmatpush.bf16.msrb.mxu2 %v14802_v27  ;;  %v17657_v4 = vld [vmem:[#allocation3 + $0x20] sm:$0xff]  ;;  %v14835_v35 = vld [vmem:[%s20337_s5 + $0x178] sm:$0xff]  ;;  %6162 = vmatpush.bf16.msrb.mxu0 %v14858_v44 }
 0x2a0   : > { %v4232_v1 = vadd.f32 %v4192_v45, %v4074_v55  ;;  %v4406_v8 = vpop.f32.mrf.mxu3  ;;  %v3815_v40 = vpop.f32.mrf.mxu0  ;;  %v14811_v2 = vld [vmem:[%s20337_s5 + $0xc0] sm:$0xff]  ;;  %v14873_v59 = vld [vmem:[%s20340_s8 + $0x28] sm:$0xff] }
 0x2a1   : > { %v3083_v5 = vor.u32 %v3082_v20, %v3079_v14  ;;  %v3854_v51 = vadd.f32 %v3815_v40, %v17115_v24  ;;  %v5281_v20 = vshrl.u32 %v17471_v16, 16  ;;  %v7284_v40 = vrot.slane %v17657_v4, 2 }
 0x2a2   : > { %v17639_v42 = vadd.f32 %v4406_v8, %v4232_v1  ;;  %5610 = vmatpush.bf16.msrb.mxu3 %v14812_v39  ;;  %v7084_v1 = vshrl.u32 %v17657_v4, 16  ;;  %v7087_v8 = vshll.u32 %v17657_v4, 16  ;;  %v14826_v39 = vld [vmem:[%s20337_s5 + $0x130] sm:$0xff] }
 0x2a3   : > { %v17649_v55 = vpop.f32.mrf.mxu1  ;;  %v3084_v0 = vsel %vm17158_vm13, %v3075_v63, %v3083_v5  ;;  %v3085_v60 = vrot.slane %v3083_v5, 4  ;;  %v4075_v24 = vadd.f32 %v17566_v7, %v3854_v51  ;;  %5505 = vmatpush.bf16.msrb.mxu2 %v14801_v9  ;;  %v5283_v9 = vor.u32 %v5281_v20, %v17576_v13  ;;  %v14834_v13 = vld [vmem:[%s20337_s5 + $0x170] sm:$0xff]  ;;  %v12711_v20 = vld [vmem:[#allocation2 + $0x88] sm:$0xe] }
 0x2a4   : > { %3123 = vst [vmem:[#allocation3 + $0x44] sm:$0xf] %v3084_v0  ;;  %v7086_v63 = vrot.slane %v7084_v1, 1  ;;  %v14830_v4 = vld [vmem:[%s20337_s5 + $0x150] sm:$0xff] }
 0x2a5   : > { %v3125_v45 = vsel %vm16985_vm8, %v3085_v60, %v3124_v37  ;;  %v7089_v37 = vrot.slane %v7087_v8, 2  ;;  %v15487_v60 = vor.u32 %v15496_v61, %v17473_v52  ;;  %v14825_v52 = vld [vmem:[%s20337_s5 + $0x128] sm:$0xff]  ;;  %v14880_v61 = vld [vmem:[%s20340_s8 + $0x60] sm:$0xff] }
 0x2a6   : > { %3126 = vst [vmem:[#allocation3 + $0x48] sm:$0x3] %v3125_v45  ;;  %5611 = vmatpush.bf16.msrb.mxu3 %v14811_v2  ;;  %6511 = vmatpush.bf16.msrb.mxu1 %v14880_v61  ;;  %v15415_v8 = vld [vmem:[#allocation2 + $0x80] sm:$0xf0]  ;;  %v14831_v61 = vld [vmem:[%s20337_s5 + $0x158] sm:$0xff] }
 0x2a7   : > { %v4194_v27 = vpop.f32.mrf.mxu2  ;;  %5733 = vmatpush.bf16.msra.mxu2 %v14827_v34  ;;  %v17685_v34 = vsel %vm2004_vm2, %v7282_v17, %v7284_v40  ;;  %v17698_v17 = vor.u32 %v7089_v37, %v7086_v63  ;;  %v14832_v63 = vld [vmem:[%s20337_s5 + $0x160] sm:$0xff] }
 0x2a8   : > { %v4233_v7 = vadd.f32 %v4194_v27, %v4075_v24  ;;  %v4408_v14 = vpop.f32.mrf.mxu3  ;;  %v3818_v51 = vpop.f32.mrf.mxu0 }
 0x2a9   : > { %v3855_v0 = vadd.f32 %v3818_v51, %v17162_v22  ;;  %v17726_v51 = vld [vmem:[#allocation2 + $0x90] sm:$0xff] }
 0x2aa   : > { %v17677_v5 = vadd.f32 %v4408_v14, %v4233_v7  ;;  %5831 = vmatpush.bf16.msra.mxu3 %v14835_v35  ;;  %v14824_v35 = vld [vmem:[%s20337_s5 + $0x120] sm:$0xff] }
 0x2ab   : > { %v17689_v24 = vpop.f32.mrf.mxu1  ;;  %4631 = vmatmul.bf16.gmra.mxu0 %v16589_v48  ;;  %v4076_v22 = vadd.f32 %v17599_v30, %v3855_v0  ;;  %5734 = vmatpush.bf16.msra.mxu2 %v14826_v39  ;;  %v17710_v48 = vsel %vm1781_vm3, %v7081_v33, %v17698_v17  ;;  %v14833_v30 = vld [vmem:[%s20337_s5 + $0x168] sm:$0xff]  ;;  %v15416_v33 = vld [vmem:[#allocation2 + $0x80] sm:$0xe] }
 0x2ac   : > { %5347 = vmatmul.bf16.gmra.mxu2 %v5283_v9  ;;  %v14809_v39 = vld [vmem:[#allocation2 + $0x88] sm:$0xf0]  ;;  %v15417_v0 = vor.u32 %v15416_v33, %v15415_v8 }
 0x2ad   : > { %5419 = vmatmul.bf16.gmra.mxu3 %v15487_v60  ;;  %v17728_v9 = vld [vmem:[#allocation3 + $0x28] sm:$0xff]  ;;  %v12712_v60 = vor.u32 %v14809_v39, %v12711_v20 }
 0x2ae   : > { %4794 = vmatmul.bf16.gmra.mxu1 %v16583_v31  ;;  %5832 = vmatpush.bf16.msra.mxu3 %v14834_v13  ;;  %v7093_v13 = vshrl.u32 %v17728_v9, 16  ;;  %v7096_v44 = vshll.u32 %v17728_v9, 16 }
 0x2af   : > { %v4197_v2 = vpop.f32.mrf.mxu2  ;;  %5735 = vmatpush.bf16.msra.mxu2 %v14825_v52  ;;  %v5446_v52 = vrot.slane %v17471_v16, 1  ;;  %v5551_v39 = vrot.slane %v12712_v60, 1 }
 0x2b0   : > { %v4234_v45 = vadd.f32 %v4197_v2, %v4076_v22  ;;  %v4411_v27 = vpop.f32.mrf.mxu3  ;;  %v3820_v1 = vpop.f32.mrf.mxu0  ;;  %v7098_v8 = vrot.slane %v7096_v44, 2 }
 0x2b1   : > { %v3856_v7 = vadd.f32 %v3820_v1, %v17182_v46  ;;  %v14823_v46 = vld [vmem:[%s20337_s5 + $0x118] sm:$0xff]  ;;  %v14822_v1 = vld [vmem:[%s20337_s5 + $0x110] sm:$0xff] }
 0x2b2   : > { %v17718_v31 = vadd.f32 %v4411_v27, %v4234_v45  ;;  %5833 = vmatpush.bf16.msra.mxu3 %v14833_v30  ;;  %v5552_v45 = vrot.slane %v17726_v51, 1  ;;  %v7095_v27 = vrot.slane %v7093_v13, 1  ;;  %v14821_v13 = vld [vmem:[%s20337_s5 + $0x108] sm:$0xff] }
 0x2b3   : > { %v17721_v14 = vpop.f32.mrf.mxu1  ;;  %v4077_v37 = vadd.f32 %v17649_v55, %v3856_v7  ;;  %5736 = vmatpush.bf16.msra.mxu2 %v14824_v35  ;;  %v7286_v55 = vrot.slane %v17728_v9, 2  ;;  %v5445_v35 = vrot.slane %v15417_v0, 1  ;;  %v14842_v9 = vld [vmem:[%s20337_s5 + $0x1a8] sm:$0xff] }
 0x2b4   : > { %v14850_v51 = vld [vmem:[%s20337_s5 + $0x1e8] sm:$0xff] }
 0x2b5   : > { %v17750_v33 = vsel %vm2004_vm2, %v7284_v40, %v7286_v55  ;;  %v14857_v40 = vld [vmem:[%s20337_s5 + $0x220] sm:$0xff] }
 0x2b6   : > { %5834 = vmatpush.bf16.msra.mxu3 %v14832_v63  ;;  %6163 = vmatpush.bf16.msrb.mxu0 %v14857_v40 }
 0x2b7   : > { %v4199_v22 = vpop.f32.mrf.mxu2  ;;  %5737 = vmatpush.bf16.msra.mxu2 %v14823_v46  ;;  %v17763_v46 = vor.u32 %v7098_v8, %v7095_v27  ;;  %v14828_v8 = vld [vmem:[%s20337_s5 + $0x140] sm:$0xff] }
 0x2b8   : > { %v4235_v2 = vadd.f32 %v4199_v22, %v4077_v37  ;;  %v4413_v30 = vpop.f32.mrf.mxu3  ;;  %v3823_v20 = vpop.f32.mrf.mxu0  ;;  %v5447_v37 = vsel %vm1406_vm0, %v5445_v35, %v5446_v52 }
 0x2b9   : > { %v3857_v63 = vadd.f32 %v3823_v20, %v17223_v43  ;;  %v5553_v43 = vsel %vm1406_vm0, %v5551_v39, %v5552_v45  ;;  %v17782_v44 = vsel %vm1781_vm3, %v17698_v17, %v17763_v46  ;;  %v14852_v20 = vld [vmem:[%s20337_s5 + $0x1f8] sm:$0xff] }
 0x2ba   : > { %v17752_v7 = vadd.f32 %v4413_v30, %v4235_v2  ;;  %5835 = vmatpush.bf16.msra.mxu3 %v14831_v61  ;;  %v14820_v30 = vld [vmem:[%s20337_s5 + $0x100] sm:$0xff]  ;;  %v17805_v39 = vld [vmem:[#allocation3 + $0x30] sm:$0xff] }
 0x2bb   : > { %v17758_v0 = vpop.f32.mrf.mxu1  ;;  %4636 = vmatmul.bf16.gmra.mxu0 %v16613_v53  ;;  %v4078_v60 = vadd.f32 %v17689_v24, %v3857_v63  ;;  %5738 = vmatpush.bf16.msra.mxu2 %v14822_v1  ;;  %v14879_v53 = vld [vmem:[%s20340_s8 + $0x58] sm:$0xff]  ;;  %v14829_v24 = vld [vmem:[%s20337_s5 + $0x148] sm:$0xff]  ;;  %v7105_v40 = vshll.u32 %v17805_v39, 16 }
 0x2bc   : > { %5506 = vmatmul.bf16.vlgmr.msrb.gmra.mxu2 %v5447_v37  ;;  %6512 = vmatpush.bf16.msrb.mxu1 %v14879_v53  ;;  %v5627_v37 = vld [vmem:[#allocation2 + $0x88] sm:$0xe] }
 0x2bd   : > { %5612 = vmatmul.bf16.vlgmr.msrb.gmra.mxu3 %v5553_v43  ;;  %v7102_v43 = vshrl.u32 %v17805_v39, 16 }
 0x2be   : > { %4799 = vmatmul.bf16.gmra.mxu1 %v16592_v6  ;;  %5836 = vmatpush.bf16.msra.mxu3 %v14830_v4  ;;  %v14844_v6 = vld [vmem:[%s20337_s5 + $0x1b8] sm:$0xff]  ;;  %v17808_v4 = vld [vmem:[#allocation2 + $0x8c] sm:$0xf] }
 0x2bf   : > { %v4202_v22 = vpop.f32.mrf.mxu2  ;;  %5739 = vmatpush.bf16.msra.mxu2 %v14821_v13  ;;  %v7288_v13 = vrot.slane %v17805_v39, 2 }
 0x2c0   : > { %v4236_v61 = vadd.f32 %v4202_v22, %v4078_v60  ;;  %v4416_v2 = vpop.f32.mrf.mxu3  ;;  %v3825_v17 = vpop.f32.mrf.mxu0 }
 0x2c1   : > { %v3858_v35 = vadd.f32 %v3825_v17, %v17243_v41  ;;  %v14843_v41 = vld [vmem:[%s20337_s5 + $0x1b0] sm:$0xff] }
 0x2c2   : > { %v17791_v27 = vadd.f32 %v4416_v2, %v4236_v61  ;;  %5837 = vmatpush.bf16.msra.mxu3 %v14829_v24  ;;  %v5653_v24 = vunpack.c.l.b16 %v5627_v37  ;;  %v5654_v61 = vunpack.c.l.b16 %v17808_v4  ;;  %v7107_v2 = vrot.slane %v7105_v40, 2  ;;  %v14856_v37 = vld [vmem:[%s20337_s5 + $0x218] sm:$0xff]  ;;  %v14841_v40 = vld [vmem:[%s20337_s5 + $0x1a0] sm:$0xff] }
 0x2c3   : > { %v17797_v1 = vpop.f32.mrf.mxu1  ;;  %v4079_v63 = vadd.f32 %v17721_v14, %v3858_v35  ;;  %5740 = vmatpush.bf16.msra.mxu2 %v14820_v30  ;;  %v7104_v14 = vrot.slane %v7102_v43, 1  ;;  %v17822_v30 = vsel %vm2004_vm2, %v7286_v55, %v7288_v13  ;;  %v14851_v35 = vld [vmem:[%s20337_s5 + $0x1f0] sm:$0xff]  ;;  %v5756_v43 = vld [vmem:[#allocation2 + $0x88] sm:$0xc]  ;;  %6164 = vmatpush.bf16.msrb.mxu0 %v14856_v37 }
 0x2c4   : > { %v5658_v4 = vpack.c.b16 %v5654_v61, %v5653_v24 }
 0x2c5   : > { %v17837_v55 = vor.u32 %v7107_v2, %v7104_v14  ;;  %v5774_v2 = vunpack.c.l.b16 %v5756_v43 }
 0x2c6   : > { %5838 = vmatpush.bf16.msra.mxu3 %v14828_v8 }
 0x2c7   : > { %5943 = vmatpush.bf16.msrb.mxu2 %v14844_v6  ;;  %v4204_v60 = vpop.f32.mrf.mxu2  ;;  %v17854_v16 = vsel %vm1781_vm3, %v17763_v46, %v17837_v55 }
 0x2c8   : > { %v4237_v53 = vadd.f32 %v4204_v60, %v4079_v63  ;;  %v4418_v22 = vpop.f32.mrf.mxu3  ;;  %v3828_v6 = vpop.f32.mrf.mxu0  ;;  %v17832_v63 = vld [vmem:[#allocation2 + $0x90] sm:$0xff] }
 0x2c9   : > { %v3859_v8 = vadd.f32 %v3828_v6, %v17284_v25  ;;  %v14849_v6 = vld [vmem:[%s20337_s5 + $0x1e0] sm:$0xff] }
 0x2ca   : > { %6062 = vmatpush.bf16.msrb.mxu3 %v14852_v20  ;;  %v17824_v17 = vadd.f32 %v4418_v22, %v4237_v53  ;;  %v5662_v53 = vshrl.u32 %v5658_v4, 16  ;;  %v5665_v22 = vshll.u32 %v5658_v4, 16  ;;  %v17876_v4 = vld [vmem:[#allocation3 + $0x38] sm:$0xff] }
 0x2cb   : > { %5944 = vmatpush.bf16.msrb.mxu2 %v14843_v41  ;;  %v17830_v20 = vpop.f32.mrf.mxu1  ;;  %4641 = vmatmul.bf16.gmra.mxu0 %v16623_v32  ;;  %v4080_v25 = vadd.f32 %v17758_v0, %v3859_v8  ;;  %v14878_v41 = vld [vmem:[%s20340_s8 + $0x50] sm:$0xff]  ;;  %v20386_v32 = vld [vmem:[#allocation4_spill] sm:$0xff]  ;;  %v5673_v0 = vshll.u32 %v17832_v63, 16 }
 0x2cc   : > { %5511 = vmatmul.bf16.gmra.mxu2 %v5446_v52  ;;  %6513 = vmatpush.bf16.msrb.mxu1 %v14878_v41 }
 0x2cd   : > { %5617 = vmatmul.bf16.gmra.mxu3 %v5552_v45  ;;  %v5670_v45 = vshrl.u32 %v17832_v63, 16  ;;  %v5675_v37 = vrot.slane %v5673_v0, 2  ;;  %v7114_v0 = vshll.u32 %v17876_v4, 16 }
 0x2ce   : > { %4804 = vmatmul.bf16.gmra.mxu1 %v20386_v32  ;;  %6063 = vmatpush.bf16.msrb.mxu3 %v14851_v35  ;;  %v5664_v32 = vrot.slane %v5662_v53, 1  ;;  %v20357_v53 = vrot.slane %v17832_v63, 2 }
 0x2cf   : > { %v4207_v52 = vpop.f32.mrf.mxu2  ;;  %5945 = vmatpush.bf16.msrb.mxu2 %v14842_v9  ;;  %v5672_v9 = vrot.slane %v5670_v45, 1  ;;  %v7111_v45 = vshrl.u32 %v17876_v4, 16 }
 0x2d0   : > { %v4238_v46 = vadd.f32 %v4207_v52, %v4080_v25  ;;  %v4421_v60 = vpop.f32.mrf.mxu3  ;;  %v3830_v24 = vpop.f32.mrf.mxu0  ;;  %v14840_v25 = vld [vmem:[%s20337_s5 + $0x198] sm:$0xff]  ;;  %v5775_v52 = vpack.c.b16 %v5654_v61, %v5774_v2 }
 0x2d1   : > { %v3860_v35 = vadd.f32 %v3830_v24, %v17304_v47  ;;  %v14848_v47 = vld [vmem:[%s20337_s5 + $0x1d8] sm:$0xff]  ;;  %v7113_v24 = vrot.slane %v7111_v45, 1 }
 0x2d2   : > { %v17865_v14 = vadd.f32 %v4421_v60, %v4238_v46  ;;  %6064 = vmatpush.bf16.msrb.mxu3 %v14850_v51  ;;  %v5667_v51 = vrot.slane %v5665_v22, 2  ;;  %v7290_v46 = vrot.slane %v17876_v4, 2  ;;  %v5631_v22 = vld [vmem:[#allocation2 + $0x98] sm:$0x1]  ;;  %v14889_v4 = vld [vmem:[%s20340_s8 + $0xa8] sm:$0xff] }
 0x2d3   : > { %v17871_v8 = vpop.f32.mrf.mxu1  ;;  %5946 = vmatpush.bf16.msrb.mxu2 %v14841_v40  ;;  %v4081_v41 = vadd.f32 %v17797_v1, %v3860_v35  ;;  %v17884_v40 = vor.u32 %v5675_v37, %v5672_v9  ;;  %v14839_v1 = vld [vmem:[%s20337_s5 + $0x190] sm:$0xff]  ;;  %v5657_v39 = vunpack.c.l.b16 %v5631_v22  ;;  %v14846_v22 = vld [vmem:[%s20337_s5 + $0x1c8] sm:$0xff] }
 0x2d4   : > { %v5668_v2 = vor.u32 %v5667_v51, %v5664_v32  ;;  %v17896_v35 = vsel %vm2004_vm2, %v7288_v13, %v7290_v46  ;;  %v14838_v13 = vld [vmem:[%s20337_s5 + $0x188] sm:$0xff] }
 0x2d5   : > { %20387 = vst [vmem:[#allocation4_spill] sm:$0xff] %v17896_v35 }
 0x2d6   : > { %6065 = vmatpush.bf16.msrb.mxu3 %v14849_v6  ;;  %v7116_v6 = vrot.slane %v7114_v0, 2  ;;  %v5677_v32 = vsel %vm1781_vm3, %v5668_v2, %v17884_v40  ;;  %v5660_v2 = vpack.c.b16 %v5657_v39, %v5657_v39 }
 0x2d7   : > { %v4209_v43 = vpop.f32.mrf.mxu2  ;;  %5947 = vmatpush.bf16.msrb.mxu2 %v14840_v25  ;;  %v5776_v25 = vrot.slane %v5775_v52, 2  ;;  %v20388_v52 = vld [vmem:[#allocation6_spill] sm:$0xff] }
 0x2d8   : > { %v4239_v61 = vadd.f32 %v4209_v43, %v4081_v41  ;;  %v4423_v60 = vpop.f32.mrf.mxu3  ;;  %v3833_v37 = vpop.f32.mrf.mxu0  ;;  %v14847_v41 = vld [vmem:[%s20337_s5 + $0x1d0] sm:$0xff]  ;;  %v17911_v0 = vor.u32 %v7116_v6, %v7113_v24 }
 0x2d9   : > { %v3861_v45 = vadd.f32 %v3833_v37, %v17345_v10  ;;  %v5778_v10 = vsel %vm2004_vm2, %v5776_v25, %v20357_v53 }
 0x2da   : > { %v17898_v9 = vadd.f32 %v4423_v60, %v4239_v61  ;;  %6066 = vmatpush.bf16.msrb.mxu3 %v14848_v47  ;;  %v14855_v47 = vld [vmem:[%s20337_s5 + $0x210] sm:$0xff]  ;;  %v17927_v61 = vsel %vm1781_vm3, %v17837_v55, %v17911_v0  ;;  %v20389_v60 = vld [vmem:[#allocation7_spill] sm:$0xff]  ;;  %v14875_v55 = vld [vmem:[%s20340_s8 + $0x38] sm:$0xff] }
 0x2db   : > { %v17906_v51 = vpop.f32.mrf.mxu1  ;;  %5948 = vmatpush.bf16.msrb.mxu2 %v14839_v1  ;;  %4646 = vmatmul.bf16.gmra.mxu0 %v20388_v52  ;;  %v4082_v43 = vadd.f32 %v17830_v20, %v3861_v45  ;;  %v14877_v1 = vld [vmem:[%s20340_s8 + $0x48] sm:$0xff]  ;;  %v14837_v20 = vld [vmem:[%s20337_s5 + $0x180] sm:$0xff]  ;;  %v14891_v52 = vld [vmem:[%s20340_s8 + $0xb8] sm:$0xff] }
 0x2dc   : > { %5741 = vmatmul.bf16.vlgmr.msra.gmra.mxu2 %v5677_v32  ;;  %6165 = vmatpush.bf16.msrb.mxu0 %v14855_v47  ;;  %v14845_v45 = vld [vmem:[%s20337_s5 + $0x1c0] sm:$0xff]  ;;  %v14874_v47 = vld [vmem:[%s20340_s8 + $0x30] sm:$0xff] }
 0x2dd   : > { %5839 = vmatmul.bf16.vlgmr.msra.gmra.mxu3 %v5778_v10  ;;  %6514 = vmatpush.bf16.msrb.mxu1 %v14877_v1  ;;  %v17950_v10 = vld [vmem:[#allocation3 + $0x40] sm:$0xff] }
 0x2de   : > { %4809 = vmatmul.bf16.gmra.mxu1 %v20389_v60  ;;  %6067 = vmatpush.bf16.msrb.mxu3 %v14847_v41  ;;  %20390 = vst [vmem:[#allocation6_spill] sm:$0xff] %v17950_v10  ;;  %v7120_v1 = vshrl.u32 %v17950_v10, 16  ;;  %v7123_v60 = vshll.u32 %v17950_v10, 16 }
 0x2df   : > { %v4212_v24 = vpop.f32.mrf.mxu2  ;;  %5949 = vmatpush.bf16.msrb.mxu2 %v14838_v13  ;;  %v5679_v13 = vshll.u32 %v5660_v2, 16 }
 0x2e0   : > { %v4240_v6 = vadd.f32 %v4212_v24, %v4082_v43  ;;  %v4426_v37 = vpop.f32.mrf.mxu3  ;;  %v3835_v41 = vpop.f32.mrf.mxu0 }
 0x2e1   : > { %v3862_v32 = vadd.f32 %v3835_v41, %v17365_v15  ;;  %v5854_v15 = vld [vmem:[#allocation2 + $0x90] sm:$0xc] }
 0x2e2   : > { %v17939_v25 = vadd.f32 %v4426_v37, %v4240_v6  ;;  %6068 = vmatpush.bf16.msrb.mxu3 %v14846_v22  ;;  %v20358_v22 = vrot.slane %v17950_v10, 2  ;;  %v17959_v6 = vld [vmem:[#allocation2 + $0x94] sm:$0xf] }
 0x2e3   : > { %v17945_v39 = vpop.f32.mrf.mxu1  ;;  %5950 = vmatpush.bf16.msrb.mxu2 %v14837_v20  ;;  %v4083_v43 = vadd.f32 %v17871_v8, %v3862_v32  ;;  %v5681_v20 = vrot.slane %v5679_v13, 2  ;;  %v14890_v37 = vld [vmem:[%s20340_s8 + $0xb0] sm:$0xff]  ;;  %v5779_v32 = vrot.slane %v5660_v2, 2 }
 0x2e4   : > { %v17972_v13 = vsel %vm2004_vm2, %v7290_v46, %v20358_v22  ;;  %v20393_v46 = vrot.slane %v17832_v63, 2  ;;  %v14876_v63 = vld [vmem:[%s20340_s8 + $0x40] sm:$0xff] }
 0x2e5   : > { %20391 = vst [vmem:[#allocation7_spill] sm:$0xff] %v17972_v13  ;;  %6515 = vmatpush.bf16.msrb.mxu1 %v14876_v63 }
 0x2e6   : > { %6069 = vmatpush.bf16.msrb.mxu3 %v14845_v45  ;;  %v7125_v45 = vrot.slane %v7123_v60, 2  ;;  %v5682_v60 = vsel %vm1781_vm3, %v17884_v40, %v5681_v20 }
 0x2e7   : > { %6613 = vmatpush.bf16.msra.mxu2 %v14875_v55  ;;  %v4214_v24 = vpop.f32.mrf.mxu2  ;;  %v7122_v55 = vrot.slane %v7120_v1, 1  ;;  %v5880_v1 = vunpack.c.l.b16 %v5854_v15  ;;  %v5780_v15 = vsel %vm2004_vm2, %v20393_v46, %v5779_v32 }
 0x2e8   : > { %v4241_v41 = vadd.f32 %v4214_v24, %v4083_v43  ;;  %v4428_v8 = vpop.f32.mrf.mxu3  ;;  %v3838_v53 = vpop.f32.mrf.mxu0  ;;  %v20359_v43 = vunpack.c.l.b16 %v17959_v6 }
 0x2e9   : > { %v17977_v2 = vor.u32 %v7125_v45, %v7122_v55  ;;  %v17991_v55 = vld [vmem:[#allocation2 + $0x98] sm:$0xff] }
 0x2ea   : > { %6756 = vmatpush.bf16.msra.mxu3 %v14891_v52  ;;  %v17974_v52 = vadd.f32 %v4428_v8, %v4241_v41  ;;  %v5885_v20 = vpack.c.b16 %v20359_v43, %v5880_v1  ;;  %v5995_v8 = vshrl.u32 %v17991_v55, 16  ;;  %v5998_v32 = vshll.u32 %v17991_v55, 16 }
 0x2eb   : > { %6614 = vmatpush.bf16.msra.mxu2 %v14874_v47  ;;  %20392 = vst [vmem:[#allocation12_spill] sm:$0xff] %v17977_v2  ;;  %v3863_v47 = vadd.f32 %v3838_v53, %v17406_v21  ;;  %v17982_v24 = vpop.f32.mrf.mxu1  ;;  %4651 = vmatmul.bf16.gmra.mxu0 %v16653_v36  ;;  %v14854_v21 = vld [vmem:[%s20337_s5 + $0x208] sm:$0xff]  ;;  %v17999_v40 = vsel %vm1781_vm3, %v17911_v0, %v17977_v2  ;;  %v14872_v36 = vld [vmem:[%s20340_s8 + $0x20] sm:$0xff]  ;;  %v20395_v29 = vrot.slane %v17991_v55, 2 }
 0x2ec   : > { %5746 = vmatmul.bf16.gmra.mxu2 %v5682_v60  ;;  %20394 = vst [vmem:[#allocation13_spill] sm:$0xff] %v17999_v40  ;;  %6166 = vmatpush.bf16.msrb.mxu0 %v14854_v21  ;;  %v5987_v60 = vshrl.u32 %v5885_v20, 16  ;;  %v14887_v21 = vld [vmem:[%s20340_s8 + $0x98] sm:$0xff] }
 0x2ed   : > { %5844 = vmatmul.bf16.gmra.mxu3 %v5780_v15  ;;  %v4084_v53 = vadd.f32 %v17906_v51, %v3863_v47 }
 0x2ee   : > { %6757 = vmatpush.bf16.msra.mxu3 %v14890_v37  ;;  %4814 = vmatmul.bf16.gmra.mxu1 %v16646_v56  ;;  %v4462_v37 = vld [vmem:[#allocation2 + $0x90] sm:$0x7]  ;;  %v14871_v56 = vld [vmem:[%s20340_s8 + $0x18] sm:$0xff] }
 0x2ef   : > { %6615 = vmatpush.bf16.msra.mxu2 %v14873_v59  ;;  %v4217_v0 = vpop.f32.mrf.mxu2  ;;  %v14888_v59 = vld [vmem:[%s20340_s8 + $0xa0] sm:$0xff]  ;;  %v4480_v45 = vunpack.c.l.b16 %v4462_v37 }
 0x2f0   : > { %v4242_v51 = vadd.f32 %v4217_v0, %v4084_v53  ;;  %v4431_v41 = vpop.f32.mrf.mxu3  ;;  %v3840_v47 = vpop.f32.mrf.mxu0  ;;  %v5997_v53 = vrot.slane %v5995_v8, 2  ;;  %v5966_v0 = vld [vmem:[#allocation2 + $0xa0] sm:$0x3]  ;;  %v14886_v8 = vld [vmem:[%s20340_s8 + $0x90] sm:$0xff] }
 0x2f1   : > { %v3864_v46 = vadd.f32 %v3840_v47, %v17424_v57  ;;  %v4481_v37 = vpack.c.b16 %v4480_v45, %v4480_v45  ;;  %v5984_v45 = vunpack.c.l.b16 %v5966_v0  ;;  %v5858_v0 = vld [vmem:[#allocation2 + $0xa0] sm:$0x1] }
 0x2f2   : > { %6758 = vmatpush.bf16.msra.mxu3 %v14889_v4  ;;  %v18019_v1 = vadd.f32 %v4431_v41, %v4242_v51  ;;  %v5990_v4 = vshll.u32 %v5885_v20, 16  ;;  %v14870_v51 = vld [vmem:[%s20340_s8 + $0x10] sm:$0xff]  ;;  %v5989_v41 = vrot.slane %v5987_v60, 2  ;;  %v14869_v60 = vld [vmem:[%s20340_s8 + $0x8] sm:$0xff] }
 0x2f3   : > { %6616 = vmatpush.bf16.msra.mxu2 %v14872_v36  ;;  %v18022_v15 = vpop.f32.mrf.mxu1  ;;  %v6000_v36 = vrot.slane %v5998_v32, 3  ;;  %v4085_v63 = vadd.f32 %v17945_v39, %v3864_v46  ;;  %v4718_v46 = vrot.slane %v4481_v37, 3 }
 0x2f4   : > { %v5992_v57 = vrot.slane %v5990_v4, 3 }
 0x2f5   : > { %v18035_v39 = vor.u32 %v6000_v36, %v5997_v53  ;;  %v20396_v36 = vld [vmem:[#allocation9_spill] sm:$0xff] }
 0x2f6   : > { %6759 = vmatpush.bf16.msra.mxu3 %v14888_v59 }
 0x2f7   : > { %6617 = vmatpush.bf16.msra.mxu2 %v14871_v56  ;;  %v4219_v47 = vpop.f32.mrf.mxu2  ;;  %v5888_v56 = vrot.slane %v5885_v20, 2  ;;  %v14885_v20 = vld [vmem:[%s20340_s8 + $0x88] sm:$0xff] }
 0x2f8   : > { %v4243_v32 = vadd.f32 %v4219_v47, %v4085_v63  ;;  %v4433_v22 = vpop.f32.mrf.mxu3  ;;  %v3843_v43 = vpop.f32.mrf.mxu0  ;;  %v18061_v47 = vld [vmem:[#allocation3] sm:$0xff]  }
 0x2f9   : > { %v3865_v59 = vadd.f32 %v3843_v43, %v17463_v62  ;;  %v5890_v63 = vsel %vm2004_vm2, %v5888_v56, %v20395_v29  ;;  %v20397_v43 = vld [vmem:[#allocation5_spill] sm:$0xff]  ;;  %v4554_v56 = vshrl.u32 %v4481_v37, 16  ;;  %v6385_v3 = vshrl.u32 %v18061_v47, 16 }
 0x2fa   : > { %6760 = vmatpush.bf16.msra.mxu3 %v14887_v21  ;;  %v18040_v4 = vadd.f32 %v4433_v22, %v4243_v32  ;;  %v5993_v21 = vor.u32 %v5992_v57, %v5989_v41  ;;  %v20398_v29 = vrot.slane %v20397_v43, 3  ;;  %v14868_v57 = vld [vmem:[%s20340_s8] sm:$0xff]  ;;  %v5884_v32 = vunpack.c.l.b16 %v5858_v0 }
 0x2fb   : > { %6618 = vmatpush.bf16.msra.mxu2 %v14870_v51  ;;  %v4069_v53 = vpop.f32.mrf.mxu1  ;;  %4656 = vmatmul.bf16.gmra.mxu0 %v20396_v36  ;;  %v18052_v51 = vpack.c.b16 %v5984_v45, %v5984_v45  ;;  %v4086_v62 = vadd.f32 %v17982_v24, %v3865_v59  ;;  %v4557_v45 = vshll.u32 %v4481_v37, 16  ;;  %v4556_v37 = vrot.slane %v4554_v56, 2 }
 0x2fc   : > { %5951 = vmatmul.bf16.vlgmr.msrb.gmra.mxu2 %v5890_v63  ;;  %v6002_v22 = vsel %vm2379_vm5, %v5993_v21, %v18035_v39  ;;  %v4719_v41 = vsel %vm2602_vm4, %v20398_v29, %v4718_v46  ;;  %v18065_v46 = vld [vmem:[#allocation3 + $0x8] sm:$0xff]  ;;  %v5887_v29 = vpack.c.b16 %v5884_v32, %v5884_v32 }
 0x2fd   : > { %6070 = vmatmul.bf16.vlgmr.msrb.gmra.mxu3 %v6002_v22  ;;  %v6004_v24 = vshrl.u32 %v18052_v51, 16  ;;  %v6007_v59 = vshll.u32 %v18052_v51, 16  ;;  %v6392_v2 = vshll.u32 %v18065_v46, 16 }
 0x2fe   : > { %6761 = vmatpush.bf16.msra.mxu3 %v14886_v8  ;;  %4819 = vmatmul.bf16.gmra.mxu1 %v4719_v41 }
 0x2ff   : > { %6619 = vmatpush.bf16.msra.mxu2 %v14869_v60  ;;  %v4222_v8 = vpop.f32.mrf.mxu2  ;;  %v6387_v60 = vshll.u32 %v18061_v47, 16  ;;  %v6009_v41 = vrot.slane %v6007_v59, 3  ;;  %v20400_v59 = vld [vmem:[#allocation8_spill] sm:$0xff] }
 0x300   : > { %v4244_v21 = vadd.f32 %v4222_v8, %v4086_v62  ;;  %v4436_v63 = vpop.f32.mrf.mxu3  ;;  %v3845_v22 = vpop.f32.mrf.mxu0  ;;  %v6006_v62 = vrot.slane %v6004_v24, 2 }
 0x301   : > { %v3866_v43 = vadd.f32 %v3845_v22, %v17505_v11  ;;  %v6389_v10 = vrot.slane %v6387_v60, 1  ;;  %v6394_v22 = vrot.slane %v6392_v2, 1  ;;  %v6085_v2 = vld [vmem:[#allocation2 + $0x90] sm:$0x8] }
 0x302   : > { %6762 = vmatpush.bf16.msra.mxu3 %v14885_v20  ;;  %v18068_v36 = vadd.f32 %v4436_v63, %v4244_v21  ;;  %v4559_v20 = vrot.slane %v4557_v45, 3  ;;  %v6010_v35 = vor.u32 %v6009_v41, %v6006_v62  ;;  %v14853_v62 = vld [vmem:[%s20337_s5 + $0x200] sm:$0xff] }
 0x303   : > { %6620 = vmatpush.bf16.msra.mxu2 %v14868_v57  ;;  %v4071_v0 = vpop.f32.mrf.mxu1  ;;  %v4087_v8 = vadd.f32 %v18022_v15, %v3866_v43  ;;  %v5891_v57 = vrot.slane %v5887_v29, 2  ;;  %v6390_v11 = vor.u32 %v6389_v10, %v6385_v3  ;;  %v20399_v15 = vrot.slane %v17991_v55, 2  ;;  %v15419_v29 = vld [vmem:[#allocation3] sm:$0xe]  ;;  %6167 = vmatpush.bf16.msrb.mxu0 %v14853_v62 }
 0x304   : > { %v4560_v21 = vor.u32 %v4559_v20, %v4556_v37  ;;  %v14884_v41 = vld [vmem:[%s20340_s8 + $0x80] sm:$0xff] }
 0x305   : > { %v5892_v24 = vsel %vm2004_vm2, %v20399_v15, %v5891_v57  ;;  %v6395_v10 = vsel %vm1106_vm1, %v6390_v11, %v6394_v22  ;;  %v18100_v57 = vld [vmem:[#allocation3 + $0x10] sm:$0xff] }
 0x306   : > { %v4561_v60 = vsel %vm2379_vm5, %v20400_v59, %v4560_v21  ;;  %6763 = vmatpush.bf16.msra.mxu3 %v14884_v41  ;;  %v14904_v41 = vld [vmem:[%s20340_s8 + $0xe8] sm:$0xff] }
 0x307   : > { %v4224_v13 = vpop.f32.mrf.mxu2 }
 0x308   : > { %v4245_v63 = vadd.f32 %v4224_v13, %v4087_v8  ;;  %v4438_v40 = vpop.f32.mrf.mxu3  ;;  %v3848_v56 = vpop.f32.mrf.mxu0  ;;  %v6011_v13 = vsel %vm2379_vm5, %v18035_v39, %v6010_v35  ;;  %v14922_v35 = vld [vmem:[%s20340_s8 + $0x178] sm:$0xff]  ;;  %v6103_v39 = vunpack.c.l.b16 %v6085_v2 }
 0x309   : > { %v3867_v45 = vadd.f32 %v3848_v56, %v17555_v54  ;;  %v14906_v8 = vld [vmem:[%s20340_s8 + $0xf8] sm:$0xff]  ;;  %7352 = vmatpush.bf16.msrb.mxu2 %v14922_v35 }
 0x30a   : > { %v18074_v32 = vadd.f32 %v4438_v40, %v4245_v63  ;;  %v15418_v40 = vld [vmem:[#allocation3] sm:$0xf0]  ;;  %6971 = vmatpush.bf16.msra.mxu0 %v14906_v8 }
 0x30b   : > { %v4785_v43 = vpop.f32.mrf.mxu1  ;;  %4661 = vmatmul.bf16.gmra.mxu0 %v4561_v60  ;;  %v4088_v3 = vadd.f32 %v4069_v53, %v3867_v45  ;;  %v14914_v53 = vld [vmem:[%s20340_s8 + $0x138] sm:$0xff]  ;;  %v15420_v45 = vor.u32 %v15419_v29, %v15418_v40  ;;  %v6400_v60 = vshll.u32 %v18100_v57, 16  ;;  %v6396_v40 = vshrl.u32 %v18065_v46, 16 }
 0x30c   : > { %5956 = vmatmul.bf16.gmra.mxu2 %v5892_v24  ;;  %7193 = vmatpush.bf16.msra.mxu1 %v14914_v53  ;;  %v20401_v24 = vunpack.c.l.b16 %v17959_v6 }
 0x30d   : > { %6075 = vmatmul.bf16.gmra.mxu3 %v6011_v13  ;;  %v6402_v29 = vrot.slane %v6400_v60, 1  ;;  %v14921_v60 = vld [vmem:[%s20340_s8 + $0x170] sm:$0xff] }
 0x30e   : > { %6516 = vmatmul.bf16.vlgmr.msrb.gmra.mxu1 %v6395_v10  ;;  %v6104_v59 = vpack.c.b16 %v20401_v24, %v6103_v39  ;;  %v18126_v39 = vld [vmem:[%s20338_s6] ss:$0 sm:$0xff]  ;;  %7353 = vmatpush.bf16.msrb.mxu2 %v14921_v60 }
 0x30f   : > { %v4227_v54 = vpop.f32.mrf.mxu2 }
 0x310   : > { %v4246_v37 = vadd.f32 %v4227_v54, %v4088_v3  ;;  %v4441_v20 = vpop.f32.mrf.mxu3  ;;  %v3850_v63 = vpop.f32.mrf.mxu0  ;;  %v6106_v3 = vrot.slane %v17991_v55, 3  ;;  %v6683_v54 = vrot.slane %v15420_v45, 1  ;;  %v6105_v6 = vrot.slane %v6104_v59, 3  ;;  %v18140_v45 = vld [vmem:[%s20339_s7] ss:$0 sm:$0xff] }
 0x311   : > { %v3868_v11 = vadd.f32 %v3850_v63, %v17590_v50  ;;  %v14905_v50 = vld [vmem:[%s20340_s8 + $0xf0] sm:$0xff]  ;;  %v6398_v63 = vor.u32 %v6396_v40, %v6394_v22 }
 0x312   : > { %v18102_v21 = vadd.f32 %v4441_v20, %v4246_v37  ;;  %v6684_v37 = vrot.slane %v18065_v46, 1  ;;  %6972 = vmatpush.bf16.msra.mxu0 %v14905_v50  ;;  %v6107_v53 = vsel %vm2602_vm4, %v6105_v6, %v6106_v3  ;;  %v14902_v50 = vld [vmem:[%s20340_s8 + $0xd8] sm:$0xff] }
 0x313   : > { %v4787_v56 = vpop.f32.mrf.mxu1  ;;  %v4089_v15 = vadd.f32 %v4071_v0, %v3868_v11  ;;  %v14937_v0 = vld [vmem:[%s20340_s8 + $0x1b8] sm:$0xff] }
 0x314   : > { %7567 = vmatpush.bf16.msrb.mxu3 %v14937_v0  ;;  %v6685_v11 = vsel %vm1406_vm0, %v6683_v54, %v6684_v37 }
 0x316   : > { %6973 = vmatpush.bf16.msra.mxu0 %v14904_v41 }
 0x317   : > { %v4229_v13 = vpop.f32.mrf.mxu2 }
 0x318   : > { %v4247_v10 = vadd.f32 %v4229_v13, %v4089_v15  ;;  %v4443_v2 = vpop.f32.mrf.mxu3  ;;  %v4627_v62 = vpop.f32.mrf.mxu0  ;;  %v6403_v15 = vsel %vm1106_vm1, %v6398_v63, %v6402_v29  ;;  %v14913_v13 = vld [vmem:[%s20340_s8 + $0x130] sm:$0xff]  ;;  %v6108_v63 = vrot.slane %v18052_v51, 3 }
 0x319   : > { %v4667_v35 = vadd.f32 %v4627_v62, %v17639_v42  ;;  %7194 = vmatpush.bf16.msra.mxu1 %v14913_v13  ;;  %v4916_v62 = vpop.permute.xlu0 %4915 }
 0x31a   : > { %v18117_v20 = vadd.f32 %v4443_v2, %v4247_v10 }
 0x31b   : > { %v18131_v8 = vpop.f32.mrf.mxu1  ;;  %6168 = vmatmul.bf16.vlgmr.msrb.gmra.mxu0 %v6107_v53  ;;  %v4825_v42 = vadd.f32 %v4785_v43, %v4667_v35  ;;  %v14903_v43 = vld [vmem:[%s20340_s8 + $0xe0] sm:$0xff] }
 0x31c   : > { %6621 = vmatmul.bf16.vlgmr.msra.gmra.mxu2 %v18061_v47  ;;  %v18144_v47 = vld [vmem:[#allocation3 + $0x18] sm:$0xff]  ;;  %6974 = vmatpush.bf16.msra.mxu0 %v14903_v43 }
 0x31d   : > { %6764 = vmatmul.bf16.vlgmr.msra.gmra.mxu3 %v6685_v11  ;;  %v4845_v22 = vmul.f32 %v18126_v39, %v4825_v42  ;;  %v6408_v41 = vshll.u32 %v18144_v47, 16 }
 0x31e   : > { %6521 = vmatmul.bf16.gmra.mxu1 %v6403_v15 }
 0x31f   : > { %v5343_v24 = vpop.f32.mrf.mxu2  ;;  %v4865_v10 = vadd.f32 %v18140_v45, %v4845_v22  ;;  %v18175_v43 = vrot.slane %v6408_v41, 1 }
 0x320   : > { %v5415_v59 = vpop.f32.mrf.mxu3  ;;  %v4629_v54 = vpop.f32.mrf.mxu0  ;;  %6975 = vmatpush.bf16.msra.mxu0 %v14902_v50  ;;  %v6109_v50 = vsel %vm2602_vm4, %v6106_v3, %v6108_v63 }
 0x321   : > { %v18156_v2 = vadd.f32 %v5415_v59, %v5343_v24  ;;  %v4881_v0 = vmax.f32 %v4865_v10, 0.0  ;;  %v4668_v6 = vadd.f32 %v4629_v54, %v17677_v5  ;;  %v6686_v24 = vrot.slane %v18100_v57, 1  ;;  %v14901_v5 = vld [vmem:[%s20340_s8 + $0xd0] sm:$0xff] }
 0x322   : > { %v14936_v59 = vld [vmem:[%s20340_s8 + $0x1b0] sm:$0xff] }
 0x323   : > { %v18162_v40 = vpop.f32.mrf.mxu1  ;;  %v4993_v35 = vmul.f32 %v4916_v62, %v4881_v0  ;;  %v4826_v53 = vadd.f32 %v4787_v56, %v4668_v6  ;;  %v6404_v56 = vshrl.u32 %v18100_v57, 16  ;;  %7568 = vmatpush.bf16.msrb.mxu3 %v14936_v59  ;;  %v14900_v6 = vld [vmem:[%s20340_s8 + $0xc8] sm:$0xff]  ;;  %v6687_v55 = vsel %vm1406_vm0, %v6684_v37, %v6686_v24 }
 0x324   : > { %6976 = vmatpush.bf16.msra.mxu0 %v14901_v5 }
 0x325   : > { %v5009_v11 = vpack.c.bf16 %v4993_v35, %v4993_v35  ;;  %v4846_v42 = vmul.f32 %v18126_v39, %v4826_v53  ;;  %v6406_v0 = vor.u32 %v6404_v56, %v6402_v29  ;;  %v18201_v56 = vld [vmem:[#allocation3 + $0x20] sm:$0xff] }
 0x327   : > { %v5345_v15 = vpop.f32.mrf.mxu2  ;;  %v5026_v51 = vshrl.u32 %v5009_v11, 16  ;;  %v5029_v60 = vshll.u32 %v5009_v11, 16  ;;  %v4866_v13 = vadd.f32 %v18140_v45, %v4846_v42  ;;  %v4921_v42 = vpop.permute.xlu1 %4920 }
 0x328   : > { %v5417_v22 = vpop.f32.mrf.mxu3  ;;  %v4632_v54 = vpop.f32.mrf.mxu0  ;;  %6977 = vmatpush.bf16.msra.mxu0 %v14900_v6 }
 0x329   : > { %v18178_v10 = vadd.f32 %v5417_v22, %v5345_v15  ;;  %v5028_v62 = vrot.slane %v5026_v51, 6  ;;  %v5031_v41 = vrot.slane %v5029_v60, 7  ;;  %v4882_v35 = vmax.f32 %v4866_v13, 0.0  ;;  %v5201_v15 = vld [vmem:[#allocation3 + $0x48] sm:$0xe] }
 0x32a   : > { %v4669_v53 = vadd.f32 %v4632_v54, %v17718_v31  ;;  %v6411_v31 = vsel %vm1106_vm1, %v6406_v0, %v18175_v43  ;;  %v14920_v51 = vld [vmem:[%s20340_s8 + $0x168] sm:$0xff] }
 0x32b   : > { %v18187_v11 = vpop.f32.mrf.mxu1  ;;  %6173 = vmatmul.bf16.gmra.mxu0 %v6109_v50  ;;  %v5032_v3 = vor.u32 %v5031_v41, %v5028_v62  ;;  %v4994_v29 = vmul.f32 %v4921_v42, %v4882_v35  ;;  %v14912_v60 = vld [vmem:[%s20340_s8 + $0x128] sm:$0xff]  ;;  %7354 = vmatpush.bf16.msrb.mxu2 %v14920_v51  ;;  %v6898_v51 = vrot.slane %v17466_v12, 1 }
 0x32c   : > { %6626 = vmatmul.bf16.gmra.mxu2 %v18065_v46  ;;  %v4827_v63 = vadd.f32 %v18131_v8, %v4669_v53  ;;  %v14899_v8 = vld [vmem:[%s20340_s8 + $0xc0] sm:$0xff]  ;;  %7195 = vmatpush.bf16.msra.mxu1 %v14912_v60 }
 0x32d   : > { %6769 = vmatmul.bf16.gmra.mxu3 %v6687_v55  ;;  %v5202_v22 = vsel %vm17111_vm11, %v5032_v3, %v5201_v15  ;;  %v5010_v5 = vpack.c.bf16 %v4994_v29, %v4994_v29  ;;  %6978 = vmatpush.bf16.msra.mxu0 %v14899_v8  ;;  %v4926_v55 = vpop.permute.xlu2 %4925  ;;  %v6416_v29 = vshll.u32 %v18201_v56, 16 }
 0x32e   : > { %6526 = vmatmul.bf16.gmra.mxu1 %v6411_v31  ;;  %v4847_v59 = vmul.f32 %v18126_v39, %v4827_v63  ;;  %5203 = vst [vmem:[#allocation3 + $0x48] sm:$0xe] %v5202_v22  ;;  %v5033_v63 = vrot.slane %v5032_v3, 4  ;;  %v6688_v3 = vrot.slane %v18144_v47, 1 }
 0x32f   : > { %v5348_v46 = vpop.f32.mrf.mxu2  ;;  %v5035_v13 = vshrl.u32 %v5010_v5, 16  ;;  %v5038_v54 = vshll.u32 %v5010_v5, 16  ;;  %v18220_v5 = vld [vmem:[#allocation3 + $0x10] sm:$0xff] }
 0x330   : > { %v5420_v37 = vpop.f32.mrf.mxu3  ;;  %v4867_v50 = vadd.f32 %v18140_v45, %v4847_v59  ;;  %v4634_v6 = vpop.f32.mrf.mxu0  ;;  %v6899_v59 = vrot.slane %v18220_v5, 1 }
 0x331   : > { %v18213_v0 = vadd.f32 %v5420_v37, %v5348_v46  ;;  %v5037_v62 = vrot.slane %v5035_v13, 6  ;;  %v5040_v41 = vrot.slane %v5038_v54, 7  ;;  %v4670_v53 = vadd.f32 %v4634_v6, %v17752_v7 }
 0x332   : > { %v4883_v35 = vmax.f32 %v4867_v50, 0.0  ;;  %v6412_v13 = vshrl.u32 %v18144_v47, 16  ;;  %v18232_v54 = vrot.slane %v6416_v29, 1  ;;  %v6900_v12 = vsel %vm1406_vm0, %v6898_v51, %v6899_v59 }
 0x333   : > { %v18216_v42 = vpop.f32.mrf.mxu1  ;;  %v5041_v31 = vor.u32 %v5040_v41, %v5037_v62  ;;  %v4828_v22 = vadd.f32 %v18162_v40, %v4670_v53  ;;  %v14935_v40 = vld [vmem:[%s20340_s8 + $0x1a8] sm:$0xff] }
 0x334   : > { %v4995_v15 = vmul.f32 %v4926_v55, %v4883_v35  ;;  %7569 = vmatpush.bf16.msrb.mxu3 %v14935_v40  ;;  %v6414_v53 = vor.u32 %v6412_v13, %v18175_v43 }
 0x335   : > { %v5042_v46 = vsel %vm17158_vm13, %v5033_v63, %v5041_v31  ;;  %v4848_v7 = vmul.f32 %v18126_v39, %v4828_v22 }
 0x336   : > { %v5011_v37 = vpack.c.bf16 %v4995_v15, %v4995_v15  ;;  %5204 = vst [vmem:[#allocation3 + $0x4c] sm:$0xf] %v5042_v46  ;;  %v4931_v46 = vpop.permute.xlu0 %4930  ;;  %v6419_v43 = vsel %vm1106_vm1, %v6414_v53, %v18232_v54 }
 0x337   : > { %v5350_v8 = vpop.f32.mrf.mxu2  ;;  %v4868_v62 = vadd.f32 %v18140_v45, %v4848_v7  ;;  %v5043_v7 = vrot.slane %v5041_v31, 4  ;;  %v14919_v31 = vld [vmem:[%s20340_s8 + $0x160] sm:$0xff] }
 0x338   : > { %v5422_v60 = vpop.f32.mrf.mxu3  ;;  %v5045_v50 = vshrl.u32 %v5011_v37, 16  ;;  %v5048_v6 = vshll.u32 %v5011_v37, 16  ;;  %v4637_v35 = vpop.f32.mrf.mxu0  ;;  %v6689_v37 = vsel %vm1406_vm0, %v6686_v24, %v6688_v3  ;;  %7355 = vmatpush.bf16.msrb.mxu2 %v14919_v31 }
 0x339   : > { %v18235_v41 = vadd.f32 %v5422_v60, %v5350_v8  ;;  %v4884_v15 = vmax.f32 %v4868_v62, 0.0  ;;  %v4671_v29 = vadd.f32 %v4637_v35, %v17791_v27  ;;  %v14911_v62 = vld [vmem:[%s20340_s8 + $0x120] sm:$0xff] }
 0x33a   : > { %v5047_v55 = vrot.slane %v5045_v50, 6  ;;  %v5050_v63 = vrot.slane %v5048_v6, 7  ;;  %v18256_v50 = vld [vmem:[#allocation3 + $0x28] sm:$0xff]  ;;  %7196 = vmatpush.bf16.msra.mxu1 %v14911_v62 }
 0x33b   : > { %v18242_v22 = vpop.f32.mrf.mxu1  ;;  %6979 = vmatmul.bf16.vlgmr.msra.gmra.mxu0 %v6900_v12  ;;  %v4996_v51 = vmul.f32 %v4931_v46, %v4884_v15  ;;  %v4829_v27 = vadd.f32 %v18187_v11, %v4671_v29  ;;  %v14945_v11 = vld [vmem:[%s20340_s8 + $0x1f8] sm:$0xff] }
 0x33c   : > { %6631 = vmatmul.bf16.gmra.mxu2 %v18100_v57  ;;  %v5051_v8 = vor.u32 %v5050_v63, %v5047_v55  ;;  %7789 = vmatpush.bf16.msrb.mxu0 %v14945_v11 }
 0x33d   : > { %6774 = vmatmul.bf16.gmra.mxu3 %v6689_v37  ;;  %v5012_v40 = vpack.c.bf16 %v4996_v51, %v4996_v51  ;;  %v4849_v13 = vmul.f32 %v18126_v39, %v4829_v27 }
 0x33e   : > { %6531 = vmatmul.bf16.gmra.mxu1 %v6419_v43  ;;  %v5052_v60 = vsel %vm17158_vm13, %v5043_v7, %v5051_v8  ;;  %v4936_v43 = vpop.permute.xlu1 %4935  ;;  %v6424_v7 = vshll.u32 %v18256_v50, 16  ;;  %v5053_v51 = vrot.slane %v5051_v8, 4  ;;  %v6690_v8 = vrot.slane %v18201_v56, 1 }
 0x33f   : > { %v5507_v57 = vpop.f32.mrf.mxu2  ;;  %5205 = vst [vmem:[#allocation3 + $0x50] sm:$0xf] %v5052_v60  ;;  %v5055_v35 = vshrl.u32 %v5012_v40, 16  ;;  %v5058_v12 = vshll.u32 %v5012_v40, 16  ;;  %v4869_v53 = vadd.f32 %v18140_v45, %v4849_v13  ;;  %v18276_v13 = vld [vmem:[#allocation3 + $0x18] sm:$0xff] }
 0x340   : > { %v5517_v24 = vadd.f32 %v5507_v57, %v18156_v2  ;;  %v5613_v6 = vpop.f32.mrf.mxu3  ;;  %v4639_v2 = vpop.f32.mrf.mxu0  ;;  %v6901_v57 = vrot.slane %v18276_v13, 1  ;;  %v6691_v5 = vsel %vm1406_vm0, %v6688_v3, %v6690_v8 }
 0x341   : > { %v5057_v63 = vrot.slane %v5055_v35, 6  ;;  %v5060_v15 = vrot.slane %v5058_v12, 7  ;;  %v4885_v29 = vmax.f32 %v4869_v53, 0.0  ;;  %v4672_v46 = vadd.f32 %v4639_v2, %v17824_v17 }
 0x342   : > { %v18269_v55 = vadd.f32 %v5613_v6, %v5517_v24  ;;  %v6420_v35 = vshrl.u32 %v18201_v56, 16  ;;  %v18288_v12 = vrot.slane %v6424_v7, 1 }
 0x343   : > { %v18272_v37 = vpop.f32.mrf.mxu1  ;;  %v5061_v27 = vor.u32 %v5060_v15, %v5057_v63  ;;  %v4997_v60 = vmul.f32 %v4936_v43, %v4885_v29  ;;  %v4830_v40 = vadd.f32 %v18216_v42, %v4672_v46  ;;  %v14934_v42 = vld [vmem:[%s20340_s8 + $0x1a0] sm:$0xff] }
 0x344   : > { %7570 = vmatpush.bf16.msrb.mxu3 %v14934_v42  ;;  %v6422_v46 = vor.u32 %v6420_v35, %v18232_v54  ;;  %v18314_v42 = vld [vmem:[#allocation3 + $0x30] sm:$0xff] }
 0x345   : > { %v5062_v24 = vsel %vm17158_vm13, %v5053_v51, %v5061_v27  ;;  %v5013_v6 = vpack.c.bf16 %v4997_v60, %v4997_v60  ;;  %v4850_v17 = vmul.f32 %v18126_v39, %v4830_v40  ;;  %v5063_v54 = vrot.slane %v5061_v27, 4  ;;  %v14918_v27 = vld [vmem:[%s20340_s8 + $0x158] sm:$0xff] }
 0x346   : > { %5206 = vst [vmem:[#allocation3 + $0x54] sm:$0xf] %v5062_v24  ;;  %v4941_v24 = vpop.permute.xlu2 %4940  ;;  %7356 = vmatpush.bf16.msrb.mxu2 %v14918_v27 }
 0x347   : > { %v5509_v31 = vpop.f32.mrf.mxu2  ;;  %v5065_v53 = vshrl.u32 %v5013_v6, 16  ;;  %v5068_v2 = vshll.u32 %v5013_v6, 16  ;;  %v4870_v63 = vadd.f32 %v18140_v45, %v4850_v17 }
 0x348   : > { %v5518_v11 = vadd.f32 %v5509_v31, %v18178_v10  ;;  %v5615_v62 = vpop.f32.mrf.mxu3  ;;  %v4642_v29 = vpop.f32.mrf.mxu0  ;;  %v6902_v10 = vsel %vm1406_vm0, %v6899_v59, %v6901_v57  ;;  %v6427_v59 = vsel %vm1106_vm1, %v6422_v46, %v18288_v12 }
 0x349   : > { %v5067_v43 = vrot.slane %v5065_v53, 6  ;;  %v5070_v51 = vrot.slane %v5068_v2, 7  ;;  %v4886_v7 = vmax.f32 %v4870_v63, 0.0  ;;  %v4673_v60 = vadd.f32 %v4642_v29, %v17865_v14  ;;  %v14910_v53 = vld [vmem:[%s20340_s8 + $0x118] sm:$0xff] }
 0x34a   : > { %v18291_v15 = vadd.f32 %v5615_v62, %v5518_v11  ;;  %7197 = vmatpush.bf16.msra.mxu1 %v14910_v53 }
 0x34b   : > { %v18300_v40 = vpop.f32.mrf.mxu1  ;;  %6984 = vmatmul.bf16.gmra.mxu0 %v6902_v10  ;;  %v5071_v6 = vor.u32 %v5070_v51, %v5067_v43  ;;  %v4998_v17 = vmul.f32 %v4941_v24, %v4886_v7  ;;  %v4831_v14 = vadd.f32 %v18242_v22, %v4673_v60  ;;  %v14944_v22 = vld [vmem:[%s20340_s8 + $0x1f0] sm:$0xff]  ;;  %v4946_v24 = vpop.permute.xlu0 %4945 }
 0x34c   : > { %6636 = vmatmul.bf16.gmra.mxu2 %v18144_v47  ;;  %7790 = vmatpush.bf16.msrb.mxu0 %v14944_v22  ;;  %v6428_v22 = vshrl.u32 %v18256_v50, 16 }
 0x34d   : > { %6779 = vmatmul.bf16.gmra.mxu3 %v6691_v5  ;;  %v5072_v31 = vsel %vm17158_vm13, %v5063_v54, %v5071_v6  ;;  %v5014_v11 = vpack.c.bf16 %v4998_v17, %v4998_v17  ;;  %v4851_v62 = vmul.f32 %v18126_v39, %v4831_v14  ;;  %v6432_v5 = vshll.u32 %v18314_v42, 16 }
 0x34e   : > { %6536 = vmatmul.bf16.gmra.mxu1 %v6427_v59  ;;  %5207 = vst [vmem:[#allocation3 + $0x58] sm:$0xf] %v5072_v31  ;;  %v5073_v59 = vrot.slane %v5071_v6, 4  ;;  %v18334_v31 = vld [vmem:[#allocation3 + $0x20] sm:$0xff]  ;;  %v6692_v6 = vrot.slane %v18256_v50, 1 }
 0x34f   : > { %v5512_v47 = vpop.f32.mrf.mxu2  ;;  %v5075_v2 = vshrl.u32 %v5014_v11, 16  ;;  %v5078_v63 = vshll.u32 %v5014_v11, 16  ;;  %v4871_v29 = vadd.f32 %v18140_v45, %v4851_v62  ;;  %v6903_v11 = vrot.slane %v18334_v31, 1 }
 0x350   : > { %v5519_v3 = vadd.f32 %v5512_v47, %v18213_v0  ;;  %v5618_v35 = vpop.f32.mrf.mxu3  ;;  %v4644_v0 = vpop.f32.mrf.mxu0  ;;  %v18346_v53 = vrot.slane %v6432_v5, 1  ;;  %v6693_v13 = vsel %vm1406_vm0, %v6690_v8, %v6692_v6  ;;  %v18374_v8 = vld [vmem:[#allocation3 + $0x38] sm:$0xff] }
 0x351   : > { %v5077_v46 = vrot.slane %v5075_v2, 6  ;;  %v5080_v43 = vrot.slane %v5078_v63, 7  ;;  %v4887_v51 = vmax.f32 %v4871_v29, 0.0  ;;  %v4674_v7 = vadd.f32 %v4644_v0, %v17898_v9 }
 0x352   : > { %v18327_v10 = vadd.f32 %v5618_v35, %v5519_v3 }
 0x353   : > { %v18330_v60 = vpop.f32.mrf.mxu1  ;;  %v5081_v54 = vor.u32 %v5080_v43, %v5077_v46  ;;  %v4999_v17 = vmul.f32 %v4946_v24, %v4887_v51  ;;  %v4832_v14 = vadd.f32 %v18272_v37, %v4674_v7  ;;  %v14933_v37 = vld [vmem:[%s20340_s8 + $0x198] sm:$0xff]  ;;  %v6430_v43 = vor.u32 %v6428_v22, %v18288_v12 }
 0x354   : > { %7571 = vmatpush.bf16.msrb.mxu3 %v14933_v37 }
 0x355   : > { %v5082_v62 = vsel %vm17158_vm13, %v5073_v59, %v5081_v54  ;;  %v5015_v47 = vpack.c.bf16 %v4999_v17, %v4999_v17  ;;  %v4852_v9 = vmul.f32 %v18126_v39, %v4832_v14  ;;  %v4951_v17 = vpop.permute.xlu1 %4950  ;;  %v5083_v12 = vrot.slane %v5081_v54, 4  ;;  %v14917_v54 = vld [vmem:[%s20340_s8 + $0x150] sm:$0xff] }
 0x356   : > { %5208 = vst [vmem:[#allocation3 + $0x5c] sm:$0xf] %v5082_v62  ;;  %7357 = vmatpush.bf16.msrb.mxu2 %v14917_v54  ;;  %v6436_v54 = vshrl.u32 %v18314_v42, 16 }
 0x357   : > { %v5514_v3 = vpop.f32.mrf.mxu2  ;;  %v5085_v2 = vshrl.u32 %v5015_v47, 16  ;;  %v5088_v63 = vshll.u32 %v5015_v47, 16  ;;  %v4872_v29 = vadd.f32 %v18140_v45, %v4852_v9 }
 0x358   : > { %v5520_v35 = vadd.f32 %v5514_v3, %v18235_v41  ;;  %v5620_v27 = vpop.f32.mrf.mxu3  ;;  %v4647_v46 = vpop.f32.mrf.mxu0  ;;  %v6904_v41 = vsel %vm1406_vm0, %v6901_v57, %v6903_v11  ;;  %v6435_v57 = vsel %vm1106_vm1, %v6430_v43, %v18346_v53 }
 0x359   : > { %v5087_v51 = vrot.slane %v5085_v2, 6  ;;  %v5090_v7 = vrot.slane %v5088_v63, 7  ;;  %v4888_v24 = vmax.f32 %v4872_v29, 0.0  ;;  %v4675_v5 = vadd.f32 %v4647_v46, %v17939_v25 }
 0x35a   : > { %v18349_v0 = vadd.f32 %v5620_v27, %v5520_v35  ;;  %v14909_v27 = vld [vmem:[%s20340_s8 + $0x110] sm:$0xff] }
 0x35b   : > { %v18358_v59 = vpop.f32.mrf.mxu1  ;;  %6989 = vmatmul.bf16.gmra.mxu0 %v6904_v41  ;;  %v5091_v14 = vor.u32 %v5090_v7, %v5087_v51  ;;  %v5000_v62 = vmul.f32 %v4951_v17, %v4888_v24  ;;  %v4833_v25 = vadd.f32 %v18300_v40, %v4675_v5  ;;  %v14943_v40 = vld [vmem:[%s20340_s8 + $0x1e8] sm:$0xff]  ;;  %7198 = vmatpush.bf16.msra.mxu1 %v14909_v27  ;;  %v4956_v7 = vpop.permute.xlu2 %4955  ;;  %v6440_v24 = vshll.u32 %v18374_v8, 16 }
 0x35c   : > { %6641 = vmatmul.bf16.gmra.mxu2 %v18201_v56  ;;  %7791 = vmatpush.bf16.msrb.mxu0 %v14943_v40 }
 0x35d   : > { %6784 = vmatmul.bf16.gmra.mxu3 %v6693_v13  ;;  %v5092_v47 = vsel %vm17158_vm13, %v5083_v12, %v5091_v14  ;;  %v5016_v9 = vpack.c.bf16 %v5000_v62, %v5000_v62  ;;  %v4853_v3 = vmul.f32 %v18126_v39, %v4833_v25  ;;  %v5093_v5 = vrot.slane %v5091_v14, 4  ;;  %v18393_v12 = vld [vmem:[#allocation3 + $0x28] sm:$0xff] }
 0x35e   : > { %6541 = vmatmul.bf16.gmra.mxu1 %v6435_v57  ;;  %5209 = vst [vmem:[#allocation3 + $0x60] sm:$0xf] %v5092_v47  ;;  %v6905_v62 = vrot.slane %v18393_v12, 1  ;;  %v6694_v14 = vrot.slane %v18314_v42, 1  ;;  %v18408_v40 = vrot.slane %v6440_v24, 1 }
 0x35f   : > { %v18372_v56 = vpop.f32.mrf.mxu2  ;;  %v5095_v37 = vshrl.u32 %v5016_v9, 16  ;;  %v5098_v22 = vshll.u32 %v5016_v9, 16  ;;  %v4873_v2 = vadd.f32 %v18140_v45, %v4853_v3 }
 0x360   : > { %v18376_v35 = vpop.f32.mrf.mxu3  ;;  %v4649_v63 = vpop.f32.mrf.mxu0  ;;  %v6695_v31 = vsel %vm1406_vm0, %v6692_v6, %v6694_v14 }
 0x361   : > { %v5097_v29 = vrot.slane %v5095_v37, 6  ;;  %v5100_v46 = vrot.slane %v5098_v22, 7  ;;  %v4889_v41 = vmax.f32 %v4873_v2, 0.0  ;;  %v4676_v43 = vadd.f32 %v4649_v63, %v17974_v52  ;;  %v6323_v2 = vld [vmem:[#allocation3 + $0x40] sm:$0x1] }
 0x363   : > { %v18389_v51 = vpop.f32.mrf.mxu1  ;;  %v5101_v17 = vor.u32 %v5100_v46, %v5097_v29  ;;  %v5001_v13 = vmul.f32 %v4956_v7, %v4889_v41  ;;  %v4834_v57 = vadd.f32 %v18330_v60, %v4676_v43  ;;  %v14932_v60 = vld [vmem:[%s20340_s8 + $0x190] sm:$0xff]  ;;  %v6906_v29 = vsel %vm1406_vm0, %v6903_v11, %v6905_v62 }
 0x364   : > { %7572 = vmatpush.bf16.msrb.mxu3 %v14932_v60  ;;  %v6438_v46 = vor.u32 %v6436_v54, %v18346_v53  ;;  %v6374_v53 = vunpack.c.l.b16 %v6323_v2 }
 0x365   : > { %v5102_v25 = vsel %vm17158_vm13, %v5093_v5, %v5101_v17  ;;  %v5017_v47 = vpack.c.bf16 %v5001_v13, %v5001_v13  ;;  %v4854_v52 = vmul.f32 %v18126_v39, %v4834_v57  ;;  %v4961_v13 = vpop.permute.xlu0 %4960  ;;  %v5103_v57 = vrot.slane %v5101_v17, 4  ;;  %v14916_v17 = vld [vmem:[%s20340_s8 + $0x148] sm:$0xff] }
 0x366   : > { %5210 = vst [vmem:[#allocation3 + $0x64] sm:$0xf] %v5102_v25  ;;  %v6443_v11 = vsel %vm1106_vm1, %v6438_v46, %v18408_v40  ;;  %7358 = vmatpush.bf16.msrb.mxu2 %v14916_v17 }
 0x367   : > { %v18399_v9 = vpop.f32.mrf.mxu2  ;;  %v5105_v27 = vshrl.u32 %v5017_v47, 16  ;;  %v5108_v37 = vshll.u32 %v5017_v47, 16  ;;  %v4874_v22 = vadd.f32 %v18140_v45, %v4854_v52 }
 0x368   : > { %v18401_v3 = vpop.f32.mrf.mxu3  ;;  %v4652_v63 = vpop.f32.mrf.mxu0 }
 0x369   : > { %v5107_v41 = vrot.slane %v5105_v27, 6  ;;  %v5110_v43 = vrot.slane %v5108_v37, 7  ;;  %v4890_v7 = vmax.f32 %v4874_v22, 0.0  ;;  %v4677_v24 = vadd.f32 %v4652_v63, %v18019_v1  ;;  %v14908_v27 = vld [vmem:[%s20340_s8 + $0x108] sm:$0xff] }
 0x36a   : > { %v18445_v37 = vpack.c.b16 %v6374_v53, %v6374_v53  ;;  %7199 = vmatpush.bf16.msra.mxu1 %v14908_v27  ;;  %v6444_v27 = vshrl.u32 %v18374_v8, 16 }
 0x36b   : > { %v18418_v5 = vpop.f32.mrf.mxu1  ;;  %6994 = vmatmul.bf16.gmra.mxu0 %v6906_v29  ;;  %v5111_v25 = vor.u32 %v5110_v43, %v5107_v41  ;;  %v5002_v47 = vmul.f32 %v4961_v13, %v4890_v7  ;;  %v4835_v1 = vadd.f32 %v18358_v59, %v4677_v24  ;;  %v14942_v59 = vld [vmem:[%s20340_s8 + $0x1e0] sm:$0xff]  ;;  %v4966_v13 = vpop.permute.xlu1 %4965 }
 0x36c   : > { %6646 = vmatmul.bf16.gmra.mxu2 %v18256_v50  ;;  %7792 = vmatpush.bf16.msrb.mxu0 %v14942_v59 }
 0x36d   : > { %6789 = vmatmul.bf16.gmra.mxu3 %v6695_v31  ;;  %v5112_v52 = vsel %vm17158_vm13, %v5103_v57, %v5111_v25  ;;  %v5018_v60 = vpack.c.bf16 %v5002_v47, %v5002_v47  ;;  %v4855_v50 = vmul.f32 %v18126_v39, %v4835_v1  ;;  %v6448_v31 = vshll.u32 %v18445_v37, 16  ;;  %v18453_v1 = vld [vmem:[#allocation3 + $0x30] sm:$0xff] }
 0x36e   : > { %6546 = vmatmul.bf16.gmra.mxu1 %v6443_v11  ;;  %5211 = vst [vmem:[#allocation3 + $0x68] sm:$0xf] %v5112_v52  ;;  %v5113_v11 = vrot.slane %v5111_v25, 4  ;;  %v6907_v52 = vrot.slane %v18453_v1, 1  ;;  %v6696_v25 = vrot.slane %v18374_v8, 1 }
 0x36f   : > { %v18432_v54 = vpop.f32.mrf.mxu2  ;;  %v5115_v22 = vshrl.u32 %v5018_v60, 16  ;;  %v5118_v2 = vshll.u32 %v5018_v60, 16  ;;  %v4875_v63 = vadd.f32 %v18140_v45, %v4855_v50 }
 0x370   : > { %v18434_v6 = vpop.f32.mrf.mxu3  ;;  %v4654_v29 = vpop.f32.mrf.mxu0  ;;  %v6697_v12 = vsel %vm1406_vm0, %v6694_v14, %v6696_v25  ;;  %v14915_v14 = vld [vmem:[%s20340_s8 + $0x140] sm:$0xff] }
 0x371   : > { %v5117_v46 = vrot.slane %v5115_v22, 6  ;;  %v5120_v41 = vrot.slane %v5118_v2, 7  ;;  %v4891_v43 = vmax.f32 %v4875_v63, 0.0  ;;  %v4678_v7 = vadd.f32 %v4654_v29, %v18040_v4  ;;  %7359 = vmatpush.bf16.msrb.mxu2 %v14915_v14 }
 0x372   : > { %v6450_v22 = vrot.slane %v6448_v31, 1 }
 0x373   : > { %v18449_v24 = vpop.f32.mrf.mxu1  ;;  %v5121_v53 = vor.u32 %v5120_v41, %v5117_v46  ;;  %v5003_v57 = vmul.f32 %v4966_v13, %v4891_v43  ;;  %v4836_v47 = vadd.f32 %v18389_v51, %v4678_v7  ;;  %v14931_v51 = vld [vmem:[%s20340_s8 + $0x188] sm:$0xff]  ;;  %v6908_v41 = vsel %vm1406_vm0, %v6905_v62, %v6907_v52 }
 0x374   : > { %7573 = vmatpush.bf16.msrb.mxu3 %v14931_v51  ;;  %v6446_v43 = vor.u32 %v6444_v27, %v18408_v40 }
 0x375   : > { %v5122_v60 = vsel %vm17158_vm13, %v5113_v11, %v5121_v53  ;;  %v5019_v50 = vpack.c.bf16 %v5003_v57, %v5003_v57  ;;  %v4856_v4 = vmul.f32 %v18126_v39, %v4836_v47  ;;  %v4971_v47 = vpop.permute.xlu2 %4970  ;;  %v5123_v40 = vrot.slane %v5121_v53, 4  ;;  %v14907_v53 = vld [vmem:[%s20340_s8 + $0x100] sm:$0xff] }
 0x376   : > { %5212 = vst [vmem:[#allocation3 + $0x6c] sm:$0xf] %v5122_v60  ;;  %v6451_v62 = vsel %vm1106_vm1, %v6446_v43, %v6450_v22  ;;  %7200 = vmatpush.bf16.msra.mxu1 %v14907_v53 }
 0x377   : > { %v18459_v17 = vpop.f32.mrf.mxu2  ;;  %v5125_v2 = vshrl.u32 %v5019_v50, 16  ;;  %v5128_v63 = vshll.u32 %v5019_v50, 16  ;;  %v4876_v29 = vadd.f32 %v18140_v45, %v4856_v4 }
 0x378   : > { %v18461_v59 = vpop.f32.mrf.mxu3  ;;  %v4657_v46 = vpop.f32.mrf.mxu0 }
 0x379   : > { %v5127_v7 = vrot.slane %v5125_v2, 6  ;;  %v5130_v13 = vrot.slane %v5128_v63, 7  ;;  %v4892_v11 = vmax.f32 %v4876_v29, 0.0  ;;  %v4679_v57 = vadd.f32 %v4657_v46, %v18068_v36 }
 0x37b   : > { %v18476_v31 = vpop.f32.mrf.mxu1  ;;  %6999 = vmatmul.bf16.gmra.mxu0 %v6908_v41  ;;  %v5131_v60 = vor.u32 %v5130_v13, %v5127_v7  ;;  %v5004_v50 = vmul.f32 %v4971_v47, %v4892_v11  ;;  %v4837_v4 = vadd.f32 %v18418_v5, %v4679_v57  ;;  %v14941_v5 = vld [vmem:[%s20340_s8 + $0x1d8] sm:$0xff]  ;;  %v4976_v57 = vpop.permute.xlu0 %4975 }
 0x37c   : > { %6651 = vmatmul.bf16.gmra.mxu2 %v18314_v42  ;;  %7793 = vmatpush.bf16.msrb.mxu0 %v14941_v5 }
 0x37d   : > { %6794 = vmatmul.bf16.gmra.mxu3 %v6697_v12  ;;  %v5132_v36 = vsel %vm17158_vm13, %v5123_v40, %v5131_v60  ;;  %v5020_v51 = vpack.c.bf16 %v5004_v50, %v5004_v50  ;;  %v4857_v27 = vmul.f32 %v18126_v39, %v4837_v4  ;;  %v5133_v47 = vrot.slane %v5131_v60, 4  ;;  %v18507_v50 = vld [vmem:[#allocation3 + $0x38] sm:$0xff] }
 0x37e   : > { %6551 = vmatmul.bf16.gmra.mxu1 %v6451_v62  ;;  %5213 = vst [vmem:[#allocation3 + $0x70] sm:$0xf] %v5132_v36  ;;  %v6909_v4 = vrot.slane %v18507_v50, 1  ;;  %v6698_v60 = vrot.slane %v18445_v37, 1 }
 0x37f   : > { %v18489_v2 = vpop.f32.mrf.mxu2  ;;  %v5135_v22 = vshrl.u32 %v5020_v51, 16  ;;  %v5138_v63 = vshll.u32 %v5020_v51, 16  ;;  %v4877_v29 = vadd.f32 %v18140_v45, %v4857_v27 }
 0x380   : > { %v18491_v42 = vpop.f32.mrf.mxu3  ;;  %v4659_v46 = vpop.f32.mrf.mxu0  ;;  %v6699_v1 = vsel %vm1406_vm0, %v6696_v25, %v6698_v60  ;;  %v7417_v60 = vld [vmem:[#allocation3 + $0x10] sm:$0xc] }
 0x381   : > { %v5137_v41 = vrot.slane %v5135_v22, 6  ;;  %v5140_v43 = vrot.slane %v5138_v63, 7  ;;  %v4893_v7 = vmax.f32 %v4877_v29, 0.0  ;;  %v4680_v13 = vadd.f32 %v4659_v46, %v18074_v32  ;;  %v14930_v29 = vld [vmem:[%s20340_s8 + $0x180] sm:$0xff] }
 0x382   : > { %v6910_v63 = vsel %vm1406_vm0, %v6907_v52, %v6909_v4  ;;  %7574 = vmatpush.bf16.msrb.mxu3 %v14930_v29  ;;  %v14969_v29 = vld [vmem:[%s20342_s10 + $0x38] sm:$0xff] }
 0x383   : > { %v18504_v11 = vpop.f32.mrf.mxu1  ;;  %v5141_v12 = vor.u32 %v5140_v43, %v5137_v41  ;;  %v5005_v62 = vmul.f32 %v4976_v57, %v4893_v7  ;;  %v4838_v40 = vadd.f32 %v18449_v24, %v4680_v13  ;;  %v4981_v13 = vpop.permute.xlu1 %4980  ;;  %8245 = vmatpush.bf16.msra.mxu2 %v14969_v29  ;;  %v18600_v29 = vld [vmem:[%s20339_s7] ss:$0 sm:$0xff] }
 0x385   : > { %v5142_v36 = vsel %vm17158_vm13, %v5133_v47, %v5141_v12  ;;  %v5021_v51 = vpack.c.bf16 %v5005_v62, %v5005_v62  ;;  %v4858_v27 = vmul.f32 %v18126_v39, %v4838_v40  ;;  %v5143_v52 = vrot.slane %v5141_v12, 4 }
 0x386   : > { %5214 = vst [vmem:[#allocation3 + $0x74] sm:$0xf] %v5142_v36  ;;  %v5752_v40 = vadd.f32 %v18372_v56, %v18269_v55 }
 0x387   : > { %v18513_v32 = vpop.f32.mrf.mxu2  ;;  %v5145_v5 = vshrl.u32 %v5021_v51, 16  ;;  %v5148_v53 = vshll.u32 %v5021_v51, 16  ;;  %v4878_v24 = vadd.f32 %v18140_v45, %v4858_v27 }
 0x388   : > { %v18515_v14 = vpop.f32.mrf.mxu3  ;;  %v4662_v22 = vpop.f32.mrf.mxu0  ;;  %v5850_v55 = vadd.f32 %v18376_v35, %v5752_v40  ;;  %v14953_v35 = vld [vmem:[%s20340_s8 + $0x238] sm:$0xff]  ;;  %v20402_v40 = vunpack.c.l.b16 %v17571_v49 }
 0x389   : > { %v5147_v46 = vrot.slane %v5145_v5, 6  ;;  %v5150_v41 = vrot.slane %v5148_v53, 7  ;;  %v4894_v43 = vmax.f32 %v4878_v24, 0.0  ;;  %v4681_v37 = vadd.f32 %v4662_v22, %v18102_v21  ;;  %7948 = vmatpush.bf16.msrb.mxu1 %v14953_v35  ;;  %v4991_v35 = vpop.permute.xlu0 %4990 }
 0x38b   : > { %v18528_v7 = vpop.f32.mrf.mxu1  ;;  %7004 = vmatmul.bf16.gmra.mxu0 %v6910_v63  ;;  %v5151_v57 = vor.u32 %v5150_v41, %v5147_v46  ;;  %v5006_v47 = vmul.f32 %v4981_v13, %v4894_v43  ;;  %v4839_v62 = vadd.f32 %v18476_v31, %v4681_v37  ;;  %v14940_v63 = vld [vmem:[%s20340_s8 + $0x1d0] sm:$0xff]  ;;  %v4986_v46 = vpop.permute.xlu2 %4985  ;;  %v5962_v41 = vadd.f32 %v18489_v2, %v5850_v55 }
 0x38c   : > { %6656 = vmatmul.bf16.gmra.mxu2 %v18374_v8  ;;  %v7468_v43 = vunpack.c.l.b16 %v7417_v60  ;;  %7794 = vmatpush.bf16.msrb.mxu0 %v14940_v63 }
 0x38d   : > { %6799 = vmatmul.bf16.gmra.mxu3 %v6699_v1  ;;  %v5152_v21 = vsel %vm17158_vm13, %v5143_v52, %v5151_v57  ;;  %v5022_v36 = vpack.c.bf16 %v5006_v47, %v5006_v47  ;;  %v4859_v8 = vmul.f32 %v18126_v39, %v4839_v62  ;;  %v5153_v37 = vrot.slane %v5151_v57, 4  ;;  %v18563_v47 = vld [vmem:[#allocation3 + $0x40] sm:$0xff] }
 0x38e   : > { %7201 = vmatmul.bf16.vlgmr.msra.gmra.mxu1 %v17562_v58  ;;  %5215 = vst [vmem:[#allocation3 + $0x78] sm:$0xf] %v5152_v21  ;;  %v5753_v52 = vadd.f32 %v18399_v9, %v18291_v15  ;;  %v6911_v62 = vrot.slane %v18563_v47, 1  ;;  %v18568_v21 = vpack.c.b16 %v20402_v40, %v7468_v43  ;;  %v14992_v15 = vld [vmem:[%s20340_s8 + $0x78] sm:$0xff] }
 0x38f   : > { %v18541_v25 = vpop.f32.mrf.mxu2  ;;  %v5155_v51 = vshrl.u32 %v5022_v36, 16  ;;  %v5158_v31 = vshll.u32 %v5022_v36, 16  ;;  %v4879_v27 = vadd.f32 %v18140_v45, %v4859_v8  ;;  %v18580_v8 = vld [vmem:[#allocation3 + $0x18] sm:$0xff]  ;;  %8562 = vmatpush.bf16.msra.mxu3 %v14992_v15 }
 0x390   : > { %v18543_v12 = vpop.f32.mrf.mxu3  ;;  %v4664_v56 = vpop.f32.mrf.mxu0  ;;  %v7495_v49 = vrot.slane %v18580_v8, 2  ;;  %v5851_v55 = vadd.f32 %v18401_v3, %v5753_v52  ;;  %v1008_v40 = vld [vmem:[#allocation3 + $0x98] sm:$0xf] }
 0x391   : > { %v5157_v58 = vrot.slane %v5155_v51, 6  ;;  %v5160_v5 = vrot.slane %v5158_v31, 7  ;;  %v4895_v53 = vmax.f32 %v4879_v27, 0.0  ;;  %v4682_v24 = vadd.f32 %v4664_v56, %v18117_v20  ;;  %v14984_v47 = vld [vmem:[%s20340_s8 + $0x38] sm:$0xff] }
 0x392   : > { %v6081_v51 = vadd.f32 %v18491_v42, %v5962_v41  ;;  %v7494_v42 = vrot.slane %v18568_v21, 2 }
 0x393   : > { %v18548_v22 = vpop.f32.mrf.mxu1  ;;  %v5161_v20 = vor.u32 %v5160_v5, %v5157_v58  ;;  %v5007_v13 = vmul.f32 %v4986_v46, %v4895_v53  ;;  %v4840_v1 = vadd.f32 %v18504_v11, %v4682_v24  ;;  %v6912_v58 = vsel %vm1406_vm0, %v6909_v4, %v6911_v62  ;;  %v6837_v5 = vld [vmem:[#allocation3 + $0x48] sm:$0x1] }
 0x394   : > { %v5963_v46 = vadd.f32 %v18513_v32, %v5851_v55  ;;  %v7496_v50 = vsel %vm2004_vm2, %v7494_v42, %v7495_v49  ;;  %v14968_v32 = vld [vmem:[%s20342_s10 + $0x30] sm:$0xff] }
 0x395   : > { %v5162_v2 = vsel %vm17158_vm13, %v5153_v37, %v5161_v20  ;;  %v5023_v57 = vpack.c.bf16 %v5007_v13, %v5007_v13  ;;  %v4860_v11 = vmul.f32 %v18126_v39, %v4840_v1  ;;  %v18588_v39 = vld [vmem:[%s20338_s6] ss:$0 sm:$0xff]  ;;  %v5163_v4 = vrot.slane %v5161_v20, 4  ;;  %v14952_v20 = vld [vmem:[%s20340_s8 + $0x230] sm:$0xff]  ;;  %8246 = vmatpush.bf16.msra.mxu2 %v14968_v32 }
 0x396   : > { %5216 = vst [vmem:[#allocation3 + $0x7c] sm:$0xf] %v5162_v2  ;;  %v5754_v13 = vadd.f32 %v18432_v54, %v18327_v10  ;;  %v6888_v1 = vunpack.c.l.b16 %v6837_v5  ;;  %v6082_v15 = vadd.f32 %v18515_v14, %v5963_v46  ;;  %7949 = vmatpush.bf16.msrb.mxu1 %v14952_v20  ;;  %v18630_v5 = vld [vmem:[#allocation3 + $0x20] sm:$0xff] }
 0x397   : > { %v18573_v36 = vpop.f32.mrf.mxu2  ;;  %v5165_v31 = vshrl.u32 %v5023_v57, 16  ;;  %v5168_v27 = vshll.u32 %v5023_v57, 16  ;;  %v4880_v60 = vadd.f32 %v18140_v45, %v4860_v11  ;;  %v1009_v11 = vsel %vm1007_vm6, 0, %v1008_v40 }
 0x398   : > { %v18578_v9 = vpop.f32.mrf.mxu3  ;;  %v6169_v56 = vpop.f32.mrf.mxu0  ;;  %1010 = vst [vmem:[#allocation3 + $0x98] sm:$0xf] %v1009_v11  ;;  %v5852_v55 = vadd.f32 %v18434_v6, %v5754_v13  ;;  %v6897_v42 = vpack.c.b16 %v6888_v1, %v6888_v1  ;;  %v5219_v6 = vld [vmem:[#allocation3 + $0x88] sm:$0x3] }
 0x399   : > { %v5167_v53 = vrot.slane %v5165_v31, 6  ;;  %v5170_v45 = vrot.slane %v5168_v27, 7  ;;  %v4896_v24 = vmax.f32 %v4880_v60, 0.0  ;;  %v6179_v63 = vadd.f32 %v6169_v56, %v6081_v51  ;;  %v6210_v60 = vpop.permute.xlu1 %6209 }
 0x39a   : > { %v5964_v14 = vadd.f32 %v18541_v25, %v5852_v55  ;;  %v6913_v1 = vrot.slane %v6897_v42, 1  ;;  %v14991_v25 = vld [vmem:[%s20340_s8 + $0x70] sm:$0xff] }
 0x39b   : > { %v18602_v3 = vpop.f32.mrf.mxu1  ;;  %7009 = vmatmul.bf16.gmra.mxu0 %v6912_v58  ;;  %v5171_v41 = vor.u32 %v5170_v45, %v5167_v53  ;;  %v5008_v43 = vmul.f32 %v4991_v35, %v4896_v24  ;;  %v6187_v37 = vmul.f32 %v18588_v39, %v6179_v63  ;;  %8563 = vmatpush.bf16.msra.mxu3 %v14991_v25 }
 0x39c   : > { %7360 = vmatmul.bf16.vlgmr.msrb.gmra.mxu2 %v17543_v18  ;;  %v14939_v18 = vld [vmem:[%s20340_s8 + $0x1c8] sm:$0xff]  ;;  %v6083_v40 = vadd.f32 %v18543_v12, %v5964_v14  ;;  %v6914_v26 = vsel %vm1406_vm0, %v6911_v62, %v6913_v1  ;;  %v6220_v1 = vpop.permute.xlu0 %6219 }
 0x39d   : > { %7575 = vmatmul.bf16.vlgmr.msrb.gmra.mxu3 %v7496_v50  ;;  %v5172_v10 = vsel %vm17158_vm13, %v5163_v4, %v5171_v41  ;;  %v5024_v54 = vpack.c.bf16 %v5008_v43, %v5008_v43  ;;  %7795 = vmatpush.bf16.msrb.mxu0 %v14939_v18  ;;  %v5173_v35 = vrot.slane %v5171_v41, 4  ;;  %v7497_v43 = vrot.slane %v18630_v5, 2  ;;  %v14938_v41 = vld [vmem:[%s20340_s8 + $0x1c0] sm:$0xff] }
 0x39e   : > { %7206 = vmatmul.bf16.gmra.mxu1 %v17646_v28  ;;  %v6195_v28 = vadd.f32 %v18600_v29, %v6187_v37  ;;  %5217 = vst [vmem:[#allocation3 + $0x80] sm:$0xf] %v5172_v10  ;;  %v5755_v37 = vadd.f32 %v18459_v17, %v18349_v0 }
 0x39f   : > { %v6622_v52 = vpop.f32.mrf.mxu2  ;;  %v5175_v51 = vshrl.u32 %v5024_v54, 16  ;;  %v5178_v31 = vshll.u32 %v5024_v54, 16  ;;  %v7498_v42 = vsel %vm2004_vm2, %v7495_v49, %v7497_v43  ;;  %v14950_v49 = vld [vmem:[%s20340_s8 + $0x220] sm:$0xff] }
 0x3a0   : > { %v6623_v2 = vadd.f32 %v6622_v52, %v18528_v7  ;;  %v6765_v57 = vpop.f32.mrf.mxu3  ;;  %v6199_v27 = vmax.f32 %v6195_v28, 0.0  ;;  %v6171_v58 = vpop.f32.mrf.mxu0  ;;  %v14967_v28 = vld [vmem:[%s20342_s10 + $0x28] sm:$0xff] }
 0x3a1   : > { %v5177_v7 = vrot.slane %v5175_v51, 6  ;;  %v5180_v53 = vrot.slane %v5178_v31, 7  ;;  %v6180_v24 = vadd.f32 %v6171_v58, %v6082_v15  ;;  %v14951_v52 = vld [vmem:[%s20340_s8 + $0x228] sm:$0xff]  ;;  %7796 = vmatpush.bf16.msrb.mxu0 %v14938_v41  ;;  %8247 = vmatpush.bf16.msra.mxu2 %v14967_v28  ;;  %v6215_v51 = vpop.permute.xlu2 %6214  ;;  %v5853_v31 = vadd.f32 %v18461_v59, %v5755_v37  ;;  %v14966_v59 = vld [vmem:[%s20342_s10 + $0x20] sm:$0xff] }
 0x3a2   : > { %v18628_v56 = vadd.f32 %v6765_v57, %v6623_v2  ;;  %v6227_v45 = vmul.f32 %v6210_v60, %v6199_v27  ;;  %7950 = vmatpush.bf16.msrb.mxu1 %v14951_v52  ;;  %v14990_v15 = vld [vmem:[%s20340_s8 + $0x68] sm:$0xff] }
 0x3a3   : > { %v18632_v63 = vpop.f32.mrf.mxu1  ;;  %v5181_v46 = vor.u32 %v5180_v53, %v5177_v7  ;;  %v6188_v4 = vmul.f32 %v18588_v39, %v6180_v24  ;;  %v5965_v62 = vadd.f32 %v18573_v36, %v5853_v31  ;;  %v7665_v53 = vshll.u32 %v18580_v8, 16  ;;  %8564 = vmatpush.bf16.msra.mxu3 %v14990_v15  ;;  %v18703_v52 = vld [vmem:[#allocation3 + $0x28] sm:$0xff] }
 0x3a4   : > { %v6231_v50 = vpack.c.bf16 %v6227_v45, %v6227_v45  ;;  %v7654_v36 = vshrl.u32 %v18568_v21, 16 }
 0x3a5   : > { %v5182_v13 = vsel %vm17158_vm13, %v5173_v35, %v5181_v46  ;;  %v5183_v18 = vrot.slane %v5181_v46, 4  ;;  %v6196_v54 = vadd.f32 %v18600_v29, %v6188_v4  ;;  %v7657_v35 = vshll.u32 %v18568_v21, 16  ;;  %8248 = vmatpush.bf16.msra.mxu2 %v14966_v59  ;;  %8667 = vmatpush.bf16.msra.mxu0 %v14984_v47 }
 0x3a6   : > { %5218 = vst [vmem:[#allocation3 + $0x84] sm:$0xf] %v5182_v13  ;;  %v6236_v20 = vshrl.u32 %v6231_v50, 16  ;;  %v6239_v10 = vshll.u32 %v6231_v50, 16  ;;  %7951 = vmatpush.bf16.msrb.mxu1 %v14950_v49  ;;  %v6084_v37 = vadd.f32 %v18578_v9, %v5965_v62  ;;  %v14989_v9 = vld [vmem:[%s20340_s8 + $0x60] sm:$0xff]  ;;  %v7656_v38 = vrot.slane %v7654_v36, 2  ;;  %v6225_v62 = vpop.permute.xlu1 %6224 }
 0x3a7   : > { %v6624_v32 = vpop.f32.mrf.mxu2  ;;  %v5220_v2 = vsel %vm16985_vm8, %v5183_v18, %v5219_v6  ;;  %v6200_v57 = vmax.f32 %v6196_v54, 0.0  ;;  %8565 = vmatpush.bf16.msra.mxu3 %v14989_v9  ;;  %v14965_v36 = vld [vmem:[%s20342_s10 + $0x18] sm:$0xff]  ;;  %vm6286_vm8 = vsmask.f32 256 }
 0x3a8   : > { %v6625_v0 = vadd.f32 %v6624_v32, %v18548_v22  ;;  %v6767_v17 = vpop.f32.mrf.mxu3  ;;  %5221 = vst [vmem:[#allocation3 + $0x88] sm:$0x3] %v5220_v2  ;;  %v6174_v22 = vpop.f32.mrf.mxu0  ;;  %v6238_v60 = vrot.slane %v6236_v20, 6  ;;  %v6241_v55 = vrot.slane %v6239_v10, 7  ;;  %v7667_v32 = vrot.slane %v7665_v53, 3  ;;  %vm6287_vm9 = vmand %vm6285_vm7, %vm6286_vm8 }
 0x3a9   : > { %v6181_v12 = vadd.f32 %v6174_v22, %v6083_v40  ;;  %v6228_v58 = vmul.f32 %v6215_v51, %v6200_v57  ;;  %v7659_v40 = vrot.slane %v7657_v35, 3  ;;  %8249 = vmatpush.bf16.msra.mxu2 %v14965_v36 }
 0x3aa   : > { %v18658_v11 = vadd.f32 %v6767_v17, %v6625_v0  ;;  %v6242_v46 = vor.u32 %v6241_v55, %v6238_v60 }
 0x3ab   : > { %v18667_v27 = vpop.f32.mrf.mxu1  ;;  %7014 = vmatmul.bf16.gmra.mxu0 %v6914_v26  ;;  %v6189_v7 = vmul.f32 %v18588_v39, %v6181_v12  ;;  %v6232_v45 = vpack.c.bf16 %v6228_v58, %v6228_v58  ;;  %v7499_v58 = vrot.slane %v18703_v52, 2 }
 0x3ac   : > { %7365 = vmatmul.bf16.gmra.mxu2 %v17628_v19  ;;  %v7662_v19 = vshrl.u32 %v18580_v8, 16  ;;  %v6243_v17 = vrot.slane %v6242_v46, 4 }
 0x3ad   : > { %7580 = vmatmul.bf16.gmra.mxu3 %v7498_v42  ;;  %v6197_v24 = vadd.f32 %v18600_v29, %v6189_v7  ;;  %v6245_v50 = vshrl.u32 %v6232_v45, 16  ;;  %v6248_v8 = vshll.u32 %v6232_v45, 16  ;;  %v7660_v42 = vor.u32 %v7659_v40, %v7656_v38 }
 0x3ae   : > { %7211 = vmatmul.bf16.gmra.mxu1 %v17710_v48  ;;  %v7664_v18 = vrot.slane %v7662_v19, 2 }
 0x3af   : > { %v6627_v14 = vpop.f32.mrf.mxu2  ;;  %v6279_v48 = vld [vmem:[#allocation3 + $0x88] sm:$0xe]  ;;  %v6201_v13 = vmax.f32 %v6197_v24, 0.0  ;;  %v6247_v21 = vrot.slane %v6245_v50, 6  ;;  %v6250_v41 = vrot.slane %v6248_v8, 7  ;;  %v7674_v50 = vshll.u32 %v18630_v5, 16 }
 0x3b0   : > { %v6628_v4 = vadd.f32 %v6627_v14, %v18602_v3  ;;  %v6770_v6 = vpop.f32.mrf.mxu3  ;;  %v6280_v25 = vsel %vm17111_vm11, %v6242_v46, %v6279_v48  ;;  %v6176_v10 = vpop.f32.mrf.mxu0  ;;  %v18708_v15 = vor.u32 %v7667_v32, %v7664_v18  ;;  %v7500_v14 = vsel %vm2004_vm2, %v7497_v43, %v7499_v58  ;;  %v6288_v32 = vld [vmem:[#allocation3 + $0x98] sm:$0x1] }
 0x3b1   : > { %6281 = vst [vmem:[#allocation3 + $0x88] sm:$0xe] %v6280_v25  ;;  %v6229_v54 = vmul.f32 %v6220_v1, %v6201_v13  ;;  %v6182_v3 = vadd.f32 %v6176_v10, %v6084_v37  ;;  %v6251_v28 = vor.u32 %v6250_v41, %v6247_v21  ;;  %v7671_v43 = vshrl.u32 %v18630_v5, 16 }
 0x3b2   : > { %v18696_v20 = vadd.f32 %v6770_v6, %v6628_v4  ;;  %v7669_v53 = vsel %vm2379_vm5, %v7660_v42, %v18708_v15  ;;  %v7676_v21 = vrot.slane %v7674_v50, 3 }
 0x3b3   : > { %v18698_v0 = vpop.f32.mrf.mxu1  ;;  %v6233_v2 = vpack.c.bf16 %v6229_v54, %v6229_v54  ;;  %v6190_v57 = vmul.f32 %v18588_v39, %v6182_v3  ;;  %v6252_v22 = vsel %vm17158_vm13, %v6243_v17, %v6251_v28  ;;  %v6253_v49 = vrot.slane %v6251_v28, 4  ;;  %v18749_v17 = vld [vmem:[#allocation3 + $0x30] sm:$0xff] }
 0x3b4   : > { %6282 = vst [vmem:[#allocation3 + $0x8c] sm:$0xf] %v6252_v22  ;;  %v7673_v25 = vrot.slane %v7671_v43, 2  ;;  %v7501_v22 = vrot.slane %v18749_v17, 2 }
 0x3b5   : > { %v6255_v51 = vshrl.u32 %v6233_v2, 16  ;;  %v6258_v31 = vshll.u32 %v6233_v2, 16  ;;  %v6198_v12 = vadd.f32 %v18600_v29, %v6190_v57 }
 0x3b6   : > { %v7677_v2 = vor.u32 %v7676_v21, %v7673_v25 }
 0x3b7   : > { %v6629_v26 = vpop.f32.mrf.mxu2  ;;  %v6257_v59 = vrot.slane %v6255_v51, 6  ;;  %v6260_v39 = vrot.slane %v6258_v31, 7  ;;  %v6202_v47 = vmax.f32 %v6198_v12, 0.0 }
 0x3b8   : > { %v6630_v60 = vadd.f32 %v6629_v26, %v18632_v63  ;;  %v6772_v55 = vpop.f32.mrf.mxu3  ;;  %v6980_v19 = vpop.f32.mrf.mxu0  ;;  %v7678_v23 = vsel %vm2379_vm5, %v18708_v15, %v7677_v2  ;;  %v14948_v15 = vld [vmem:[%s20340_s8 + $0x210] sm:$0xff] }
 0x3b9   : > { %v6261_v45 = vor.u32 %v6260_v39, %v6257_v59  ;;  %v6230_v29 = vmul.f32 %v6225_v62, %v6202_v47  ;;  %v18718_v24 = vadd.f32 %v6980_v19, %v18628_v56  ;;  %v14983_v56 = vld [vmem:[%s20340_s8 + $0x30] sm:$0xff] }
 0x3ba   : > { %v18713_v7 = vadd.f32 %v6772_v55, %v6630_v60  ;;  %8668 = vmatpush.bf16.msra.mxu0 %v14983_v56  ;;  %v7502_v60 = vsel %vm2004_vm2, %v7499_v58, %v7501_v22  ;;  %v7680_v55 = vshrl.u32 %v18703_v52, 16  ;;  %v7683_v58 = vshll.u32 %v18703_v52, 16 }
 0x3bb   : > { %v18720_v63 = vpop.f32.mrf.mxu1  ;;  %7797 = vmatmul.bf16.vlgmr.msrb.gmra.mxu0 %v7669_v53  ;;  %v6262_v35 = vsel %vm17158_vm13, %v6253_v49, %v6261_v45  ;;  %v6234_v46 = vpack.c.bf16 %v6230_v29, %v6230_v29  ;;  %v6263_v41 = vrot.slane %v6261_v45, 4  ;;  %v18783_v45 = vld [vmem:[#allocation3 + $0x38] sm:$0xff] }
 0x3bc   : > { %7370 = vmatmul.bf16.gmra.mxu2 %v17685_v34  ;;  %v14949_v34 = vld [vmem:[%s20340_s8 + $0x218] sm:$0xff]  ;;  %6283 = vst [vmem:[#allocation3 + $0x90] sm:$0xf] %v6262_v35  ;;  %v7682_v53 = vrot.slane %v7680_v55, 2  ;;  %v7685_v49 = vrot.slane %v7683_v58, 3  ;;  %v7503_v56 = vrot.slane %v18783_v45, 2 }
 0x3bd   : > { %7585 = vmatmul.bf16.gmra.mxu3 %v7500_v14  ;;  %v6265_v8 = vshrl.u32 %v6234_v46, 16  ;;  %v6268_v4 = vshll.u32 %v6234_v46, 16  ;;  %7952 = vmatpush.bf16.msrb.mxu1 %v14949_v34  ;;  %v7698_v58 = vshrl.u32 %v18783_v45, 16 }
 0x3be   : > { %7216 = vmatmul.bf16.gmra.mxu1 %v17782_v44  ;;  %v7686_v14 = vor.u32 %v7685_v49, %v7682_v53  ;;  %v7504_v50 = vsel %vm2004_vm2, %v7501_v22, %v7503_v56 }
 0x3bf   : > { %v6632_v6 = vpop.f32.mrf.mxu2  ;;  %v6267_v13 = vrot.slane %v6265_v8, 6  ;;  %v6270_v18 = vrot.slane %v6268_v4, 7  ;;  %v14963_v8 = vld [vmem:[%s20342_s10 + $0x8] sm:$0xff]  ;;  %v14981_v4 = vld [vmem:[%s20340_s8 + $0x20] sm:$0xff] }
 0x3c0   : > { %v6633_v37 = vadd.f32 %v6632_v6, %v18667_v27  ;;  %v6775_v48 = vpop.f32.mrf.mxu3  ;;  %v6982_v1 = vpop.f32.mrf.mxu0  ;;  %v14988_v27 = vld [vmem:[%s20340_s8 + $0x58] sm:$0xff]  ;;  %v7687_v34 = vsel %vm2379_vm5, %v7677_v2, %v7686_v14  ;;  %v14947_v6 = vld [vmem:[%s20340_s8 + $0x208] sm:$0xff] }
 0x3c1   : > { %v6271_v10 = vor.u32 %v6270_v18, %v6267_v13  ;;  %v6273_v54 = vrot.slane %v6267_v13, 4  ;;  %v18744_v3 = vadd.f32 %v6982_v1, %v18658_v11  ;;  %8566 = vmatpush.bf16.msra.mxu3 %v14988_v27  ;;  %7953 = vmatpush.bf16.msrb.mxu1 %v14948_v15  ;;  %v14946_v15 = vld [vmem:[%s20340_s8 + $0x200] sm:$0xff] }
 0x3c2   : > { %v6809_v44 = vadd.f32 %v6775_v48, %v6633_v37  ;;  %v7689_v37 = vshrl.u32 %v18749_v17, 16  ;;  %v7692_v48 = vshll.u32 %v18749_v17, 16 }
 0x3c3   : > { %v6534_v9 = vpop.f32.mrf.mxu1  ;;  %v6272_v28 = vsel %vm17158_vm13, %v6263_v41, %v6271_v10  ;;  %v6289_v38 = vsel %vm6287_vm9, %v6273_v54, %v6288_v32  ;;  %v18810_v10 = vld [vmem:[#allocation3 + $0x40] sm:$0xff]  ;;  %v7036_v54 = vld [vmem:[#allocation3 + $0x48] sm:$0x3] }
 0x3c4   : > { %6284 = vst [vmem:[#allocation3 + $0x94] sm:$0xf] %v6272_v28  ;;  %v7691_v21 = vrot.slane %v7689_v37, 2  ;;  %v7694_v41 = vrot.slane %v7692_v48, 3  ;;  %v7055_v2 = vunpack.c.l.b16 %v7036_v54  ;;  %v7433_v54 = vld [vmem:[#allocation3 + $0x50] sm:$0x3] }
 0x3c5   : > { %6290 = vst [vmem:[#allocation3 + $0x98] sm:$0x1] %v6289_v38  ;;  %7954 = vmatpush.bf16.msrb.mxu1 %v14947_v6 }
 0x3c6   : > { %v7695_v27 = vor.u32 %v7694_v41, %v7691_v21  ;;  %v15015_v41 = vld [vmem:[%s20340_s8 + $0xf8] sm:$0xff] }
 0x3c7   : > { %v6634_v40 = vpop.f32.mrf.mxu2 }
 0x3c8   : > { %v6635_v57 = vadd.f32 %v6634_v40, %v18698_v0  ;;  %v6777_v11 = vpop.f32.mrf.mxu3  ;;  %v6985_v31 = vpop.f32.mrf.mxu0  ;;  %v14964_v0 = vld [vmem:[%s20342_s10 + $0x10] sm:$0xff]  ;;  %v7505_v40 = vrot.slane %v18810_v10, 2 }
 0x3c9   : > { %v18756_v12 = vadd.f32 %v6985_v31, %v18696_v20  ;;  %v14982_v20 = vld [vmem:[%s20340_s8 + $0x28] sm:$0xff]  ;;  %8250 = vmatpush.bf16.msra.mxu2 %v14964_v0  ;;  %v14980_v0 = vld [vmem:[%s20340_s8 + $0x18] sm:$0xff]  ;;  %7955 = vmatpush.bf16.msrb.mxu1 %v14946_v15 }
 0x3ca   : > { %v6810_v51 = vadd.f32 %v6777_v11, %v6635_v57  ;;  %8669 = vmatpush.bf16.msra.mxu0 %v14982_v20  ;;  %v18826_v20 = vpack.c.b16 %v7055_v2, %v7055_v2 }
 0x3cb   : > { %v6537_v26 = vpop.f32.mrf.mxu1  ;;  %7802 = vmatmul.bf16.gmra.mxu0 %v7678_v23  ;;  %v20403_v23 = vld [vmem:[#allocation4_spill] sm:$0xff] }
 0x3cc   : > { %7375 = vmatmul.bf16.gmra.mxu2 %v17750_v33 }
 0x3cd   : > { %7590 = vmatmul.bf16.gmra.mxu3 %v7502_v60  ;;  %8251 = vmatpush.bf16.msra.mxu2 %v14963_v8  ;;  %v14962_v60 = vld [vmem:[%s20342_s10] sm:$0xff] }
 0x3ce   : > { %7221 = vmatmul.bf16.gmra.mxu1 %v17854_v16  ;;  %v14987_v16 = vld [vmem:[%s20340_s8 + $0x50] sm:$0xff]  ;;  %8670 = vmatpush.bf16.msra.mxu0 %v14981_v4 }
 0x3cf   : > { %v6637_v33 = vpop.f32.mrf.mxu2  ;;  %8567 = vmatpush.bf16.msra.mxu3 %v14987_v16 }
 0x3d0   : > { %v6638_v42 = vadd.f32 %v6637_v33, %v18720_v63  ;;  %v6780_v59 = vpop.f32.mrf.mxu3  ;;  %v6987_v47 = vpop.f32.mrf.mxu0  ;;  %v20404_v33 = vld [vmem:[#allocation13_spill] sm:$0xff] }
 0x3d1   : > { %v18778_v62 = vadd.f32 %v6987_v47, %v18713_v7  ;;  %8252 = vmatpush.bf16.msra.mxu2 %v14962_v60  ;;  %v7129_v47 = vshrl.u32 %v18826_v20, 16 }
 0x3d2   : > { %v6811_v39 = vadd.f32 %v6780_v59, %v6638_v42  ;;  %v7701_v42 = vshll.u32 %v18783_v45, 16  ;;  %8671 = vmatpush.bf16.msra.mxu0 %v14980_v0 }
 0x3d3   : > { %v6539_v19 = vpop.f32.mrf.mxu1 }
 0x3d5   : > { %9023 = vmatpush.bf16.msrb.mxu2 %v15015_v41 }
 0x3d7   : > { %v6639_v29 = vpop.f32.mrf.mxu2 }
 0x3d8   : > { %v6640_v36 = vadd.f32 %v6639_v29, %v6534_v9  ;;  %v6782_v63 = vpop.f32.mrf.mxu3  ;;  %v6990_v7 = vpop.f32.mrf.mxu0 }
 0x3d9   : > { %v18788_v46 = vadd.f32 %v6990_v7, %v6809_v44  ;;  %v7131_v7 = vrot.slane %v7129_v47, 1 }
 0x3da   : > { %v18786_v35 = vadd.f32 %v6782_v63, %v6640_v36  ;;  %v7703_v36 = vrot.slane %v7701_v42, 3  ;;  %v14985_v63 = vld [vmem:[%s20340_s8 + $0x40] sm:$0xff] }
 0x3db   : > { %v6542_v43 = vpop.f32.mrf.mxu1  ;;  %7807 = vmatmul.bf16.gmra.mxu0 %v7687_v34 }
 0x3dc   : > { %7380 = vmatmul.bf16.gmra.mxu2 %v17822_v30 }
 0x3dd   : > { %7595 = vmatmul.bf16.gmra.mxu3 %v7504_v50 }
 0x3de   : > { %7226 = vmatmul.bf16.gmra.mxu1 %v17927_v61  ;;  %v14986_v61 = vld [vmem:[%s20340_s8 + $0x48] sm:$0xff] }
 0x3df   : > { %v6642_v30 = vpop.f32.mrf.mxu2  ;;  %8568 = vmatpush.bf16.msra.mxu3 %v14986_v61 }
 0x3e0   : > { %v6643_v13 = vadd.f32 %v6642_v30, %v6537_v26  ;;  %v6785_v18 = vpop.f32.mrf.mxu3  ;;  %v6992_v44 = vpop.f32.mrf.mxu0  ;;  %v7506_v26 = vsel %vm2004_vm2, %v7503_v56, %v7505_v40  ;;  %v18842_v56 = vld [vmem:[#allocation3 + $0x48] sm:$0xff] }
 0x3e1   : > { %v18805_v1 = vadd.f32 %v6992_v44, %v6810_v51  ;;  %v7696_v51 = vsel %vm2379_vm5, %v7686_v14, %v7695_v27  ;;  %v7700_v14 = vrot.slane %v7698_v58, 2  ;;  %v7507_v6 = vrot.slane %v18842_v56, 2  ;;  %v20405_v44 = vld [vmem:[#allocation7_spill] sm:$0xff]  ;;  %v13499_v58 = vld [vmem:[#allocation2 + $0x8] sm:$0xe] }
 0x3e2   : > { %v6813_v32 = vadd.f32 %v6785_v18, %v6643_v13  ;;  %v7716_v41 = vshrl.u32 %v18842_v56, 16 }
 0x3e3   : > { %v6544_v25 = vpop.f32.mrf.mxu1  ;;  %8569 = vmatpush.bf16.msra.mxu3 %v14985_v63  ;;  %v7704_v50 = vor.u32 %v7703_v36, %v7700_v14  ;;  %v7508_v21 = vsel %vm2004_vm2, %v7505_v40, %v7507_v6  ;;  %v14955_v63 = vld [vmem:[#allocation2 + $0x10] sm:$0xff] }
 0x3e5   : > { %v7705_v13 = vsel %vm2379_vm5, %v7695_v27, %v7704_v50 }
 0x3e7   : > { %v6644_v9 = vpop.f32.mrf.mxu2 }
 0x3e8   : > { %v6645_v28 = vadd.f32 %v6644_v9, %v6539_v19  ;;  %v6787_v38 = vpop.f32.mrf.mxu3  ;;  %v6995_v11 = vpop.f32.mrf.mxu0  ;;  %v7132_v19 = vshll.u32 %v18826_v20, 16  ;;  %v15000_v9 = vld [vmem:[%s20340_s8 + $0xb8] sm:$0xff] }
 0x3e9   : > { %v18815_v22 = vadd.f32 %v6995_v11, %v6811_v39  ;;  %8809 = vmatpush.bf16.msra.mxu1 %v15000_v9  ;;  %v7484_v11 = vunpack.c.l.b16 %v7433_v54 }
 0x3ea   : > { %v18813_v57 = vadd.f32 %v6787_v38, %v6645_v28  ;;  %v7134_v34 = vrot.slane %v7132_v19, 2  ;;  %v7707_v28 = vshrl.u32 %v18810_v10, 16  ;;  %v7710_v38 = vshll.u32 %v18810_v10, 16 }
 0x3eb   : > { %v6547_v31 = vpop.f32.mrf.mxu1  ;;  %7812 = vmatmul.bf16.gmra.mxu0 %v7696_v51 }
 0x3ec   : > { %7385 = vmatmul.bf16.gmra.mxu2 %v20403_v23  ;;  %v7709_v0 = vrot.slane %v7707_v28, 2  ;;  %v7712_v15 = vrot.slane %v7710_v38, 3 }
 0x3ed   : > { %7600 = vmatmul.bf16.gmra.mxu3 %v7506_v26 }
 0x3ee   : > { %7231 = vmatmul.bf16.gmra.mxu1 %v20404_v33  ;;  %v15023_v33 = vld [vmem:[%s20340_s8 + $0x138] sm:$0xff] }
 0x3ef   : > { %v6647_v55 = vpop.f32.mrf.mxu2  ;;  %9244 = vmatpush.bf16.msrb.mxu3 %v15023_v33 }
 0x3f0   : > { %v6648_v59 = vadd.f32 %v6647_v55, %v6542_v43  ;;  %v6790_v39 = vpop.f32.mrf.mxu3  ;;  %v6997_v49 = vpop.f32.mrf.mxu0  ;;  %v7493_v55 = vpack.c.b16 %v7484_v11, %v7484_v11 }
 0x3f1   : > { %v18837_v16 = vadd.f32 %v6997_v49, %v18786_v35  ;;  %v7135_v35 = vor.u32 %v7134_v34, %v7131_v7  ;;  %v20407_v34 = vld [vmem:[#allocation6_spill] sm:$0xff] }
 0x3f2   : > { %v6815_v53 = vadd.f32 %v6790_v39, %v6648_v59  ;;  %v7294_v59 = vrot.slane %v18826_v20, 2  ;;  %v18878_v39 = vor.u32 %v7712_v15, %v7709_v0  ;;  %v7509_v19 = vrot.slane %v7493_v55, 2 }
 0x3f3   : > { %v6549_v29 = vpop.f32.mrf.mxu1  ;;  %v7718_v55 = vrot.slane %v7716_v41, 2 }
 0x3f7   : > { %v6649_v43 = vpop.f32.mrf.mxu2 }
 0x3f8   : > { %v6650_v8 = vadd.f32 %v6649_v43, %v6544_v25  ;;  %v6792_v4 = vpop.f32.mrf.mxu3  ;;  %v7000_v37 = vpop.f32.mrf.mxu0  ;;  %v14979_v25 = vld [vmem:[%s20340_s8 + $0x10] sm:$0xff]  ;;  %v20408_v43 = vrot.slane %v20407_v34, 2 }
 0x3f9   : > { %v18847_v48 = vadd.f32 %v7000_v37, %v6813_v32  ;;  %v20406_v32 = vld [vmem:[#allocation12_spill] sm:$0xff]  ;;  %8672 = vmatpush.bf16.msra.mxu0 %v14979_v25  ;;  %v15014_v37 = vld [vmem:[%s20340_s8 + $0xf0] sm:$0xff]  ;;  %v8121_v25 = vshll.u32 %v14955_v63, 16 }
 0x3fa   : > { %v18845_v30 = vadd.f32 %v6792_v4, %v6650_v8  ;;  %v7136_v61 = vsel %vm1781_vm3, %v20406_v32, %v7135_v35  ;;  %v7295_v8 = vsel %vm2004_vm2, %v20408_v43, %v7294_v59  ;;  %v7714_v4 = vsel %vm2379_vm5, %v7704_v50, %v18878_v39  ;;  %v14999_v50 = vld [vmem:[%s20340_s8 + $0xb0] sm:$0xff]  ;;  %9024 = vmatpush.bf16.msrb.mxu2 %v15014_v37 }
 0x3fb   : > { %v18850_v18 = vpop.f32.mrf.mxu1  ;;  %7817 = vmatmul.bf16.gmra.mxu0 %v7705_v13  ;;  %v7719_v32 = vshll.u32 %v18842_v56, 16  ;;  %8810 = vmatpush.bf16.msra.mxu1 %v14999_v50  ;;  %v8123_v33 = vrot.slane %v8121_v25, 2  ;;  %v7632_v59 = vld [vmem:[#allocation3 + $0x50] sm:$0x7] }
 0x3fc   : > { %7390 = vmatmul.bf16.gmra.mxu2 %v20405_v44  ;;  %v20409_v44 = vld [vmem:[#allocation11_spill] sm:$0xff] }
 0x3fd   : > { %7605 = vmatmul.bf16.gmra.mxu3 %v7508_v21  ;;  %v8118_v21 = vshrl.u32 %v14955_v63, 16 }
 0x3fe   : > { %7236 = vmatmul.bf16.gmra.mxu1 %v7136_v61  ;;  %v18905_v61 = vld [vmem:[#allocation3 + $0x40] sm:$0xff]  }
 0x3ff   : > { %v6652_v27 = vpop.f32.mrf.mxu2  ;;  %v8120_v11 = vrot.slane %v8118_v21, 1  ;;  %v8439_v43 = vshrl.u32 %v18905_v61, 16 }
 0x400   : > { %v6653_v40 = vadd.f32 %v6652_v27, %v6547_v31  ;;  %v6795_v2 = vpop.f32.mrf.mxu3  ;;  %v7002_v23 = vpop.f32.mrf.mxu0  ;;  %v14954_v31 = vld [vmem:[#allocation2 + $0x8] sm:$0xf0] }
 0x401   : > { %v18870_v26 = vadd.f32 %v7002_v23, %v18813_v57  ;;  %v13500_v49 = vor.u32 %v14954_v31, %v13499_v58  ;;  %v18908_v27 = vld [vmem:[#allocation3 + $0x48] sm:$0xff]  ;;  %v8441_v23 = vshll.u32 %v18905_v61, 16  ;;  %v7721_v58 = vrot.slane %v7719_v32, 3 }
 0x402   : > { %v18867_v51 = vadd.f32 %v6795_v2, %v6653_v40  ;;  %v14998_v32 = vld [vmem:[%s20340_s8 + $0xa8] sm:$0xff] }
 0x403   : > { %v18872_v60 = vpop.f32.mrf.mxu1  ;;  %v8110_v13 = vshrl.u32 %v13500_v49, 16  ;;  %8811 = vmatpush.bf16.msra.mxu1 %v14998_v32 }
 0x405   : > { %v8112_v28 = vrot.slane %v8110_v13, 1 }
 0x407   : > { %v6654_v42 = vpop.f32.mrf.mxu2 }
 0x408   : > { %v6655_v47 = vadd.f32 %v6654_v42, %v6549_v29  ;;  %v6797_v57 = vpop.f32.mrf.mxu3  ;;  %v7005_v36 = vpop.f32.mrf.mxu0  ;;  %v7510_v29 = vsel %vm2004_vm2, %v7507_v6, %v7509_v19  ;;  %v8113_v6 = vshll.u32 %v13500_v49, 16  ;;  %v8446_v42 = vshll.u32 %v18908_v27, 16 }
 0x409   : > { %v18882_v7 = vadd.f32 %v7005_v36, %v6815_v53  ;;  %v14978_v53 = vld [vmem:[%s20340_s8 + $0x8] sm:$0xff]  ;;  %v18921_v49 = vor.u32 %v8123_v33, %v8120_v11  ;;  %v7651_v36 = vunpack.c.l.b16 %v7632_v59 }
 0x40a   : > { %v18880_v14 = vadd.f32 %v6797_v57, %v6655_v47  ;;  %8673 = vmatpush.bf16.msra.mxu0 %v14978_v53  ;;  %v8115_v2 = vrot.slane %v8113_v6, 2  ;;  %v8443_v47 = vrot.slane %v8441_v23, 1  ;;  %v14956_v53 = vld [vmem:[#allocation2 + $0x18] sm:$0xff]  ;;  %v14977_v6 = vld [vmem:[%s20340_s8] sm:$0xff] }
 0x40b   : > { %v7202_v20 = vpop.f32.mrf.mxu1  ;;  %7822 = vmatmul.bf16.gmra.mxu0 %v7714_v4  ;;  %v18959_v23 = vld [vmem:[#allocation3 + $0x50] sm:$0xff] }
 0x40c   : > { %7395 = vmatmul.bf16.gmra.mxu2 %v7295_v8  ;;  %v18891_v35 = vadd.f32 %v7202_v20, %v18718_v24  ;;  %v8116_v19 = vor.u32 %v8115_v2, %v8112_v28  ;;  %v8448_v8 = vrot.slane %v8446_v42, 1 }
 0x40d   : > { %7610 = vmatmul.bf16.gmra.mxu3 %v7510_v29  ;;  %v8444_v29 = vor.u32 %v8443_v47, %v8439_v43 }
 0x40e   : > { %7956 = vmatmul.bf16.vlgmr.msrb.gmra.mxu1 %v20409_v44  ;;  %v8125_v13 = vsel %vm1781_vm3, %v8116_v19, %v18921_v49  ;;  %v18938_v44 = vpack.c.b16 %v7651_v36, %v7651_v36  ;;  %8674 = vmatpush.bf16.msra.mxu0 %v14977_v6  ;;  %v8454_v19 = vshll.u32 %v18959_v23, 16 }
 0x40f   : > { %v6657_v24 = vpop.f32.mrf.mxu2  ;;  %v8449_v21 = vsel %vm1106_vm1, %v8444_v29, %v8448_v8 }
 0x410   : > { %v6658_v54 = vadd.f32 %v6657_v24, %v18850_v18  ;;  %v6800_v9 = vpop.f32.mrf.mxu3  ;;  %v7007_v40 = vpop.f32.mrf.mxu0  ;;  %v15022_v18 = vld [vmem:[%s20340_s8 + $0x130] sm:$0xff]  ;;  %v15013_v24 = vld [vmem:[%s20340_s8 + $0xe8] sm:$0xff]  ;;  %v7725_v28 = vshrl.u32 %v18938_v44, 16  ;;  %v8456_v29 = vrot.slane %v8454_v19, 1 }
 0x411   : > { %v18914_v0 = vadd.f32 %v7007_v40, %v18845_v30  ;;  %9245 = vmatpush.bf16.msrb.mxu3 %v15022_v18  ;;  %v18923_v30 = vor.u32 %v7721_v58, %v7718_v55  ;;  %9025 = vmatpush.bf16.msrb.mxu2 %v15013_v24  ;;  %v7728_v40 = vshll.u32 %v18938_v44, 16  ;;  %v14957_v24 = vld [vmem:[#allocation2 + $0x20] sm:$0xff] }
 0x412   : > { %v18910_v38 = vadd.f32 %v6800_v9, %v6658_v54  ;;  %v8127_v54 = vshrl.u32 %v14956_v53, 16  ;;  %v8130_v9 = vshll.u32 %v14956_v53, 16  ;;  %v7727_v59 = vrot.slane %v7725_v28, 2 }
 0x413   : > { %v7204_v15 = vpop.f32.mrf.mxu1  ;;  %v7730_v47 = vrot.slane %v7728_v40, 3  ;;  %v7880_v53 = vrot.slane %v18703_v52, 3 }
 0x414   : > { %v7243_v31 = vadd.f32 %v7204_v15, %v18744_v3  ;;  %v7878_v3 = vrot.slane %v18630_v5, 3  ;;  %v8129_v55 = vrot.slane %v8127_v54, 1  ;;  %v8132_v42 = vrot.slane %v8130_v9, 2 }
 0x417   : > { %v6659_v57 = vpop.f32.mrf.mxu2 }
 0x418   : > { %v6660_v63 = vadd.f32 %v6659_v57, %v18872_v60  ;;  %v6802_v34 = vpop.f32.mrf.mxu3  ;;  %v7010_v20 = vpop.f32.mrf.mxu0  ;;  %v7723_v60 = vsel %vm2379_vm5, %v18878_v39, %v18923_v30  ;;  %v20410_v39 = vld [vmem:[#allocation10_spill] sm:$0xff]  ;;  %v15021_v57 = vld [vmem:[%s20340_s8 + $0x128] sm:$0xff] }
 0x419   : > { %v18931_v37 = vadd.f32 %v7010_v20, %v18867_v51  ;;  %v20411_v25 = vrot.slane %v20410_v39, 3  ;;  %9246 = vmatpush.bf16.msrb.mxu3 %v15021_v57  ;;  %v7882_v57 = vrot.slane %v18749_v17, 3  ;;  %v15011_v17 = vld [vmem:[%s20340_s8 + $0xd8] sm:$0xff] }
 0x41a   : > { %v18928_v4 = vadd.f32 %v6802_v34, %v6660_v63  ;;  %v8133_v63 = vor.u32 %v8132_v42, %v8129_v55  ;;  %v7731_v34 = vor.u32 %v7730_v47, %v7727_v59  ;;  %v8458_v47 = vshrl.u32 %v18959_v23, 16 }
 0x41b   : > { %v7207_v50 = vpop.f32.mrf.mxu1  ;;  %7827 = vmatmul.bf16.gmra.mxu0 %v7723_v60  ;;  %v7879_v41 = vsel %vm2602_vm4, %v20411_v25, %v7878_v3  ;;  %v8136_v25 = vshrl.u32 %v14957_v24, 16 }
 0x41c   : > { %8253 = vmatmul.bf16.vlgmr.msra.gmra.mxu2 %v8125_v13  ;;  %v7244_v51 = vadd.f32 %v7207_v50, %v18756_v12 }
 0x41d   : > { %8570 = vmatmul.bf16.vlgmr.msra.gmra.mxu3 %v8449_v21  ;;  %v7732_v21 = vsel %vm2379_vm5, %v18923_v30, %v7731_v34  ;;  %v14997_v30 = vld [vmem:[%s20340_s8 + $0xa0] sm:$0xff]  ;;  %v8138_v40 = vrot.slane %v8136_v25, 1  ;;  %v8460_v34 = vor.u32 %v8458_v47, %v8456_v29  ;;  %v14995_v47 = vld [vmem:[%s20340_s8 + $0x90] sm:$0xff] }
 0x41e   : > { %7961 = vmatmul.bf16.gmra.mxu1 %v7879_v41  ;;  %v8139_v41 = vshll.u32 %v14957_v24, 16 }
 0x41f   : > { %v7361_v12 = vpop.f32.mrf.mxu2  ;;  %8812 = vmatpush.bf16.msra.mxu1 %v14997_v30  ;;  %v15019_v30 = vld [vmem:[%s20340_s8 + $0x118] sm:$0xff] }
 0x420   : > { %v7401_v2 = vadd.f32 %v7361_v12, %v18891_v35  ;;  %v7576_v11 = vpop.f32.mrf.mxu3  ;;  %v7012_v33 = vpop.f32.mrf.mxu0  ;;  %v18996_v12 = vld [vmem:[#allocation3 + $0x58] sm:$0xff] }
 0x421   : > { %v18964_v58 = vadd.f32 %v7012_v33, %v18880_v14  ;;  %v8450_v14 = vshrl.u32 %v18908_v27, 16 }
 0x422   : > { %v18961_v15 = vadd.f32 %v7576_v11, %v7401_v2  ;;  %v8141_v2 = vrot.slane %v8139_v41, 2  ;;  %v15020_v11 = vld [vmem:[%s20340_s8 + $0x120] sm:$0xff] }
 0x423   : > { %v7209_v18 = vpop.f32.mrf.mxu1  ;;  %v8452_v50 = vor.u32 %v8450_v14, %v8448_v8  ;;  %v15012_v8 = vld [vmem:[%s20340_s8 + $0xe0] sm:$0xff]  ;;  %9247 = vmatpush.bf16.msrb.mxu3 %v15020_v11  ;;  %v14958_v14 = vld [vmem:[#allocation2 + $0x28] sm:$0xff] }
 0x424   : > { %v7245_v35 = vadd.f32 %v7209_v18, %v18778_v62  ;;  %v8134_v62 = vsel %vm1781_vm3, %v18921_v49, %v8133_v63  ;;  %v7881_v49 = vsel %vm2602_vm4, %v7878_v3, %v7880_v53  ;;  %9026 = vmatpush.bf16.msrb.mxu2 %v15012_v8  ;;  %v8142_v18 = vor.u32 %v8141_v2, %v8138_v40 }
 0x425   : > { %v8457_v39 = vsel %vm1106_vm1, %v8452_v50, %v8456_v29  ;;  %v14996_v29 = vld [vmem:[%s20340_s8 + $0x98] sm:$0xff]  ;;  %v8145_v50 = vshrl.u32 %v14958_v14, 16 }
 0x426   : > { %8813 = vmatpush.bf16.msra.mxu1 %v14996_v29  ;;  %v15018_v29 = vld [vmem:[%s20340_s8 + $0x110] sm:$0xff] }
 0x427   : > { %v7363_v36 = vpop.f32.mrf.mxu2  ;;  %9248 = vmatpush.bf16.msrb.mxu3 %v15019_v30 }
 0x428   : > { %v7402_v43 = vadd.f32 %v7363_v36, %v7243_v31  ;;  %v7578_v20 = vpop.f32.mrf.mxu3  ;;  %v7015_v60 = vpop.f32.mrf.mxu0  ;;  %9027 = vmatpush.bf16.msrb.mxu2 %v15011_v17 }
 0x429   : > { %v18976_v6 = vadd.f32 %v7015_v60, %v18910_v38  ;;  %v15031_v38 = vld [vmem:[%s20340_s8 + $0x178] sm:$0xff] }
 0x42a   : > { %v18973_v13 = vadd.f32 %v7578_v20, %v7402_v43  ;;  %9402 = vmatpush.bf16.msrb.mxu0 %v15031_v38  ;;  %v8147_v38 = vrot.slane %v8145_v50, 1  ;;  %8814 = vmatpush.bf16.msra.mxu1 %v14995_v47  ;;  %v15017_v47 = vld [vmem:[%s20340_s8 + $0x108] sm:$0xff] }
 0x42b   : > { %v7212_v31 = vpop.f32.mrf.mxu1  ;;  %7832 = vmatmul.bf16.gmra.mxu0 %v7732_v21  ;;  %9249 = vmatpush.bf16.msrb.mxu3 %v15018_v29 }
 0x42c   : > { %8258 = vmatmul.bf16.gmra.mxu2 %v8134_v62  ;;  %v7246_v52 = vadd.f32 %v7212_v31, %v18788_v46  ;;  %v19029_v31 = vld [vmem:[#allocation3 + $0x60] sm:$0xff] }
 0x42d   : > { %8575 = vmatmul.bf16.gmra.mxu3 %v8457_v39 }
 0x42e   : > { %7966 = vmatmul.bf16.gmra.mxu1 %v7881_v49 }
 0x42f   : > { %v7366_v46 = vpop.f32.mrf.mxu2  ;;  %9250 = vmatpush.bf16.msrb.mxu3 %v15017_v47  ;;  %v7890_v47 = vrot.slane %v18938_v44, 3 }
 0x430   : > { %v7403_v32 = vadd.f32 %v7366_v46, %v7244_v51  ;;  %v7581_v54 = vpop.f32.mrf.mxu3  ;;  %v7017_v5 = vpop.f32.mrf.mxu0  ;;  %v8462_v51 = vshll.u32 %v18996_v12, 16 }
 0x431   : > { %v19001_v3 = vadd.f32 %v7017_v5, %v18928_v4  ;;  %v8466_v5 = vshrl.u32 %v18996_v12, 16 }
 0x432   : > { %v18998_v9 = vadd.f32 %v7581_v54, %v7403_v32  ;;  %v8464_v4 = vrot.slane %v8462_v51, 1 }
 0x433   : > { %v7214_v28 = vpop.f32.mrf.mxu1 }
 0x434   : > { %v7247_v33 = vadd.f32 %v7214_v28, %v18805_v1  ;;  %v8143_v1 = vsel %vm1781_vm3, %v8133_v63, %v8142_v18  ;;  %v7883_v63 = vsel %vm2602_vm4, %v7880_v53, %v7882_v57  ;;  %v7884_v28 = vrot.slane %v18783_v45, 3  ;;  %v15010_v45 = vld [vmem:[%s20340_s8 + $0xd0] sm:$0xff] }
 0x435   : > { %v8468_v11 = vor.u32 %v8466_v5, %v8464_v4  ;;  %9028 = vmatpush.bf16.msrb.mxu2 %v15010_v45  ;;  %v14994_v5 = vld [vmem:[%s20340_s8 + $0x88] sm:$0xff] }
 0x436   : > { %8815 = vmatpush.bf16.msra.mxu1 %v14994_v5 }
 0x437   : > { %v7368_v55 = vpop.f32.mrf.mxu2 }
 0x438   : > { %v7404_v42 = vadd.f32 %v7368_v55, %v7245_v35  ;;  %v7583_v59 = vpop.f32.mrf.mxu3  ;;  %v7798_v36 = vpop.f32.mrf.mxu0  ;;  %v8465_v35 = vsel %vm1106_vm1, %v8460_v34, %v8464_v4 }
 0x439   : > { %v19013_v43 = vadd.f32 %v7798_v36, %v18961_v15  ;;  %v15030_v15 = vld [vmem:[%s20340_s8 + $0x170] sm:$0xff] }
 0x43a   : > { %v19010_v19 = vadd.f32 %v7583_v59, %v7404_v42  ;;  %9403 = vmatpush.bf16.msrb.mxu0 %v15030_v15  ;;  %v14959_v42 = vld [vmem:[#allocation2 + $0x30] sm:$0xff] }
 0x43b   : > { %v7217_v20 = vpop.f32.mrf.mxu1  ;;  %8675 = vmatmul.bf16.vlgmr.msra.gmra.mxu0 %v18905_v61  ;;  %v8154_v36 = vshrl.u32 %v14959_v42, 16 }
 0x43c   : > { %8263 = vmatmul.bf16.gmra.mxu2 %v8143_v1  ;;  %v7248_v60 = vadd.f32 %v7217_v20, %v18815_v22  ;;  %v8148_v22 = vshll.u32 %v14958_v14, 16  ;;  %v19062_v20 = vld [vmem:[#allocation3 + $0x68] sm:$0xff] }
 0x43d   : > { %8580 = vmatmul.bf16.gmra.mxu3 %v8465_v35  ;;  %v8156_v15 = vrot.slane %v8154_v36, 1 }
 0x43e   : > { %7971 = vmatmul.bf16.gmra.mxu1 %v7883_v63  ;;  %v8150_v49 = vrot.slane %v8148_v22, 2 }
 0x43f   : > { %v7371_v61 = vpop.f32.mrf.mxu2 }
 0x440   : > { %v7405_v62 = vadd.f32 %v7371_v61, %v7246_v52  ;;  %v7586_v21 = vpop.f32.mrf.mxu3  ;;  %v7800_v39 = vpop.f32.mrf.mxu0  ;;  %v8470_v52 = vshll.u32 %v19029_v31, 16  ;;  %v8151_v41 = vor.u32 %v8150_v49, %v8147_v38 }
 0x441   : > { %v19034_v53 = vadd.f32 %v7800_v39, %v18973_v13  ;;  %v8474_v39 = vshrl.u32 %v19029_v31, 16 }
 0x442   : > { %v19031_v24 = vadd.f32 %v7586_v21, %v7405_v62  ;;  %v8472_v13 = vrot.slane %v8470_v52, 1 }
 0x443   : > { %v7219_v8 = vpop.f32.mrf.mxu1 }
 0x444   : > { %v7249_v46 = vadd.f32 %v7219_v8, %v18837_v16  ;;  %v8152_v16 = vsel %vm1781_vm3, %v8142_v18, %v8151_v41  ;;  %v7885_v18 = vsel %vm2602_vm4, %v7882_v57, %v7884_v28  ;;  %v7886_v8 = vrot.slane %v18810_v10, 3  ;;  %v15009_v10 = vld [vmem:[%s20340_s8 + $0xc8] sm:$0xff] }
 0x445   : > { %v8476_v30 = vor.u32 %v8474_v39, %v8472_v13  ;;  %9029 = vmatpush.bf16.msrb.mxu2 %v15009_v10  ;;  %v15008_v39 = vld [vmem:[%s20340_s8 + $0xc0] sm:$0xff] }
 0x447   : > { %v7373_v25 = vpop.f32.mrf.mxu2 }
 0x448   : > { %v7406_v32 = vadd.f32 %v7373_v25, %v7247_v33  ;;  %v7588_v54 = vpop.f32.mrf.mxu3  ;;  %v7803_v2 = vpop.f32.mrf.mxu0  ;;  %v8473_v33 = vsel %vm1106_vm1, %v8468_v11, %v8472_v13 }
 0x449   : > { %v19046_v51 = vadd.f32 %v7803_v2, %v18998_v9  ;;  %v15029_v9 = vld [vmem:[%s20340_s8 + $0x168] sm:$0xff]  ;;  %9030 = vmatpush.bf16.msrb.mxu2 %v15008_v39 }
 0x44a   : > { %v19043_v40 = vadd.f32 %v7588_v54, %v7406_v32  ;;  %9404 = vmatpush.bf16.msrb.mxu0 %v15029_v9  ;;  %v14960_v32 = vld [vmem:[#allocation2 + $0x38] sm:$0xff] }
 0x44b   : > { %v7222_v55 = vpop.f32.mrf.mxu1  ;;  %8680 = vmatmul.bf16.gmra.mxu0 %v18908_v27  ;;  %v8163_v2 = vshrl.u32 %v14960_v32, 16 }
 0x44c   : > { %8268 = vmatmul.bf16.gmra.mxu2 %v8152_v16  ;;  %v7250_v59 = vadd.f32 %v7222_v55, %v18847_v48  ;;  %v8157_v48 = vshll.u32 %v14959_v42, 16  ;;  %v19095_v55 = vld [vmem:[#allocation3 + $0x70] sm:$0xff] }
 0x44d   : > { %8585 = vmatmul.bf16.gmra.mxu3 %v8473_v33  ;;  %v8165_v9 = vrot.slane %v8163_v2, 1 }
 0x44e   : > { %7976 = vmatmul.bf16.gmra.mxu1 %v7885_v18  ;;  %v8159_v63 = vrot.slane %v8157_v48, 2 }
 0x44f   : > { %v7376_v4 = vpop.f32.mrf.mxu2 }
 0x450   : > { %v7407_v34 = vadd.f32 %v7376_v4, %v7248_v60  ;;  %v7591_v1 = vpop.f32.mrf.mxu3  ;;  %v7805_v35 = vpop.f32.mrf.mxu0  ;;  %v8478_v60 = vshll.u32 %v19062_v20, 16  ;;  %v8160_v22 = vor.u32 %v8159_v63, %v8156_v15 }
 0x451   : > { %v19067_v57 = vadd.f32 %v7805_v35, %v19010_v19  ;;  %v8482_v35 = vshrl.u32 %v19062_v20, 16 }
 0x452   : > { %v19064_v14 = vadd.f32 %v7591_v1, %v7407_v34  ;;  %v8480_v19 = vrot.slane %v8478_v60, 1 }
 0x453   : > { %v7224_v17 = vpop.f32.mrf.mxu1 }
 0x454   : > { %v7251_v61 = vadd.f32 %v7224_v17, %v18870_v26  ;;  %v8161_v26 = vsel %vm1781_vm3, %v8151_v41, %v8160_v22  ;;  %v7887_v41 = vsel %vm2602_vm4, %v7884_v28, %v7886_v8  ;;  %v7888_v17 = vrot.slane %v18842_v56, 3 }
 0x455   : > { %v8484_v29 = vor.u32 %v8482_v35, %v8480_v19 }
 0x457   : > { %v7378_v50 = vpop.f32.mrf.mxu2 }
 0x458   : > { %v7408_v62 = vadd.f32 %v7378_v50, %v7249_v46  ;;  %v7593_v21 = vpop.f32.mrf.mxu3  ;;  %v7808_v49 = vpop.f32.mrf.mxu0  ;;  %v8481_v46 = vsel %vm1106_vm1, %v8476_v30, %v8480_v19  ;;  %v14993_v19 = vld [vmem:[%s20340_s8 + $0x80] sm:$0xff] }
 0x459   : > { %v19079_v52 = vadd.f32 %v7808_v49, %v19031_v24  ;;  %v15028_v24 = vld [vmem:[%s20340_s8 + $0x160] sm:$0xff]  ;;  %8816 = vmatpush.bf16.msra.mxu1 %v14993_v19 }
 0x45a   : > { %v19076_v38 = vadd.f32 %v7593_v21, %v7408_v62  ;;  %9405 = vmatpush.bf16.msrb.mxu0 %v15028_v24  ;;  %v14961_v62 = vld [vmem:[#allocation2 + $0x40] sm:$0xff] }
 0x45b   : > { %v7227_v25 = vpop.f32.mrf.mxu1  ;;  %8685 = vmatmul.bf16.gmra.mxu0 %v18959_v23  ;;  %v8172_v49 = vshrl.u32 %v14961_v62, 16  ;;  %v8175_v30 = vshll.u32 %v14961_v62, 16 }
 0x45c   : > { %8273 = vmatmul.bf16.gmra.mxu2 %v8161_v26  ;;  %v7252_v54 = vadd.f32 %v7227_v25, %v18882_v7  ;;  %v8166_v7 = vshll.u32 %v14960_v32, 16  ;;  %v19130_v32 = vld [vmem:[#allocation3 + $0x78] sm:$0xff] }
 0x45d   : > { %8590 = vmatmul.bf16.gmra.mxu3 %v8481_v46  ;;  %v8177_v5 = vrot.slane %v8175_v30, 2 }
 0x45e   : > { %7981 = vmatmul.bf16.gmra.mxu1 %v7887_v41  ;;  %v8168_v18 = vrot.slane %v8166_v7, 2  ;;  %v8174_v41 = vrot.slane %v8172_v49, 1  ;;  %v8049_v7 = vld [vmem:[#allocation2 + $0x48] sm:$0x3] }
 0x45f   : > { %v7381_v13 = vpop.f32.mrf.mxu2 }
 0x460   : > { %v7409_v11 = vadd.f32 %v7381_v13, %v7250_v59  ;;  %v7596_v16 = vpop.f32.mrf.mxu3  ;;  %v7810_v33 = vpop.f32.mrf.mxu0  ;;  %v8486_v59 = vshll.u32 %v19095_v55, 16  ;;  %v8169_v48 = vor.u32 %v8168_v18, %v8165_v9  ;;  %v15016_v13 = vld [vmem:[%s20340_s8 + $0x100] sm:$0xff]  ;;  %v8490_v9 = vshrl.u32 %v19095_v55, 16 }
 0x461   : > { %v19100_v28 = vadd.f32 %v7810_v33, %v19043_v40  ;;  %9251 = vmatpush.bf16.msrb.mxu3 %v15016_v13  ;;  %v8099_v33 = vunpack.c.l.b16 %v8049_v7 }
 0x462   : > { %v19097_v42 = vadd.f32 %v7596_v16, %v7409_v11  ;;  %v8488_v40 = vrot.slane %v8486_v59, 1  ;;  %v19142_v16 = vor.u32 %v8177_v5, %v8174_v41  ;;  %v8378_v59 = vld [vmem:[#allocation3 + $0x80] sm:$0x1] }
 0x463   : > { %v7229_v45 = vpop.f32.mrf.mxu1 }
 0x464   : > { %v7253_v4 = vadd.f32 %v7229_v45, %v18914_v0  ;;  %v8170_v0 = vsel %vm1781_vm3, %v8160_v22, %v8169_v48  ;;  %v7889_v22 = vsel %vm2602_vm4, %v7886_v8, %v7888_v17  ;;  %v8179_v35 = vsel %vm1781_vm3, %v8169_v48, %v19142_v16 }
 0x465   : > { %v7891_v48 = vsel %vm2602_vm4, %v7888_v17, %v7890_v47 }
 0x467   : > { %v7383_v36 = vpop.f32.mrf.mxu2 }
 0x468   : > { %v7410_v34 = vadd.f32 %v7383_v36, %v7251_v61  ;;  %v7598_v1 = vpop.f32.mrf.mxu3  ;;  %v7813_v63 = vpop.f32.mrf.mxu0  ;;  %v8489_v61 = vsel %vm1106_vm1, %v8484_v29, %v8488_v40  ;;  %v8108_v29 = vpack.c.b16 %v8099_v33, %v8099_v33 }
 0x469   : > { %v19112_v60 = vadd.f32 %v7813_v63, %v19064_v14  ;;  %v15027_v14 = vld [vmem:[%s20340_s8 + $0x158] sm:$0xff] }
 0x46a   : > { %v19109_v15 = vadd.f32 %v7598_v1, %v7410_v34  ;;  %9406 = vmatpush.bf16.msrb.mxu0 %v15027_v14  ;;  %v8181_v62 = vshrl.u32 %v8108_v29, 16 }
 0x46b   : > { %v7232_v50 = vpop.f32.mrf.mxu1  ;;  %8690 = vmatmul.bf16.gmra.mxu0 %v18996_v12 }
 0x46c   : > { %8278 = vmatmul.bf16.gmra.mxu2 %v8170_v0  ;;  %v7254_v21 = vadd.f32 %v7232_v50, %v18931_v37  ;;  %v8428_v0 = vunpack.c.l.b16 %v8378_v59  ;;  %v15046_v50 = vld [vmem:[%s20340_s8 + $0x1b8] sm:$0xff]  ;;  %v8183_v49 = vrot.slane %v8181_v62, 1 }
 0x46d   : > { %8595 = vmatmul.bf16.gmra.mxu3 %v8489_v61  ;;  %v8184_v61 = vshll.u32 %v8108_v29, 16  ;;  %9616 = vmatpush.bf16.msrb.mxu1 %v15046_v50  ;;  %v19196_v29 = vld [vmem:[#allocation3 + $0x50] sm:$0xff] }
 0x46e   : > { %7986 = vmatmul.bf16.gmra.mxu1 %v7889_v22  ;;  %v19170_v22 = vpack.c.b16 %v8428_v0, %v8428_v0  ;;  %v15045_v0 = vld [vmem:[%s20340_s8 + $0x1b0] sm:$0xff]  ;;  %v9120_v62 = vshll.u32 %v19196_v29, 16 }
 0x46f   : > { %v7386_v37 = vpop.f32.mrf.mxu2  ;;  %v8186_v30 = vrot.slane %v8184_v61, 2 }
 0x470   : > { %v7411_v26 = vadd.f32 %v7386_v37, %v7252_v54  ;;  %v7601_v25 = vpop.f32.mrf.mxu3  ;;  %v7815_v10 = vpop.f32.mrf.mxu0  ;;  %v8494_v54 = vshll.u32 %v19130_v32, 16 }
 0x471   : > { %v19135_v8 = vadd.f32 %v7815_v10, %v19076_v38  ;;  %v15422_v10 = vld [vmem:[#allocation3 + $0x40] sm:$0xf0]  ;;  %v8187_v5 = vor.u32 %v8186_v30, %v8183_v49  ;;  %9617 = vmatpush.bf16.msrb.mxu1 %v15045_v0 }
 0x472   : > { %v19132_v46 = vadd.f32 %v7601_v25, %v7411_v26  ;;  %v8496_v18 = vrot.slane %v8494_v54, 1  ;;  %v8502_v25 = vshll.u32 %v19170_v22, 16  ;;  %v19182_v54 = vld [vmem:[#allocation3 + $0x4c] sm:$0xf] }
 0x473   : > { %v7234_v24 = vpop.f32.mrf.mxu1  ;;  %v8925_v59 = vunpack.c.l.b16 %v19182_v54 }
 0x474   : > { %v7255_v2 = vadd.f32 %v7234_v24, %v18964_v58  ;;  %v8492_v58 = vor.u32 %v8490_v9, %v8488_v40  ;;  %v15026_v40 = vld [vmem:[%s20340_s8 + $0x150] sm:$0xff]  ;;  %v15423_v24 = vld [vmem:[#allocation3 + $0x40] sm:$0xe]  ;;  %v8504_v33 = vrot.slane %v8502_v25, 1  ;;  %v9122_v25 = vrot.slane %v9120_v62, 2 }
 0x475   : > { %9407 = vmatpush.bf16.msrb.mxu0 %v15026_v40  ;;  %v15424_v13 = vor.u32 %v15423_v24, %v15422_v10 }
 0x477   : > { %v7388_v11 = vpop.f32.mrf.mxu2 }
 0x478   : > { %v7412_v45 = vadd.f32 %v7388_v11, %v7253_v4  ;;  %v7603_v38 = vpop.f32.mrf.mxu3  ;;  %v7818_v34 = vpop.f32.mrf.mxu0  ;;  %v8497_v4 = vsel %vm1106_vm1, %v8492_v58, %v8496_v18  ;;  %v8498_v11 = vshrl.u32 %v19130_v32, 16  ;;  %v8188_v58 = vsel %vm1781_vm3, %v19142_v16, %v8187_v5 }
 0x479   : > { %v19149_v1 = vadd.f32 %v7818_v34, %v19097_v42  ;;  %v15054_v42 = vld [vmem:[%s20340_s8 + $0x1f8] sm:$0xff] }
 0x47a   : > { %v19146_v36 = vadd.f32 %v7603_v38, %v7412_v45  ;;  %9837 = vmatpush.bf16.msra.mxu2 %v15054_v42  ;;  %v8874_v45 = vld [vmem:[#allocation3 + $0x48] sm:$0xe]  ;;  %v8500_v47 = vor.u32 %v8498_v11, %v8496_v18 }
 0x47b   : > { %v7237_v63 = vpop.f32.mrf.mxu1  ;;  %8695 = vmatmul.bf16.gmra.mxu0 %v19029_v31  ;;  %v15025_v18 = vld [vmem:[%s20340_s8 + $0x148] sm:$0xff] }
 0x47c   : > { %8283 = vmatmul.bf16.gmra.mxu2 %v8179_v35  ;;  %v19156_v44 = vadd.f32 %v7237_v63, %v18976_v6  ;;  %v8736_v35 = vrot.slane %v15424_v13, 1  ;;  %v8505_v63 = vsel %vm1106_vm1, %v8500_v47, %v8504_v33  ;;  %9408 = vmatpush.bf16.msrb.mxu0 %v15025_v18  ;;  %v19231_v47 = vld [vmem:[%s20341_s9] ss:$0 sm:$0xff]  ;;  %v15044_v18 = vld [vmem:[%s20340_s8 + $0x1a8] sm:$0xff] }
 0x47d   : > { %8600 = vmatmul.bf16.gmra.mxu3 %v8497_v4  ;;  %v8924_v4 = vunpack.c.l.b16 %v8874_v45  ;;  %9618 = vmatpush.bf16.msrb.mxu1 %v15044_v18 }
 0x47e   : > { %7991 = vmatmul.bf16.gmra.mxu1 %v7891_v48 }
 0x47f   : > { %v7391_v6 = vpop.f32.mrf.mxu2  ;;  %v8941_v40 = vpack.c.b16 %v8925_v59, %v8924_v4  ;;  %v15052_v4 = vld [vmem:[%s20340_s8 + $0x1e8] sm:$0xff] }
 0x480   : > { %v7413_v39 = vadd.f32 %v7391_v6, %v7254_v21  ;;  %v7606_v14 = vpop.f32.mrf.mxu3  ;;  %v7820_v56 = vpop.f32.mrf.mxu0  ;;  %v15062_v21 = vld [vmem:[%s20340_s8 + $0x238] sm:$0xff]  ;;  %v9117_v6 = vshrl.u32 %v19196_v29, 16 }
 0x481   : > { %v19175_v17 = vadd.f32 %v7820_v56, %v19109_v15  ;;  %9995 = vmatpush.bf16.msra.mxu3 %v15062_v21  ;;  %v9112_v56 = vshll.u32 %v8941_v40, 16 }
 0x482   : > { %v19172_v19 = vadd.f32 %v7606_v14, %v7413_v39  ;;  %v9109_v14 = vshrl.u32 %v8941_v40, 16  ;;  %v9119_v30 = vrot.slane %v9117_v6, 1 }
 0x483   : > { %v7239_v37 = vpop.f32.mrf.mxu1  ;;  %v9114_v21 = vrot.slane %v9112_v56, 2 }
 0x484   : > { %v7257_v26 = vadd.f32 %v7239_v37, %v19001_v3  ;;  %v8737_v3 = vrot.slane %v18908_v27, 1  ;;  %v9111_v10 = vrot.slane %v9109_v14, 1 }
 0x486   : > { %v8738_v16 = vsel %vm1406_vm0, %v8736_v35, %v8737_v3 }
 0x487   : > { %v7393_v41 = vpop.f32.mrf.mxu2 }
 0x488   : > { %v7414_v15 = vadd.f32 %v7393_v41, %v7255_v2  ;;  %v7608_v7 = vpop.f32.mrf.mxu3  ;;  %v7823_v9 = vpop.f32.mrf.mxu0  ;;  %v8951_v41 = vrot.slane %v19196_v29, 1 }
 0x489   : > { %v19190_v34 = vadd.f32 %v7823_v9, %v19132_v46  ;;  %v15053_v46 = vld [vmem:[%s20340_s8 + $0x1f0] sm:$0xff]  ;;  %v9115_v9 = vor.u32 %v9114_v21, %v9111_v10  ;;  %v8741_v21 = vrot.slane %v18996_v12, 1 }
 0x48a   : > { %v19186_v38 = vadd.f32 %v7608_v7, %v7414_v15  ;;  %9838 = vmatpush.bf16.msra.mxu2 %v15053_v46  ;;  %v9123_v15 = vor.u32 %v9122_v25, %v9119_v30  ;;  %v8950_v7 = vrot.slane %v8941_v40, 1  ;;  %v15060_v30 = vld [vmem:[%s20340_s8 + $0x228] sm:$0xff] }
 0x48b   : > { %v7957_v2 = vpop.f32.mrf.mxu1  ;;  %8700 = vmatmul.bf16.gmra.mxu0 %v19062_v20 }
 0x48c   : > { %8288 = vmatmul.bf16.gmra.mxu2 %v8188_v58  ;;  %v7997_v11 = vadd.f32 %v7957_v2, %v19013_v43  ;;  %v9124_v43 = vsel %vm1781_vm3, %v9115_v9, %v9123_v15  ;;  %v19239_v2 = vld [vmem:[#allocation3 + $0x58] sm:$0xff] }
 0x48d   : > { %8605 = vmatmul.bf16.gmra.mxu3 %v8505_v63  ;;  %v15024_v63 = vld [vmem:[%s20340_s8 + $0x140] sm:$0xff] }
 0x48e   : > { %8817 = vmatmul.bf16.vlgmr.msra.gmra.mxu1 %v8738_v16  ;;  %v8017_v46 = vadd.f32 %v19231_v47, %v7997_v11  ;;  %v19260_v16 = vld [vmem:[%s20343_s11] ss:$0 sm:$0xff]  ;;  %9409 = vmatpush.bf16.msrb.mxu0 %v15024_v63 }
 0x48f   : > { %v7396_v42 = vpop.f32.mrf.mxu2  ;;  %9839 = vmatpush.bf16.msra.mxu2 %v15052_v4 }
 0x490   : > { %v7415_v48 = vadd.f32 %v7396_v42, %v19156_v44  ;;  %v7611_v50 = vpop.f32.mrf.mxu3  ;;  %v7825_v39 = vpop.f32.mrf.mxu0  ;;  %v15061_v44 = vld [vmem:[%s20340_s8 + $0x230] sm:$0xff]  ;;  %v9129_v42 = vshll.u32 %v19239_v2, 16 }
 0x491   : > { %v19218_v37 = vadd.f32 %v7825_v39, %v19146_v36  ;;  %9996 = vmatpush.bf16.msra.mxu3 %v15061_v44  ;;  %v8739_v36 = vrot.slane %v18959_v23, 1 }
 0x492   : > { %v19215_v61 = vadd.f32 %v7611_v50, %v7415_v48  ;;  %v9131_v56 = vrot.slane %v9129_v42, 2 }
 0x493   : > { %v7959_v49 = vpop.f32.mrf.mxu1 }
 0x494   : > { %v7998_v48 = vadd.f32 %v7959_v49, %v19034_v53  ;;  %v8953_v53 = vrot.slane %v19239_v2, 1 }
 0x495   : > { %9997 = vmatpush.bf16.msra.mxu3 %v15060_v30 }
 0x496   : > { %v8018_v25 = vadd.f32 %v19231_v47, %v7998_v48  ;;  %v8954_v11 = vsel %vm1406_vm0, %v8951_v41, %v8953_v53 }
 0x497   : > { %v7398_v24 = vpop.f32.mrf.mxu2 }
 0x498   : > { %v7416_v5 = vadd.f32 %v7398_v24, %v7257_v26  ;;  %v7613_v13 = vpop.f32.mrf.mxu3  ;;  %v7828_v45 = vpop.f32.mrf.mxu0  ;;  %v8952_v26 = vsel %vm1406_vm0, %v8950_v7, %v8951_v41  ;;  %v8742_v41 = vsel %vm1406_vm0, %v8739_v36, %v8741_v21 }
 0x499   : > { %v19234_v58 = vadd.f32 %v7828_v45, %v19172_v19  ;;  %v8740_v19 = vsel %vm1406_vm0, %v8737_v3, %v8739_v36  ;;  %v9126_v3 = vshrl.u32 %v19239_v2, 16  ;;  %v9309_v36 = vld [vmem:[#allocation3 + $0x48] sm:$0xc] }
 0x49a   : > { %v19226_v33 = vadd.f32 %v7613_v13, %v7416_v5  ;;  %v9327_v42 = vunpack.c.l.b16 %v9309_v36 }
 0x49b   : > { %v7962_v35 = vpop.f32.mrf.mxu1  ;;  %8705 = vmatmul.bf16.gmra.mxu0 %v19095_v55  ;;  %v9128_v14 = vrot.slane %v9126_v3, 1 }
 0x49c   : > { %9031 = vmatmul.bf16.vlgmr.msrb.gmra.mxu2 %v8952_v26  ;;  %v7999_v24 = vadd.f32 %v7962_v35, %v19046_v51  ;;  %v19294_v26 = vld [vmem:[#allocation3 + $0x60] sm:$0xff] }
 0x49d   : > { %9252 = vmatmul.bf16.vlgmr.msrb.gmra.mxu3 %v9124_v43  ;;  %v15051_v51 = vld [vmem:[%s20340_s8 + $0x1e0] sm:$0xff]  ;;  %v9138_v23 = vshll.u32 %v19294_v26, 16 }
 0x49e   : > { %8822 = vmatmul.bf16.gmra.mxu1 %v8740_v19  ;;  %v8019_v35 = vadd.f32 %v19231_v47, %v7999_v24  ;;  %9840 = vmatpush.bf16.msra.mxu2 %v15051_v51  ;;  %v9135_v19 = vshrl.u32 %v19294_v26, 16  ;;  %v8743_v24 = vrot.slane %v19029_v31, 1  ;;  %v15050_v31 = vld [vmem:[%s20340_s8 + $0x1d8] sm:$0xff] }
 0x49f   : > { %v8254_v0 = vpop.f32.mrf.mxu2 }
 0x4a0   : > { %v8294_v40 = vadd.f32 %v8254_v0, %v8017_v46  ;;  %v19262_v27 = vpop.f32.mrf.mxu3  ;;  %v7830_v6 = vpop.f32.mrf.mxu0  ;;  %v9137_v48 = vrot.slane %v9135_v19, 1 }
 0x4a1   : > { %v19274_v62 = vadd.f32 %v7830_v6, %v19186_v38  ;;  %v9132_v38 = vor.u32 %v9131_v56, %v9128_v14  ;;  %v15059_v6 = vld [vmem:[%s20340_s8 + $0x220] sm:$0xff]  ;;  %v9328_v14 = vpack.c.b16 %v8925_v59, %v9327_v42  ;;  %v9330_v56 = vrot.slane %v19196_v29, 2 }
 0x4a2   : > { %v8314_v50 = vadd.f32 %v19260_v16, %v8294_v40  ;;  %9998 = vmatpush.bf16.msra.mxu3 %v15059_v6  ;;  %9841 = vmatpush.bf16.msra.mxu2 %v15050_v31  ;;  %v8745_v6 = vrot.slane %v19062_v20, 1  ;;  %v15049_v20 = vld [vmem:[%s20340_s8 + $0x1d0] sm:$0xff] }
 0x4a3   : > { %v7964_v39 = vpop.f32.mrf.mxu1  ;;  %v9133_v9 = vsel %vm1781_vm3, %v9123_v15, %v9132_v38  ;;  %v15043_v15 = vld [vmem:[%s20340_s8 + $0x1a0] sm:$0xff] }
 0x4a4   : > { %8330 = vst [vmem:[%s19269_s13] sm:$0xff] %v8314_v50  ;;  %9619 = vmatpush.bf16.msrb.mxu1 %v15043_v15  ;;  %v8000_v18 = vadd.f32 %v7964_v39, %v19067_v57  ;;  %v9140_v50 = vrot.slane %v9138_v23, 2 }
 0x4a6   : > { %v8020_v57 = vadd.f32 %v19231_v47, %v8000_v18  ;;  %9842 = vmatpush.bf16.msra.mxu2 %v15049_v20 }
 0x4a7   : > { %v8256_v44 = vpop.f32.mrf.mxu2 }
 0x4a8   : > { %v8295_v49 = vadd.f32 %v8256_v44, %v8018_v25  ;;  %v19282_v10 = vpop.f32.mrf.mxu3  ;;  %v7833_v13 = vpop.f32.mrf.mxu0  ;;  %v9141_v44 = vor.u32 %v9140_v50, %v9137_v48 }
 0x4a9   : > { %v19288_v7 = vadd.f32 %v7833_v13, %v19215_v61  ;;  %v15078_v61 = vld [vmem:[%s20342_s10 + $0x38] sm:$0xff] }
 0x4aa   : > { %v8315_v5 = vadd.f32 %v19260_v16, %v8295_v49  ;;  %10292 = vmatpush.bf16.msra.mxu0 %v15078_v61  ;;  %v9329_v49 = vrot.slane %v9328_v14, 2  ;;  %v9142_v51 = vsel %vm1781_vm3, %v9132_v38, %v9141_v44  ;;  %v19341_v61 = vld [vmem:[#allocation3 + $0x68] sm:$0xff] }
 0x4ab   : > { %v7967_v45 = vpop.f32.mrf.mxu1  ;;  %8710 = vmatmul.bf16.gmra.mxu0 %v19130_v32  ;;  %v9147_v12 = vshll.u32 %v19341_v61, 16 }
 0x4ac   : > { %8331 = vst [vmem:[%s19269_s13 + $0x8] sm:$0xff] %v8315_v5  ;;  %9036 = vmatmul.bf16.gmra.mxu2 %v8954_v11  ;;  %v8001_v5 = vadd.f32 %v7967_v45, %v19079_v52  ;;  %v15077_v52 = vld [vmem:[%s20342_s10 + $0x30] sm:$0xff] }
 0x4ad   : > { %9257 = vmatmul.bf16.gmra.mxu3 %v9133_v9  ;;  %v9331_v9 = vsel %vm2004_vm2, %v9329_v49, %v9330_v56  ;;  %v9149_v18 = vrot.slane %v9147_v12, 2 }
 0x4ae   : > { %8827 = vmatmul.bf16.gmra.mxu1 %v8742_v41  ;;  %v8021_v38 = vadd.f32 %v19231_v47, %v8001_v5  ;;  %10293 = vmatpush.bf16.msra.mxu0 %v15077_v52 }
 0x4af   : > { %v8259_v43 = vpop.f32.mrf.mxu2 }
 0x4b0   : > { %v8296_v63 = vadd.f32 %v8259_v43, %v8019_v35  ;;  %v19311_v4 = vpop.f32.mrf.mxu3  ;;  %v7835_v0 = vpop.f32.mrf.mxu0  ;;  %v9144_v35 = vshrl.u32 %v19341_v61, 16 }
 0x4b1   : > { %v19318_v40 = vadd.f32 %v7835_v0, %v19226_v33  ;;  %v8955_v33 = vrot.slane %v19294_v26, 1 }
 0x4b2   : > { %v8316_v46 = vadd.f32 %v19260_v16, %v8296_v63  ;;  %v9146_v36 = vrot.slane %v9144_v35, 1 }
 0x4b3   : > { %v7969_v3 = vpop.f32.mrf.mxu1  ;;  %v8956_v11 = vsel %vm1406_vm0, %v8953_v53, %v8955_v33  ;;  %v15042_v53 = vld [vmem:[%s20340_s8 + $0x198] sm:$0xff] }
 0x4b4   : > { %8332 = vst [vmem:[%s19269_s13 + $0x10] sm:$0xff] %v8316_v46  ;;  %9620 = vmatpush.bf16.msrb.mxu1 %v15042_v53  ;;  %v15058_v46 = vld [vmem:[%s20340_s8 + $0x218] sm:$0xff]  ;;  %v9150_v50 = vor.u32 %v9149_v18, %v9146_v36 }
 0x4b5   : > { %9999 = vmatpush.bf16.msra.mxu3 %v15058_v46 }
 0x4b7   : > { %v8261_v39 = vpop.f32.mrf.mxu2 }
 0x4b8   : > { %v8297_v30 = vadd.f32 %v8261_v39, %v8020_v57  ;;  %v19329_v25 = vpop.f32.mrf.mxu3  ;;  %v8676_v59 = vpop.f32.mrf.mxu0 }
 0x4b9   : > { %v19335_v13 = vadd.f32 %v8676_v59, %v19262_v27  ;;  %v8744_v27 = vsel %vm1406_vm0, %v8741_v21, %v8743_v24  ;;  %v8002_v21 = vadd.f32 %v7969_v3, %v19100_v28  ;;  %v8957_v28 = vrot.slane %v19341_v61, 1  ;;  %v19384_v59 = vld [vmem:[#allocation3 + $0x70] sm:$0xff] }
 0x4ba   : > { %v8317_v54 = vadd.f32 %v19260_v16, %v8297_v30  ;;  %v9332_v3 = vrot.slane %v19239_v2, 2  ;;  %v9151_v2 = vsel %vm1781_vm3, %v9141_v44, %v9150_v50 }
 0x4bb   : > { %v7972_v29 = vpop.f32.mrf.mxu1  ;;  %9410 = vmatmul.bf16.vlgmr.msrb.gmra.mxu0 %v9331_v9  ;;  %v8022_v0 = vadd.f32 %v19231_v47, %v8002_v21  ;;  %v8958_v49 = vsel %vm1406_vm0, %v8955_v33, %v8957_v28  ;;  %v15041_v33 = vld [vmem:[%s20340_s8 + $0x190] sm:$0xff]  ;;  %v9334_v21 = vrot.slane %v19294_v26, 2 }
 0x4bc   : > { %8333 = vst [vmem:[%s19269_s13 + $0x18] sm:$0xff] %v8317_v54  ;;  %9041 = vmatmul.bf16.gmra.mxu2 %v8956_v11  ;;  %v8003_v14 = vadd.f32 %v7972_v29, %v19112_v60  ;;  %v9333_v5 = vsel %vm2004_vm2, %v9330_v56, %v9332_v3  ;;  %v15076_v60 = vld [vmem:[%s20342_s10 + $0x28] sm:$0xff]  ;;  %9621 = vmatpush.bf16.msrb.mxu1 %v15041_v33  ;;  %v9153_v29 = vshrl.u32 %v19384_v59, 16 }
 0x4bd   : > { %9262 = vmatmul.bf16.gmra.mxu3 %v9142_v51  ;;  %10294 = vmatpush.bf16.msra.mxu0 %v15076_v60  ;;  %v9156_v51 = vshll.u32 %v19384_v59, 16 }
 0x4be   : > { %8832 = vmatmul.bf16.gmra.mxu1 %v8744_v27  ;;  %v8023_v56 = vadd.f32 %v19231_v47, %v8003_v14 }
 0x4bf   : > { %v8264_v45 = vpop.f32.mrf.mxu2 }
 0x4c0   : > { %v8298_v41 = vadd.f32 %v8264_v45, %v8021_v38  ;;  %v19356_v15 = vpop.f32.mrf.mxu3  ;;  %v8678_v63 = vpop.f32.mrf.mxu0  ;;  %v9155_v38 = vrot.slane %v9153_v29, 1  ;;  %v9158_v45 = vrot.slane %v9156_v51, 2  ;;  %v9336_v51 = vrot.slane %v19341_v61, 2 }
 0x4c1   : > { %v19363_v19 = vadd.f32 %v8678_v63, %v19282_v10 }
 0x4c2   : > { %v8318_v43 = vadd.f32 %v19260_v16, %v8298_v41  ;;  %v15057_v41 = vld [vmem:[%s20340_s8 + $0x210] sm:$0xff]  ;;  %v9159_v63 = vor.u32 %v9158_v45, %v9155_v38 }
 0x4c3   : > { %v7974_v23 = vpop.f32.mrf.mxu1  ;;  %10000 = vmatpush.bf16.msra.mxu3 %v15057_v41 }
 0x4c4   : > { %8334 = vst [vmem:[%s19269_s13 + $0x20] sm:$0xff] %v8318_v43  ;;  %v9160_v26 = vsel %vm1781_vm3, %v9150_v50, %v9159_v63 }
 0x4c7   : > { %v8266_v42 = vpop.f32.mrf.mxu2 }
 0x4c8   : > { %v8299_v48 = vadd.f32 %v8266_v42, %v8022_v0  ;;  %v19372_v10 = vpop.f32.mrf.mxu3  ;;  %v8681_v39 = vpop.f32.mrf.mxu0 }
 0x4c9   : > { %v19378_v30 = vadd.f32 %v8681_v39, %v19311_v4  ;;  %v8746_v4 = vsel %vm1406_vm0, %v8743_v24, %v8745_v6  ;;  %v8004_v24 = vadd.f32 %v7974_v23, %v19135_v8  ;;  %v8959_v8 = vrot.slane %v19384_v59, 1 }
 0x4ca   : > { %v8319_v57 = vadd.f32 %v19260_v16, %v8299_v48  ;;  %v8747_v23 = vrot.slane %v19095_v55, 1  ;;  %v9335_v48 = vsel %vm2004_vm2, %v9332_v3, %v9334_v21  ;;  %v15048_v55 = vld [vmem:[%s20340_s8 + $0x1c8] sm:$0xff] }
 0x4cb   : > { %v7977_v54 = vpop.f32.mrf.mxu1  ;;  %9415 = vmatmul.bf16.gmra.mxu0 %v9333_v5  ;;  %v8024_v35 = vadd.f32 %v19231_v47, %v8004_v24  ;;  %v8960_v42 = vsel %vm1406_vm0, %v8957_v28, %v8959_v8  ;;  %v15040_v28 = vld [vmem:[%s20340_s8 + $0x188] sm:$0xff]  ;;  %9843 = vmatpush.bf16.msra.mxu2 %v15048_v55 }
 0x4cc   : > { %8335 = vst [vmem:[%s19269_s13 + $0x28] sm:$0xff] %v8319_v57  ;;  %9046 = vmatmul.bf16.gmra.mxu2 %v8958_v49  ;;  %v8005_v36 = vadd.f32 %v7977_v54, %v19149_v1  ;;  %v19425_v57 = vld [vmem:[#allocation3 + $0x78] sm:$0xff]  ;;  %9622 = vmatpush.bf16.msrb.mxu1 %v15040_v28 }
 0x4cd   : > { %9267 = vmatmul.bf16.gmra.mxu3 %v9151_v2  ;;  %v15075_v1 = vld [vmem:[%s20342_s10 + $0x20] sm:$0xff]  ;;  %v9162_v5 = vshrl.u32 %v19425_v57, 16  ;;  %v9165_v54 = vshll.u32 %v19425_v57, 16 }
 0x4ce   : > { %8837 = vmatmul.bf16.gmra.mxu1 %v8746_v4  ;;  %v8025_v3 = vadd.f32 %v19231_v47, %v8005_v36  ;;  %10295 = vmatpush.bf16.msra.mxu0 %v15075_v1  ;;  %v19466_v36 = vld [vmem:[#allocation3 + $0x80] sm:$0xff] }
 0x4cf   : > { %v8269_v44 = vpop.f32.mrf.mxu2  ;;  %v9164_v33 = vrot.slane %v9162_v5, 1 }
 0x4d0   : > { %v8300_v11 = vadd.f32 %v8269_v44, %v8023_v56  ;;  %v19397_v9 = vpop.f32.mrf.mxu3  ;;  %v8683_v52 = vpop.f32.mrf.mxu0  ;;  %v9167_v56 = vrot.slane %v9165_v54, 2  ;;  %v15056_v44 = vld [vmem:[%s20340_s8 + $0x208] sm:$0xff]  ;;  %v8963_v54 = vrot.slane %v19466_v36, 1 }
 0x4d1   : > { %v19404_v27 = vadd.f32 %v8683_v52, %v19329_v25  ;;  %10001 = vmatpush.bf16.msra.mxu3 %v15056_v44  ;;  %v8749_v52 = vrot.slane %v19130_v32, 1 }
 0x4d2   : > { %v8320_v31 = vadd.f32 %v19260_v16, %v8300_v11 }
 0x4d3   : > { %v7979_v53 = vpop.f32.mrf.mxu1 }
 0x4d4   : > { %8336 = vst [vmem:[%s19269_s13 + $0x30] sm:$0xff] %v8320_v31  ;;  %v9168_v31 = vor.u32 %v9167_v56, %v9164_v33  ;;  %v8751_v33 = vrot.slane %v19170_v22, 1 }
 0x4d6   : > { %v9169_v61 = vsel %vm1781_vm3, %v9159_v63, %v9168_v31 }
 0x4d7   : > { %v8271_v12 = vpop.f32.mrf.mxu2 }
 0x4d8   : > { %v8301_v43 = vadd.f32 %v8271_v12, %v8024_v35  ;;  %v19413_v25 = vpop.f32.mrf.mxu3  ;;  %v8686_v46 = vpop.f32.mrf.mxu0  ;;  %v9337_v12 = vsel %vm2004_vm2, %v9334_v21, %v9336_v51  ;;  %v15039_v21 = vld [vmem:[%s20340_s8 + $0x180] sm:$0xff] }
 0x4d9   : > { %v19419_v0 = vadd.f32 %v8686_v46, %v19356_v15  ;;  %v8748_v15 = vsel %vm1406_vm0, %v8745_v6, %v8747_v23  ;;  %v8006_v6 = vadd.f32 %v7979_v53, %v19175_v17  ;;  %v8961_v17 = vrot.slane %v19425_v57, 1  ;;  %9623 = vmatpush.bf16.msrb.mxu1 %v15039_v21 }
 0x4da   : > { %v8321_v18 = vadd.f32 %v19260_v16, %v8301_v43 }
 0x4db   : > { %v7982_v14 = vpop.f32.mrf.mxu1  ;;  %9420 = vmatmul.bf16.gmra.mxu0 %v9335_v48  ;;  %v8026_v11 = vadd.f32 %v19231_v47, %v8006_v6  ;;  %v8962_v35 = vsel %vm1406_vm0, %v8959_v8, %v8961_v17  ;;  %v8750_v8 = vsel %vm1406_vm0, %v8747_v23, %v8749_v52  ;;  %v9171_v48 = vshrl.u32 %v19466_v36, 16 }
 0x4dc   : > { %8337 = vst [vmem:[%s19269_s13 + $0x38] sm:$0xff] %v8321_v18  ;;  %9051 = vmatmul.bf16.gmra.mxu2 %v8960_v42  ;;  %v8007_v53 = vadd.f32 %v7982_v14, %v19190_v34  ;;  %v15047_v34 = vld [vmem:[%s20340_s8 + $0x1c0] sm:$0xff]  ;;  %v9174_v14 = vshll.u32 %v19466_v36, 16  ;;  %v9338_v6 = vrot.slane %v19384_v59, 2  ;;  %v15085_v59 = vld [vmem:[%s20340_s8 + $0x30] sm:$0xff] }
 0x4dd   : > { %9272 = vmatmul.bf16.gmra.mxu3 %v9160_v26  ;;  %9844 = vmatpush.bf16.msra.mxu2 %v15047_v34  ;;  %v9173_v28 = vrot.slane %v9171_v48, 1 }
 0x4de   : > { %8842 = vmatmul.bf16.gmra.mxu1 %v8748_v15  ;;  %v8027_v63 = vadd.f32 %v19231_v47, %v8007_v53  ;;  %v9339_v53 = vsel %vm2004_vm2, %v9336_v51, %v9338_v6  ;;  %v8752_v51 = vsel %vm1406_vm0, %v8749_v52, %v8751_v33 }
 0x4df   : > { %v8274_v50 = vpop.f32.mrf.mxu2 }
 0x4e0   : > { %v8302_v39 = vadd.f32 %v8274_v50, %v8025_v3  ;;  %v19438_v49 = vpop.f32.mrf.mxu3  ;;  %v8688_v20 = vpop.f32.mrf.mxu0  ;;  %v9176_v3 = vrot.slane %v9174_v14, 2  ;;  %v15055_v50 = vld [vmem:[%s20340_s8 + $0x200] sm:$0xff] }
 0x4e1   : > { %v19445_v60 = vadd.f32 %v8688_v20, %v19372_v10  ;;  %10002 = vmatpush.bf16.msra.mxu3 %v15055_v50 }
 0x4e2   : > { %v8322_v2 = vadd.f32 %v19260_v16, %v8302_v39  ;;  %v9088_v39 = vld [vmem:[#allocation3 + $0x88] sm:$0x3]  ;;  %v19499_v20 = vor.u32 %v9176_v3, %v9173_v28  ;;  %v19547_v3 = vld [vmem:[#allocation3 + $0x58] sm:$0xff] }
 0x4e3   : > { %v7984_v4 = vpop.f32.mrf.mxu1  ;;  %v9544_v33 = vrot.slane %v19547_v3, 2 }
 0x4e4   : > { %8338 = vst [vmem:[%s19269_s13 + $0x40] sm:$0xff] %v8322_v2  ;;  %v8008_v23 = vadd.f32 %v7984_v4, %v19218_v37  ;;  %v9106_v4 = vunpack.c.l.b16 %v9088_v39  ;;  %v9178_v22 = vsel %vm1781_vm3, %v9168_v31, %v19499_v20  ;;  %v15094_v31 = vld [vmem:[%s20340_s8 + $0x78] sm:$0xff]  ;;  %v9340_v39 = vrot.slane %v19425_v57, 2 }
 0x4e5   : > { %10505 = vmatpush.bf16.msra.mxu1 %v15094_v31 }
 0x4e6   : > { %v8028_v5 = vadd.f32 %v19231_v47, %v8008_v23 }
 0x4e7   : > { %v8276_v29 = vpop.f32.mrf.mxu2 }
 0x4e8   : > { %v8303_v24 = vadd.f32 %v8276_v29, %v8026_v11  ;;  %v19454_v10 = vpop.f32.mrf.mxu3  ;;  %v8691_v45 = vpop.f32.mrf.mxu0 }
 0x4e9   : > { %v19460_v41 = vadd.f32 %v8691_v45, %v19397_v9  ;;  %v15074_v9 = vld [vmem:[%s20342_s10 + $0x18] sm:$0xff]  ;;  %v19516_v45 = vpack.c.b16 %v9106_v4, %v9106_v4 }
 0x4ea   : > { %v8323_v38 = vadd.f32 %v19260_v16, %v8303_v24  ;;  %10296 = vmatpush.bf16.msra.mxu0 %v15074_v9  ;;  %v8964_v24 = vsel %vm1406_vm0, %v8961_v17, %v8963_v54  ;;  %v15086_v17 = vld [vmem:[%s20340_s8 + $0x38] sm:$0xff] }
 0x4eb   : > { %v7987_v43 = vpop.f32.mrf.mxu1  ;;  %9425 = vmatmul.bf16.gmra.mxu0 %v9337_v12  ;;  %10577 = vmatpush.bf16.msrb.mxu2 %v15086_v17  ;;  %v9180_v32 = vshrl.u32 %v19516_v45, 16  ;;  %v9183_v52 = vshll.u32 %v19516_v45, 16  ;;  %v19535_v9 = vld [vmem:[#allocation3 + $0x54] sm:$0xf]  ;;  %v9710_v17 = vshrl.u32 %v19547_v3, 16 }
 0x4ec   : > { %8339 = vst [vmem:[%s19269_s13 + $0x48] sm:$0xff] %v8323_v38  ;;  %9056 = vmatmul.bf16.gmra.mxu2 %v8962_v35  ;;  %v8009_v56 = vadd.f32 %v7987_v43, %v19234_v58  ;;  %v8890_v58 = vld [vmem:[#allocation3 + $0x88] sm:$0x1]  ;;  %v9518_v23 = vunpack.c.l.b16 %v19535_v9 }
 0x4ed   : > { %9277 = vmatmul.bf16.gmra.mxu3 %v9169_v61  ;;  %v8940_v43 = vunpack.c.l.b16 %v8890_v58  ;;  %v9185_v28 = vrot.slane %v9183_v52, 2 }
 0x4ee   : > { %8847 = vmatmul.bf16.gmra.mxu1 %v8750_v8  ;;  %v8029_v35 = vadd.f32 %v19231_v47, %v8009_v56 }
 0x4ef   : > { %v8279_v18 = vpop.f32.mrf.mxu2  ;;  %v8949_v14 = vpack.c.b16 %v8940_v43, %v8940_v43  ;;  %10578 = vmatpush.bf16.msrb.mxu2 %v15085_v59 }
 0x4f0   : > { %v8304_v46 = vadd.f32 %v8279_v18, %v8027_v63  ;;  %v19481_v42 = vpop.f32.mrf.mxu3  ;;  %v8693_v55 = vpop.f32.mrf.mxu0  ;;  %v9467_v18 = vld [vmem:[#allocation3 + $0x50] sm:$0xc] }
 0x4f1   : > { %v19488_v1 = vadd.f32 %v8693_v55, %v19413_v25  ;;  %v9182_v55 = vrot.slane %v9180_v32, 1 }
 0x4f2   : > { %v8324_v26 = vadd.f32 %v19260_v16, %v8304_v46 }
 0x4f3   : > { %v7989_v15 = vpop.f32.mrf.mxu1  ;;  %v9186_v4 = vor.u32 %v9185_v28, %v9182_v55 }
 0x4f4   : > { %8340 = vst [vmem:[%s19269_s13 + $0x50] sm:$0xff] %v8324_v26  ;;  %v8010_v8 = vadd.f32 %v7989_v15, %v19274_v62  ;;  %v15102_v26 = vld [vmem:[%s20340_s8 + $0xb8] sm:$0xff]  ;;  %v9517_v62 = vunpack.c.l.b16 %v9467_v18  ;;  %v9712_v18 = vrot.slane %v9710_v17, 2 }
 0x4f5   : > { %10669 = vmatpush.bf16.msrb.mxu3 %v15102_v26  ;;  %v15101_v26 = vld [vmem:[%s20340_s8 + $0xb0] sm:$0xff] }
 0x4f6   : > { %v8030_v15 = vadd.f32 %v19231_v47, %v8010_v8 }
 0x4f7   : > { %v8281_v37 = vpop.f32.mrf.mxu2 }
 0x4f8   : > { %v8305_v25 = vadd.f32 %v8281_v37, %v8028_v5  ;;  %v19497_v2 = vpop.f32.mrf.mxu3  ;;  %v8696_v11 = vpop.f32.mrf.mxu0  ;;  %v9534_v5 = vpack.c.b16 %v9518_v23, %v9517_v62 }
 0x4f9   : > { %v19505_v29 = vadd.f32 %v8696_v11, %v19438_v49  ;;  %v15073_v49 = vld [vmem:[%s20342_s10 + $0x10] sm:$0xff]  ;;  %10670 = vmatpush.bf16.msrb.mxu3 %v15101_v26  ;;  %v15063_v26 = vld [vmem:[#allocation2 + $0x48] sm:$0xf0] }
 0x4fa   : > { %v8325_v44 = vadd.f32 %v19260_v16, %v8305_v25  ;;  %10297 = vmatpush.bf16.msra.mxu0 %v15073_v49  ;;  %v9543_v49 = vrot.slane %v9534_v5, 2  ;;  %v9705_v43 = vshll.u32 %v9534_v5, 16 }
 0x4fb   : > { %v7992_v38 = vpop.f32.mrf.mxu1  ;;  %9430 = vmatmul.bf16.gmra.mxu0 %v9339_v53 }
 0x4fc   : > { %8341 = vst [vmem:[%s19269_s13 + $0x58] sm:$0xff] %v8325_v44  ;;  %9061 = vmatmul.bf16.gmra.mxu2 %v8964_v24  ;;  %v8011_v56 = vadd.f32 %v7992_v38, %v19288_v7  ;;  %v9187_v7 = vsel %vm1781_vm3, %v19499_v20, %v9186_v4  ;;  %v15093_v20 = vld [vmem:[%s20340_s8 + $0x70] sm:$0xff] }
 0x4fd   : > { %9282 = vmatmul.bf16.gmra.mxu3 %v9178_v22  ;;  %v9341_v22 = vsel %vm2004_vm2, %v9338_v6, %v9340_v39  ;;  %v9545_v6 = vsel %vm2004_vm2, %v9543_v49, %v9544_v33  ;;  %10506 = vmatpush.bf16.msra.mxu1 %v15093_v20 }
 0x4fe   : > { %8852 = vmatmul.bf16.gmra.mxu1 %v8752_v51  ;;  %v9713_v51 = vshll.u32 %v19547_v3, 16 }
 0x4ff   : > { %v8284_v12 = vpop.f32.mrf.mxu2 }
 0x500   : > { %v8306_v61 = vadd.f32 %v8284_v12, %v8029_v35  ;;  %v19531_v34 = vpop.f32.mrf.mxu3  ;;  %v8698_v63 = vpop.f32.mrf.mxu0  ;;  %v9702_v12 = vshrl.u32 %v9534_v5, 16  ;;  %v9342_v5 = vrot.slane %v19466_v36, 2 }
 0x501   : > { %v19540_v46 = vadd.f32 %v8698_v63, %v19454_v10  ;;  %v8965_v10 = vrot.slane %v8949_v14, 1  ;;  %v9715_v14 = vrot.slane %v9713_v51, 3  ;;  %v15100_v51 = vld [vmem:[%s20340_s8 + $0xa8] sm:$0xff] }
 0x502   : > { %v8326_v21 = vadd.f32 %v19260_v16, %v8306_v61  ;;  %v9902_v61 = vld [vmem:[#allocation3 + $0x50] sm:$0x8]  ;;  %v9704_v62 = vrot.slane %v9702_v12, 2  ;;  %v9343_v36 = vsel %vm2004_vm2, %v9340_v39, %v9342_v5  ;;  %v15092_v39 = vld [vmem:[%s20340_s8 + $0x68] sm:$0xff]  ;;  %10671 = vmatpush.bf16.msrb.mxu3 %v15100_v51 }
 0x503   : > { %v7994_v48 = vpop.f32.mrf.mxu1  ;;  %v8966_v53 = vsel %vm1406_vm0, %v8963_v54, %v8965_v10  ;;  %v15072_v54 = vld [vmem:[%s20342_s10 + $0x8] sm:$0xff]  ;;  %v9920_v28 = vunpack.c.l.b16 %v9902_v61  ;;  %v9716_v10 = vor.u32 %v9715_v14, %v9712_v18  ;;  %10507 = vmatpush.bf16.msra.mxu1 %v15092_v39  ;;  %v9344_v61 = vrot.slane %v19516_v45, 2 }
 0x504   : > { %8342 = vst [vmem:[%s19269_s13 + $0x60] sm:$0xff] %v8326_v21  ;;  %10298 = vmatpush.bf16.msra.mxu0 %v15072_v54  ;;  %v8012_v32 = vadd.f32 %v7994_v48, %v19318_v40  ;;  %v19602_v40 = vld [vmem:[#allocation3 + $0x60] sm:$0xff]  ;;  %v19647_v12 = vld [vmem:[#allocation3 + $0x68] sm:$0xff] }
 0x505   : > { %v9719_v54 = vshrl.u32 %v19602_v40, 16  ;;  %v14063_v14 = vld [vmem:[#allocation2 + $0x48] sm:$0xe]  ;;  %v9345_v45 = vsel %vm2004_vm2, %v9342_v5, %v9344_v61  ;;  %v15091_v5 = vld [vmem:[%s20340_s8 + $0x60] sm:$0xff]  ;;  %v9927_v51 = vrot.slane %v19647_v12, 3 }
 0x506   : > { %v8032_v48 = vadd.f32 %v19231_v47, %v8012_v32 }
 0x507   : > { %v8286_v50 = vpop.f32.mrf.mxu2  ;;  %10508 = vmatpush.bf16.msra.mxu1 %v15091_v5 }
 0x508   : > { %v8307_v37 = vadd.f32 %v8286_v50, %v8030_v15  ;;  %v19553_v25 = vpop.f32.mrf.mxu3  ;;  %v8701_v11 = vpop.f32.mrf.mxu0  ;;  %v9707_v15 = vrot.slane %v9705_v43, 3 }
 0x509   : > { %v19559_v24 = vadd.f32 %v8701_v11, %v19481_v42 }
 0x50a   : > { %v8327_v44 = vadd.f32 %v19260_v16, %v8307_v37 }
 0x50b   : > { %v8818_v58 = vpop.f32.mrf.mxu1  ;;  %9435 = vmatmul.bf16.gmra.mxu0 %v9341_v22 }
 0x50c   : > { %8343 = vst [vmem:[%s19269_s13 + $0x68] sm:$0xff] %v8327_v44  ;;  %9066 = vmatmul.bf16.gmra.mxu2 %v8966_v53  ;;  %v19573_v42 = vadd.f32 %v8818_v58, %v19335_v13  ;;  %v8031_v13 = vadd.f32 %v19231_v47, %v8011_v56  ;;  %v9708_v56 = vor.u32 %v9707_v15, %v9704_v62  ;;  %v9546_v44 = vrot.slane %v19602_v40, 2  ;;  %v15071_v58 = vld [vmem:[%s20342_s10] sm:$0xff] }
 0x50d   : > { %9287 = vmatmul.bf16.gmra.mxu3 %v9187_v7  ;;  %10299 = vmatpush.bf16.msra.mxu0 %v15071_v58 }
 0x50e   : > { %9624 = vmatmul.bf16.vlgmr.msrb.gmra.mxu1 %v9545_v6  ;;  %v9547_v57 = vsel %vm2004_vm2, %v9544_v33, %v9546_v44 }
 0x50f   : > { %v8289_v38 = vpop.f32.mrf.mxu2 }
 0x510   : > { %v8308_v31 = vadd.f32 %v8289_v38, %v8031_v13  ;;  %v19590_v35 = vpop.f32.mrf.mxu3  ;;  %v8703_v8 = vpop.f32.mrf.mxu0  ;;  %v9721_v38 = vrot.slane %v9719_v54, 2  ;;  %v15099_v54 = vld [vmem:[%s20340_s8 + $0xa0] sm:$0xff] }
 0x511   : > { %v19595_v21 = vadd.f32 %v8703_v8, %v19497_v2  ;;  %v9921_v2 = vpack.c.b16 %v9518_v23, %v9920_v28  ;;  %v9717_v23 = vsel %vm2379_vm5, %v9708_v56, %v9716_v10  ;;  %v9548_v8 = vrot.slane %v19647_v12, 2  ;;  %10672 = vmatpush.bf16.msrb.mxu3 %v15099_v54 }
 0x512   : > { %v8328_v52 = vadd.f32 %v19260_v16, %v8308_v31  ;;  %v9731_v56 = vshll.u32 %v19647_v12, 16 }
 0x513   : > { %v8820_v63 = vpop.f32.mrf.mxu1  ;;  %v9922_v47 = vrot.slane %v9921_v2, 3  ;;  %v15112_v2 = vld [vmem:[%s20340_s8 + $0xf8] sm:$0xff] }
 0x514   : > { %8344 = vst [vmem:[%s19269_s13 + $0x70] sm:$0xff] %v8328_v52  ;;  %v8859_v55 = vadd.f32 %v8820_v63, %v19363_v19  ;;  %v9923_v19 = vrot.slane %v19547_v3, 3  ;;  %v9925_v52 = vrot.slane %v19602_v40, 3  ;;  %10775 = vmatpush.bf16.msrb.mxu0 %v15112_v2  ;;  %v9733_v39 = vrot.slane %v9731_v56, 3 }
 0x516   : > { %v9926_v15 = vsel %vm2602_vm4, %v9923_v19, %v9925_v52 }
 0x517   : > { %v8291_v50 = vpop.f32.mrf.mxu2 }
 0x518   : > { %v8309_v37 = vadd.f32 %v8291_v50, %v8032_v48  ;;  %v19608_v4 = vpop.f32.mrf.mxu3  ;;  %v8706_v53 = vpop.f32.mrf.mxu0  ;;  %v9549_v50 = vsel %vm2004_vm2, %v9546_v44, %v9548_v8 }
 0x519   : > { %v19614_v9 = vadd.f32 %v8706_v53, %v19531_v34  ;;  %v15084_v34 = vld [vmem:[%s20340_s8 + $0x28] sm:$0xff] }
 0x51a   : > { %v8329_v11 = vadd.f32 %v19260_v16, %v8309_v37  ;;  %v9924_v16 = vsel %vm2602_vm4, %v9922_v47, %v9923_v19  ;;  %10579 = vmatpush.bf16.msrb.mxu2 %v15084_v34  ;;  %v9728_v19 = vshrl.u32 %v19647_v12, 16 }
 0x51b   : > { %v8823_v22 = vpop.f32.mrf.mxu1  ;;  %9440 = vmatmul.bf16.gmra.mxu0 %v9343_v36 }
 0x51c   : > { %8345 = vst [vmem:[%s19269_s13 + $0x78] sm:$0xff] %v8329_v11  ;;  %9845 = vmatmul.bf16.vlgmr.msra.gmra.mxu2 %v9717_v23  ;;  %v8860_v49 = vadd.f32 %v8823_v22, %v19378_v30  ;;  %v9722_v30 = vshll.u32 %v19602_v40, 16  ;;  %v15090_v40 = vld [vmem:[%s20340_s8 + $0x58] sm:$0xff] }
 0x51d   : > { %10003 = vmatmul.bf16.vlgmr.msra.gmra.mxu3 %v9924_v16  ;;  %10509 = vmatpush.bf16.msra.mxu1 %v15090_v40  ;;  %v15097_v40 = vld [vmem:[%s20340_s8 + $0x90] sm:$0xff] }
 0x51e   : > { %9629 = vmatmul.bf16.gmra.mxu1 %v9547_v57  ;;  %v9724_v17 = vrot.slane %v9722_v30, 3  ;;  %v9730_v57 = vrot.slane %v9728_v19, 2 }
 0x51f   : > { %v9032_v7 = vpop.f32.mrf.mxu2 }
 0x520   : > { %v9072_v59 = vadd.f32 %v9032_v7, %v19573_v42  ;;  %v9253_v6 = vpop.f32.mrf.mxu3  ;;  %v8708_v3 = vpop.f32.mrf.mxu0  ;;  %v19649_v43 = vor.u32 %v9724_v17, %v9721_v38 }
 0x521   : > { %v19641_v33 = vadd.f32 %v8708_v3, %v19553_v25 }
 0x522   : > { %v19638_v20 = vadd.f32 %v9253_v6, %v9072_v59  ;;  %v9726_v62 = vsel %vm2379_vm5, %v9716_v10, %v19649_v43  ;;  %v14064_v10 = vor.u32 %v15063_v26, %v14063_v14  ;;  %v19691_v6 = vld [vmem:[#allocation3 + $0x70] sm:$0xff] }
 0x523   : > { %v8825_v13 = vpop.f32.mrf.mxu1  ;;  %v9550_v61 = vrot.slane %v19691_v6, 2 }
 0x524   : > { %v8861_v31 = vadd.f32 %v8825_v13, %v19404_v27  ;;  %v15064_v27 = vld [vmem:[#allocation2 + $0x50] sm:$0xff]  ;;  %v10157_v23 = vshrl.u32 %v14064_v10, 16  ;;  %v10160_v44 = vshll.u32 %v14064_v10, 16  ;;  %v9734_v13 = vor.u32 %v9733_v39, %v9730_v57 }
 0x525   : > { %v10168_v11 = vshll.u32 %v15064_v27, 16 }
 0x526   : > { %v10159_v30 = vrot.slane %v10157_v23, 1  ;;  %v10162_v59 = vrot.slane %v10160_v44, 2  ;;  %v9735_v14 = vsel %vm2379_vm5, %v19649_v43, %v9734_v13  ;;  %v9551_v43 = vsel %vm2004_vm2, %v9548_v8, %v9550_v61 }
 0x527   : > { %v9034_v42 = vpop.f32.mrf.mxu2  ;;  %v10170_v7 = vrot.slane %v10168_v11, 2  ;;  %v15098_v11 = vld [vmem:[%s20340_s8 + $0x98] sm:$0xff] }
 0x528   : > { %v9073_v32 = vadd.f32 %v9034_v42, %v8859_v55  ;;  %v9255_v25 = vpop.f32.mrf.mxu3  ;;  %v8711_v18 = vpop.f32.mrf.mxu0  ;;  %v10163_v42 = vor.u32 %v10162_v59, %v10159_v30  ;;  %10673 = vmatpush.bf16.msrb.mxu3 %v15098_v11 }
 0x529   : > { %v19657_v28 = vadd.f32 %v8711_v18, %v19590_v35  ;;  %v15083_v35 = vld [vmem:[%s20340_s8 + $0x20] sm:$0xff]  ;;  %v15065_v18 = vld [vmem:[#allocation2 + $0x58] sm:$0xff] }
 0x52a   : > { %v19654_v63 = vadd.f32 %v9255_v25, %v9073_v32  ;;  %10580 = vmatpush.bf16.msrb.mxu2 %v15083_v35  ;;  %v10177_v35 = vshll.u32 %v15065_v18, 16 }
 0x52b   : > { %v8828_v55 = vpop.f32.mrf.mxu1  ;;  %9445 = vmatmul.bf16.gmra.mxu0 %v9345_v45  ;;  %v15082_v45 = vld [vmem:[%s20340_s8 + $0x18] sm:$0xff] }
 0x52c   : > { %9850 = vmatmul.bf16.gmra.mxu2 %v9726_v62  ;;  %v19666_v48 = vadd.f32 %v8828_v55, %v19419_v0  ;;  %v10165_v0 = vshrl.u32 %v15064_v27, 16  ;;  %v9737_v55 = vshrl.u32 %v19691_v6, 16  ;;  %v10179_v56 = vrot.slane %v10177_v35, 2  ;;  %10674 = vmatpush.bf16.msrb.mxu3 %v15097_v40 }
 0x52d   : > { %10008 = vmatmul.bf16.gmra.mxu3 %v9926_v15  ;;  %v9740_v15 = vshll.u32 %v19691_v6, 16 }
 0x52e   : > { %9634 = vmatmul.bf16.gmra.mxu1 %v9549_v50  ;;  %v10167_v58 = vrot.slane %v10165_v0, 1  ;;  %10581 = vmatpush.bf16.msrb.mxu2 %v15082_v45 }
 0x52f   : > { %v9037_v37 = vpop.f32.mrf.mxu2  ;;  %v9742_v19 = vrot.slane %v9740_v15, 3 }
 0x530   : > { %v9074_v53 = vadd.f32 %v9037_v37, %v8860_v49  ;;  %v9258_v47 = vpop.f32.mrf.mxu3  ;;  %v8713_v22 = vpop.f32.mrf.mxu0  ;;  %v10171_v38 = vor.u32 %v10170_v7, %v10167_v58  ;;  %v9739_v37 = vrot.slane %v9737_v55, 2  ;;  %v15066_v7 = vld [vmem:[#allocation2 + $0x60] sm:$0xff] }
 0x531   : > { %v19685_v16 = vadd.f32 %v8713_v22, %v19608_v4 }
 0x532   : > { %v19682_v36 = vadd.f32 %v9258_v47, %v9074_v53  ;;  %v10172_v26 = vsel %vm1781_vm3, %v10163_v42, %v10171_v38  ;;  %v19731_v47 = vld [vmem:[#allocation3 + $0x78] sm:$0xff]  ;;  %v9743_v23 = vor.u32 %v9742_v19, %v9739_v37  ;;  %v10186_v42 = vshll.u32 %v15066_v7, 16 }
 0x533   : > { %v8830_v34 = vpop.f32.mrf.mxu1 }
 0x534   : > { %v8863_v49 = vadd.f32 %v8830_v34, %v19445_v60  ;;  %v9552_v34 = vrot.slane %v19731_v47, 2 }
 0x537   : > { %v9039_v3 = vpop.f32.mrf.mxu2 }
 0x538   : > { %v9075_v4 = vadd.f32 %v9039_v3, %v8861_v31  ;;  %v9260_v17 = vpop.f32.mrf.mxu3  ;;  %v9411_v25 = vpop.f32.mrf.mxu0  ;;  %v9928_v31 = vsel %vm2602_vm4, %v9925_v52, %v9927_v51  ;;  %v10174_v52 = vshrl.u32 %v15065_v18, 16  ;;  %v15081_v3 = vld [vmem:[%s20340_s8 + $0x10] sm:$0xff] }
 0x539   : > { %v19698_v60 = vadd.f32 %v9411_v25, %v19638_v20  ;;  %v15111_v20 = vld [vmem:[%s20340_s8 + $0xf0] sm:$0xff]  ;;  %10582 = vmatpush.bf16.msrb.mxu2 %v15081_v3 }
 0x53a   : > { %v19695_v32 = vadd.f32 %v9260_v17, %v9075_v4  ;;  %10776 = vmatpush.bf16.msrb.mxu0 %v15111_v20  ;;  %v10176_v10 = vrot.slane %v10174_v52, 1  ;;  %v10183_v4 = vshrl.u32 %v15066_v7, 16 }
 0x53b   : > { %v8833_v27 = vpop.f32.mrf.mxu1  ;;  %10300 = vmatmul.bf16.vlgmr.msra.gmra.mxu0 %v10172_v26 }
 0x53c   : > { %9855 = vmatmul.bf16.gmra.mxu2 %v9735_v14  ;;  %v8864_v62 = vadd.f32 %v8833_v27, %v19460_v41  ;;  %v10180_v44 = vor.u32 %v10179_v56, %v10176_v10  ;;  %v10185_v26 = vrot.slane %v10183_v4, 1 }
 0x53d   : > { %10013 = vmatmul.bf16.gmra.mxu3 %v9928_v31 }
 0x53e   : > { %9639 = vmatmul.bf16.gmra.mxu1 %v9551_v43  ;;  %v10181_v30 = vsel %vm1781_vm3, %v10171_v38, %v10180_v44  ;;  %v15089_v38 = vld [vmem:[%s20340_s8 + $0x50] sm:$0xff]  ;;  %v10188_v43 = vrot.slane %v10186_v42, 2 }
 0x53f   : > { %v9042_v41 = vpop.f32.mrf.mxu2  ;;  %10510 = vmatpush.bf16.msra.mxu1 %v15089_v38  ;;  %v15096_v38 = vld [vmem:[%s20340_s8 + $0x88] sm:$0xff] }
 0x540   : > { %v9076_v2 = vadd.f32 %v9042_v41, %v19666_v48  ;;  %v9263_v12 = vpop.f32.mrf.mxu3  ;;  %v9413_v8 = vpop.f32.mrf.mxu0  ;;  %v19765_v41 = vld [vmem:[#allocation3 + $0x80] sm:$0xff]  ;;  %v10189_v15 = vor.u32 %v10188_v43, %v10185_v26  ;;  %10675 = vmatpush.bf16.msrb.mxu3 %v15096_v38 }
 0x541   : > { %v19725_v5 = vadd.f32 %v9413_v8, %v19654_v63  ;;  %v9929_v63 = vrot.slane %v19691_v6, 3 }
 0x542   : > { %v19722_v50 = vadd.f32 %v9263_v12, %v9076_v2  ;;  %v9554_v12 = vrot.slane %v19765_v41, 2  ;;  %v10190_v19 = vsel %vm1781_vm3, %v10180_v44, %v10189_v15 }
 0x543   : > { %v8835_v0 = vpop.f32.mrf.mxu1 }
 0x544   : > { %v8865_v53 = vadd.f32 %v8835_v0, %v19488_v1  ;;  %v9744_v1 = vsel %vm2379_vm5, %v9734_v13, %v9743_v23  ;;  %v9553_v13 = vsel %vm2004_vm2, %v9550_v61, %v9552_v34  ;;  %v15067_v0 = vld [vmem:[#allocation2 + $0x68] sm:$0xff] }
 0x545   : > { %v10192_v44 = vshrl.u32 %v15067_v0, 16 }
 0x547   : > { %v9044_v48 = vpop.f32.mrf.mxu2 }
 0x548   : > { %v9077_v22 = vadd.f32 %v9044_v48, %v8863_v49  ;;  %v9265_v58 = vpop.f32.mrf.mxu3  ;;  %v9416_v39 = vpop.f32.mrf.mxu0  ;;  %v9930_v49 = vsel %vm2602_vm4, %v9927_v51, %v9929_v63  ;;  %v9749_v51 = vshll.u32 %v19731_v47, 16  ;;  %v9555_v48 = vsel %vm2004_vm2, %v9552_v34, %v9554_v12 }
 0x549   : > { %v19738_v54 = vadd.f32 %v9416_v39, %v19682_v36  ;;  %v15110_v36 = vld [vmem:[%s20340_s8 + $0xe8] sm:$0xff] }
 0x54a   : > { %v19735_v57 = vadd.f32 %v9265_v58, %v9077_v22  ;;  %10777 = vmatpush.bf16.msrb.mxu0 %v15110_v36  ;;  %v9751_v20 = vrot.slane %v9749_v51, 3  ;;  %v9758_v58 = vshll.u32 %v19765_v41, 16 }
 0x54b   : > { %v8838_v59 = vpop.f32.mrf.mxu1  ;;  %10305 = vmatmul.bf16.gmra.mxu0 %v10181_v30  ;;  %v10194_v30 = vrot.slane %v10192_v44, 1 }
 0x54c   : > { %9860 = vmatmul.bf16.gmra.mxu2 %v9744_v1  ;;  %v8866_v6 = vadd.f32 %v8838_v59, %v19505_v29  ;;  %v9746_v29 = vshrl.u32 %v19731_v47, 16  ;;  %v9760_v36 = vrot.slane %v9758_v58, 3 }
 0x54d   : > { %10018 = vmatmul.bf16.gmra.mxu3 %v9930_v49 }
 0x54e   : > { %9644 = vmatmul.bf16.gmra.mxu1 %v9553_v13  ;;  %v9748_v45 = vrot.slane %v9746_v29, 2 }
 0x54f   : > { %v9047_v17 = vpop.f32.mrf.mxu2 }
 0x550   : > { %v9078_v25 = vadd.f32 %v9047_v17, %v8864_v62  ;;  %v9268_v18 = vpop.f32.mrf.mxu3  ;;  %v9418_v61 = vpop.f32.mrf.mxu0  ;;  %v9752_v55 = vor.u32 %v9751_v20, %v9748_v45  ;;  %v19799_v17 = vld [vmem:[#allocation3 + $0x88] sm:$0xff] }
 0x551   : > { %v19759_v27 = vadd.f32 %v9418_v61, %v19695_v32  ;;  %v9931_v32 = vrot.slane %v19731_v47, 3  ;;  %v15080_v47 = vld [vmem:[%s20340_s8 + $0x8] sm:$0xff] }
 0x552   : > { %v19756_v14 = vadd.f32 %v9268_v18, %v9078_v25  ;;  %10583 = vmatpush.bf16.msrb.mxu2 %v15080_v47  ;;  %v9933_v25 = vrot.slane %v19765_v41, 3  ;;  %v9556_v18 = vrot.slane %v19799_v17, 2 }
 0x553   : > { %v8840_v31 = vpop.f32.mrf.mxu1  ;;  %v9932_v11 = vsel %vm2602_vm4, %v9929_v63, %v9931_v32  ;;  %v10195_v63 = vshll.u32 %v15067_v0, 16 }
 0x554   : > { %v8867_v52 = vadd.f32 %v8840_v31, %v19540_v46  ;;  %v9753_v46 = vsel %vm2379_vm5, %v9743_v23, %v9752_v55  ;;  %v15088_v23 = vld [vmem:[%s20340_s8 + $0x48] sm:$0xff]  ;;  %v15068_v31 = vld [vmem:[#allocation2 + $0x70] sm:$0xff]  ;;  %v9934_v40 = vsel %vm2602_vm4, %v9931_v32, %v9933_v25  ;;  %v9764_v32 = vshrl.u32 %v19799_v17, 16 }
 0x555   : > { %10511 = vmatpush.bf16.msra.mxu1 %v15088_v23  ;;  %v10197_v13 = vrot.slane %v10195_v63, 2  ;;  %v10204_v0 = vshll.u32 %v15068_v31, 16 }
 0x556   : > { %v9766_v23 = vrot.slane %v9764_v32, 2  ;;  %v15128_v32 = vld [vmem:[%s20340_s8 + $0x170] sm:$0xff] }
 0x557   : > { %v9049_v62 = vpop.f32.mrf.mxu2  ;;  %v19803_v51 = vor.u32 %v10197_v13, %v10194_v30 }
 0x558   : > { %v9079_v35 = vadd.f32 %v9049_v62, %v8865_v53  ;;  %v9270_v2 = vpop.f32.mrf.mxu3  ;;  %v9421_v10 = vpop.f32.mrf.mxu0  ;;  %v15108_v62 = vld [vmem:[%s20340_s8 + $0xd8] sm:$0xff] }
 0x559   : > { %v19772_v37 = vadd.f32 %v9421_v10, %v19722_v50  ;;  %v15109_v50 = vld [vmem:[%s20340_s8 + $0xe0] sm:$0xff]  ;;  %v10199_v20 = vsel %vm1781_vm3, %v10189_v15, %v19803_v51  ;;  %v9767_v10 = vshll.u32 %v19799_v17, 16 }
 0x55a   : > { %v19769_v8 = vadd.f32 %v9270_v2, %v9079_v35  ;;  %10778 = vmatpush.bf16.msrb.mxu0 %v15109_v50  ;;  %v15087_v15 = vld [vmem:[%s20340_s8 + $0x40] sm:$0xff]  ;;  %v9483_v35 = vld [vmem:[#allocation3 + $0x90] sm:$0x3] }
 0x55b   : > { %v8843_v56 = vpop.f32.mrf.mxu1  ;;  %10310 = vmatmul.bf16.gmra.mxu0 %v10190_v19  ;;  %10512 = vmatpush.bf16.msra.mxu1 %v15087_v15  ;;  %v9769_v44 = vrot.slane %v9767_v10, 3  ;;  %v19894_v15 = vld [vmem:[#allocation3 + $0x80] sm:$0xff]  }
 0x55c   : > { %9865 = vmatmul.bf16.gmra.mxu2 %v9753_v46  ;;  %v8868_v53 = vadd.f32 %v8843_v56, %v19559_v24  ;;  %v9755_v24 = vshrl.u32 %v19765_v41, 16  ;;  %v9533_v56 = vunpack.c.l.b16 %v9483_v35 }
 0x55d   : > { %10023 = vmatmul.bf16.gmra.mxu3 %v9932_v11 }
 0x55e   : > { %9649 = vmatmul.bf16.gmra.mxu1 %v9555_v48  ;;  %v9757_v3 = vrot.slane %v9755_v24, 2  ;;  %10779 = vmatpush.bf16.msrb.mxu0 %v15108_v62  ;;  %v15095_v24 = vld [vmem:[%s20340_s8 + $0x80] sm:$0xff]  ;;  %v9542_v63 = vpack.c.b16 %v9533_v56, %v9533_v56 }
 0x55f   : > { %v9052_v22 = vpop.f32.mrf.mxu2  ;;  %10676 = vmatpush.bf16.msrb.mxu3 %v15095_v24 }
 0x560   : > { %v9080_v39 = vadd.f32 %v9052_v22, %v8866_v6  ;;  %v9273_v7 = vpop.f32.mrf.mxu3  ;;  %v9423_v34 = vpop.f32.mrf.mxu0  ;;  %v19801_v29 = vor.u32 %v9760_v36, %v9757_v3  ;;  %v10206_v22 = vrot.slane %v10204_v0, 2  ;;  %v9935_v3 = vrot.slane %v19799_v17, 3  ;;  %v15121_v36 = vld [vmem:[%s20340_s8 + $0x138] sm:$0xff] }
 0x561   : > { %v19793_v59 = vadd.f32 %v9423_v34, %v19735_v57  ;;  %v9558_v13 = vrot.slane %v9542_v63, 2  ;;  %10904 = vmatpush.bf16.msrb.mxu1 %v15121_v36 }
 0x562   : > { %v19790_v1 = vadd.f32 %v9273_v7, %v9080_v39  ;;  %v9762_v45 = vsel %vm2379_vm5, %v9752_v55, %v19801_v29  ;;  %v9557_v55 = vsel %vm2004_vm2, %v9554_v12, %v9556_v18  ;;  %v19847_v7 = vor.u32 %v9769_v44, %v9766_v23  ;;  %v15137_v23 = vld [vmem:[%s20340_s8 + $0x1b0] sm:$0xff]  ;;  %v15118_v44 = vld [vmem:[%s20340_s8 + $0x120] sm:$0xff] }
 0x563   : > { %v8845_v49 = vpop.f32.mrf.mxu1  ;;  %v9559_v41 = vsel %vm2004_vm2, %v9556_v18, %v9558_v13  ;;  %v15138_v18 = vld [vmem:[%s20340_s8 + $0x1b8] sm:$0xff] }
 0x564   : > { %v8869_v4 = vadd.f32 %v8845_v49, %v19595_v21  ;;  %11114 = vmatpush.bf16.msra.mxu3 %v15138_v18  ;;  %v15117_v13 = vld [vmem:[%s20340_s8 + $0x118] sm:$0xff]  ;;  %v15124_v18 = vld [vmem:[%s20340_s8 + $0x150] sm:$0xff] }
 0x567   : > { %v9054_v6 = vpop.f32.mrf.mxu2 }
 0x568   : > { %v9081_v57 = vadd.f32 %v9054_v6, %v8867_v52  ;;  %v9275_v42 = vpop.f32.mrf.mxu3  ;;  %v9426_v26 = vpop.f32.mrf.mxu0  ;;  %v15069_v6 = vld [vmem:[#allocation2 + $0x78] sm:$0xff]  ;;  %11115 = vmatpush.bf16.msra.mxu3 %v15137_v23  ;;  %v15427_v23 = vld [vmem:[#allocation3 + $0x80] sm:$0xe] }
 0x569   : > { %v19810_v21 = vadd.f32 %v9426_v26, %v19756_v14  ;;  %v15079_v14 = vld [vmem:[%s20340_s8] sm:$0xff] }
 0x56a   : > { %v19807_v61 = vadd.f32 %v9275_v42, %v9081_v57  ;;  %10584 = vmatpush.bf16.msrb.mxu2 %v15079_v14  ;;  %v19857_v57 = vld [vmem:[#allocation3 + $0x88] sm:$0xff]  }
 0x56b   : > { %v8848_v43 = vpop.f32.mrf.mxu1  ;;  %10315 = vmatmul.bf16.gmra.mxu0 %v10199_v20  ;;  %v19859_v42 = vld [vmem:[#allocation3 + $0x88] sm:$0xf]   ;;  %v10448_v24 = vshll.u32 %v19857_v57, 16 }
 0x56c   : > { %9870 = vmatmul.bf16.gmra.mxu2 %v9762_v45  ;;  %v19820_v52 = vadd.f32 %v8848_v43, %v19614_v9  ;;  %v10201_v9 = vshrl.u32 %v15068_v31, 16  ;;  %v9936_v43 = vsel %vm2602_vm4, %v9933_v25, %v9935_v3  ;;  %v10213_v25 = vshll.u32 %v15069_v6, 16 }
 0x56d   : > { %10028 = vmatmul.bf16.gmra.mxu3 %v9934_v40  ;;  %v15129_v40 = vld [vmem:[%s20340_s8 + $0x178] sm:$0xff] }
 0x56e   : > { %9654 = vmatmul.bf16.gmra.mxu1 %v9557_v55  ;;  %v10203_v47 = vrot.slane %v10201_v9, 1  ;;  %11002 = vmatpush.bf16.msra.mxu2 %v15129_v40  ;;  %v15070_v40 = vld [vmem:[#allocation2 + $0x80] sm:$0xff] }
 0x56f   : > { %v9057_v2 = vpop.f32.mrf.mxu2 }
 0x570   : > { %v9082_v46 = vadd.f32 %v9057_v2, %v8868_v53  ;;  %v9278_v19 = vpop.f32.mrf.mxu3  ;;  %v9428_v11 = vpop.f32.mrf.mxu0  ;;  %v9681_v53 = vld [vmem:[#allocation3 + $0x90] sm:$0x7]  ;;  %v19849_v34 = vor.u32 %v10206_v22, %v10203_v47  ;;  %v15119_v2 = vld [vmem:[%s20340_s8 + $0x128] sm:$0xff] }
 0x571   : > { %v19839_v50 = vadd.f32 %v9428_v11, %v19769_v8  ;;  %v9699_v8 = vunpack.c.l.b16 %v9681_v53 }
 0x572   : > { %v19836_v12 = vadd.f32 %v9278_v19, %v9082_v46  ;;  %v10208_v31 = vsel %vm1781_vm3, %v19803_v51, %v19849_v34  ;;  %v15120_v51 = vld [vmem:[%s20340_s8 + $0x130] sm:$0xff]  ;;  %v10215_v19 = vrot.slane %v10213_v25, 2  ;;  %11003 = vmatpush.bf16.msra.mxu2 %v15128_v32 }
 0x573   : > { %v8850_v48 = vpop.f32.mrf.mxu1  ;;  %v19870_v20 = vpack.c.b16 %v9699_v8, %v9699_v8  ;;  %10905 = vmatpush.bf16.msrb.mxu1 %v15120_v51 }
 0x574   : > { %v19845_v58 = vadd.f32 %v8850_v48, %v19641_v33  ;;  %v10443_v48 = vshll.u32 %v19894_v15, 16 }
 0x575   : > { %v9773_v62 = vshrl.u32 %v19870_v20, 16  ;;  %v9776_v55 = vshll.u32 %v19870_v20, 16  ;;  %v9937_v36 = vrot.slane %v19870_v20, 3 }
 0x576   : > { %v10445_v8 = vrot.slane %v10443_v48, 1  ;;  %v15114_v48 = vld [vmem:[%s20340_s8 + $0x100] sm:$0xff] }
 0x577   : > { %v9059_v39 = vpop.f32.mrf.mxu2  ;;  %v9775_v11 = vrot.slane %v9773_v62, 2  ;;  %v9778_v47 = vrot.slane %v9776_v55, 3  ;;  %10906 = vmatpush.bf16.msrb.mxu1 %v15119_v2 }
 0x578   : > { %v9083_v30 = vadd.f32 %v9059_v39, %v8869_v4  ;;  %v9280_v49 = vpop.f32.mrf.mxu3  ;;  %v9431_v38 = vpop.f32.mrf.mxu0  ;;  %v9771_v4 = vsel %vm2379_vm5, %v19801_v29, %v19847_v7  ;;  %v15107_v29 = vld [vmem:[%s20340_s8 + $0xd0] sm:$0xff] }
 0x579   : > { %v19862_v26 = vadd.f32 %v9431_v38, %v19790_v1  ;;  %10780 = vmatpush.bf16.msrb.mxu0 %v15107_v29  ;;  %v9779_v39 = vor.u32 %v9778_v47, %v9775_v11  ;;  %v15126_v38 = vld [vmem:[%s20340_s8 + $0x160] sm:$0xff]  ;;  %v15426_v11 = vld [vmem:[#allocation3 + $0x80] sm:$0xf0]  ;;  %v15133_v47 = vld [vmem:[%s20340_s8 + $0x190] sm:$0xff] }
 0x57a   : > { %v19855_v33 = vadd.f32 %v9280_v49, %v9083_v30 }
 0x57b   : > { %v8853_v45 = vpop.f32.mrf.mxu1  ;;  %10320 = vmatmul.bf16.gmra.mxu0 %v10208_v31  ;;  %10907 = vmatpush.bf16.msrb.mxu1 %v15118_v44  ;;  %v15428_v44 = vor.u32 %v15427_v23, %v15426_v11 }
 0x57c   : > { %9875 = vmatmul.bf16.gmra.mxu2 %v9771_v4  ;;  %v19878_v1 = vadd.f32 %v8853_v45, %v19657_v28  ;;  %v10210_v28 = vshrl.u32 %v15069_v6, 16  ;;  %v10441_v6 = vshrl.u32 %v19894_v15, 16  ;;  %v19939_v4 = vrot.slane %v10448_v24, 1 }
 0x57d   : > { %10033 = vmatmul.bf16.gmra.mxu3 %v9936_v43  ;;  %v9780_v43 = vsel %vm2379_vm5, %v19847_v7, %v9779_v39  ;;  %v15116_v7 = vld [vmem:[%s20340_s8 + $0x110] sm:$0xff] }
 0x57e   : > { %9659 = vmatmul.bf16.gmra.mxu1 %v9559_v41  ;;  %v10212_v46 = vrot.slane %v10210_v28, 1  ;;  %v10446_v51 = vor.u32 %v10445_v8, %v10441_v6  ;;  %v15135_v41 = vld [vmem:[%s20340_s8 + $0x1a0] sm:$0xff]  ;;  %v15125_v28 = vld [vmem:[%s20340_s8 + $0x158] sm:$0xff]  ;;  %v10616_v6 = vrot.slane %v15428_v44, 1 }
 0x57f   : > { %v9062_v14 = vpop.f32.mrf.mxu2  ;;  %10908 = vmatpush.bf16.msrb.mxu1 %v15117_v13  ;;  %v15122_v13 = vld [vmem:[%s20340_s8 + $0x140] sm:$0xff] }
 0x580   : > { %v9084_v9 = vadd.f32 %v9062_v14, %v19820_v52  ;;  %v9283_v35 = vpop.f32.mrf.mxu3  ;;  %v9433_v0 = vpop.f32.mrf.mxu0  ;;  %v19925_v53 = vor.u32 %v10215_v19, %v10212_v46  ;;  %v10451_v25 = vsel %vm1106_vm1, %v10446_v51, %v19939_v4  ;;  %v10222_v14 = vshll.u32 %v15070_v40, 16 }
 0x581   : > { %v19909_v52 = vadd.f32 %v9433_v0, %v19807_v61  ;;  %v15127_v61 = vld [vmem:[%s20340_s8 + $0x168] sm:$0xff] }
 0x582   : > { %v19906_v10 = vadd.f32 %v9283_v35, %v9084_v9  ;;  %11004 = vmatpush.bf16.msra.mxu2 %v15127_v61  ;;  %v10217_v45 = vsel %vm1781_vm3, %v19849_v34, %v19925_v53  ;;  %v9938_v34 = vsel %vm2602_vm4, %v9935_v3, %v9937_v36  ;;  %v10219_v3 = vshrl.u32 %v15070_v40, 16  ;;  %v15134_v9 = vld [vmem:[%s20340_s8 + $0x198] sm:$0xff]  ;;  %v15115_v35 = vld [vmem:[%s20340_s8 + $0x108] sm:$0xff] }
 0x583   : > { %v8855_v56 = vpop.f32.mrf.mxu1  ;;  %10909 = vmatpush.bf16.msrb.mxu1 %v15116_v7  ;;  %v10096_v0 = vld [vmem:[#allocation2 + $0x88] sm:$0x3] }
 0x584   : > { %v19922_v22 = vadd.f32 %v8855_v56, %v19685_v16  ;;  %v15136_v16 = vld [vmem:[%s20340_s8 + $0x1a8] sm:$0xff]  ;;  %v10221_v19 = vrot.slane %v10219_v3, 1  ;;  %v10224_v56 = vrot.slane %v10222_v14, 2  ;;  %v10146_v61 = vunpack.c.l.b16 %v10096_v0  ;;  %v15105_v3 = vld [vmem:[%s20340_s8 + $0xc0] sm:$0xff]  ;;  %v15153_v14 = vld [vmem:[%s20340_s8 + $0x230] sm:$0xff] }
 0x585   : > { %11116 = vmatpush.bf16.msra.mxu3 %v15136_v16  ;;  %v15132_v36 = vld [vmem:[%s20340_s8 + $0x188] sm:$0xff]  ;;  %v15154_v16 = vld [vmem:[%s20340_s8 + $0x238] sm:$0xff] }
 0x586   : > { %11005 = vmatpush.bf16.msra.mxu2 %v15126_v38 }
 0x587   : > { %v9064_v63 = vpop.f32.mrf.mxu2  ;;  %10910 = vmatpush.bf16.msrb.mxu1 %v15115_v35 }
 0x588   : > { %v9085_v30 = vadd.f32 %v9064_v63, %v19845_v58  ;;  %v9285_v49 = vpop.f32.mrf.mxu3  ;;  %v9436_v31 = vpop.f32.mrf.mxu0  ;;  %v19996_v63 = vor.u32 %v10224_v56, %v10221_v19  ;;  %v15152_v19 = vld [vmem:[%s20340_s8 + $0x228] sm:$0xff]  ;;  %v15163_v56 = vld [vmem:[%s20342_s10 + $0x30] sm:$0xff] }
 0x589   : > { %v19947_v20 = vadd.f32 %v9436_v31, %v19836_v12  ;;  %v15106_v12 = vld [vmem:[%s20340_s8 + $0xc8] sm:$0xff]  ;;  %11117 = vmatpush.bf16.msra.mxu3 %v15135_v41  ;;  %v10452_v31 = vshrl.u32 %v19857_v57, 16 }
 0x58a   : > { %v19941_v58 = vadd.f32 %v9285_v49, %v9085_v30  ;;  %10781 = vmatpush.bf16.msrb.mxu0 %v15106_v12  ;;  %11006 = vmatpush.bf16.msra.mxu2 %v15125_v28  ;;  %v10617_v30 = vrot.slane %v19857_v57, 1  ;;  %v20000_v49 = vld [vmem:[#allocation3 + $0x8c] sm:$0xf]  ;;  %v10226_v40 = vsel %vm1781_vm3, %v19925_v53, %v19996_v63  ;;  %v15143_v57 = vld [vmem:[%s20340_s8 + $0x1e0] sm:$0xff] }
 0x58b   : > { %v19951_v29 = vpop.f32.mrf.mxu1  ;;  %10325 = vmatmul.bf16.gmra.mxu0 %v10217_v45  ;;  %10911 = vmatpush.bf16.msrb.mxu1 %v15114_v48  ;;  %v10155_v45 = vpack.c.b16 %v10146_v61, %v10146_v61  ;;  %v10454_v7 = vor.u32 %v10452_v31, %v19939_v4  ;;  %v15131_v4 = vld [vmem:[%s20340_s8 + $0x180] sm:$0xff]  ;;  %v15497_v48 = vld [vmem:[#allocation3 + $0x88] sm:$0x70] }
 0x58c   : > { %9880 = vmatmul.bf16.gmra.mxu2 %v9780_v43  ;;  %v10798_v43 = vld [vmem:[#allocation3 + $0x88] sm:$0xe]  ;;  %v10618_v12 = vsel %vm1406_vm0, %v10616_v6, %v10617_v30 }
 0x58d   : > { %10038 = vmatmul.bf16.gmra.mxu3 %v9938_v34  ;;  %v10825_v34 = vunpack.c.l.b16 %v20000_v49  ;;  %v10824_v28 = vunpack.c.l.b16 %v10798_v43  ;;  %v10228_v53 = vshrl.u32 %v10155_v45, 16 }
 0x58e   : > { %10513 = vmatmul.bf16.vlgmr.msra.gmra.mxu1 %v10451_v25  ;;  %11118 = vmatpush.bf16.msra.mxu3 %v15134_v9  ;;  %v15146_v9 = vld [vmem:[%s20340_s8 + $0x1f8] sm:$0xff] }
 0x58f   : > { %v9067_v17 = vpop.f32.mrf.mxu2  ;;  %11007 = vmatpush.bf16.msra.mxu2 %v15124_v18  ;;  %11331 = vmatpush.bf16.msra.mxu1 %v15154_v16  ;;  %v10230_v0 = vrot.slane %v10228_v53, 1 }
 0x590   : > { %v9086_v62 = vadd.f32 %v9067_v17, %v19878_v1  ;;  %v9288_v55 = vpop.f32.mrf.mxu3  ;;  %v9438_v32 = vpop.f32.mrf.mxu0  ;;  %v10231_v17 = vshll.u32 %v10155_v45, 16  ;;  %10782 = vmatpush.bf16.msrb.mxu0 %v15105_v3  ;;  %v15144_v45 = vld [vmem:[%s20340_s8 + $0x1e8] sm:$0xff] }
 0x591   : > { %v19983_v1 = vadd.f32 %v9438_v32, %v19855_v33  ;;  %v15123_v33 = vld [vmem:[%s20340_s8 + $0x148] sm:$0xff] }
 0x592   : > { %v19980_v2 = vadd.f32 %v9288_v55, %v9086_v62  ;;  %11119 = vmatpush.bf16.msra.mxu3 %v15133_v47  ;;  %v15164_v55 = vld [vmem:[%s20342_s10 + $0x38] sm:$0xff] }
 0x593   : > { %v19985_v46 = vpop.f32.mrf.mxu1  ;;  %11008 = vmatpush.bf16.msra.mxu2 %v15123_v33  ;;  %11332 = vmatpush.bf16.msra.mxu1 %v15153_v14  ;;  %v10233_v33 = vrot.slane %v10231_v17, 2  ;;  %v11025_v14 = vld [vmem:[#allocation3 + $0x90] sm:$0xc] }
 0x594   : > { %11233 = vmatpush.bf16.msra.mxu0 %v15146_v9  ;;  %v9666_v49 = vadd.f32 %v19985_v46, %v19725_v5  ;;  %v15158_v5 = vld [vmem:[%s20342_s10 + $0x8] sm:$0xff] }
 0x596   : > { %11120 = vmatpush.bf16.msra.mxu3 %v15132_v36 }
 0x597   : > { %v9069_v24 = vpop.f32.mrf.mxu2  ;;  %11009 = vmatpush.bf16.msra.mxu2 %v15122_v13  ;;  %11333 = vmatpush.bf16.msra.mxu1 %v15152_v19  ;;  %v15151_v13 = vld [vmem:[%s20340_s8 + $0x220] sm:$0xff] }
 0x598   : > { %v9087_v39 = vadd.f32 %v9069_v24, %v19922_v22  ;;  %v9290_v8 = vpop.f32.mrf.mxu3  ;;  %v9441_v22 = vpop.f32.mrf.mxu0 }
 0x599   : > { %v20015_v51 = vadd.f32 %v9441_v22, %v19906_v10  ;;  %v20028_v10 = vld [vmem:[#allocation3 + $0x90] sm:$0xff]  ;;  %v15162_v22 = vld [vmem:[%s20342_s10 + $0x28] sm:$0xff] }
 0x59a   : > { %v20011_v38 = vadd.f32 %v9290_v8, %v9087_v39  ;;  %v10841_v35 = vshrl.u32 %v20028_v10, 16  ;;  %v10844_v18 = vshll.u32 %v20028_v10, 16  ;;  %11121 = vmatpush.bf16.msra.mxu3 %v15131_v4  ;;  %v10234_v8 = vor.u32 %v10233_v33, %v10230_v0  ;;  %v10927_v4 = vld [vmem:[#allocation3 + $0x88] sm:$0xc]  ;;  %v15142_v0 = vld [vmem:[%s20340_s8 + $0x1d8] sm:$0xff] }
 0x59b   : > { %v20020_v41 = vpop.f32.mrf.mxu1  ;;  %10330 = vmatmul.bf16.gmra.mxu0 %v10226_v40  ;;  %v15491_v40 = vor.u32 %v15497_v48, %v19859_v42  ;;  %11334 = vmatpush.bf16.msra.mxu1 %v15151_v13  ;;  %v15161_v42 = vld [vmem:[%s20342_s10 + $0x20] sm:$0xff]  ;;  %v15103_v48 = vld [vmem:[#allocation3 + $0x88] sm:$0xf0]  ;;  %v11051_v33 = vunpack.c.l.b16 %v11025_v14  ;;  %v15140_v14 = vld [vmem:[%s20340_s8 + $0x1c8] sm:$0xff] }
 0x59c   : > { %10585 = vmatmul.bf16.vlgmr.msrb.gmra.mxu2 %v19894_v15  ;;  %v10829_v15 = vpack.c.b16 %v10825_v34, %v10824_v28  ;;  %v10843_v61 = vrot.slane %v10841_v35, 1  ;;  %v10846_v24 = vrot.slane %v10844_v18, 2  ;;  %v10235_v28 = vsel %vm1781_vm3, %v19996_v63, %v10234_v8  ;;  %v20100_v63 = vld [vmem:[#allocation3 + $0x94] sm:$0xf] }
 0x59d   : > { %10677 = vmatmul.bf16.vlgmr.msrb.gmra.mxu3 %v10618_v12  ;;  %11468 = vmatpush.bf16.msrb.mxu2 %v15164_v55  ;;  %v10802_v12 = vld [vmem:[#allocation3 + $0x98] sm:$0x1]  ;;  %v9665_v55 = vadd.f32 %v19951_v29, %v19698_v60  ;;  %v11052_v60 = vunpack.c.l.b16 %v20100_v63 }
 0x59e   : > { %10518 = vmatmul.bf16.gmra.mxu1 %v10454_v7  ;;  %v10833_v23 = vshrl.u32 %v10829_v15, 16  ;;  %v10836_v44 = vshll.u32 %v10829_v15, 16  ;;  %15429 = vmatpush.bf16.msrb.mxu3 %v15146_v9  ;;  %v20077_v31 = vor.u32 %v10846_v24, %v10843_v61  ;;  %v15150_v15 = vld [vmem:[%s20340_s8 + $0x218] sm:$0xff]  ;;  %v10828_v3 = vunpack.c.l.b16 %v10802_v12  ;;  %v15159_v24 = vld [vmem:[%s20342_s10 + $0x10] sm:$0xff]  ;;  %v15147_v12 = vld [vmem:[%s20340_s8 + $0x200] sm:$0xff] }
 0x59f   : > { %v20030_v25 = vpop.f32.mrf.mxu2  ;;  %11335 = vmatpush.bf16.msra.mxu1 %v15150_v15  ;;  %v15160_v35 = vld [vmem:[%s20342_s10 + $0x18] sm:$0xff] }
 0x5a0   : > { %v20043_v62 = vpop.f32.mrf.mxu3  ;;  %v9443_v32 = vpop.f32.mrf.mxu0  ;;  %v10835_v36 = vrot.slane %v10833_v23, 1  ;;  %v10838_v16 = vrot.slane %v10836_v44, 2  ;;  %v9886_v29 = vadd.f32 %v20030_v25, %v9665_v55  ;;  %v20129_v61 = vld [vmem:[#allocation3 + $0x90] sm:$0xff]  ;;  %v15148_v25 = vld [vmem:[%s20340_s8 + $0x208] sm:$0xff] }
 0x5a1   : > { %v20060_v11 = vadd.f32 %v9443_v32, %v19941_v58  ;;  %11469 = vmatpush.bf16.msrb.mxu2 %v15163_v56  ;;  %v15145_v58 = vld [vmem:[%s20340_s8 + $0x1f0] sm:$0xff]  ;;  %v20119_v32 = vpack.c.b16 %v10828_v3, %v10828_v3  ;;  %v10945_v56 = vunpack.c.l.b16 %v10927_v4 }
 0x5a2   : > { %11234 = vmatpush.bf16.msra.mxu0 %v15145_v58  ;;  %15430 = vmatpush.bf16.msrb.mxu3 %v15145_v58  ;;  %v10839_v17 = vor.u32 %v10838_v16, %v10835_v36  ;;  %v14271_v36 = vld [vmem:[#allocation3 + $0x88] sm:$0xe]  ;;  %v10044_v16 = vadd.f32 %v20043_v62, %v9886_v29  ;;  %v20147_v58 = vld [vmem:[%s20341_s9] ss:$0 sm:$0xff]  ;;  %v10723_v62 = vrot.slane %v20129_v61, 1 }
 0x5a3   : > { %v20062_v47 = vpop.f32.mrf.mxu1  ;;  %v10946_v8 = vpack.c.b16 %v10825_v34, %v10945_v56  ;;  %v14272_v13 = vor.u32 %v15103_v48, %v14271_v36 }
 0x5a5   : > { %11470 = vmatpush.bf16.msrb.mxu2 %v15162_v22  ;;  %v10850_v22 = vshll.u32 %v20119_v32, 16  ;;  %v10722_v3 = vrot.slane %v14272_v13, 1  ;;  %v11256_v13 = vld [vmem:[#allocation3 + $0x90] sm:$0x8] }
 0x5a6   : > { %11235 = vmatpush.bf16.msra.mxu0 %v15144_v45  ;;  %15431 = vmatpush.bf16.msrb.mxu3 %v15144_v45  ;;  %v20150_v45 = vld [vmem:[#allocation3 + $0x98] sm:$0xff] }
 0x5a7   : > { %v20064_v39 = vpop.f32.mrf.mxu2  ;;  %v10852_v4 = vrot.slane %v10850_v22, 2 }
 0x5a8   : > { %v20075_v6 = vpop.f32.mrf.mxu3  ;;  %v9446_v43 = vpop.f32.mrf.mxu0  ;;  %v9887_v15 = vadd.f32 %v20064_v39, %v9666_v49 }
 0x5a9   : > { %v20084_v7 = vadd.f32 %v9446_v43, %v19980_v2  ;;  %v10848_v2 = vsel %vm1781_vm3, %v10839_v17, %v20077_v31  ;;  %11471 = vmatpush.bf16.msrb.mxu2 %v15161_v42  ;;  %v10948_v43 = vrot.slane %v20028_v10, 2  ;;  %v10064_v42 = vadd.f32 %v20147_v58, %v10044_v16 }
 0x5aa   : > { %11236 = vmatpush.bf16.msra.mxu0 %v15143_v57  ;;  %15432 = vmatpush.bf16.msrb.mxu3 %v15143_v57  ;;  %v11060_v57 = vrot.slane %v20150_v45, 2  ;;  %v10045_v56 = vadd.f32 %v20075_v6, %v9887_v15  ;;  %v15139_v6 = vld [vmem:[%s20340_s8 + $0x1c0] sm:$0xff] }
 0x5ab   : > { %v20088_v53 = vpop.f32.mrf.mxu1  ;;  %10335 = vmatmul.bf16.gmra.mxu0 %v10235_v28  ;;  %v10947_v28 = vrot.slane %v10946_v8, 2  ;;  %v11137_v15 = vld [vmem:[#allocation3 + $0xa0] sm:$0x3] }
 0x5ac   : > { %10590 = vmatmul.bf16.gmra.mxu2 %v15491_v40  ;;  %v15141_v40 = vld [vmem:[%s20340_s8 + $0x1d0] sm:$0xff]  ;;  %v10065_v22 = vadd.f32 %v20147_v58, %v10045_v56  ;;  %v9669_v61 = vadd.f32 %v20088_v53, %v19772_v37 }
 0x5ad   : > { %10682 = vmatmul.bf16.gmra.mxu3 %v10617_v30  ;;  %v15149_v30 = vld [vmem:[%s20340_s8 + $0x210] sm:$0xff]  ;;  %11472 = vmatpush.bf16.msrb.mxu2 %v15160_v35  ;;  %v10949_v39 = vsel %vm2004_vm2, %v10947_v28, %v10948_v43  ;;  %v10724_v35 = vsel %vm1406_vm0, %v10722_v3, %v10723_v62  ;;  %v10950_v3 = vrot.slane %v20119_v32, 2  ;;  %v11277_v32 = vrot.slane %v20150_v45, 3 }
 0x5ae   : > { %10912 = vmatmul.bf16.vlgmr.msrb.gmra.mxu1 %v10848_v2  ;;  %11237 = vmatpush.bf16.msra.mxu0 %v15142_v0  ;;  %v20175_v2 = vld [vmem:[%s20343_s11] ss:$0 sm:$0xff] }
 0x5af   : > { %v20104_v9 = vpop.f32.mrf.mxu2  ;;  %11336 = vmatpush.bf16.msra.mxu1 %v15149_v30  ;;  %15433 = vmatpush.bf16.msrb.mxu3 %v15142_v0  ;;  %v15157_v0 = vld [vmem:[%s20342_s10] sm:$0xff] }
 0x5b0   : > { %v20115_v18 = vpop.f32.mrf.mxu3  ;;  %v9448_v19 = vpop.f32.mrf.mxu0 }
 0x5b1   : > { %v20125_v23 = vadd.f32 %v9448_v19, %v20011_v38  ;;  %v20141_v38 = vpack.c.b16 %v11052_v60, %v11051_v33  ;;  %11473 = vmatpush.bf16.msrb.mxu2 %v15159_v24  ;;  %v10853_v33 = vsel %vm1781_vm3, %v20077_v31, %v10852_v4  ;;  %v9667_v24 = vadd.f32 %v20020_v41, %v19738_v54 }
 0x5b2   : > { %11238 = vmatpush.bf16.msra.mxu0 %v15141_v40 }
 0x5b3   : > { %v20127_v44 = vpop.f32.mrf.mxu1  ;;  %11337 = vmatpush.bf16.msra.mxu1 %v15148_v25  ;;  %v11059_v17 = vrot.slane %v20141_v38, 2  ;;  %15434 = vmatpush.bf16.msrb.mxu3 %v15141_v40  ;;  %v11029_v25 = vld [vmem:[#allocation3 + $0xa0] sm:$0x1]  ;;  %v9888_v31 = vadd.f32 %v20104_v9, %v9667_v24  ;;  %v11274_v40 = vunpack.c.l.b16 %v11256_v13  ;;  %v9668_v9 = vadd.f32 %v20062_v47, %v19759_v27 }
 0x5b4   : > { %v11055_v16 = vunpack.c.l.b16 %v11029_v25  ;;  %v10951_v27 = vsel %vm2004_vm2, %v10948_v43, %v10950_v3  ;;  %v11158_v24 = vshrl.u32 %v20141_v38, 16  ;;  %v11169_v13 = vshll.u32 %v20150_v45, 16 }
 0x5b5   : > { %11474 = vmatpush.bf16.msrb.mxu2 %v15158_v5  ;;  %v11061_v19 = vsel %vm2004_vm2, %v11059_v17, %v11060_v57  ;;  %v10046_v5 = vadd.f32 %v20115_v18, %v9888_v31  ;;  %v11275_v17 = vpack.c.b16 %v11052_v60, %v11274_v40  ;;  %v14559_v60 = vld [vmem:[#allocation2 + $0x88] sm:$0xe] }
 0x5b6   : > { %11239 = vmatpush.bf16.msra.mxu0 %v15140_v14  ;;  %v11171_v3 = vrot.slane %v11169_v13, 3 }
 0x5b7   : > { %v20154_v34 = vpop.f32.mrf.mxu2  ;;  %11338 = vmatpush.bf16.msra.mxu1 %v15147_v12  ;;  %15435 = vmatpush.bf16.msrb.mxu3 %v15140_v14  ;;  %v11058_v12 = vpack.c.b16 %v11055_v16, %v11055_v16  ;;  %v11166_v16 = vshrl.u32 %v20150_v45, 16 }
 0x5b8   : > { %v20167_v46 = vpop.f32.mrf.mxu3  ;;  %v10301_v55 = vpop.f32.mrf.mxu0  ;;  %v9889_v18 = vadd.f32 %v20154_v34, %v9668_v9 }
 0x5b9   : > { %v10341_v30 = vadd.f32 %v10301_v55, %v10064_v42  ;;  %11475 = vmatpush.bf16.msrb.mxu2 %v15157_v0  ;;  %v11062_v14 = vrot.slane %v11058_v12, 2  ;;  %v11155_v55 = vunpack.c.l.b16 %v11137_v15  ;;  %v15156_v0 = vld [vmem:[#allocation2 + $0x90] sm:$0xff]  ;;  %v11168_v9 = vrot.slane %v11166_v16, 2 }
 0x5ba   : > { %11240 = vmatpush.bf16.msra.mxu0 %v15139_v6  ;;  %v11405_v25 = vshrl.u32 %v15156_v0, 16 }
 0x5bb   : > { %v20187_v29 = vpop.f32.mrf.mxu1  ;;  %10783 = vmatmul.bf16.vlgmr.msrb.gmra.mxu0 %v10724_v35  ;;  %v10361_v48 = vadd.f32 %v20175_v2, %v10341_v30  ;;  %15436 = vmatpush.bf16.msrb.mxu3 %v15139_v6  ;;  %v10066_v30 = vadd.f32 %v20147_v58, %v10046_v5  ;;  %v15155_v35 = vld [vmem:[#allocation2 + $0x88] sm:$0xf0]  ;;  %v11063_v34 = vsel %vm2004_vm2, %v11060_v57, %v11062_v14  ;;  %v11408_v57 = vshll.u32 %v15156_v0, 16 }
 0x5bc   : > { %11010 = vmatmul.bf16.vlgmr.msra.gmra.mxu2 %v10949_v39  ;;  %v11276_v39 = vrot.slane %v11275_v17, 3  ;;  %v20232_v56 = vpack.c.b16 %v11155_v55, %v11155_v55  ;;  %v14560_v43 = vor.u32 %v15155_v35, %v14559_v60  ;;  %v11407_v12 = vrot.slane %v11405_v25, 1 }
 0x5bd   : > { %11122 = vmatmul.bf16.vlgmr.msra.gmra.mxu3 %v11061_v19  ;;  %10377 = vst [vmem:[%s19269_s13 + $0x80] sm:$0xff] %v10361_v48  ;;  %v10047_v48 = vadd.f32 %v20167_v46, %v9889_v18  ;;  %v11161_v46 = vshll.u32 %v20141_v38, 16  ;;  %v11410_v38 = vrot.slane %v11408_v57, 2  ;;  %v11160_v17 = vrot.slane %v11158_v24, 2 }
 0x5be   : > { %10917 = vmatmul.bf16.gmra.mxu1 %v10853_v33  ;;  %v11278_v10 = vsel %vm2602_vm4, %v11276_v39, %v11277_v32  ;;  %v11175_v31 = vshrl.u32 %v20232_v56, 16  ;;  %v11397_v37 = vshrl.u32 %v14560_v43, 16  ;;  %v11400_v53 = vshll.u32 %v14560_v43, 16 }
 0x5bf   : > { %v9856_v8 = vpop.f32.mrf.mxu2  ;;  %v11163_v15 = vrot.slane %v11161_v46, 3  ;;  %v11411_v35 = vor.u32 %v11410_v38, %v11407_v12  ;;  %v11279_v43 = vrot.slane %v20232_v56, 3  ;;  %v9671_v13 = vadd.f32 %v20187_v29, %v19810_v21 }
 0x5c0   : > { %v20203_v36 = vpop.f32.mrf.mxu3  ;;  %v10303_v49 = vpop.f32.mrf.mxu0  ;;  %v11177_v14 = vrot.slane %v11175_v31, 2  ;;  %v11402_v39 = vrot.slane %v11400_v53, 2 }
 0x5c1   : > { %v10342_v54 = vadd.f32 %v10303_v49, %v10065_v22  ;;  %v11178_v22 = vshll.u32 %v20232_v56, 16  ;;  %v9890_v49 = vadd.f32 %v9856_v8, %v9669_v61  ;;  %v11164_v0 = vor.u32 %v11163_v15, %v11160_v17 }
 0x5c2   : > { %v11280_v56 = vsel %vm2602_vm4, %v11277_v32, %v11279_v43 }
 0x5c3   : > { %v20207_v41 = vpop.f32.mrf.mxu1  ;;  %v10362_v28 = vadd.f32 %v20175_v2, %v10342_v54  ;;  %v10067_v54 = vadd.f32 %v20147_v58, %v10047_v48  ;;  %v11180_v55 = vrot.slane %v11178_v22, 3  ;;  %v10048_v18 = vadd.f32 %v20203_v36, %v9890_v49  ;;  %v11366_v48 = vld [vmem:[#allocation2 + $0x98] sm:$0x1] }
 0x5c4   : > { %v11392_v24 = vunpack.c.l.b16 %v11366_v48  ;;  %v9672_v32 = vadd.f32 %v20207_v41, %v19839_v50 }
 0x5c5   : > { %10378 = vst [vmem:[%s19269_s13 + $0x88] sm:$0xff] %v10362_v28 }
 0x5c6   : > { %v11395_v22 = vpack.c.b16 %v11392_v24, %v11392_v24 }
 0x5c7   : > { %v20216_v42 = vpop.f32.mrf.mxu2 }
 0x5c8   : > { %v20219_v4 = vpop.f32.mrf.mxu3  ;;  %v10306_v63 = vpop.f32.mrf.mxu0  ;;  %v11414_v12 = vshll.u32 %v11395_v22, 16 }
 0x5c9   : > { %v10343_v19 = vadd.f32 %v10306_v63, %v10066_v30  ;;  %v11399_v30 = vrot.slane %v11397_v37, 1  ;;  %v9670_v63 = vadd.f32 %v20127_v44, %v19793_v59 }
 0x5ca   : > { %v11416_v29 = vrot.slane %v11414_v12, 2 }
 0x5cb   : > { %v20226_v47 = vpop.f32.mrf.mxu1  ;;  %10788 = vmatmul.bf16.gmra.mxu0 %v10723_v62  ;;  %v10363_v33 = vadd.f32 %v20175_v2, %v10343_v19  ;;  %v11403_v36 = vor.u32 %v11402_v39, %v11399_v30 }
 0x5cc   : > { %11015 = vmatmul.bf16.gmra.mxu2 %v10951_v27  ;;  %v11172_v27 = vor.u32 %v11171_v3, %v11168_v9  ;;  %v11417_v3 = vsel %vm1781_vm3, %v11411_v35, %v11416_v29  ;;  %v9673_v50 = vadd.f32 %v20226_v47, %v19862_v26 }
 0x5cd   : > { %11127 = vmatmul.bf16.gmra.mxu3 %v11063_v34  ;;  %10379 = vst [vmem:[%s19269_s13 + $0x90] sm:$0xff] %v10363_v33  ;;  %v11181_v34 = vor.u32 %v11180_v55, %v11177_v14  ;;  %v9891_v33 = vadd.f32 %v20216_v42, %v9670_v63  ;;  %v11412_v59 = vsel %vm1781_vm3, %v11403_v36, %v11411_v35 }
 0x5ce   : > { %11339 = vmatmul.bf16.vlgmr.msra.gmra.mxu1 %v11278_v10  ;;  %v10068_v10 = vadd.f32 %v20147_v58, %v10048_v18  ;;  %v11173_v44 = vsel %vm2379_vm5, %v11164_v0, %v11172_v27 }
 0x5cf   : > { %v9861_v62 = vpop.f32.mrf.mxu2  ;;  %v11182_v46 = vsel %vm2379_vm5, %v11172_v27, %v11181_v34  ;;  %v10049_v42 = vadd.f32 %v20219_v4, %v9891_v33 }
 0x5d0   : > { %v10019_v6 = vpop.f32.mrf.mxu3  ;;  %v10308_v40 = vpop.f32.mrf.mxu0 }
 0x5d1   : > { %v10344_v5 = vadd.f32 %v10308_v40, %v10067_v54  ;;  %v9892_v54 = vadd.f32 %v9861_v62, %v9671_v13  ;;  %v10069_v37 = vadd.f32 %v20147_v58, %v10049_v42 }
 0x5d3   : > { %v20249_v28 = vpop.f32.mrf.mxu1  ;;  %v10364_v8 = vadd.f32 %v20175_v2, %v10344_v5  ;;  %v10050_v5 = vadd.f32 %v10019_v6, %v9892_v54 }
 0x5d5   : > { %10380 = vst [vmem:[%s19269_s13 + $0x98] sm:$0xff] %v10364_v8  ;;  %v10070_v62 = vadd.f32 %v20147_v58, %v10050_v5 }
 0x5d7   : > { %v9863_v60 = vpop.f32.mrf.mxu2 }
 0x5d8   : > { %v10021_v19 = vpop.f32.mrf.mxu3  ;;  %v10311_v25 = vpop.f32.mrf.mxu0  ;;  %v9893_v17 = vadd.f32 %v9863_v60, %v9672_v32 }
 0x5d9   : > { %v10345_v61 = vadd.f32 %v10311_v25, %v10068_v10 }
 0x5da   : > { %v10051_v6 = vadd.f32 %v10021_v19, %v9893_v17  ;;  %v9674_v19 = vadd.f32 %v20249_v28, %v19909_v52 }
 0x5db   : > { %v9650_v57 = vpop.f32.mrf.mxu1  ;;  %11241 = vmatmul.bf16.vlgmr.msra.gmra.mxu0 %v11173_v44  ;;  %v10365_v16 = vadd.f32 %v20175_v2, %v10345_v61 }
 0x5dc   : > { %11476 = vmatmul.bf16.vlgmr.msrb.gmra.mxu2 %v11412_v59  ;;  %v10071_v30 = vadd.f32 %v20147_v58, %v10051_v6  ;;  %v9675_v25 = vadd.f32 %v9650_v57, %v19947_v20 }
 0x5dd   : > { %11246 = vmatmul.bf16.vlgmr.msrb.gmra.mxu3 %v11182_v46  ;;  %10381 = vst [vmem:[%s19269_s13 + $0xa0] sm:$0xff] %v10365_v16 }
 0x5de   : > { %11344 = vmatmul.bf16.gmra.mxu1 %v11280_v56 }
 0x5df   : > { %v9866_v31 = vpop.f32.mrf.mxu2 }
 0x5e0   : > { %v10024_v49 = vpop.f32.mrf.mxu3  ;;  %v10313_v4 = vpop.f32.mrf.mxu0  ;;  %v9894_v8 = vadd.f32 %v9866_v31, %v9673_v50 }
 0x5e1   : > { %v10346_v53 = vadd.f32 %v10313_v4, %v10069_v37 }
 0x5e2   : > { %v10052_v35 = vadd.f32 %v10024_v49, %v9894_v8 }
 0x5e3   : > { %v9652_v40 = vpop.f32.mrf.mxu1  ;;  %v10366_v45 = vadd.f32 %v20175_v2, %v10346_v53 }
 0x5e4   : > { %v10072_v47 = vadd.f32 %v20147_v58, %v10052_v35  ;;  %v9676_v56 = vadd.f32 %v9652_v40, %v19983_v1 }
 0x5e5   : > { %10382 = vst [vmem:[%s19269_s13 + $0xa8] sm:$0xff] %v10366_v45 }
 0x5e7   : > { %v9868_v21 = vpop.f32.mrf.mxu2 }
 0x5e8   : > { %v10026_v38 = vpop.f32.mrf.mxu3  ;;  %v10316_v15 = vpop.f32.mrf.mxu0  ;;  %v9895_v26 = vadd.f32 %v9868_v21, %v9674_v19 }
 0x5e9   : > { %v10347_v9 = vadd.f32 %v10316_v15, %v10070_v62 }
 0x5ea   : > { %v10053_v36 = vadd.f32 %v10026_v38, %v9895_v26 }
 0x5eb   : > { %v9655_v14 = vpop.f32.mrf.mxu1  ;;  %v10367_v55 = vadd.f32 %v20175_v2, %v10347_v9 }
 0x5ec   : > { %11481 = vmatmul.bf16.gmra.mxu2 %v11417_v3  ;;  %v10073_v52 = vadd.f32 %v20147_v58, %v10053_v36  ;;  %v9677_v53 = vadd.f32 %v9655_v14, %v20015_v51 }
 0x5ed   : > { %10383 = vst [vmem:[%s19269_s13 + $0xb0] sm:$0xff] %v10367_v55 }
 0x5ef   : > { %v9871_v41 = vpop.f32.mrf.mxu2 }
 0x5f0   : > { %v10029_v18 = vpop.f32.mrf.mxu3  ;;  %v10318_v39 = vpop.f32.mrf.mxu0  ;;  %v9896_v44 = vadd.f32 %v9871_v41, %v9675_v25 }
 0x5f1   : > { %v10348_v63 = vadd.f32 %v10318_v39, %v10071_v30 }
 0x5f2   : > { %v10054_v42 = vadd.f32 %v10029_v18, %v9896_v44 }
 0x5f3   : > { %v9657_v60 = vpop.f32.mrf.mxu1  ;;  %v10368_v0 = vadd.f32 %v20175_v2, %v10348_v63 }
 0x5f4   : > { %v10074_v20 = vadd.f32 %v20147_v58, %v10054_v42  ;;  %v9678_v17 = vadd.f32 %v9657_v60, %v20060_v11 }
 0x5f5   : > { %10384 = vst [vmem:[%s19269_s13 + $0xb8] sm:$0xff] %v10368_v0 }
 0x5f7   : > { %v9873_v27 = vpop.f32.mrf.mxu2 }
 0x5f8   : > { %v10031_v34 = vpop.f32.mrf.mxu3  ;;  %v10321_v48 = vpop.f32.mrf.mxu0  ;;  %v9897_v22 = vadd.f32 %v9873_v27, %v9676_v56 }
 0x5f9   : > { %v10349_v33 = vadd.f32 %v10321_v48, %v10072_v47 }
 0x5fa   : > { %v10055_v37 = vadd.f32 %v10031_v34, %v9897_v22 }
 0x5fb   : > { %v9660_v10 = vpop.f32.mrf.mxu1  ;;  %v10369_v43 = vadd.f32 %v20175_v2, %v10349_v33 }
 0x5fc   : > { %v10075_v40 = vadd.f32 %v20147_v58, %v10055_v37  ;;  %v9679_v41 = vadd.f32 %v9660_v10, %v20084_v7 }
 0x5fd   : > { %10385 = vst [vmem:[%s19269_s13 + $0xc0] sm:$0xff] %v10369_v43 }
 0x5ff   : > { %v9876_v61 = vpop.f32.mrf.mxu2 }
 0x600   : > { %v10034_v59 = vpop.f32.mrf.mxu3  ;;  %v10323_v28 = vpop.f32.mrf.mxu0  ;;  %v9898_v1 = vadd.f32 %v9876_v61, %v9677_v53 }
 0x601   : > { %v10350_v24 = vadd.f32 %v10323_v28, %v10073_v52 }
 0x602   : > { %v10056_v29 = vadd.f32 %v10034_v59, %v9898_v1 }
 0x603   : > { %v9662_v46 = vpop.f32.mrf.mxu1  ;;  %v10370_v16 = vadd.f32 %v20175_v2, %v10350_v24 }
 0x604   : > { %v10076_v51 = vadd.f32 %v20147_v58, %v10056_v29  ;;  %v9680_v19 = vadd.f32 %v9662_v46, %v20125_v23 }
 0x605   : > { %10386 = vst [vmem:[%s19269_s13 + $0xc8] sm:$0xff] %v10370_v16 }
 0x607   : > { %v9878_v13 = vpop.f32.mrf.mxu2 }
 0x608   : > { %v10036_v31 = vpop.f32.mrf.mxu3  ;;  %v10326_v57 = vpop.f32.mrf.mxu0  ;;  %v9899_v9 = vadd.f32 %v9878_v13, %v9678_v17 }
 0x609   : > { %v10351_v49 = vadd.f32 %v10326_v57, %v10074_v20 }
 0x60a   : > { %v10057_v55 = vadd.f32 %v10036_v31, %v9899_v9 }
 0x60b   : > { %v20295_v54 = vpop.f32.mrf.mxu1  ;;  %v10371_v4 = vadd.f32 %v20175_v2, %v10351_v49 }
 0x60c   : > { %v10077_v11 = vadd.f32 %v20147_v58, %v10057_v55 }
 0x60d   : > { %10387 = vst [vmem:[%s19269_s13 + $0xd0] sm:$0xff] %v10371_v4 }
 0x60f   : > { %v9881_v12 = vpop.f32.mrf.mxu2 }
 0x610   : > { %v10039_v5 = vpop.f32.mrf.mxu3  ;;  %v10328_v45 = vpop.f32.mrf.mxu0  ;;  %v9900_v30 = vadd.f32 %v9881_v12, %v9679_v41 }
 0x611   : > { %v10352_v32 = vadd.f32 %v10328_v45, %v10075_v40 }
 0x612   : > { %v10058_v35 = vadd.f32 %v10039_v5, %v9900_v30 }
 0x613   : > { %v10516_v21 = vpop.f32.mrf.mxu1  ;;  %v10372_v38 = vadd.f32 %v20175_v2, %v10352_v32 }
 0x614   : > { %v10078_v26 = vadd.f32 %v20147_v58, %v10058_v35 }
 0x615   : > { %10388 = vst [vmem:[%s19269_s13 + $0xd8] sm:$0xff] %v10372_v38 }
 0x617   : > { %v9883_v62 = vpop.f32.mrf.mxu2 }
 0x618   : > { %v10041_v15 = vpop.f32.mrf.mxu3  ;;  %v10331_v3 = vpop.f32.mrf.mxu0  ;;  %v9901_v7 = vadd.f32 %v9883_v62, %v9680_v19 }
 0x619   : > { %v10353_v14 = vadd.f32 %v10331_v3, %v10076_v51 }
 0x61a   : > { %v10059_v10 = vadd.f32 %v10041_v15, %v9901_v7 }
 0x61b   : > { %v10519_v6 = vpop.f32.mrf.mxu1  ;;  %v10373_v50 = vadd.f32 %v20175_v2, %v10353_v14 }
 0x61c   : > { %v10079_v61 = vadd.f32 %v20147_v58, %v10059_v10 }
 0x61d   : > { %10389 = vst [vmem:[%s19269_s13 + $0xe0] sm:$0xff] %v10373_v50 }
 0x61f   : > { %v10586_v18 = vpop.f32.mrf.mxu2 }
 0x620   : > { %v10678_v8 = vpop.f32.mrf.mxu3  ;;  %v10333_v39 = vpop.f32.mrf.mxu0  ;;  %v10587_v31 = vadd.f32 %v10586_v18, %v20295_v54 }
 0x621   : > { %v10354_v63 = vadd.f32 %v10333_v39, %v10077_v11  ;;  %v15464_v11 = vld [vmem:[%s20343_s11] ss:$0 sm:$0xff] }
 0x622   : > { %v10688_v58 = vadd.f32 %v10678_v8, %v10587_v31 }
 0x623   : > { %v10521_v60 = vpop.f32.mrf.mxu1  ;;  %v10374_v0 = vadd.f32 %v20175_v2, %v10354_v63 }
 0x625   : > { %10390 = vst [vmem:[%s19269_s13 + $0xe8] sm:$0xff] %v10374_v0 }
 0x627   : > { %v10588_v27 = vpop.f32.mrf.mxu2 }
 0x628   : > { %v10680_v34 = vpop.f32.mrf.mxu3  ;;  %v10336_v47 = vpop.f32.mrf.mxu0  ;;  %v10589_v4 = vadd.f32 %v10588_v27, %v10516_v21  ;;  %v15463_v21 = vld [vmem:[%s20341_s9] ss:$0 sm:$0xff] }
 0x629   : > { %v10355_v48 = vadd.f32 %v10336_v47, %v10078_v26 }
 0x62a   : > { %v10689_v40 = vadd.f32 %v10680_v34, %v10589_v4 }
 0x62b   : > { %v10913_v33 = vpop.f32.mrf.mxu1  ;;  %v10375_v36 = vadd.f32 %v20175_v2, %v10355_v48 }
 0x62d   : > { %10391 = vst [vmem:[%s19269_s13 + $0xf0] sm:$0xff] %v10375_v36 }
 0x62f   : > { %v10591_v43 = vpop.f32.mrf.mxu2 }
 0x630   : > { %v10683_v25 = vpop.f32.mrf.mxu3  ;;  %v10338_v59 = vpop.f32.mrf.mxu0  ;;  %v10592_v5 = vadd.f32 %v10591_v43, %v10519_v6 }
 0x631   : > { %v10356_v23 = vadd.f32 %v10338_v59, %v10079_v61 }
 0x632   : > { %v10690_v38 = vadd.f32 %v10683_v25, %v10592_v5 }
 0x633   : > { %v10376_v44 = vadd.f32 %v20175_v2, %v10356_v23  ;;  %v10915_v52 = vpop.f32.mrf.mxu1 }
 0x635   : > { %10392 = vst [vmem:[%s19269_s13 + $0xf8] sm:$0xff] %v10376_v44 }
 0x637   : > { %v10593_v28 = vpop.f32.mrf.mxu2 }
 0x638   : > { %v10685_v24 = vpop.f32.mrf.mxu3  ;;  %v10784_v46 = vpop.f32.mrf.mxu0  ;;  %v10594_v51 = vadd.f32 %v10593_v28, %v10521_v60 }
 0x639   : > { %v10794_v37 = vadd.f32 %v10784_v46, %v10688_v58 }
 0x63a   : > { %v10691_v18 = vadd.f32 %v10685_v24, %v10594_v51 }
 0x63b   : > { %v10918_v16 = vpop.f32.mrf.mxu1  ;;  %v10923_v12 = vadd.f32 %v10913_v33, %v10794_v37 }
 0x63f   : > { %v11011_v42 = vpop.f32.mrf.mxu2 }
 0x640   : > { %v11123_v56 = vpop.f32.mrf.mxu3  ;;  %v10786_v13 = vpop.f32.mrf.mxu0  ;;  %v11021_v32 = vadd.f32 %v11011_v42, %v10923_v12 }
 0x641   : > { %v10795_v29 = vadd.f32 %v10786_v13, %v10689_v40 }
 0x642   : > { %v11133_v15 = vadd.f32 %v11123_v56, %v11021_v32 }
 0x643   : > { %v10920_v57 = vpop.f32.mrf.mxu1  ;;  %v10924_v9 = vadd.f32 %v10915_v52, %v10795_v29 }
 0x647   : > { %v11013_v22 = vpop.f32.mrf.mxu2 }
 0x648   : > { %v11125_v20 = vpop.f32.mrf.mxu3  ;;  %v10789_v49 = vpop.f32.mrf.mxu0  ;;  %v11022_v6 = vadd.f32 %v11013_v22, %v10924_v9 }
 0x649   : > { %v10796_v62 = vadd.f32 %v10789_v49, %v10690_v38 }
 0x64a   : > { %v11134_v60 = vadd.f32 %v11125_v20, %v11022_v6 }
 0x64b   : > { %v11340_v45 = vpop.f32.mrf.mxu1  ;;  %v10925_v55 = vadd.f32 %v10918_v16, %v10796_v62 }
 0x64f   : > { %v11016_v53 = vpop.f32.mrf.mxu2 }
 0x650   : > { %v11128_v2 = vpop.f32.mrf.mxu3  ;;  %v10791_v1 = vpop.f32.mrf.mxu0  ;;  %v11023_v39 = vadd.f32 %v11016_v53, %v10925_v55 }
 0x651   : > { %v10797_v63 = vadd.f32 %v10791_v1, %v10691_v18 }
 0x652   : > { %v11135_v7 = vadd.f32 %v11128_v2, %v11023_v39 }
 0x653   : > { %v11342_v41 = vpop.f32.mrf.mxu1  ;;  %v10926_v26 = vadd.f32 %v10920_v57, %v10797_v63 }
 0x657   : > { %v11018_v17 = vpop.f32.mrf.mxu2 }
 0x658   : > { %v11130_v54 = vpop.f32.mrf.mxu3  ;;  %v11242_v3 = vpop.f32.mrf.mxu0  ;;  %v11024_v43 = vadd.f32 %v11018_v17, %v10926_v26 }
 0x659   : > { %v11252_v14 = vadd.f32 %v11242_v3, %v11133_v15 }
 0x65a   : > { %v11136_v44 = vadd.f32 %v11130_v54, %v11024_v43 }
 0x65b   : > { %v11350_v50 = vadd.f32 %v11340_v45, %v11252_v14  ;;  %v11345_v33 = vpop.f32.mrf.mxu1 }
 0x65d   : > { %v11358_v8 = vadd.f32 %v15463_v21, %v11350_v50 }
 0x65f   : > { %v11477_v30 = vpop.f32.mrf.mxu2 }
 0x660   : > { %v11487_v35 = vadd.f32 %v11477_v30, %v11358_v8  ;;  %v11247_v0 = vpop.f32.mrf.mxu3  ;;  %v11244_v19 = vpop.f32.mrf.mxu0 }
 0x661   : > { %v11253_v34 = vadd.f32 %v11244_v19, %v11134_v60  ;;  %v11254_v48 = vadd.f32 %v11247_v0, %v11135_v7 }
 0x662   : > { %v11495_v27 = vadd.f32 %v15464_v11, %v11487_v35 }
 0x663   : > { %v11351_v47 = vadd.f32 %v11342_v41, %v11253_v34  ;;  %v11352_v61 = vadd.f32 %v11345_v33, %v11254_v48  ;;  %v11347_v42 = vpop.f32.mrf.mxu1 }
 0x664   : > { %11499 = vst [vmem:[%s19269_s13 + $0x100] sm:$0xff] %v11495_v27 }
 0x665   : > { %v11359_v10 = vadd.f32 %v15463_v21, %v11351_v47  ;;  %v11360_v28 = vadd.f32 %v15463_v21, %v11352_v61 }
 0x667   : > { %v11479_v36 = vpop.f32.mrf.mxu2 }
 0x668   : > { %v11488_v25 = vadd.f32 %v11479_v36, %v11359_v10  ;;  %v11249_v23 = vpop.f32.mrf.mxu3 }
 0x669   : > { %v11255_v52 = vadd.f32 %v11249_v23, %v11136_v44 }
 0x66a   : > { %v11496_v59 = vadd.f32 %v15464_v11, %v11488_v25 }
 0x66b   : > { %v11353_v16 = vadd.f32 %v11347_v42, %v11255_v52 }
 0x66c   : > { %11500 = vst [vmem:[%s19269_s13 + $0x108] sm:$0xff] %v11496_v59 }
 0x66d   : > { %v11361_v13 = vadd.f32 %v15463_v21, %v11353_v16 }
 0x66f   : > { %v11482_v24 = vpop.f32.mrf.mxu2 }
 0x670   : > { %v11489_v46 = vadd.f32 %v11482_v24, %v11360_v28 }
 0x672   : > { %v11497_v56 = vadd.f32 %v15464_v11, %v11489_v46 }
 0x674   : > { %11501 = vst [vmem:[%s19269_s13 + $0x110] sm:$0xff] %v11497_v56 }
 0x677   : > { %v11484_v31 = vpop.f32.mrf.mxu2 }
 0x678   : > { %v11490_v22 = vadd.f32 %v11484_v31, %v11361_v13 }
 0x67a   : > { %v11498_v20 = vadd.f32 %v15464_v11, %v11490_v22 }
 0x67c   : > { %11502 = vst [vmem:[%s19269_s13 + $0x118] sm:$0x3f] %v11498_v20 }
 0x67d PF: > { %s22_s21 = sadd.s32 1, %s15500_s21  }
 0x67e   : > { %p19_p4 = scmp.ge.s32.totalorder %s22_s21, 4  }
 0x680   :  { %21 = sbr.rel (!%p19_p4) target bundleno = 1 (0x1), region = 114 }

</bundles_post_ra>
